<compile_context>
chip_gen: v7x
topology: tpu7x:2x2x1
jax: 0.10.0
libtpu: 0.0.40
codegen_flags: <defaults>
</compile_context>

<pallas_src>
import functools
from math import floor

import numpy as np
import jax
import jax.numpy as jnp
from jax import lax
from jax.experimental import pallas as pl
from jax.experimental.pallas import tpu as pltpu

BF16 = jnp.bfloat16
F32 = jnp.float32


def _round_up(x, m):
    return ((x + m - 1) // m) * m


def _pick_tm(m, cap=256):
    """Largest multiple of 8 <= cap that divides m (else fall back to padding)."""
    hi = min(cap, m)
    hi -= hi % 8
    for cand in range(hi, 7, -8):
        if m % cand == 0:
            return cand, m
    tm = max(8, hi)
    return tm, _round_up(m, tm)


# ---------------------------------------------------------------------------
# Glue builders (cheap XLA slices / one-time host work)
# ---------------------------------------------------------------------------
def _build_phase_slabs(x_nhwc):
    """Phase-major tap slab for conv(2x2,s=1,p=1)+maxpool(2x2,s=2).

    slab[p, m, t*Cin:(t+1)*Cin] = xpad[n, 2*py+a+di, 2*px+b+dj, :] with
    (a,b)=divmod(p,2), (di,dj)=divmod(t,2) and m=(n,py,px) the pool output
    position (row-major).  Returned in bf16 (matmul operand dtype).
    """
    nb, h, w, cin = x_nhwc.shape
    hp, wp = (h + 1) // 2, (w + 1) // 2
    m = nb * hp * wp
    xpad = jnp.pad(x_nhwc, ((0, 0), (1, 1), (1, 1), (0, 0)))
    phases = []
    for a in range(2):
        for b in range(2):
            taps = []
            for di in range(2):
                for dj in range(2):
                    r, s = a + di, b + dj
                    t = xpad[:, r:r + 2 * hp:2, s:s + 2 * wp:2, :]
                    taps.append(t.reshape(m, cin))
            phases.append(jnp.concatenate(taps, axis=-1))     # (M, 4*Cin)
    slab = jnp.stack(phases, axis=0).astype(BF16)              # (4, M, 4*Cin)
    return slab, hp, wp, m


def _build_sel(h, w):
    """0/1 matrices SEL[r,s] of shape (Hp*Wp, H*W): output row q=(qy,qx) picks
    input element (2*qy+r-1, 2*qx+s-1); all-zero row where that index lies in
    the conv padding.  Lets conv3/conv4 be computed from a VMEM-resident
    activation purely with matmuls (no in-kernel gathers/relayouts)."""
    hp, wp = (h + 1) // 2, (w + 1) // 2
    sel = np.zeros((3, 3, hp * wp, h * w), np.float32)
    for r in range(3):
        for s in range(3):
            for qy in range(hp):
                for qx in range(wp):
                    y, x = 2 * qy + r - 1, 2 * qx + s - 1
                    if 0 <= y < h and 0 <= x < w:
                        sel[r, s, qy * wp + qx, y * w + x] = 1.0
    return jnp.asarray(sel)


# ---------------------------------------------------------------------------
# Pallas kernels
# ---------------------------------------------------------------------------
def _conv_pool_kernel(x_ref, w_ref, b_ref, o_ref, *, cin):
    """Fused conv(2x2,s1,p1) + bias + ReLU + maxpool(2x2,s2) on a tap slab.

    x_ref: (4, TM, 4*cin) bf16 phase-major slab, w_ref: (4*cin, cout) bf16
    K-concatenated taps, b_ref: (1, cout) f32.  One matmul per pool phase
    (VPU outer products for cin==1), max over the 4 phases, then bias+ReLU.
    """
    if cin == 1:
        w = w_ref[...].astype(F32)                               # (4, cout)
    phases = []
    for p in range(4):
        if cin == 1:
            lhs = x_ref[p].astype(F32)                           # (TM, 4)
            acc = lhs[:, 0:1] * w[0:1, :]
            for t in range(1, 4):
                acc = acc + lhs[:, t:t + 1] * w[t:t + 1, :]
            phases.append(acc)
        else:
            phases.append(jnp.dot(x_ref[p], w_ref[...],
                                  preferred_element_type=F32))
    m = jnp.maximum(jnp.maximum(phases[0], phases[1]),
                    jnp.maximum(phases[2], phases[3]))
    o_ref[...] = jnp.maximum(m + b_ref[...], 0.0)


def _conv_pool_from_vmem(y, wt_ref, sel_ref, b_ref):
    """conv(2x2,s1,p1)+bias+ReLU+pool(2x2,s2) of a VMEM-resident activation
    y (S, Cin) via selection matmuls.  wt_ref: (4, Cin, Cout) bf16 per-tap
    weights, sel_ref: (3, 3, Sp, S) f32 selection matrices, b_ref: (1, Cout)."""
    yb = y.astype(BF16)
    z = [jnp.dot(yb, wt_ref[t], preferred_element_type=F32) for t in range(4)]
    phases = []
    for a in range(2):
        for b in range(2):
            acc = None
            for di in range(2):
                for dj in range(2):
                    g = jnp.dot(sel_ref[a + di, b + dj], z[di * 2 + dj],
                                preferred_element_type=F32)
                    acc = g if acc is None else acc + g
            phases.append(acc)
    m = jnp.maximum(jnp.maximum(phases[0], phases[1]),
                    jnp.maximum(phases[2], phases[3]))
    return jnp.maximum(m + b_ref[...], 0.0)                      # (Sp, Cout)


def _tail_kernel(slab_ref, w2c_ref, b2_ref,
                 w3t_ref, b3_ref, sel3_ref,
                 w4t_ref, b4_ref, sel4_ref,
                 w1_ref, b1_ref, w2f_ref, b2f_ref, w3f_ref, b3f_ref,
                 o_ref):
    """Fused conv2+pool2 -> conv3+pool3 -> conv4+pool4 -> fc1 -> fc2 -> fc3
    for one sample; every intermediate stays in VMEM/registers."""
    # ---- conv2 + pool2: phase-slab path, one K=4*Cin matmul per phase.
    w2c = w2c_ref[...]
    pre = [jnp.dot(slab_ref[p], w2c, preferred_element_type=F32)
           for p in range(4)]
    y = jnp.maximum(jnp.maximum(pre[0], pre[1]), jnp.maximum(pre[2], pre[3]))
    y = jnp.maximum(y + b2_ref[...], 0.0)                        # (64, 32)

    # ---- conv3 + pool3 and conv4 + pool4 via selection matmuls.
    y = _conv_pool_from_vmem(y, w3t_ref, sel3_ref, b3_ref)       # (16, 64)
    y = _conv_pool_from_vmem(y, w4t_ref, sel4_ref, b4_ref)       # (4, 64)

    # ---- fc1 (NCHW flatten folded into per-position weight chunks) + ReLU.
    h = b1_ref[...]
    for r in range(w1_ref.shape[0]):
        h = h + jnp.dot(y[r:r + 1, :].astype(BF16), w1_ref[r],
                        preferred_element_type=F32)
    h = jnp.maximum(h, 0.0)                                      # (1, 50)
    # ---- fc2 + ReLU, fc3.
    h = jnp.maximum(jnp.dot(h.astype(BF16), w2f_ref[...],
                            preferred_element_type=F32) + b2f_ref[...], 0.0)
    out = jnp.dot(h.astype(BF16), w3f_ref[...],
                  preferred_element_type=F32) + b3f_ref[...]
    o_ref[0] = out


# ---------------------------------------------------------------------------
# Pallas-backed ops
# ---------------------------------------------------------------------------
def conv_relu_pool(x_nhwc, w_cat, b2d):
    """Stand-alone conv+ReLU+pool layer (used for conv1)."""
    nb, _, _, cin = x_nhwc.shape
    cout = w_cat.shape[-1]
    slab, hp, wp, m = _build_phase_slabs(x_nhwc)                 # (4, M, 4*Cin)
    tm, mp = _pick_tm(m)
    if mp != m:
        slab = jnp.pad(slab, ((0, 0), (0, mp - m), (0, 0)))
    out = pl.pallas_call(
        functools.partial(_conv_pool_kernel, cin=cin),
        out_shape=jax.ShapeDtypeStruct((mp, cout), F32),
        grid=(mp // tm,),
        in_specs=[
            pl.BlockSpec((4, tm, 4 * cin), lambda i: (0, i, 0)),
            pl.BlockSpec((4 * cin, cout), lambda i: (0, 0)),
            pl.BlockSpec((1, cout), lambda i: (0, 0)),
        ],
        out_specs=pl.BlockSpec((tm, cout), lambda i: (i, 0)),
        compiler_params=pltpu.CompilerParams(
            dimension_semantics=("parallel",)),
    )(slab, w_cat, b2d)
    return out[:m].reshape(nb, hp, wp, cout)


def _fixed_spec(shape):
    nd = len(shape)
    return pl.BlockSpec(shape, lambda n, _nd=nd: (0,) * _nd)


def fused_tail(y1_nhwc, kp):
    """conv2..conv4 + fc1..fc3 in a single pallas_call, gridded over batch."""
    nb = y1_nhwc.shape[0]
    slab, hp, wp, _ = _build_phase_slabs(y1_nhwc)   # (4, Nb*Hp*Wp, 4*Cin)
    rows = hp * wp                                   # rows per sample
    lanes = slab.shape[-1]
    nc = kp["fc3"]["w"].shape[1]

    in_specs = [
        pl.BlockSpec((4, rows, lanes), lambda n: (0, n, 0)),
        _fixed_spec(kp["conv2"]["w_cat"].shape), _fixed_spec(kp["conv2"]["b"].shape),
        _fixed_spec(kp["conv3"]["w_taps"].shape), _fixed_spec(kp["conv3"]["b"].shape),
        _fixed_spec(kp["sel3"].shape),
        _fixed_spec(kp["conv4"]["w_taps"].shape), _fixed_spec(kp["conv4"]["b"].shape),
        _fixed_spec(kp["sel4"].shape),
        _fixed_spec(kp["fc1"]["w"].shape), _fixed_spec(kp["fc1"]["b"].shape),
        _fixed_spec(kp["fc2"]["w"].shape), _fixed_spec(kp["fc2"]["b"].shape),
        _fixed_spec(kp["fc3"]["w"].shape), _fixed_spec(kp["fc3"]["b"].shape),
    ]
    out = pl.pallas_call(
        _tail_kernel,
        out_shape=jax.ShapeDtypeStruct((nb, 1, nc), F32),
        grid=(nb,),
        in_specs=in_specs,
        out_specs=pl.BlockSpec((1, 1, nc), lambda n: (n, 0, 0)),
        compiler_params=pltpu.CompilerParams(
            dimension_semantics=("parallel",)),
    )(slab,
      kp["conv2"]["w_cat"], kp["conv2"]["b"],
      kp["conv3"]["w_taps"], kp["conv3"]["b"], kp["sel3"],
      kp["conv4"]["w_taps"], kp["conv4"]["b"], kp["sel4"],
      kp["fc1"]["w"], kp["fc1"]["b"],
      kp["fc2"]["w"], kp["fc2"]["b"],
      kp["fc3"]["w"], kp["fc3"]["b"])
    return out.reshape(nb, nc)


# ---------------------------------------------------------------------------
# cnn43 parameters
# ---------------------------------------------------------------------------
def init_params(key, in_channels, no_classes, img_dim):
    """PyTorch-layout params (conv: (Cout,Cin,kh,kw); linear: (out,in))."""
    def uconv(key, cout, cin, k):
        k1, k2 = jax.random.split(key)
        bound = 1.0 / jnp.sqrt(cin * k * k)
        w = jax.random.uniform(k1, (cout, cin, k, k), F32, -bound, bound)
        b = jax.random.uniform(k2, (cout,), F32, -bound, bound)
        return w, b

    def ulin(key, fout, fin):
        k1, k2 = jax.random.split(key)
        bound = 1.0 / jnp.sqrt(fin)
        w = jax.random.uniform(k1, (fout, fin), F32, -bound, bound)
        b = jax.random.uniform(k2, (fout,), F32, -bound, bound)
        return w, b

    keys = jax.random.split(key, 7)
    c1, c2, c3, c4 = 32, 32, 64, 64
    out1 = floor((img_dim + 2 - 2) / 1) + 1
    out2 = floor((out1 - 2) / 2) + 1
    out3 = floor((out2 + 2 - 2) / 1) + 1
    out4 = floor((out3 - 2) / 2) + 1
    out5 = floor((out4 + 2 - 2) / 1) + 1
    out6 = floor((out5 - 2) / 2) + 1
    out7 = floor((out6 + 2 - 2) / 1) + 1
    out8 = floor((out7 - 2) / 2) + 1
    return {
        "conv1": uconv(keys[0], c1, in_channels, 2),
        "conv2": uconv(keys[1], c2, c1, 2),
        "conv3": uconv(keys[2], c3, c2, 2),
        "conv4": uconv(keys[3], c4, c3, 2),
        "fc1": ulin(keys[4], 50, c4 * out8 * out8),
        "fc2": ulin(keys[5], 50, 50),
        "fc3": ulin(keys[6], no_classes, 50),
        "out_channels": c4,
        "out_dim": out8,
        "pool_dims": (out2, out4, out6, out8),
    }


def prepare_kernel_params(params):
    """One-time conversion to kernel layouts: K-concatenated / per-tap bf16 conv
    weights, bf16 (in,out) FC weights, fc1 rows split per spatial position so
    the in-kernel layout matches PyTorch's NCHW flatten, and the selection
    matrices for the fused conv3/conv4 stages."""
    kp = {}
    for name in ["conv1", "conv2", "conv3", "conv4"]:
        w, b = params[name]
        cout, cin, kh, kw = w.shape
        w_hwio = jnp.transpose(w, (2, 3, 1, 0))                 # (kh,kw,cin,cout)
        kp[name] = {
            "w_cat": w_hwio.reshape(kh * kw * cin, cout).astype(BF16),
            "w_taps": w_hwio.reshape(kh * kw, cin, cout).astype(BF16),
            "b": b.reshape(1, cout).astype(F32),
        }
    c, d = params["out_channels"], params["out_dim"]
    w1, b1 = params["fc1"]
    w1k = jnp.transpose(w1.reshape(w1.shape[0], c, d, d),
                        (2, 3, 1, 0)).reshape(d * d, c, w1.shape[0])
    kp["fc1"] = {"w": w1k.astype(BF16), "b": b1.reshape(1, -1).astype(F32)}
    w2, b2 = params["fc2"]
    w3, b3 = params["fc3"]
    kp["fc2"] = {"w": w2.T.astype(BF16), "b": b2.reshape(1, -1).astype(F32)}
    kp["fc3"] = {"w": w3.T.astype(BF16), "b": b3.reshape(1, -1).astype(F32)}
    _, p2, p3, _ = params["pool_dims"]
    kp["sel3"] = _build_sel(p2, p2)     # conv3 consumes the (p2 x p2) activation
    kp["sel4"] = _build_sel(p3, p3)     # conv4 consumes the (p3 x p3) activation
    return kp


# ---------------------------------------------------------------------------
# Forward passes
# ---------------------------------------------------------------------------
def cnn43_forward(x_nchw, kp):
    x = jnp.transpose(x_nchw, (0, 2, 3, 1)).astype(F32)          # -> NHWC
    y1 = conv_relu_pool(x, kp["conv1"]["w_cat"], kp["conv1"]["b"])
    return fused_tail(y1, kp)


def cnn43_reference(x_nchw, params):
    """Pure-JAX reference with PyTorch semantics (NCHW flatten).  Matmul
    operands are rounded to bf16 with f32 accumulation, exactly as the
    kernels do, so the comparison is tight."""
    x = jnp.transpose(x_nchw, (0, 2, 3, 1)).astype(F32)
    for name in ["conv1", "conv2", "conv3", "conv4"]:
        w, b = params[name]
        y = lax.conv_general_dilated(
            x.astype(BF16), jnp.transpose(w, (2, 3, 1, 0)).astype(BF16),
            window_strides=(1, 1), padding=[(1, 1), (1, 1)],
            dimension_numbers=("NHWC", "HWIO", "NHWC"),
            preferred_element_type=F32)
        x = jnp.maximum(y + b, 0.0)
        x = lax.reduce_window(x, -jnp.inf, lax.max,
                              (1, 2, 2, 1), (1, 2, 2, 1), "VALID")
    nb = x.shape[0]
    x = jnp.transpose(x, (0, 3, 1, 2)).reshape(nb, -1)

    def lin(v, w, b):
        return jnp.dot(v.astype(BF16), w.T.astype(BF16),
                       preferred_element_type=F32) + b

    x = jnp.maximum(lin(x, *params["fc1"]), 0.0)
    x = jnp.maximum(lin(x, *params["fc2"]), 0.0)
    return lin(x, *params["fc3"])


if __name__ == "__main__":
    # Small shapes consistent with the module: batch=2, in_channels=1,
    # img_dim=32, no_classes=8.
    key = jax.random.PRNGKey(0)
    k_param, k_x = jax.random.split(key)
    params = init_params(k_param, in_channels=1, no_classes=8, img_dim=32)
    kparams = prepare_kernel_params(params)
    x = jax.random.normal(k_x, (2, 1, 32, 32), F32)

    fwd = jax.jit(cnn43_forward)
    out = jax.block_until_ready(fwd(x, kparams))
    ref = jax.block_until_ready(cnn43_reference(x, params))

    assert out.shape == (2, 8), out.shape
    assert jnp.allclose(out, ref, atol=1e-2, rtol=1e-2), (
        f"max abs diff {jnp.max(jnp.abs(out - ref))}")
    print("KERNEL_OK")
</pallas_src>

<mosaic_0001>
module attributes {stable_mosaic.version = 11 : i64} {
  func.func @_conv_pool_kernel(%arg0: i32, %arg1: memref<4x256x4xbf16, #tpu.memory_space<vmem>>, %arg2: memref<4x32xbf16, #tpu.memory_space<vmem>>, %arg3: memref<1x32xf32, #tpu.memory_space<vmem>>, %arg4: memref<256x32xf32, #tpu.memory_space<vmem>>) attributes {dimension_semantics = [#tpu.dimension_semantics<parallel>], iteration_bounds = array<i64: 2>, scalar_prefetch = 0 : i64, scratch_operands = 0 : i64, tpu.core_type = #tpu.core_type<tc>, window_params = [{transform_indices = @transform_0, window_bounds = array<i64: 4, 256, 4>}, {pipeline_mode = #tpu.pipeline_mode<synchronous>, transform_indices = @transform_1, window_bounds = array<i64: 4, 32>}, {pipeline_mode = #tpu.pipeline_mode<synchronous>, transform_indices = @transform_2, window_bounds = array<i64: 1, 32>}, {transform_indices = @transform_3, window_bounds = array<i64: 256, 32>}]} {
    %c0 = arith.constant 0 : index
    %c0_0 = arith.constant 0 : index
    %0 = vector.load %arg2[%c0, %c0_0] : memref<4x32xbf16, #tpu.memory_space<vmem>>, vector<4x32xbf16>
    %1 = arith.extf %0 : vector<4x32xbf16> to vector<4x32xf32>
    %c0_1 = arith.constant 0 : index
    %c0_2 = arith.constant 0 : index
    %c0_3 = arith.constant 0 : index
    %2 = vector.load %arg1[%c0_1, %c0_2, %c0_3] : memref<4x256x4xbf16, #tpu.memory_space<vmem>>, vector<1x256x4xbf16>
    %3 = vector.shape_cast %2 : vector<1x256x4xbf16> to vector<256x4xbf16>
    %4 = arith.extf %3 : vector<256x4xbf16> to vector<256x4xf32>
    %5 = vector.extract_strided_slice %4 {offsets = [0, 0], sizes = [256, 1], strides = [1, 1]} : vector<256x4xf32> to vector<256x1xf32>
    %6 = vector.extract_strided_slice %1 {offsets = [0, 0], sizes = [1, 32], strides = [1, 1]} : vector<4x32xf32> to vector<1x32xf32>
    %7 = vector.broadcast %5 : vector<256x1xf32> to vector<256x32xf32>
    %8 = vector.broadcast %6 : vector<1x32xf32> to vector<256x32xf32>
    %9 = arith.mulf %7, %8 : vector<256x32xf32>
    %10 = vector.extract_strided_slice %4 {offsets = [0, 1], sizes = [256, 1], strides = [1, 1]} : vector<256x4xf32> to vector<256x1xf32>
    %11 = vector.extract_strided_slice %1 {offsets = [1, 0], sizes = [1, 32], strides = [1, 1]} : vector<4x32xf32> to vector<1x32xf32>
    %12 = vector.broadcast %10 : vector<256x1xf32> to vector<256x32xf32>
    %13 = vector.broadcast %11 : vector<1x32xf32> to vector<256x32xf32>
    %14 = arith.mulf %12, %13 : vector<256x32xf32>
    %15 = arith.addf %9, %14 : vector<256x32xf32>
    %16 = vector.extract_strided_slice %4 {offsets = [0, 2], sizes = [256, 1], strides = [1, 1]} : vector<256x4xf32> to vector<256x1xf32>
    %17 = vector.extract_strided_slice %1 {offsets = [2, 0], sizes = [1, 32], strides = [1, 1]} : vector<4x32xf32> to vector<1x32xf32>
    %18 = vector.broadcast %16 : vector<256x1xf32> to vector<256x32xf32>
    %19 = vector.broadcast %17 : vector<1x32xf32> to vector<256x32xf32>
    %20 = arith.mulf %18, %19 : vector<256x32xf32>
    %21 = arith.addf %15, %20 : vector<256x32xf32>
    %22 = vector.extract_strided_slice %4 {offsets = [0, 3], sizes = [256, 1], strides = [1, 1]} : vector<256x4xf32> to vector<256x1xf32>
    %23 = vector.extract_strided_slice %1 {offsets = [3, 0], sizes = [1, 32], strides = [1, 1]} : vector<4x32xf32> to vector<1x32xf32>
    %24 = vector.broadcast %22 : vector<256x1xf32> to vector<256x32xf32>
    %25 = vector.broadcast %23 : vector<1x32xf32> to vector<256x32xf32>
    %26 = arith.mulf %24, %25 : vector<256x32xf32>
    %27 = arith.addf %21, %26 : vector<256x32xf32>
    %c1 = arith.constant 1 : index
    %c0_4 = arith.constant 0 : index
    %c0_5 = arith.constant 0 : index
    %28 = vector.load %arg1[%c1, %c0_4, %c0_5] : memref<4x256x4xbf16, #tpu.memory_space<vmem>>, vector<1x256x4xbf16>
    %29 = vector.shape_cast %28 : vector<1x256x4xbf16> to vector<256x4xbf16>
    %30 = arith.extf %29 : vector<256x4xbf16> to vector<256x4xf32>
    %31 = vector.extract_strided_slice %30 {offsets = [0, 0], sizes = [256, 1], strides = [1, 1]} : vector<256x4xf32> to vector<256x1xf32>
    %32 = vector.extract_strided_slice %1 {offsets = [0, 0], sizes = [1, 32], strides = [1, 1]} : vector<4x32xf32> to vector<1x32xf32>
    %33 = vector.broadcast %31 : vector<256x1xf32> to vector<256x32xf32>
    %34 = vector.broadcast %32 : vector<1x32xf32> to vector<256x32xf32>
    %35 = arith.mulf %33, %34 : vector<256x32xf32>
    %36 = vector.extract_strided_slice %30 {offsets = [0, 1], sizes = [256, 1], strides = [1, 1]} : vector<256x4xf32> to vector<256x1xf32>
    %37 = vector.extract_strided_slice %1 {offsets = [1, 0], sizes = [1, 32], strides = [1, 1]} : vector<4x32xf32> to vector<1x32xf32>
    %38 = vector.broadcast %36 : vector<256x1xf32> to vector<256x32xf32>
    %39 = vector.broadcast %37 : vector<1x32xf32> to vector<256x32xf32>
    %40 = arith.mulf %38, %39 : vector<256x32xf32>
    %41 = arith.addf %35, %40 : vector<256x32xf32>
    %42 = vector.extract_strided_slice %30 {offsets = [0, 2], sizes = [256, 1], strides = [1, 1]} : vector<256x4xf32> to vector<256x1xf32>
    %43 = vector.extract_strided_slice %1 {offsets = [2, 0], sizes = [1, 32], strides = [1, 1]} : vector<4x32xf32> to vector<1x32xf32>
    %44 = vector.broadcast %42 : vector<256x1xf32> to vector<256x32xf32>
    %45 = vector.broadcast %43 : vector<1x32xf32> to vector<256x32xf32>
    %46 = arith.mulf %44, %45 : vector<256x32xf32>
    %47 = arith.addf %41, %46 : vector<256x32xf32>
    %48 = vector.extract_strided_slice %30 {offsets = [0, 3], sizes = [256, 1], strides = [1, 1]} : vector<256x4xf32> to vector<256x1xf32>
    %49 = vector.extract_strided_slice %1 {offsets = [3, 0], sizes = [1, 32], strides = [1, 1]} : vector<4x32xf32> to vector<1x32xf32>
    %50 = vector.broadcast %48 : vector<256x1xf32> to vector<256x32xf32>
    %51 = vector.broadcast %49 : vector<1x32xf32> to vector<256x32xf32>
    %52 = arith.mulf %50, %51 : vector<256x32xf32>
    %53 = arith.addf %47, %52 : vector<256x32xf32>
    %c2 = arith.constant 2 : index
    %c0_6 = arith.constant 0 : index
    %c0_7 = arith.constant 0 : index
    %54 = vector.load %arg1[%c2, %c0_6, %c0_7] : memref<4x256x4xbf16, #tpu.memory_space<vmem>>, vector<1x256x4xbf16>
    %55 = vector.shape_cast %54 : vector<1x256x4xbf16> to vector<256x4xbf16>
    %56 = arith.extf %55 : vector<256x4xbf16> to vector<256x4xf32>
    %57 = vector.extract_strided_slice %56 {offsets = [0, 0], sizes = [256, 1], strides = [1, 1]} : vector<256x4xf32> to vector<256x1xf32>
    %58 = vector.extract_strided_slice %1 {offsets = [0, 0], sizes = [1, 32], strides = [1, 1]} : vector<4x32xf32> to vector<1x32xf32>
    %59 = vector.broadcast %57 : vector<256x1xf32> to vector<256x32xf32>
    %60 = vector.broadcast %58 : vector<1x32xf32> to vector<256x32xf32>
    %61 = arith.mulf %59, %60 : vector<256x32xf32>
    %62 = vector.extract_strided_slice %56 {offsets = [0, 1], sizes = [256, 1], strides = [1, 1]} : vector<256x4xf32> to vector<256x1xf32>
    %63 = vector.extract_strided_slice %1 {offsets = [1, 0], sizes = [1, 32], strides = [1, 1]} : vector<4x32xf32> to vector<1x32xf32>
    %64 = vector.broadcast %62 : vector<256x1xf32> to vector<256x32xf32>
    %65 = vector.broadcast %63 : vector<1x32xf32> to vector<256x32xf32>
    %66 = arith.mulf %64, %65 : vector<256x32xf32>
    %67 = arith.addf %61, %66 : vector<256x32xf32>
    %68 = vector.extract_strided_slice %56 {offsets = [0, 2], sizes = [256, 1], strides = [1, 1]} : vector<256x4xf32> to vector<256x1xf32>
    %69 = vector.extract_strided_slice %1 {offsets = [2, 0], sizes = [1, 32], strides = [1, 1]} : vector<4x32xf32> to vector<1x32xf32>
    %70 = vector.broadcast %68 : vector<256x1xf32> to vector<256x32xf32>
    %71 = vector.broadcast %69 : vector<1x32xf32> to vector<256x32xf32>
    %72 = arith.mulf %70, %71 : vector<256x32xf32>
    %73 = arith.addf %67, %72 : vector<256x32xf32>
    %74 = vector.extract_strided_slice %56 {offsets = [0, 3], sizes = [256, 1], strides = [1, 1]} : vector<256x4xf32> to vector<256x1xf32>
    %75 = vector.extract_strided_slice %1 {offsets = [3, 0], sizes = [1, 32], strides = [1, 1]} : vector<4x32xf32> to vector<1x32xf32>
    %76 = vector.broadcast %74 : vector<256x1xf32> to vector<256x32xf32>
    %77 = vector.broadcast %75 : vector<1x32xf32> to vector<256x32xf32>
    %78 = arith.mulf %76, %77 : vector<256x32xf32>
    %79 = arith.addf %73, %78 : vector<256x32xf32>
    %c3 = arith.constant 3 : index
    %c0_8 = arith.constant 0 : index
    %c0_9 = arith.constant 0 : index
    %80 = vector.load %arg1[%c3, %c0_8, %c0_9] : memref<4x256x4xbf16, #tpu.memory_space<vmem>>, vector<1x256x4xbf16>
    %81 = vector.shape_cast %80 : vector<1x256x4xbf16> to vector<256x4xbf16>
    %82 = arith.extf %81 : vector<256x4xbf16> to vector<256x4xf32>
    %83 = vector.extract_strided_slice %82 {offsets = [0, 0], sizes = [256, 1], strides = [1, 1]} : vector<256x4xf32> to vector<256x1xf32>
    %84 = vector.extract_strided_slice %1 {offsets = [0, 0], sizes = [1, 32], strides = [1, 1]} : vector<4x32xf32> to vector<1x32xf32>
    %85 = vector.broadcast %83 : vector<256x1xf32> to vector<256x32xf32>
    %86 = vector.broadcast %84 : vector<1x32xf32> to vector<256x32xf32>
    %87 = arith.mulf %85, %86 : vector<256x32xf32>
    %88 = vector.extract_strided_slice %82 {offsets = [0, 1], sizes = [256, 1], strides = [1, 1]} : vector<256x4xf32> to vector<256x1xf32>
    %89 = vector.extract_strided_slice %1 {offsets = [1, 0], sizes = [1, 32], strides = [1, 1]} : vector<4x32xf32> to vector<1x32xf32>
    %90 = vector.broadcast %88 : vector<256x1xf32> to vector<256x32xf32>
    %91 = vector.broadcast %89 : vector<1x32xf32> to vector<256x32xf32>
    %92 = arith.mulf %90, %91 : vector<256x32xf32>
    %93 = arith.addf %87, %92 : vector<256x32xf32>
    %94 = vector.extract_strided_slice %82 {offsets = [0, 2], sizes = [256, 1], strides = [1, 1]} : vector<256x4xf32> to vector<256x1xf32>
    %95 = vector.extract_strided_slice %1 {offsets = [2, 0], sizes = [1, 32], strides = [1, 1]} : vector<4x32xf32> to vector<1x32xf32>
    %96 = vector.broadcast %94 : vector<256x1xf32> to vector<256x32xf32>
    %97 = vector.broadcast %95 : vector<1x32xf32> to vector<256x32xf32>
    %98 = arith.mulf %96, %97 : vector<256x32xf32>
    %99 = arith.addf %93, %98 : vector<256x32xf32>
    %100 = vector.extract_strided_slice %82 {offsets = [0, 3], sizes = [256, 1], strides = [1, 1]} : vector<256x4xf32> to vector<256x1xf32>
    %101 = vector.extract_strided_slice %1 {offsets = [3, 0], sizes = [1, 32], strides = [1, 1]} : vector<4x32xf32> to vector<1x32xf32>
    %102 = vector.broadcast %100 : vector<256x1xf32> to vector<256x32xf32>
    %103 = vector.broadcast %101 : vector<1x32xf32> to vector<256x32xf32>
    %104 = arith.mulf %102, %103 : vector<256x32xf32>
    %105 = arith.addf %99, %104 : vector<256x32xf32>
    %106 = arith.maximumf %27, %53 : vector<256x32xf32>
    %107 = arith.maximumf %79, %105 : vector<256x32xf32>
    %108 = arith.maximumf %106, %107 : vector<256x32xf32>
    %c0_10 = arith.constant 0 : index
    %c0_11 = arith.constant 0 : index
    %109 = vector.load %arg3[%c0_10, %c0_11] : memref<1x32xf32, #tpu.memory_space<vmem>>, vector<1x32xf32>
    %110 = vector.broadcast %109 : vector<1x32xf32> to vector<256x32xf32>
    %111 = arith.addf %108, %110 : vector<256x32xf32>
    %cst = arith.constant 0.000000e+00 : f32
    %112 = vector.broadcast %cst : f32 to vector<256x32xf32>
    %113 = arith.maximumf %111, %112 : vector<256x32xf32>
    %c0_12 = arith.constant 0 : index
    %c0_13 = arith.constant 0 : index
    %114 = vector.load %arg4[%c0_12, %c0_13] : memref<256x32xf32, #tpu.memory_space<vmem>>, vector<256x32xf32>
    tpu.vector_store %arg4[%c0_12, %c0_13], %113 {strides = array<i32>} : memref<256x32xf32, #tpu.memory_space<vmem>>, vector<256x32xf32>,
    return
  }
  func.func @transform_0(%arg0: i32) -> (i32, i32, i32) {
    %c0_i32 = arith.constant 0 : i32
    %c0_i32_0 = arith.constant 0 : i32
    %c0_i32_1 = arith.constant 0 : i32
    return %c0_i32, %arg0, %c0_i32_0 : i32, i32, i32
  }
  func.func @transform_1(%arg0: i32) -> (i32, i32) {
    %c0_i32 = arith.constant 0 : i32
    %c0_i32_0 = arith.constant 0 : i32
    %c0_i32_1 = arith.constant 0 : i32
    return %c0_i32, %c0_i32_0 : i32, i32
  }
  func.func @transform_2(%arg0: i32) -> (i32, i32) {
    %c0_i32 = arith.constant 0 : i32
    %c0_i32_0 = arith.constant 0 : i32
    %c0_i32_1 = arith.constant 0 : i32
    return %c0_i32, %c0_i32_0 : i32, i32
  }
  func.func @transform_3(%arg0: i32) -> (i32, i32) {
    %c0_i32 = arith.constant 0 : i32
    %c0_i32_0 = arith.constant 0 : i32
    return %arg0, %c0_i32 : i32, i32
  }
}

module attributes {stable_mosaic.version = 11 : i64} {
  func.func @_tail_kernel(%arg0: i32, %arg1: memref<4x64x128xbf16, #tpu.memory_space<vmem>>, %arg2: memref<128x32xbf16, #tpu.memory_space<vmem>>, %arg3: memref<1x32xf32, #tpu.memory_space<vmem>>, %arg4: memref<4x32x64xbf16, #tpu.memory_space<vmem>>, %arg5: memref<1x64xf32, #tpu.memory_space<vmem>>, %arg6: memref<3x3x16x64xf32, #tpu.memory_space<vmem>>, %arg7: memref<4x64x64xbf16, #tpu.memory_space<vmem>>, %arg8: memref<1x64xf32, #tpu.memory_space<vmem>>, %arg9: memref<3x3x4x16xf32, #tpu.memory_space<vmem>>, %arg10: memref<4x64x50xbf16, #tpu.memory_space<vmem>>, %arg11: memref<1x50xf32, #tpu.memory_space<vmem>>, %arg12: memref<50x50xbf16, #tpu.memory_space<vmem>>, %arg13: memref<1x50xf32, #tpu.memory_space<vmem>>, %arg14: memref<50x8xbf16, #tpu.memory_space<vmem>>, %arg15: memref<1x8xf32, #tpu.memory_space<vmem>>, %arg16: memref<1x1x8xf32, #tpu.memory_space<vmem>>) attributes {dimension_semantics = [#tpu.dimension_semantics<parallel>], iteration_bounds = array<i64: 2>, scalar_prefetch = 0 : i64, scratch_operands = 0 : i64, tpu.core_type = #tpu.core_type<tc>, window_params = [{transform_indices = @transform_0, window_bounds = array<i64: 4, 64, 128>}, {pipeline_mode = #tpu.pipeline_mode<synchronous>, transform_indices = @transform_1, window_bounds = array<i64: 128, 32>}, {pipeline_mode = #tpu.pipeline_mode<synchronous>, transform_indices = @transform_2, window_bounds = array<i64: 1, 32>}, {pipeline_mode = #tpu.pipeline_mode<synchronous>, transform_indices = @transform_3, window_bounds = array<i64: 4, 32, 64>}, {pipeline_mode = #tpu.pipeline_mode<synchronous>, transform_indices = @transform_4, window_bounds = array<i64: 1, 64>}, {pipeline_mode = #tpu.pipeline_mode<synchronous>, transform_indices = @transform_5, window_bounds = array<i64: 3, 3, 16, 64>}, {pipeline_mode = #tpu.pipeline_mode<synchronous>, transform_indices = @transform_6, window_bounds = array<i64: 4, 64, 64>}, {pipeline_mode = #tpu.pipeline_mode<synchronous>, transform_indices = @transform_7, window_bounds = array<i64: 1, 64>}, {pipeline_mode = #tpu.pipeline_mode<synchronous>, transform_indices = @transform_8, window_bounds = array<i64: 3, 3, 4, 16>}, {pipeline_mode = #tpu.pipeline_mode<synchronous>, transform_indices = @transform_9, window_bounds = array<i64: 4, 64, 50>}, {pipeline_mode = #tpu.pipeline_mode<synchronous>, transform_indices = @transform_10, window_bounds = array<i64: 1, 50>}, {pipeline_mode = #tpu.pipeline_mode<synchronous>, transform_indices = @transform_11, window_bounds = array<i64: 50, 50>}, {pipeline_mode = #tpu.pipeline_mode<synchronous>, transform_indices = @transform_12, window_bounds = array<i64: 1, 50>}, {pipeline_mode = #tpu.pipeline_mode<synchronous>, transform_indices = @transform_13, window_bounds = array<i64: 50, 8>}, {pipeline_mode = #tpu.pipeline_mode<synchronous>, transform_indices = @transform_14, window_bounds = array<i64: 1, 8>}, {transform_indices = @transform_15, window_bounds = array<i64: 1, 1, 8>}]} {
    %c0 = arith.constant 0 : index
    %c0_0 = arith.constant 0 : index
    %0 = vector.load %arg2[%c0, %c0_0] : memref<128x32xbf16, #tpu.memory_space<vmem>>, vector<128x32xbf16>
    %c0_1 = arith.constant 0 : index
    %c0_2 = arith.constant 0 : index
    %c0_3 = arith.constant 0 : index
    %1 = vector.load %arg1[%c0_1, %c0_2, %c0_3] : memref<4x64x128xbf16, #tpu.memory_space<vmem>>, vector<1x64x128xbf16>
    %2 = vector.shape_cast %1 : vector<1x64x128xbf16> to vector<64x128xbf16>
    %cst = arith.constant dense<0.000000e+00> : vector<64x32xf32>
    %3 = tpu.matmul %2, %0, %cst {dimension_numbers = #tpu.dot_dimension_numbers<[1], [0], [0], [1], [0, 0, 1, 1], [], []>} : vector<64x128xbf16>, vector<128x32xbf16>, vector<64x32xf32> -> vector<64x32xf32>
    %c1 = arith.constant 1 : index
    %c0_4 = arith.constant 0 : index
    %c0_5 = arith.constant 0 : index
    %4 = vector.load %arg1[%c1, %c0_4, %c0_5] : memref<4x64x128xbf16, #tpu.memory_space<vmem>>, vector<1x64x128xbf16>
    %5 = vector.shape_cast %4 : vector<1x64x128xbf16> to vector<64x128xbf16>
    %cst_6 = arith.constant dense<0.000000e+00> : vector<64x32xf32>
    %6 = tpu.matmul %5, %0, %cst_6 {dimension_numbers = #tpu.dot_dimension_numbers<[1], [0], [0], [1], [0, 0, 1, 1], [], []>} : vector<64x128xbf16>, vector<128x32xbf16>, vector<64x32xf32> -> vector<64x32xf32>
    %c2 = arith.constant 2 : index
    %c0_7 = arith.constant 0 : index
    %c0_8 = arith.constant 0 : index
    %7 = vector.load %arg1[%c2, %c0_7, %c0_8] : memref<4x64x128xbf16, #tpu.memory_space<vmem>>, vector<1x64x128xbf16>
    %8 = vector.shape_cast %7 : vector<1x64x128xbf16> to vector<64x128xbf16>
    %cst_9 = arith.constant dense<0.000000e+00> : vector<64x32xf32>
    %9 = tpu.matmul %8, %0, %cst_9 {dimension_numbers = #tpu.dot_dimension_numbers<[1], [0], [0], [1], [0, 0, 1, 1], [], []>} : vector<64x128xbf16>, vector<128x32xbf16>, vector<64x32xf32> -> vector<64x32xf32>
    %c3 = arith.constant 3 : index
    %c0_10 = arith.constant 0 : index
    %c0_11 = arith.constant 0 : index
    %10 = vector.load %arg1[%c3, %c0_10, %c0_11] : memref<4x64x128xbf16, #tpu.memory_space<vmem>>, vector<1x64x128xbf16>
    %11 = vector.shape_cast %10 : vector<1x64x128xbf16> to vector<64x128xbf16>
    %cst_12 = arith.constant dense<0.000000e+00> : vector<64x32xf32>
    %12 = tpu.matmul %11, %0, %cst_12 {dimension_numbers = #tpu.dot_dimension_numbers<[1], [0], [0], [1], [0, 0, 1, 1], [], []>} : vector<64x128xbf16>, vector<128x32xbf16>, vector<64x32xf32> -> vector<64x32xf32>
    %13 = arith.maximumf %3, %6 : vector<64x32xf32>
    %14 = arith.maximumf %9, %12 : vector<64x32xf32>
    %15 = arith.maximumf %13, %14 : vector<64x32xf32>
    %c0_13 = arith.constant 0 : index
    %c0_14 = arith.constant 0 : index
    %16 = vector.load %arg3[%c0_13, %c0_14] : memref<1x32xf32, #tpu.memory_space<vmem>>, vector<1x32xf32>
    %17 = vector.broadcast %16 : vector<1x32xf32> to vector<64x32xf32>
    %18 = arith.addf %15, %17 : vector<64x32xf32>
    %cst_15 = arith.constant 0.000000e+00 : f32
    %19 = vector.broadcast %cst_15 : f32 to vector<64x32xf32>
    %20 = arith.maximumf %18, %19 : vector<64x32xf32>
    %21 = arith.truncf %20 : vector<64x32xf32> to vector<64x32xbf16>
    %c0_16 = arith.constant 0 : index
    %c0_17 = arith.constant 0 : index
    %c0_18 = arith.constant 0 : index
    %22 = vector.load %arg4[%c0_16, %c0_17, %c0_18] : memref<4x32x64xbf16, #tpu.memory_space<vmem>>, vector<1x32x64xbf16>
    %23 = vector.shape_cast %22 : vector<1x32x64xbf16> to vector<32x64xbf16>
    %cst_19 = arith.constant dense<0.000000e+00> : vector<64x64xf32>
    %24 = tpu.matmul %21, %23, %cst_19 {dimension_numbers = #tpu.dot_dimension_numbers<[1], [0], [0], [1], [0, 0, 1, 1], [], []>} : vector<64x32xbf16>, vector<32x64xbf16>, vector<64x64xf32> -> vector<64x64xf32>
    %c1_20 = arith.constant 1 : index
    %c0_21 = arith.constant 0 : index
    %c0_22 = arith.constant 0 : index
    %25 = vector.load %arg4[%c1_20, %c0_21, %c0_22] : memref<4x32x64xbf16, #tpu.memory_space<vmem>>, vector<1x32x64xbf16>
    %26 = vector.shape_cast %25 : vector<1x32x64xbf16> to vector<32x64xbf16>
    %cst_23 = arith.constant dense<0.000000e+00> : vector<64x64xf32>
    %27 = tpu.matmul %21, %26, %cst_23 {dimension_numbers = #tpu.dot_dimension_numbers<[1], [0], [0], [1], [0, 0, 1, 1], [], []>} : vector<64x32xbf16>, vector<32x64xbf16>, vector<64x64xf32> -> vector<64x64xf32>
    %c2_24 = arith.constant 2 : index
    %c0_25 = arith.constant 0 : index
    %c0_26 = arith.constant 0 : index
    %28 = vector.load %arg4[%c2_24, %c0_25, %c0_26] : memref<4x32x64xbf16, #tpu.memory_space<vmem>>, vector<1x32x64xbf16>
    %29 = vector.shape_cast %28 : vector<1x32x64xbf16> to vector<32x64xbf16>
    %cst_27 = arith.constant dense<0.000000e+00> : vector<64x64xf32>
    %30 = tpu.matmul %21, %29, %cst_27 {dimension_numbers = #tpu.dot_dimension_numbers<[1], [0], [0], [1], [0, 0, 1, 1], [], []>} : vector<64x32xbf16>, vector<32x64xbf16>, vector<64x64xf32> -> vector<64x64xf32>
    %c3_28 = arith.constant 3 : index
    %c0_29 = arith.constant 0 : index
    %c0_30 = arith.constant 0 : index
    %31 = vector.load %arg4[%c3_28, %c0_29, %c0_30] : memref<4x32x64xbf16, #tpu.memory_space<vmem>>, vector<1x32x64xbf16>
    %32 = vector.shape_cast %31 : vector<1x32x64xbf16> to vector<32x64xbf16>
    %cst_31 = arith.constant dense<0.000000e+00> : vector<64x64xf32>
    %33 = tpu.matmul %21, %32, %cst_31 {dimension_numbers = #tpu.dot_dimension_numbers<[1], [0], [0], [1], [0, 0, 1, 1], [], []>} : vector<64x32xbf16>, vector<32x64xbf16>, vector<64x64xf32> -> vector<64x64xf32>
    %c0_32 = arith.constant 0 : index
    %c0_33 = arith.constant 0 : index
    %c0_34 = arith.constant 0 : index
    %c0_35 = arith.constant 0 : index
    %34 = vector.load %arg6[%c0_32, %c0_33, %c0_34, %c0_35] : memref<3x3x16x64xf32, #tpu.memory_space<vmem>>, vector<1x1x16x64xf32>
    %35 = vector.shape_cast %34 : vector<1x1x16x64xf32> to vector<16x64xf32>
    %cst_36 = arith.constant dense<0.000000e+00> : vector<16x64xf32>
    %36 = tpu.matmul %35, %24, %cst_36 {dimension_numbers = #tpu.dot_dimension_numbers<[1], [0], [0], [1], [0, 0, 1, 1], [], []>} : vector<16x64xf32>, vector<64x64xf32>, vector<16x64xf32> -> vector<16x64xf32>
    %c0_37 = arith.constant 0 : index
    %c1_38 = arith.constant 1 : index
    %c0_39 = arith.constant 0 : index
    %c0_40 = arith.constant 0 : index
    %37 = vector.load %arg6[%c0_37, %c1_38, %c0_39, %c0_40] : memref<3x3x16x64xf32, #tpu.memory_space<vmem>>, vector<1x1x16x64xf32>
    %38 = vector.shape_cast %37 : vector<1x1x16x64xf32> to vector<16x64xf32>
    %cst_41 = arith.constant dense<0.000000e+00> : vector<16x64xf32>
    %39 = tpu.matmul %38, %27, %cst_41 {dimension_numbers = #tpu.dot_dimension_numbers<[1], [0], [0], [1], [0, 0, 1, 1], [], []>} : vector<16x64xf32>, vector<64x64xf32>, vector<16x64xf32> -> vector<16x64xf32>
    %40 = arith.addf %36, %39 : vector<16x64xf32>
    %c1_42 = arith.constant 1 : index
    %c0_43 = arith.constant 0 : index
    %c0_44 = arith.constant 0 : index
    %c0_45 = arith.constant 0 : index
    %41 = vector.load %arg6[%c1_42, %c0_43, %c0_44, %c0_45] : memref<3x3x16x64xf32, #tpu.memory_space<vmem>>, vector<1x1x16x64xf32>
    %42 = vector.shape_cast %41 : vector<1x1x16x64xf32> to vector<16x64xf32>
    %cst_46 = arith.constant dense<0.000000e+00> : vector<16x64xf32>
    %43 = tpu.matmul %42, %30, %cst_46 {dimension_numbers = #tpu.dot_dimension_numbers<[1], [0], [0], [1], [0, 0, 1, 1], [], []>} : vector<16x64xf32>, vector<64x64xf32>, vector<16x64xf32> -> vector<16x64xf32>
    %44 = arith.addf %40, %43 : vector<16x64xf32>
    %c1_47 = arith.constant 1 : index
    %c1_48 = arith.constant 1 : index
    %c0_49 = arith.constant 0 : index
    %c0_50 = arith.constant 0 : index
    %45 = vector.load %arg6[%c1_47, %c1_48, %c0_49, %c0_50] : memref<3x3x16x64xf32, #tpu.memory_space<vmem>>, vector<1x1x16x64xf32>
    %46 = vector.shape_cast %45 : vector<1x1x16x64xf32> to vector<16x64xf32>
    %cst_51 = arith.constant dense<0.000000e+00> : vector<16x64xf32>
    %47 = tpu.matmul %46, %33, %cst_51 {dimension_numbers = #tpu.dot_dimension_numbers<[1], [0], [0], [1], [0, 0, 1, 1], [], []>} : vector<16x64xf32>, vector<64x64xf32>, vector<16x64xf32> -> vector<16x64xf32>
    %48 = arith.addf %44, %47 : vector<16x64xf32>
    %c0_52 = arith.constant 0 : index
    %c1_53 = arith.constant 1 : index
    %c0_54 = arith.constant 0 : index
    %c0_55 = arith.constant 0 : index
    %49 = vector.load %arg6[%c0_52, %c1_53, %c0_54, %c0_55] : memref<3x3x16x64xf32, #tpu.memory_space<vmem>>, vector<1x1x16x64xf32>
    %50 = vector.shape_cast %49 : vector<1x1x16x64xf32> to vector<16x64xf32>
    %cst_56 = arith.constant dense<0.000000e+00> : vector<16x64xf32>
    %51 = tpu.matmul %50, %24, %cst_56 {dimension_numbers = #tpu.dot_dimension_numbers<[1], [0], [0], [1], [0, 0, 1, 1], [], []>} : vector<16x64xf32>, vector<64x64xf32>, vector<16x64xf32> -> vector<16x64xf32>
    %c0_57 = arith.constant 0 : index
    %c2_58 = arith.constant 2 : index
    %c0_59 = arith.constant 0 : index
    %c0_60 = arith.constant 0 : index
    %52 = vector.load %arg6[%c0_57, %c2_58, %c0_59, %c0_60] : memref<3x3x16x64xf32, #tpu.memory_space<vmem>>, vector<1x1x16x64xf32>
    %53 = vector.shape_cast %52 : vector<1x1x16x64xf32> to vector<16x64xf32>
    %cst_61 = arith.constant dense<0.000000e+00> : vector<16x64xf32>
    %54 = tpu.matmul %53, %27, %cst_61 {dimension_numbers = #tpu.dot_dimension_numbers<[1], [0], [0], [1], [0, 0, 1, 1], [], []>} : vector<16x64xf32>, vector<64x64xf32>, vector<16x64xf32> -> vector<16x64xf32>
    %55 = arith.addf %51, %54 : vector<16x64xf32>
    %c1_62 = arith.constant 1 : index
    %c1_63 = arith.constant 1 : index
    %c0_64 = arith.constant 0 : index
    %c0_65 = arith.constant 0 : index
    %56 = vector.load %arg6[%c1_62, %c1_63, %c0_64, %c0_65] : memref<3x3x16x64xf32, #tpu.memory_space<vmem>>, vector<1x1x16x64xf32>
    %57 = vector.shape_cast %56 : vector<1x1x16x64xf32> to vector<16x64xf32>
    %cst_66 = arith.constant dense<0.000000e+00> : vector<16x64xf32>
    %58 = tpu.matmul %57, %30, %cst_66 {dimension_numbers = #tpu.dot_dimension_numbers<[1], [0], [0], [1], [0, 0, 1, 1], [], []>} : vector<16x64xf32>, vector<64x64xf32>, vector<16x64xf32> -> vector<16x64xf32>
    %59 = arith.addf %55, %58 : vector<16x64xf32>
    %c1_67 = arith.constant 1 : index
    %c2_68 = arith.constant 2 : index
    %c0_69 = arith.constant 0 : index
    %c0_70 = arith.constant 0 : index
    %60 = vector.load %arg6[%c1_67, %c2_68, %c0_69, %c0_70] : memref<3x3x16x64xf32, #tpu.memory_space<vmem>>, vector<1x1x16x64xf32>
    %61 = vector.shape_cast %60 : vector<1x1x16x64xf32> to vector<16x64xf32>
    %cst_71 = arith.constant dense<0.000000e+00> : vector<16x64xf32>
    %62 = tpu.matmul %61, %33, %cst_71 {dimension_numbers = #tpu.dot_dimension_numbers<[1], [0], [0], [1], [0, 0, 1, 1], [], []>} : vector<16x64xf32>, vector<64x64xf32>, vector<16x64xf32> -> vector<16x64xf32>
    %63 = arith.addf %59, %62 : vector<16x64xf32>
    %c1_72 = arith.constant 1 : index
    %c0_73 = arith.constant 0 : index
    %c0_74 = arith.constant 0 : index
    %c0_75 = arith.constant 0 : index
    %64 = vector.load %arg6[%c1_72, %c0_73, %c0_74, %c0_75] : memref<3x3x16x64xf32, #tpu.memory_space<vmem>>, vector<1x1x16x64xf32>
    %65 = vector.shape_cast %64 : vector<1x1x16x64xf32> to vector<16x64xf32>
    %cst_76 = arith.constant dense<0.000000e+00> : vector<16x64xf32>
    %66 = tpu.matmul %65, %24, %cst_76 {dimension_numbers = #tpu.dot_dimension_numbers<[1], [0], [0], [1], [0, 0, 1, 1], [], []>} : vector<16x64xf32>, vector<64x64xf32>, vector<16x64xf32> -> vector<16x64xf32>
    %c1_77 = arith.constant 1 : index
    %c1_78 = arith.constant 1 : index
    %c0_79 = arith.constant 0 : index
    %c0_80 = arith.constant 0 : index
    %67 = vector.load %arg6[%c1_77, %c1_78, %c0_79, %c0_80] : memref<3x3x16x64xf32, #tpu.memory_space<vmem>>, vector<1x1x16x64xf32>
    %68 = vector.shape_cast %67 : vector<1x1x16x64xf32> to vector<16x64xf32>
    %cst_81 = arith.constant dense<0.000000e+00> : vector<16x64xf32>
    %69 = tpu.matmul %68, %27, %cst_81 {dimension_numbers = #tpu.dot_dimension_numbers<[1], [0], [0], [1], [0, 0, 1, 1], [], []>} : vector<16x64xf32>, vector<64x64xf32>, vector<16x64xf32> -> vector<16x64xf32>
    %70 = arith.addf %66, %69 : vector<16x64xf32>
    %c2_82 = arith.constant 2 : index
    %c0_83 = arith.constant 0 : index
    %c0_84 = arith.constant 0 : index
    %c0_85 = arith.constant 0 : index
    %71 = vector.load %arg6[%c2_82, %c0_83, %c0_84, %c0_85] : memref<3x3x16x64xf32, #tpu.memory_space<vmem>>, vector<1x1x16x64xf32>
    %72 = vector.shape_cast %71 : vector<1x1x16x64xf32> to vector<16x64xf32>
    %cst_86 = arith.constant dense<0.000000e+00> : vector<16x64xf32>
    %73 = tpu.matmul %72, %30, %cst_86 {dimension_numbers = #tpu.dot_dimension_numbers<[1], [0], [0], [1], [0, 0, 1, 1], [], []>} : vector<16x64xf32>, vector<64x64xf32>, vector<16x64xf32> -> vector<16x64xf32>
    %74 = arith.addf %70, %73 : vector<16x64xf32>
    %c2_87 = arith.constant 2 : index
    %c1_88 = arith.constant 1 : index
    %c0_89 = arith.constant 0 : index
    %c0_90 = arith.constant 0 : index
    %75 = vector.load %arg6[%c2_87, %c1_88, %c0_89, %c0_90] : memref<3x3x16x64xf32, #tpu.memory_space<vmem>>, vector<1x1x16x64xf32>
    %76 = vector.shape_cast %75 : vector<1x1x16x64xf32> to vector<16x64xf32>
    %cst_91 = arith.constant dense<0.000000e+00> : vector<16x64xf32>
    %77 = tpu.matmul %76, %33, %cst_91 {dimension_numbers = #tpu.dot_dimension_numbers<[1], [0], [0], [1], [0, 0, 1, 1], [], []>} : vector<16x64xf32>, vector<64x64xf32>, vector<16x64xf32> -> vector<16x64xf32>
    %78 = arith.addf %74, %77 : vector<16x64xf32>
    %c1_92 = arith.constant 1 : index
    %c1_93 = arith.constant 1 : index
    %c0_94 = arith.constant 0 : index
    %c0_95 = arith.constant 0 : index
    %79 = vector.load %arg6[%c1_92, %c1_93, %c0_94, %c0_95] : memref<3x3x16x64xf32, #tpu.memory_space<vmem>>, vector<1x1x16x64xf32>
    %80 = vector.shape_cast %79 : vector<1x1x16x64xf32> to vector<16x64xf32>
    %cst_96 = arith.constant dense<0.000000e+00> : vector<16x64xf32>
    %81 = tpu.matmul %80, %24, %cst_96 {dimension_numbers = #tpu.dot_dimension_numbers<[1], [0], [0], [1], [0, 0, 1, 1], [], []>} : vector<16x64xf32>, vector<64x64xf32>, vector<16x64xf32> -> vector<16x64xf32>
    %c1_97 = arith.constant 1 : index
    %c2_98 = arith.constant 2 : index
    %c0_99 = arith.constant 0 : index
    %c0_100 = arith.constant 0 : index
    %82 = vector.load %arg6[%c1_97, %c2_98, %c0_99, %c0_100] : memref<3x3x16x64xf32, #tpu.memory_space<vmem>>, vector<1x1x16x64xf32>
    %83 = vector.shape_cast %82 : vector<1x1x16x64xf32> to vector<16x64xf32>
    %cst_101 = arith.constant dense<0.000000e+00> : vector<16x64xf32>
    %84 = tpu.matmul %83, %27, %cst_101 {dimension_numbers = #tpu.dot_dimension_numbers<[1], [0], [0], [1], [0, 0, 1, 1], [], []>} : vector<16x64xf32>, vector<64x64xf32>, vector<16x64xf32> -> vector<16x64xf32>
    %85 = arith.addf %81, %84 : vector<16x64xf32>
    %c2_102 = arith.constant 2 : index
    %c1_103 = arith.constant 1 : index
    %c0_104 = arith.constant 0 : index
    %c0_105 = arith.constant 0 : index
    %86 = vector.load %arg6[%c2_102, %c1_103, %c0_104, %c0_105] : memref<3x3x16x64xf32, #tpu.memory_space<vmem>>, vector<1x1x16x64xf32>
    %87 = vector.shape_cast %86 : vector<1x1x16x64xf32> to vector<16x64xf32>
    %cst_106 = arith.constant dense<0.000000e+00> : vector<16x64xf32>
    %88 = tpu.matmul %87, %30, %cst_106 {dimension_numbers = #tpu.dot_dimension_numbers<[1], [0], [0], [1], [0, 0, 1, 1], [], []>} : vector<16x64xf32>, vector<64x64xf32>, vector<16x64xf32> -> vector<16x64xf32>
    %89 = arith.addf %85, %88 : vector<16x64xf32>
    %c2_107 = arith.constant 2 : index
    %c2_108 = arith.constant 2 : index
    %c0_109 = arith.constant 0 : index
    %c0_110 = arith.constant 0 : index
    %90 = vector.load %arg6[%c2_107, %c2_108, %c0_109, %c0_110] : memref<3x3x16x64xf32, #tpu.memory_space<vmem>>, vector<1x1x16x64xf32>
    %91 = vector.shape_cast %90 : vector<1x1x16x64xf32> to vector<16x64xf32>
    %cst_111 = arith.constant dense<0.000000e+00> : vector<16x64xf32>
    %92 = tpu.matmul %91, %33, %cst_111 {dimension_numbers = #tpu.dot_dimension_numbers<[1], [0], [0], [1], [0, 0, 1, 1], [], []>} : vector<16x64xf32>, vector<64x64xf32>, vector<16x64xf32> -> vector<16x64xf32>
    %93 = arith.addf %89, %92 : vector<16x64xf32>
    %94 = arith.maximumf %48, %63 : vector<16x64xf32>
    %95 = arith.maximumf %78, %93 : vector<16x64xf32>
    %96 = arith.maximumf %94, %95 : vector<16x64xf32>
    %c0_112 = arith.constant 0 : index
    %c0_113 = arith.constant 0 : index
    %97 = vector.load %arg5[%c0_112, %c0_113] : memref<1x64xf32, #tpu.memory_space<vmem>>, vector<1x64xf32>
    %98 = vector.broadcast %97 : vector<1x64xf32> to vector<16x64xf32>
    %99 = arith.addf %96, %98 : vector<16x64xf32>
    %cst_114 = arith.constant 0.000000e+00 : f32
    %100 = vector.broadcast %cst_114 : f32 to vector<16x64xf32>
    %101 = arith.maximumf %99, %100 : vector<16x64xf32>
    %102 = arith.truncf %101 : vector<16x64xf32> to vector<16x64xbf16>
    %c0_115 = arith.constant 0 : index
    %c0_116 = arith.constant 0 : index
    %c0_117 = arith.constant 0 : index
    %103 = vector.load %arg7[%c0_115, %c0_116, %c0_117] : memref<4x64x64xbf16, #tpu.memory_space<vmem>>, vector<1x64x64xbf16>
    %104 = vector.shape_cast %103 : vector<1x64x64xbf16> to vector<64x64xbf16>
    %cst_118 = arith.constant dense<0.000000e+00> : vector<16x64xf32>
    %105 = tpu.matmul %102, %104, %cst_118 {dimension_numbers = #tpu.dot_dimension_numbers<[1], [0], [0], [1], [0, 0, 1, 1], [], []>} : vector<16x64xbf16>, vector<64x64xbf16>, vector<16x64xf32> -> vector<16x64xf32>
    %c1_119 = arith.constant 1 : index
    %c0_120 = arith.constant 0 : index
    %c0_121 = arith.constant 0 : index
    %106 = vector.load %arg7[%c1_119, %c0_120, %c0_121] : memref<4x64x64xbf16, #tpu.memory_space<vmem>>, vector<1x64x64xbf16>
    %107 = vector.shape_cast %106 : vector<1x64x64xbf16> to vector<64x64xbf16>
    %cst_122 = arith.constant dense<0.000000e+00> : vector<16x64xf32>
    %108 = tpu.matmul %102, %107, %cst_122 {dimension_numbers = #tpu.dot_dimension_numbers<[1], [0], [0], [1], [0, 0, 1, 1], [], []>} : vector<16x64xbf16>, vector<64x64xbf16>, vector<16x64xf32> -> vector<16x64xf32>
    %c2_123 = arith.constant 2 : index
    %c0_124 = arith.constant 0 : index
    %c0_125 = arith.constant 0 : index
    %109 = vector.load %arg7[%c2_123, %c0_124, %c0_125] : memref<4x64x64xbf16, #tpu.memory_space<vmem>>, vector<1x64x64xbf16>
    %110 = vector.shape_cast %109 : vector<1x64x64xbf16> to vector<64x64xbf16>
    %cst_126 = arith.constant dense<0.000000e+00> : vector<16x64xf32>
    %111 = tpu.matmul %102, %110, %cst_126 {dimension_numbers = #tpu.dot_dimension_numbers<[1], [0], [0], [1], [0, 0, 1, 1], [], []>} : vector<16x64xbf16>, vector<64x64xbf16>, vector<16x64xf32> -> vector<16x64xf32>
    %c3_127 = arith.constant 3 : index
    %c0_128 = arith.constant 0 : index
    %c0_129 = arith.constant 0 : index
    %112 = vector.load %arg7[%c3_127, %c0_128, %c0_129] : memref<4x64x64xbf16, #tpu.memory_space<vmem>>, vector<1x64x64xbf16>
    %113 = vector.shape_cast %112 : vector<1x64x64xbf16> to vector<64x64xbf16>
    %cst_130 = arith.constant dense<0.000000e+00> : vector<16x64xf32>
    %114 = tpu.matmul %102, %113, %cst_130 {dimension_numbers = #tpu.dot_dimension_numbers<[1], [0], [0], [1], [0, 0, 1, 1], [], []>} : vector<16x64xbf16>, vector<64x64xbf16>, vector<16x64xf32> -> vector<16x64xf32>
    %c0_131 = arith.constant 0 : index
    %c0_132 = arith.constant 0 : index
    %c0_133 = arith.constant 0 : index
    %c0_134 = arith.constant 0 : index
    %115 = vector.load %arg9[%c0_131, %c0_132, %c0_133, %c0_134] : memref<3x3x4x16xf32, #tpu.memory_space<vmem>>, vector<1x1x4x16xf32>
    %116 = vector.shape_cast %115 : vector<1x1x4x16xf32> to vector<4x16xf32>
    %cst_135 = arith.constant dense<0.000000e+00> : vector<4x64xf32>
    %117 = tpu.matmul %116, %105, %cst_135 {dimension_numbers = #tpu.dot_dimension_numbers<[1], [0], [0], [1], [0, 0, 1, 1], [], []>} : vector<4x16xf32>, vector<16x64xf32>, vector<4x64xf32> -> vector<4x64xf32>
    %c0_136 = arith.constant 0 : index
    %c1_137 = arith.constant 1 : index
    %c0_138 = arith.constant 0 : index
    %c0_139 = arith.constant 0 : index
    %118 = vector.load %arg9[%c0_136, %c1_137, %c0_138, %c0_139] : memref<3x3x4x16xf32, #tpu.memory_space<vmem>>, vector<1x1x4x16xf32>
    %119 = vector.shape_cast %118 : vector<1x1x4x16xf32> to vector<4x16xf32>
    %cst_140 = arith.constant dense<0.000000e+00> : vector<4x64xf32>
    %120 = tpu.matmul %119, %108, %cst_140 {dimension_numbers = #tpu.dot_dimension_numbers<[1], [0], [0], [1], [0, 0, 1, 1], [], []>} : vector<4x16xf32>, vector<16x64xf32>, vector<4x64xf32> -> vector<4x64xf32>
    %121 = arith.addf %117, %120 : vector<4x64xf32>
    %c1_141 = arith.constant 1 : index
    %c0_142 = arith.constant 0 : index
    %c0_143 = arith.constant 0 : index
    %c0_144 = arith.constant 0 : index
    %122 = vector.load %arg9[%c1_141, %c0_142, %c0_143, %c0_144] : memref<3x3x4x16xf32, #tpu.memory_space<vmem>>, vector<1x1x4x16xf32>
    %123 = vector.shape_cast %122 : vector<1x1x4x16xf32> to vector<4x16xf32>
    %cst_145 = arith.constant dense<0.000000e+00> : vector<4x64xf32>
    %124 = tpu.matmul %123, %111, %cst_145 {dimension_numbers = #tpu.dot_dimension_numbers<[1], [0], [0], [1], [0, 0, 1, 1], [], []>} : vector<4x16xf32>, vector<16x64xf32>, vector<4x64xf32> -> vector<4x64xf32>
    %125 = arith.addf %121, %124 : vector<4x64xf32>
    %c1_146 = arith.constant 1 : index
    %c1_147 = arith.constant 1 : index
    %c0_148 = arith.constant 0 : index
    %c0_149 = arith.constant 0 : index
    %126 = vector.load %arg9[%c1_146, %c1_147, %c0_148, %c0_149] : memref<3x3x4x16xf32, #tpu.memory_space<vmem>>, vector<1x1x4x16xf32>
    %127 = vector.shape_cast %126 : vector<1x1x4x16xf32> to vector<4x16xf32>
    %cst_150 = arith.constant dense<0.000000e+00> : vector<4x64xf32>
    %128 = tpu.matmul %127, %114, %cst_150 {dimension_numbers = #tpu.dot_dimension_numbers<[1], [0], [0], [1], [0, 0, 1, 1], [], []>} : vector<4x16xf32>, vector<16x64xf32>, vector<4x64xf32> -> vector<4x64xf32>
    %129 = arith.addf %125, %128 : vector<4x64xf32>
    %c0_151 = arith.constant 0 : index
    %c1_152 = arith.constant 1 : index
    %c0_153 = arith.constant 0 : index
    %c0_154 = arith.constant 0 : index
    %130 = vector.load %arg9[%c0_151, %c1_152, %c0_153, %c0_154] : memref<3x3x4x16xf32, #tpu.memory_space<vmem>>, vector<1x1x4x16xf32>
    %131 = vector.shape_cast %130 : vector<1x1x4x16xf32> to vector<4x16xf32>
    %cst_155 = arith.constant dense<0.000000e+00> : vector<4x64xf32>
    %132 = tpu.matmul %131, %105, %cst_155 {dimension_numbers = #tpu.dot_dimension_numbers<[1], [0], [0], [1], [0, 0, 1, 1], [], []>} : vector<4x16xf32>, vector<16x64xf32>, vector<4x64xf32> -> vector<4x64xf32>
    %c0_156 = arith.constant 0 : index
    %c2_157 = arith.constant 2 : index
    %c0_158 = arith.constant 0 : index
    %c0_159 = arith.constant 0 : index
    %133 = vector.load %arg9[%c0_156, %c2_157, %c0_158, %c0_159] : memref<3x3x4x16xf32, #tpu.memory_space<vmem>>, vector<1x1x4x16xf32>
    %134 = vector.shape_cast %133 : vector<1x1x4x16xf32> to vector<4x16xf32>
    %cst_160 = arith.constant dense<0.000000e+00> : vector<4x64xf32>
    %135 = tpu.matmul %134, %108, %cst_160 {dimension_numbers = #tpu.dot_dimension_numbers<[1], [0], [0], [1], [0, 0, 1, 1], [], []>} : vector<4x16xf32>, vector<16x64xf32>, vector<4x64xf32> -> vector<4x64xf32>
    %136 = arith.addf %132, %135 : vector<4x64xf32>
    %c1_161 = arith.constant 1 : index
    %c1_162 = arith.constant 1 : index
    %c0_163 = arith.constant 0 : index
    %c0_164 = arith.constant 0 : index
    %137 = vector.load %arg9[%c1_161, %c1_162, %c0_163, %c0_164] : memref<3x3x4x16xf32, #tpu.memory_space<vmem>>, vector<1x1x4x16xf32>
    %138 = vector.shape_cast %137 : vector<1x1x4x16xf32> to vector<4x16xf32>
    %cst_165 = arith.constant dense<0.000000e+00> : vector<4x64xf32>
    %139 = tpu.matmul %138, %111, %cst_165 {dimension_numbers = #tpu.dot_dimension_numbers<[1], [0], [0], [1], [0, 0, 1, 1], [], []>} : vector<4x16xf32>, vector<16x64xf32>, vector<4x64xf32> -> vector<4x64xf32>
    %140 = arith.addf %136, %139 : vector<4x64xf32>
    %c1_166 = arith.constant 1 : index
    %c2_167 = arith.constant 2 : index
    %c0_168 = arith.constant 0 : index
    %c0_169 = arith.constant 0 : index
    %141 = vector.load %arg9[%c1_166, %c2_167, %c0_168, %c0_169] : memref<3x3x4x16xf32, #tpu.memory_space<vmem>>, vector<1x1x4x16xf32>
    %142 = vector.shape_cast %141 : vector<1x1x4x16xf32> to vector<4x16xf32>
    %cst_170 = arith.constant dense<0.000000e+00> : vector<4x64xf32>
    %143 = tpu.matmul %142, %114, %cst_170 {dimension_numbers = #tpu.dot_dimension_numbers<[1], [0], [0], [1], [0, 0, 1, 1], [], []>} : vector<4x16xf32>, vector<16x64xf32>, vector<4x64xf32> -> vector<4x64xf32>
    %144 = arith.addf %140, %143 : vector<4x64xf32>
    %c1_171 = arith.constant 1 : index
    %c0_172 = arith.constant 0 : index
    %c0_173 = arith.constant 0 : index
    %c0_174 = arith.constant 0 : index
    %145 = vector.load %arg9[%c1_171, %c0_172, %c0_173, %c0_174] : memref<3x3x4x16xf32, #tpu.memory_space<vmem>>, vector<1x1x4x16xf32>
    %146 = vector.shape_cast %145 : vector<1x1x4x16xf32> to vector<4x16xf32>
    %cst_175 = arith.constant dense<0.000000e+00> : vector<4x64xf32>
    %147 = tpu.matmul %146, %105, %cst_175 {dimension_numbers = #tpu.dot_dimension_numbers<[1], [0], [0], [1], [0, 0, 1, 1], [], []>} : vector<4x16xf32>, vector<16x64xf32>, vector<4x64xf32> -> vector<4x64xf32>
    %c1_176 = arith.constant 1 : index
    %c1_177 = arith.constant 1 : index
    %c0_178 = arith.constant 0 : index
    %c0_179 = arith.constant 0 : index
    %148 = vector.load %arg9[%c1_176, %c1_177, %c0_178, %c0_179] : memref<3x3x4x16xf32, #tpu.memory_space<vmem>>, vector<1x1x4x16xf32>
    %149 = vector.shape_cast %148 : vector<1x1x4x16xf32> to vector<4x16xf32>
    %cst_180 = arith.constant dense<0.000000e+00> : vector<4x64xf32>
    %150 = tpu.matmul %149, %108, %cst_180 {dimension_numbers = #tpu.dot_dimension_numbers<[1], [0], [0], [1], [0, 0, 1, 1], [], []>} : vector<4x16xf32>, vector<16x64xf32>, vector<4x64xf32> -> vector<4x64xf32>
    %151 = arith.addf %147, %150 : vector<4x64xf32>
    %c2_181 = arith.constant 2 : index
    %c0_182 = arith.constant 0 : index
    %c0_183 = arith.constant 0 : index
    %c0_184 = arith.constant 0 : index
    %152 = vector.load %arg9[%c2_181, %c0_182, %c0_183, %c0_184] : memref<3x3x4x16xf32, #tpu.memory_space<vmem>>, vector<1x1x4x16xf32>
    %153 = vector.shape_cast %152 : vector<1x1x4x16xf32> to vector<4x16xf32>
    %cst_185 = arith.constant dense<0.000000e+00> : vector<4x64xf32>
    %154 = tpu.matmul %153, %111, %cst_185 {dimension_numbers = #tpu.dot_dimension_numbers<[1], [0], [0], [1], [0, 0, 1, 1], [], []>} : vector<4x16xf32>, vector<16x64xf32>, vector<4x64xf32> -> vector<4x64xf32>
    %155 = arith.addf %151, %154 : vector<4x64xf32>
    %c2_186 = arith.constant 2 : index
    %c1_187 = arith.constant 1 : index
    %c0_188 = arith.constant 0 : index
    %c0_189 = arith.constant 0 : index
    %156 = vector.load %arg9[%c2_186, %c1_187, %c0_188, %c0_189] : memref<3x3x4x16xf32, #tpu.memory_space<vmem>>, vector<1x1x4x16xf32>
    %157 = vector.shape_cast %156 : vector<1x1x4x16xf32> to vector<4x16xf32>
    %cst_190 = arith.constant dense<0.000000e+00> : vector<4x64xf32>
    %158 = tpu.matmul %157, %114, %cst_190 {dimension_numbers = #tpu.dot_dimension_numbers<[1], [0], [0], [1], [0, 0, 1, 1], [], []>} : vector<4x16xf32>, vector<16x64xf32>, vector<4x64xf32> -> vector<4x64xf32>
    %159 = arith.addf %155, %158 : vector<4x64xf32>
    %c1_191 = arith.constant 1 : index
    %c1_192 = arith.constant 1 : index
    %c0_193 = arith.constant 0 : index
    %c0_194 = arith.constant 0 : index
    %160 = vector.load %arg9[%c1_191, %c1_192, %c0_193, %c0_194] : memref<3x3x4x16xf32, #tpu.memory_space<vmem>>, vector<1x1x4x16xf32>
    %161 = vector.shape_cast %160 : vector<1x1x4x16xf32> to vector<4x16xf32>
    %cst_195 = arith.constant dense<0.000000e+00> : vector<4x64xf32>
    %162 = tpu.matmul %161, %105, %cst_195 {dimension_numbers = #tpu.dot_dimension_numbers<[1], [0], [0], [1], [0, 0, 1, 1], [], []>} : vector<4x16xf32>, vector<16x64xf32>, vector<4x64xf32> -> vector<4x64xf32>
    %c1_196 = arith.constant 1 : index
    %c2_197 = arith.constant 2 : index
    %c0_198 = arith.constant 0 : index
    %c0_199 = arith.constant 0 : index
    %163 = vector.load %arg9[%c1_196, %c2_197, %c0_198, %c0_199] : memref<3x3x4x16xf32, #tpu.memory_space<vmem>>, vector<1x1x4x16xf32>
    %164 = vector.shape_cast %163 : vector<1x1x4x16xf32> to vector<4x16xf32>
    %cst_200 = arith.constant dense<0.000000e+00> : vector<4x64xf32>
    %165 = tpu.matmul %164, %108, %cst_200 {dimension_numbers = #tpu.dot_dimension_numbers<[1], [0], [0], [1], [0, 0, 1, 1], [], []>} : vector<4x16xf32>, vector<16x64xf32>, vector<4x64xf32> -> vector<4x64xf32>
    %166 = arith.addf %162, %165 : vector<4x64xf32>
    %c2_201 = arith.constant 2 : index
    %c1_202 = arith.constant 1 : index
    %c0_203 = arith.constant 0 : index
    %c0_204 = arith.constant 0 : index
    %167 = vector.load %arg9[%c2_201, %c1_202, %c0_203, %c0_204] : memref<3x3x4x16xf32, #tpu.memory_space<vmem>>, vector<1x1x4x16xf32>
    %168 = vector.shape_cast %167 : vector<1x1x4x16xf32> to vector<4x16xf32>
    %cst_205 = arith.constant dense<0.000000e+00> : vector<4x64xf32>
    %169 = tpu.matmul %168, %111, %cst_205 {dimension_numbers = #tpu.dot_dimension_numbers<[1], [0], [0], [1], [0, 0, 1, 1], [], []>} : vector<4x16xf32>, vector<16x64xf32>, vector<4x64xf32> -> vector<4x64xf32>
    %170 = arith.addf %166, %169 : vector<4x64xf32>
    %c2_206 = arith.constant 2 : index
    %c2_207 = arith.constant 2 : index
    %c0_208 = arith.constant 0 : index
    %c0_209 = arith.constant 0 : index
    %171 = vector.load %arg9[%c2_206, %c2_207, %c0_208, %c0_209] : memref<3x3x4x16xf32, #tpu.memory_space<vmem>>, vector<1x1x4x16xf32>
    %172 = vector.shape_cast %171 : vector<1x1x4x16xf32> to vector<4x16xf32>
    %cst_210 = arith.constant dense<0.000000e+00> : vector<4x64xf32>
    %173 = tpu.matmul %172, %114, %cst_210 {dimension_numbers = #tpu.dot_dimension_numbers<[1], [0], [0], [1], [0, 0, 1, 1], [], []>} : vector<4x16xf32>, vector<16x64xf32>, vector<4x64xf32> -> vector<4x64xf32>
    %174 = arith.addf %170, %173 : vector<4x64xf32>
    %175 = arith.maximumf %129, %144 : vector<4x64xf32>
    %176 = arith.maximumf %159, %174 : vector<4x64xf32>
    %177 = arith.maximumf %175, %176 : vector<4x64xf32>
    %c0_211 = arith.constant 0 : index
    %c0_212 = arith.constant 0 : index
    %178 = vector.load %arg8[%c0_211, %c0_212] : memref<1x64xf32, #tpu.memory_space<vmem>>, vector<1x64xf32>
    %179 = vector.broadcast %178 : vector<1x64xf32> to vector<4x64xf32>
    %180 = arith.addf %177, %179 : vector<4x64xf32>
    %cst_213 = arith.constant 0.000000e+00 : f32
    %181 = vector.broadcast %cst_213 : f32 to vector<4x64xf32>
    %182 = arith.maximumf %180, %181 : vector<4x64xf32>
    %c0_214 = arith.constant 0 : index
    %c0_215 = arith.constant 0 : index
    %183 = vector.load %arg11[%c0_214, %c0_215] : memref<1x50xf32, #tpu.memory_space<vmem>>, vector<1x50xf32>
    %184 = vector.extract_strided_slice %182 {offsets = [0, 0], sizes = [1, 64], strides = [1, 1]} : vector<4x64xf32> to vector<1x64xf32>
    %185 = arith.truncf %184 : vector<1x64xf32> to vector<1x64xbf16>
    %c0_216 = arith.constant 0 : index
    %c0_217 = arith.constant 0 : index
    %c0_218 = arith.constant 0 : index
    %186 = vector.load %arg10[%c0_216, %c0_217, %c0_218] : memref<4x64x50xbf16, #tpu.memory_space<vmem>>, vector<1x64x50xbf16>
    %187 = vector.shape_cast %186 : vector<1x64x50xbf16> to vector<64x50xbf16>
    %cst_219 = arith.constant dense<0.000000e+00> : vector<1x50xf32>
    %188 = tpu.matmul %185, %187, %cst_219 {dimension_numbers = #tpu.dot_dimension_numbers<[1], [0], [0], [1], [0, 0, 1, 1], [], []>} : vector<1x64xbf16>, vector<64x50xbf16>, vector<1x50xf32> -> vector<1x50xf32>
    %189 = arith.addf %183, %188 : vector<1x50xf32>
    %190 = vector.extract_strided_slice %182 {offsets = [1, 0], sizes = [1, 64], strides = [1, 1]} : vector<4x64xf32> to vector<1x64xf32>
    %191 = arith.truncf %190 : vector<1x64xf32> to vector<1x64xbf16>
    %c1_220 = arith.constant 1 : index
    %c0_221 = arith.constant 0 : index
    %c0_222 = arith.constant 0 : index
    %192 = vector.load %arg10[%c1_220, %c0_221, %c0_222] : memref<4x64x50xbf16, #tpu.memory_space<vmem>>, vector<1x64x50xbf16>
    %193 = vector.shape_cast %192 : vector<1x64x50xbf16> to vector<64x50xbf16>
    %cst_223 = arith.constant dense<0.000000e+00> : vector<1x50xf32>
    %194 = tpu.matmul %191, %193, %cst_223 {dimension_numbers = #tpu.dot_dimension_numbers<[1], [0], [0], [1], [0, 0, 1, 1], [], []>} : vector<1x64xbf16>, vector<64x50xbf16>, vector<1x50xf32> -> vector<1x50xf32>
    %195 = arith.addf %189, %194 : vector<1x50xf32>
    %196 = vector.extract_strided_slice %182 {offsets = [2, 0], sizes = [1, 64], strides = [1, 1]} : vector<4x64xf32> to vector<1x64xf32>
    %197 = arith.truncf %196 : vector<1x64xf32> to vector<1x64xbf16>
    %c2_224 = arith.constant 2 : index
    %c0_225 = arith.constant 0 : index
    %c0_226 = arith.constant 0 : index
    %198 = vector.load %arg10[%c2_224, %c0_225, %c0_226] : memref<4x64x50xbf16, #tpu.memory_space<vmem>>, vector<1x64x50xbf16>
    %199 = vector.shape_cast %198 : vector<1x64x50xbf16> to vector<64x50xbf16>
    %cst_227 = arith.constant dense<0.000000e+00> : vector<1x50xf32>
    %200 = tpu.matmul %197, %199, %cst_227 {dimension_numbers = #tpu.dot_dimension_numbers<[1], [0], [0], [1], [0, 0, 1, 1], [], []>} : vector<1x64xbf16>, vector<64x50xbf16>, vector<1x50xf32> -> vector<1x50xf32>
    %201 = arith.addf %195, %200 : vector<1x50xf32>
    %202 = vector.extract_strided_slice %182 {offsets = [3, 0], sizes = [1, 64], strides = [1, 1]} : vector<4x64xf32> to vector<1x64xf32>
    %203 = arith.truncf %202 : vector<1x64xf32> to vector<1x64xbf16>
    %c3_228 = arith.constant 3 : index
    %c0_229 = arith.constant 0 : index
    %c0_230 = arith.constant 0 : index
    %204 = vector.load %arg10[%c3_228, %c0_229, %c0_230] : memref<4x64x50xbf16, #tpu.memory_space<vmem>>, vector<1x64x50xbf16>
    %205 = vector.shape_cast %204 : vector<1x64x50xbf16> to vector<64x50xbf16>
    %cst_231 = arith.constant dense<0.000000e+00> : vector<1x50xf32>
    %206 = tpu.matmul %203, %205, %cst_231 {dimension_numbers = #tpu.dot_dimension_numbers<[1], [0], [0], [1], [0, 0, 1, 1], [], []>} : vector<1x64xbf16>, vector<64x50xbf16>, vector<1x50xf32> -> vector<1x50xf32>
    %207 = arith.addf %201, %206 : vector<1x50xf32>
    %cst_232 = arith.constant 0.000000e+00 : f32
    %208 = vector.broadcast %cst_232 : f32 to vector<1x50xf32>
    %209 = arith.maximumf %207, %208 : vector<1x50xf32>
    %210 = arith.truncf %209 : vector<1x50xf32> to vector<1x50xbf16>
    %c0_233 = arith.constant 0 : index
    %c0_234 = arith.constant 0 : index
    %211 = vector.load %arg12[%c0_233, %c0_234] : memref<50x50xbf16, #tpu.memory_space<vmem>>, vector<50x50xbf16>
    %cst_235 = arith.constant dense<0.000000e+00> : vector<1x50xf32>
    %212 = tpu.matmul %210, %211, %cst_235 {dimension_numbers = #tpu.dot_dimension_numbers<[1], [0], [0], [1], [0, 0, 1, 1], [], []>} : vector<1x50xbf16>, vector<50x50xbf16>, vector<1x50xf32> -> vector<1x50xf32>
    %c0_236 = arith.constant 0 : index
    %c0_237 = arith.constant 0 : index
    %213 = vector.load %arg13[%c0_236, %c0_237] : memref<1x50xf32, #tpu.memory_space<vmem>>, vector<1x50xf32>
    %214 = arith.addf %212, %213 : vector<1x50xf32>
    %cst_238 = arith.constant 0.000000e+00 : f32
    %215 = vector.broadcast %cst_238 : f32 to vector<1x50xf32>
    %216 = arith.maximumf %214, %215 : vector<1x50xf32>
    %217 = arith.truncf %216 : vector<1x50xf32> to vector<1x50xbf16>
    %c0_239 = arith.constant 0 : index
    %c0_240 = arith.constant 0 : index
    %218 = vector.load %arg14[%c0_239, %c0_240] : memref<50x8xbf16, #tpu.memory_space<vmem>>, vector<50x8xbf16>
    %cst_241 = arith.constant dense<0.000000e+00> : vector<1x8xf32>
    %219 = tpu.matmul %217, %218, %cst_241 {dimension_numbers = #tpu.dot_dimension_numbers<[1], [0], [0], [1], [0, 0, 1, 1], [], []>} : vector<1x50xbf16>, vector<50x8xbf16>, vector<1x8xf32> -> vector<1x8xf32>
    %c0_242 = arith.constant 0 : index
    %c0_243 = arith.constant 0 : index
    %220 = vector.load %arg15[%c0_242, %c0_243] : memref<1x8xf32, #tpu.memory_space<vmem>>, vector<1x8xf32>
    %221 = arith.addf %219, %220 : vector<1x8xf32>
    %c0_244 = arith.constant 0 : index
    %c0_245 = arith.constant 0 : index
    %c0_246 = arith.constant 0 : index
    %222 = vector.load %arg16[%c0_244, %c0_245, %c0_246] : memref<1x1x8xf32, #tpu.memory_space<vmem>>, vector<1x1x8xf32>
    %223 = vector.shape_cast %222 : vector<1x1x8xf32> to vector<1x8xf32>
    %224 = vector.shape_cast %221 : vector<1x8xf32> to vector<1x1x8xf32>
    tpu.vector_store %arg16[%c0_244, %c0_245, %c0_246], %224 {strides = array<i32>} : memref<1x1x8xf32, #tpu.memory_space<vmem>>, vector<1x1x8xf32>,
    return
  }
  func.func @transform_0(%arg0: i32) -> (i32, i32, i32) {
    %c0_i32 = arith.constant 0 : i32
    %c0_i32_0 = arith.constant 0 : i32
    %c0_i32_1 = arith.constant 0 : i32
    return %c0_i32, %arg0, %c0_i32_0 : i32, i32, i32
  }
  func.func @transform_1(%arg0: i32) -> (i32, i32) {
    %c0_i32 = arith.constant 0 : i32
    %c0_i32_0 = arith.constant 0 : i32
    %c0_i32_1 = arith.constant 0 : i32
    return %c0_i32, %c0_i32_0 : i32, i32
  }
  func.func @transform_2(%arg0: i32) -> (i32, i32) {
    %c0_i32 = arith.constant 0 : i32
    %c0_i32_0 = arith.constant 0 : i32
    %c0_i32_1 = arith.constant 0 : i32
    return %c0_i32, %c0_i32_0 : i32, i32
  }
  func.func @transform_3(%arg0: i32) -> (i32, i32, i32) {
    %c0_i32 = arith.constant 0 : i32
    %c0_i32_0 = arith.constant 0 : i32
    %c0_i32_1 = arith.constant 0 : i32
    %c0_i32_2 = arith.constant 0 : i32
    return %c0_i32, %c0_i32_0, %c0_i32_1 : i32, i32, i32
  }
  func.func @transform_4(%arg0: i32) -> (i32, i32) {
    %c0_i32 = arith.constant 0 : i32
    %c0_i32_0 = arith.constant 0 : i32
    %c0_i32_1 = arith.constant 0 : i32
    return %c0_i32, %c0_i32_0 : i32, i32
  }
  func.func @transform_5(%arg0: i32) -> (i32, i32, i32, i32) {
    %c0_i32 = arith.constant 0 : i32
    %c0_i32_0 = arith.constant 0 : i32
    %c0_i32_1 = arith.constant 0 : i32
    %c0_i32_2 = arith.constant 0 : i32
    %c0_i32_3 = arith.constant 0 : i32
    return %c0_i32, %c0_i32_0, %c0_i32_1, %c0_i32_2 : i32, i32, i32, i32
  }
  func.func @transform_6(%arg0: i32) -> (i32, i32, i32) {
    %c0_i32 = arith.constant 0 : i32
    %c0_i32_0 = arith.constant 0 : i32
    %c0_i32_1 = arith.constant 0 : i32
    %c0_i32_2 = arith.constant 0 : i32
    return %c0_i32, %c0_i32_0, %c0_i32_1 : i32, i32, i32
  }
  func.func @transform_7(%arg0: i32) -> (i32, i32) {
    %c0_i32 = arith.constant 0 : i32
    %c0_i32_0 = arith.constant 0 : i32
    %c0_i32_1 = arith.constant 0 : i32
    return %c0_i32, %c0_i32_0 : i32, i32
  }
  func.func @transform_8(%arg0: i32) -> (i32, i32, i32, i32) {
    %c0_i32 = arith.constant 0 : i32
    %c0_i32_0 = arith.constant 0 : i32
    %c0_i32_1 = arith.constant 0 : i32
    %c0_i32_2 = arith.constant 0 : i32
    %c0_i32_3 = arith.constant 0 : i32
    return %c0_i32, %c0_i32_0, %c0_i32_1, %c0_i32_2 : i32, i32, i32, i32
  }
  func.func @transform_9(%arg0: i32) -> (i32, i32, i32) {
    %c0_i32 = arith.constant 0 : i32
    %c0_i32_0 = arith.constant 0 : i32
    %c0_i32_1 = arith.constant 0 : i32
    %c0_i32_2 = arith.constant 0 : i32
    return %c0_i32, %c0_i32_0, %c0_i32_1 : i32, i32, i32
  }
  func.func @transform_10(%arg0: i32) -> (i32, i32) {
    %c0_i32 = arith.constant 0 : i32
    %c0_i32_0 = arith.constant 0 : i32
    %c0_i32_1 = arith.constant 0 : i32
    return %c0_i32, %c0_i32_0 : i32, i32
  }
  func.func @transform_11(%arg0: i32) -> (i32, i32) {
    %c0_i32 = arith.constant 0 : i32
    %c0_i32_0 = arith.constant 0 : i32
    %c0_i32_1 = arith.constant 0 : i32
    return %c0_i32, %c0_i32_0 : i32, i32
  }
  func.func @transform_12(%arg0: i32) -> (i32, i32) {
    %c0_i32 = arith.constant 0 : i32
    %c0_i32_0 = arith.constant 0 : i32
    %c0_i32_1 = arith.constant 0 : i32
    return %c0_i32, %c0_i32_0 : i32, i32
  }
  func.func @transform_13(%arg0: i32) -> (i32, i32) {
    %c0_i32 = arith.constant 0 : i32
    %c0_i32_0 = arith.constant 0 : i32
    %c0_i32_1 = arith.constant 0 : i32
    return %c0_i32, %c0_i32_0 : i32, i32
  }
  func.func @transform_14(%arg0: i32) -> (i32, i32) {
    %c0_i32 = arith.constant 0 : i32
    %c0_i32_0 = arith.constant 0 : i32
    %c0_i32_1 = arith.constant 0 : i32
    return %c0_i32, %c0_i32_0 : i32, i32
  }
  func.func @transform_15(%arg0: i32) -> (i32, i32, i32) {
    %c0_i32 = arith.constant 0 : i32
    %c0_i32_0 = arith.constant 0 : i32
    %c0_i32_1 = arith.constant 0 : i32
    return %arg0, %c0_i32, %c0_i32_0 : i32, i32, i32
  }
}

</mosaic_0001>

<bundles_post_ra>
// kernel: cnn43_forward.2
= control target key start
LH: loop header
LB: loop body
LE: loop exit
PB: predicated region body
PF: predicated region fallthrough
CT: control target
= control target key end

     0   :  { %s6140_s12 = smov 0   ;;  %s6142_s13 = smov 0   ;;  %s9687_s0 = inlined_call_operand.vmem [shape: bf16[4,512,4], index: 0, kind: input, shape index: {}]   ;;  %s9688_s1 = inlined_call_operand.vmem [shape: bf16[4,32], index: 1, kind: input, shape index: {}]   ;;  %s9689_s2 = inlined_call_operand.vmem [shape: f32[1,32], index: 2, kind: input, shape index: {}]   ;;  %s9690_s3 = inlined_call_operand.vmem [shape: f32[512,32], index: 3, kind: output, shape index: {}]  }
   0x1   :  { %s6144_s14 = smov 0  }
   0x2 LB: > { %s4334_s15 = sadd.s32 4294967295, %s6114_s14   ;;  %s6157_s16 = sadd.s32 1, %s6114_s14   ;;  %s6114_s14 = sphi %s6144_s14, %s10905_s14   ;;  %s6110_s13 = sphi %s6142_s13, %s10904_s13   ;;  %s6106_s12 = sphi %s6140_s12, %s10903_s12  }
   0x3   : > { %s17_s17 = ssub.s32 %s6114_s14, %s6157_s16  ;;  %s20_s18 = sadd.s32 1, %s6110_s13 }
   0x4   : > { %p18_p0 = scmp.eq.s32.totalorder %s17_s17, 0  ;;  %p27_p1 = scmp.ne.s32.totalorder %s6110_s13, %s6106_s12 }
   0x5   : > { %p28_p2 = scmp.eq.s32.totalorder %s6114_s14, 0  ;;  %p4337_p4 = scmp.ge.s32.totalorder %s6114_s14, 2 }
   0x6   : > { %s6166_s19 = scalar_select %p18_p0, %s6110_s13, %s20_s18  }
   0x7   : > { %p29_p3 = por %p28_p2, %p27_p1  ;;  %127 = sbr.rel (%p4337_p4) target bundleno = 50 (0x32), region = 24 }
   0xe   : > { %130 = sbr.rel (!%p29_p3) target bundleno = 50 (0x32), region = 28  ;;  %s132_s20 = sand.u32 (%p29_p3), 1, %s6110_s13  }
   0xf   : > { %s4444_s21 = sshll.u32 (%p29_p3), %s6114_s14, 7  ;;  %s4338_s22 = sshll.u32 (%p29_p3), %s132_s20, 9 }
  0x10   : > { %s6174_s25 = scalar_lea.vmem (%p29_p3), %s9687_s0, %s4444_s21  ;;  %s6179_s26 = scalar_lea.vmem (%p29_p3), [#allocation2], %s4338_s22 }
  0x11   : > { %v153_v0 = vld [vmem:[%s6174_s25] sm:$0xff] (%p29_p3)   ;;  %v157_v1 = vld [vmem:[%s6174_s25 + $0x8] sm:$0xff] (%p29_p3)   ;;  %v161_v2 = vld [vmem:[%s6174_s25 + $0x10] sm:$0xff] (%p29_p3)  }
  0x12   : > { %154 = vst [vmem:[%s6179_s26] sm:$0xff] (%p29_p3), %v153_v0   ;;  %158 = vst [vmem:[%s6179_s26 + $0x8] sm:$0xff] (%p29_p3), %v157_v1   ;;  %v165_v3 = vld [vmem:[%s6174_s25 + $0x18] sm:$0xff] (%p29_p3)   ;;  %v169_v4 = vld [vmem:[%s6174_s25 + $0x20] sm:$0xff] (%p29_p3)  }
  0x13   : > { %162 = vst [vmem:[%s6179_s26 + $0x10] sm:$0xff] (%p29_p3), %v161_v2   ;;  %v173_v5 = vld [vmem:[%s6174_s25 + $0x28] sm:$0xff] (%p29_p3)   ;;  %166 = vst [vmem:[%s6179_s26 + $0x18] sm:$0xff] (%p29_p3), %v165_v3   ;;  %v177_v6 = vld [vmem:[%s6174_s25 + $0x30] sm:$0xff] (%p29_p3)  }
  0x14   : > { %170 = vst [vmem:[%s6179_s26 + $0x20] sm:$0xff] (%p29_p3), %v169_v4   ;;  %174 = vst [vmem:[%s6179_s26 + $0x28] sm:$0xff] (%p29_p3), %v173_v5   ;;  %v181_v7 = vld [vmem:[%s6174_s25 + $0x38] sm:$0xff] (%p29_p3)   ;;  %v185_v8 = vld [vmem:[%s6174_s25 + $0x40] sm:$0xff] (%p29_p3)  }
  0x15   : > { %178 = vst [vmem:[%s6179_s26 + $0x30] sm:$0xff] %v177_v6   ;;  %182 = vst [vmem:[%s6179_s26 + $0x38] sm:$0xff] %v181_v7   ;;  %v189_v9 = vld [vmem:[%s6174_s25 + $0x48] sm:$0xff]   ;;  %v193_v10 = vld [vmem:[%s6174_s25 + $0x50] sm:$0xff]  }
  0x16   : > { %186 = vst [vmem:[%s6179_s26 + $0x40] sm:$0xff] %v185_v8   ;;  %v197_v11 = vld [vmem:[%s6174_s25 + $0x58] sm:$0xff]   ;;  %190 = vst [vmem:[%s6179_s26 + $0x48] sm:$0xff] %v189_v9   ;;  %v201_v12 = vld [vmem:[%s6174_s25 + $0x60] sm:$0xff]  }
  0x17   : > { %194 = vst [vmem:[%s6179_s26 + $0x50] sm:$0xff] %v193_v10   ;;  %198 = vst [vmem:[%s6179_s26 + $0x58] sm:$0xff] %v197_v11   ;;  %v205_v13 = vld [vmem:[%s6174_s25 + $0x68] sm:$0xff]   ;;  %v209_v14 = vld [vmem:[%s6174_s25 + $0x70] sm:$0xff]  }
  0x18   : > { %202 = vst [vmem:[%s6179_s26 + $0x60] sm:$0xff] %v201_v12   ;;  %206 = vst [vmem:[%s6179_s26 + $0x68] sm:$0xff] %v205_v13   ;;  %v213_v15 = vld [vmem:[%s6174_s25 + $0x78] sm:$0xff]   ;;  %v217_v16 = vld [vmem:[%s6174_s25 + $0x100] sm:$0xff]  }
  0x19   : > { %210 = vst [vmem:[%s6179_s26 + $0x70] sm:$0xff] %v209_v14   ;;  %v221_v17 = vld [vmem:[%s6174_s25 + $0x108] sm:$0xff]   ;;  %214 = vst [vmem:[%s6179_s26 + $0x78] sm:$0xff] %v213_v15   ;;  %v225_v18 = vld [vmem:[%s6174_s25 + $0x110] sm:$0xff]  }
  0x1a   : > { %218 = vst [vmem:[%s6179_s26 + $0x80] sm:$0xff] %v217_v16   ;;  %222 = vst [vmem:[%s6179_s26 + $0x88] sm:$0xff] %v221_v17   ;;  %v229_v19 = vld [vmem:[%s6174_s25 + $0x118] sm:$0xff]   ;;  %v233_v20 = vld [vmem:[%s6174_s25 + $0x120] sm:$0xff]  }
  0x1b   : > { %226 = vst [vmem:[%s6179_s26 + $0x90] sm:$0xff] %v225_v18   ;;  %230 = vst [vmem:[%s6179_s26 + $0x98] sm:$0xff] %v229_v19   ;;  %v237_v21 = vld [vmem:[%s6174_s25 + $0x128] sm:$0xff]   ;;  %v241_v22 = vld [vmem:[%s6174_s25 + $0x130] sm:$0xff]  }
  0x1c   : > { %234 = vst [vmem:[%s6179_s26 + $0xa0] sm:$0xff] %v233_v20   ;;  %v245_v23 = vld [vmem:[%s6174_s25 + $0x138] sm:$0xff]   ;;  %238 = vst [vmem:[%s6179_s26 + $0xa8] sm:$0xff] %v237_v21   ;;  %v249_v24 = vld [vmem:[%s6174_s25 + $0x140] sm:$0xff]  }
  0x1d   : > { %242 = vst [vmem:[%s6179_s26 + $0xb0] sm:$0xff] %v241_v22   ;;  %246 = vst [vmem:[%s6179_s26 + $0xb8] sm:$0xff] %v245_v23   ;;  %v253_v25 = vld [vmem:[%s6174_s25 + $0x148] sm:$0xff]   ;;  %v257_v26 = vld [vmem:[%s6174_s25 + $0x150] sm:$0xff]  }
  0x1e   : > { %250 = vst [vmem:[%s6179_s26 + $0xc0] sm:$0xff] %v249_v24   ;;  %254 = vst [vmem:[%s6179_s26 + $0xc8] sm:$0xff] %v253_v25   ;;  %v261_v27 = vld [vmem:[%s6174_s25 + $0x158] sm:$0xff]   ;;  %v265_v28 = vld [vmem:[%s6174_s25 + $0x160] sm:$0xff]  }
  0x1f   : > { %258 = vst [vmem:[%s6179_s26 + $0xd0] sm:$0xff] %v257_v26   ;;  %v269_v29 = vld [vmem:[%s6174_s25 + $0x168] sm:$0xff]   ;;  %262 = vst [vmem:[%s6179_s26 + $0xd8] sm:$0xff] %v261_v27   ;;  %v273_v30 = vld [vmem:[%s6174_s25 + $0x170] sm:$0xff]  }
  0x20   : > { %266 = vst [vmem:[%s6179_s26 + $0xe0] sm:$0xff] %v265_v28   ;;  %270 = vst [vmem:[%s6179_s26 + $0xe8] sm:$0xff] %v269_v29   ;;  %v277_v31 = vld [vmem:[%s6174_s25 + $0x178] sm:$0xff]   ;;  %v281_v32 = vld [vmem:[%s6174_s25 + $0x200] sm:$0xff]  }
  0x21   : > { %274 = vst [vmem:[%s6179_s26 + $0xf0] sm:$0xff] %v273_v30   ;;  %278 = vst [vmem:[%s6179_s26 + $0xf8] sm:$0xff] %v277_v31   ;;  %v285_v33 = vld [vmem:[%s6174_s25 + $0x208] sm:$0xff]   ;;  %v289_v34 = vld [vmem:[%s6174_s25 + $0x210] sm:$0xff]  }
  0x22   : > { %282 = vst [vmem:[%s6179_s26 + $0x100] sm:$0xff] %v281_v32   ;;  %v293_v35 = vld [vmem:[%s6174_s25 + $0x218] sm:$0xff]   ;;  %286 = vst [vmem:[%s6179_s26 + $0x108] sm:$0xff] %v285_v33   ;;  %v297_v36 = vld [vmem:[%s6174_s25 + $0x220] sm:$0xff]  }
  0x23   : > { %290 = vst [vmem:[%s6179_s26 + $0x110] sm:$0xff] %v289_v34   ;;  %294 = vst [vmem:[%s6179_s26 + $0x118] sm:$0xff] %v293_v35   ;;  %v301_v37 = vld [vmem:[%s6174_s25 + $0x228] sm:$0xff]   ;;  %v305_v38 = vld [vmem:[%s6174_s25 + $0x230] sm:$0xff]  }
  0x24   : > { %298 = vst [vmem:[%s6179_s26 + $0x120] sm:$0xff] %v297_v36   ;;  %302 = vst [vmem:[%s6179_s26 + $0x128] sm:$0xff] %v301_v37   ;;  %v309_v39 = vld [vmem:[%s6174_s25 + $0x238] sm:$0xff]   ;;  %v313_v40 = vld [vmem:[%s6174_s25 + $0x240] sm:$0xff]  }
  0x25   : > { %306 = vst [vmem:[%s6179_s26 + $0x130] sm:$0xff] %v305_v38   ;;  %v317_v41 = vld [vmem:[%s6174_s25 + $0x248] sm:$0xff]   ;;  %310 = vst [vmem:[%s6179_s26 + $0x138] sm:$0xff] %v309_v39   ;;  %v321_v42 = vld [vmem:[%s6174_s25 + $0x250] sm:$0xff]  }
  0x26   : > { %314 = vst [vmem:[%s6179_s26 + $0x140] sm:$0xff] %v313_v40   ;;  %318 = vst [vmem:[%s6179_s26 + $0x148] sm:$0xff] %v317_v41   ;;  %v325_v43 = vld [vmem:[%s6174_s25 + $0x258] sm:$0xff]   ;;  %v329_v44 = vld [vmem:[%s6174_s25 + $0x260] sm:$0xff]  }
  0x27   : > { %322 = vst [vmem:[%s6179_s26 + $0x150] sm:$0xff] %v321_v42   ;;  %326 = vst [vmem:[%s6179_s26 + $0x158] sm:$0xff] %v325_v43   ;;  %v333_v45 = vld [vmem:[%s6174_s25 + $0x268] sm:$0xff]   ;;  %v337_v46 = vld [vmem:[%s6174_s25 + $0x270] sm:$0xff]  }
  0x28   : > { %330 = vst [vmem:[%s6179_s26 + $0x160] sm:$0xff] %v329_v44   ;;  %v341_v47 = vld [vmem:[%s6174_s25 + $0x278] sm:$0xff]   ;;  %334 = vst [vmem:[%s6179_s26 + $0x168] sm:$0xff] %v333_v45   ;;  %v345_v48 = vld [vmem:[%s6174_s25 + $0x300] sm:$0xff]  }
  0x29   : > { %338 = vst [vmem:[%s6179_s26 + $0x170] sm:$0xff] %v337_v46   ;;  %342 = vst [vmem:[%s6179_s26 + $0x178] sm:$0xff] %v341_v47   ;;  %v349_v49 = vld [vmem:[%s6174_s25 + $0x308] sm:$0xff]   ;;  %v353_v50 = vld [vmem:[%s6174_s25 + $0x310] sm:$0xff]  }
  0x2a   : > { %346 = vst [vmem:[%s6179_s26 + $0x180] sm:$0xff] %v345_v48   ;;  %350 = vst [vmem:[%s6179_s26 + $0x188] sm:$0xff] %v349_v49   ;;  %v357_v51 = vld [vmem:[%s6174_s25 + $0x318] sm:$0xff]   ;;  %v361_v52 = vld [vmem:[%s6174_s25 + $0x320] sm:$0xff]  }
  0x2b   : > { %354 = vst [vmem:[%s6179_s26 + $0x190] sm:$0xff] %v353_v50   ;;  %v365_v53 = vld [vmem:[%s6174_s25 + $0x328] sm:$0xff]   ;;  %358 = vst [vmem:[%s6179_s26 + $0x198] sm:$0xff] %v357_v51   ;;  %v369_v54 = vld [vmem:[%s6174_s25 + $0x330] sm:$0xff]  }
  0x2c   : > { %362 = vst [vmem:[%s6179_s26 + $0x1a0] sm:$0xff] %v361_v52   ;;  %366 = vst [vmem:[%s6179_s26 + $0x1a8] sm:$0xff] %v365_v53   ;;  %v373_v55 = vld [vmem:[%s6174_s25 + $0x338] sm:$0xff]   ;;  %v377_v56 = vld [vmem:[%s6174_s25 + $0x340] sm:$0xff]  }
  0x2d   : > { %370 = vst [vmem:[%s6179_s26 + $0x1b0] sm:$0xff] %v369_v54   ;;  %374 = vst [vmem:[%s6179_s26 + $0x1b8] sm:$0xff] %v373_v55   ;;  %v381_v57 = vld [vmem:[%s6174_s25 + $0x348] sm:$0xff]   ;;  %v385_v58 = vld [vmem:[%s6174_s25 + $0x350] sm:$0xff]  }
  0x2e   : > { %378 = vst [vmem:[%s6179_s26 + $0x1c0] sm:$0xff] %v377_v56   ;;  %v389_v59 = vld [vmem:[%s6174_s25 + $0x358] sm:$0xff]   ;;  %382 = vst [vmem:[%s6179_s26 + $0x1c8] sm:$0xff] %v381_v57   ;;  %v393_v60 = vld [vmem:[%s6174_s25 + $0x360] sm:$0xff]  }
  0x2f   : > { %386 = vst [vmem:[%s6179_s26 + $0x1d0] sm:$0xff] %v385_v58   ;;  %390 = vst [vmem:[%s6179_s26 + $0x1d8] sm:$0xff] %v389_v59   ;;  %v397_v61 = vld [vmem:[%s6174_s25 + $0x368] sm:$0xff]   ;;  %v401_v62 = vld [vmem:[%s6174_s25 + $0x370] sm:$0xff]  }
  0x30   : > { %394 = vst [vmem:[%s6179_s26 + $0x1e0] sm:$0xff] %v393_v60   ;;  %398 = vst [vmem:[%s6179_s26 + $0x1e8] sm:$0xff] %v397_v61   ;;  %v405_v63 = vld [vmem:[%s6174_s25 + $0x378] sm:$0xff]  }
  0x31   : > { %402 = vst [vmem:[%s6179_s26 + $0x1f0] sm:$0xff] %v401_v62   ;;  %406 = vst [vmem:[%s6179_s26 + $0x1f8] sm:$0xff] %v405_v63  }
  0x32 PF: > { %p4341_p5 = scmp.ge.s32.totalorder %s6114_s14, 1  ;;  %p686_p6 = scmp.lt.s32.totalorder %s6114_s14, 3 }
  0x34   : > { %p687_p7 = pnand %p4341_p5, %p686_p6 }
  0x36   : > { %690 = sbr.rel (%p687_p7) target bundleno = 771 (0x303), region = 69 }
  0x3d   : > { %s693_s27 = sand.u32 1, %s6106_s12   ;;  %v9691_v0 = vmov 0   ;;  %s9282_s5 = sshll.u32 %s4334_s15, 5  ;;  %vm4239_vm0 = vcmask 261120  }
  0x3e   : > { %4803 = vset.pattern.permute.xlu1 %v9691_v0  ;;  %4792 = vset.pattern.permute.xlu0 %v9691_v0  ;;  %s4342_s28 = sshll.u32 %s693_s27, 9  ;;  %p718_p8 = scmp.lt.s32.totalorder %s9282_s5, 63 }
  0x3f   : > { %s6311_s29 = scalar_lea.vmem [#allocation2], %s4342_s28 }
  0x40   : > { %v4702_v1 = vld [vmem:[%s6311_s29 + $0x10] sm:$0xff]   ;;  %v4446_v2 = vld [vmem:[%s6311_s29] sm:$0xff]   ;;  %v4703_v3 = vld [vmem:[%s6311_s29 + $0x18] sm:$0xff]   ;;  %s10907_s5 = smov (!%p718_p8, %s9282_s5), 63 }
  0x41   : > { %v4455_v4 = vunpack.c.l.bf16 %v4702_v1  ;;  %v4456_v5 = vunpack.c.h.bf16 %v4702_v1  ;;  %v4447_v6 = vunpack.c.l.bf16 %v4446_v2  ;;  %v4448_v7 = vunpack.c.h.bf16 %v4446_v2  ;;  %v4701_v8 = vld [vmem:[%s6311_s29 + $0x8] sm:$0xff]   ;;  %v4704_v14 = vld [vmem:[%s6311_s29 + $0x20] sm:$0xff]   ;;  %v4707_v23 = vld [vmem:[%s6311_s29 + $0x38] sm:$0xff]   ;;  %s4344_s8 = sshll.u32 %s10907_s5, 3 }
  0x42   : > { %v4705_v9 = vld [vmem:[%s6311_s29 + $0x28] sm:$0xff]   ;;  %v4459_v10 = vunpack.c.l.bf16 %v4703_v3  ;;  %v4460_v11 = vunpack.c.h.bf16 %v4703_v3  ;;  %v4451_v12 = vunpack.c.l.bf16 %v4701_v8  ;;  %v4452_v13 = vunpack.c.h.bf16 %v4701_v8  ;;  %v4706_v24 = vld [vmem:[%s6311_s29 + $0x30] sm:$0xff]   ;;  %v4708_v32 = vld [vmem:[%s6311_s29 + $0x40] sm:$0xff]   ;;  %s9365_s11 = scalar_lea.vmem %s9690_s3, %s4344_s8 }
  0x43   : > { %v6319_v15 = vpack.i.bf16 %v4456_v5, %v4455_v4  ;;  %v6321_v16 = vpack.i.bf16 %v4448_v7, %v4447_v6  ;;  %v4467_v17 = vunpack.c.l.bf16 %v4705_v9  ;;  %v4468_v18 = vunpack.c.h.bf16 %v4705_v9  ;;  %v4709_v31 = vld [vmem:[%s6311_s29 + $0x48] sm:$0xff]   ;;  %v4711_v39 = vld [vmem:[%s6311_s29 + $0x58] sm:$0xff]   ;;  %v4710_v40 = vld [vmem:[%s6311_s29 + $0x50] sm:$0xff]  }
  0x44   : > { %v6325_v19 = vpack.i.bf16 %v4460_v11, %v4459_v10  ;;  %v6327_v20 = vpack.i.bf16 %v4452_v13, %v4451_v12  ;;  %v4463_v21 = vunpack.c.l.bf16 %v4704_v14  ;;  %v4464_v22 = vunpack.c.h.bf16 %v4704_v14  ;;  %v4713_v47 = vld [vmem:[%s6311_s29 + $0x68] sm:$0xff]   ;;  %v4712_v48 = vld [vmem:[%s6311_s29 + $0x60] sm:$0xff]   ;;  %v4715_v55 = vld [vmem:[%s6311_s29 + $0x78] sm:$0xff]  }
  0x45   : > { %9961 = vst [vmem:[#allocation3_spill] sm:$0xff] %v6321_v16  ;;  %4805 = vperm.xlu1 %4803, %v6319_v15   ;;  %4794 = vperm.xlu0 %4792, %v6321_v16   ;;  %v6331_v25 = vpack.i.bf16 %v4468_v18, %v4467_v17  ;;  %v4475_v26 = vunpack.c.l.bf16 %v4707_v23  ;;  %v4476_v28 = vunpack.c.h.bf16 %v4707_v23  ;;  %v4471_v29 = vunpack.c.l.bf16 %v4706_v24  ;;  %v4714_v56 = vld [vmem:[%s6311_s29 + $0x70] sm:$0xff]   ;;  %v4717_v63 = vld [vmem:[%s6311_s29 + $0x88] sm:$0xff]   ;;  %v4720_v5 = vld [vmem:[%s6311_s29 + $0xa0] sm:$0xff]  }
  0x46   : > { %9962 = vst [vmem:[#allocation4_spill] sm:$0xff] %v6325_v19  ;;  %v6335_v27 = vpack.i.bf16 %v4464_v22, %v4463_v21  ;;  %v4472_v30 = vunpack.c.h.bf16 %v4706_v24  ;;  %v4483_v33 = vunpack.c.l.bf16 %v4709_v31  ;;  %v4484_v34 = vunpack.c.h.bf16 %v4709_v31  ;;  %v4722_v9 = vld [vmem:[%s6311_s29 + $0xb0] sm:$0xff]   ;;  %v4724_v14 = vld [vmem:[%s6311_s29 + $0xc0] sm:$0xff]  }
  0x47   : > { %9963 = vst [vmem:[#allocation5_spill] sm:$0xff] %v6331_v25  ;;  %v6341_v35 = vpack.i.bf16 %v4476_v28, %v4475_v26  ;;  %v4479_v37 = vunpack.c.l.bf16 %v4708_v32  ;;  %v4480_v38 = vunpack.c.h.bf16 %v4708_v32  ;;  %v4491_v42 = vunpack.c.l.bf16 %v4711_v39  ;;  %v4726_v22 = vld [vmem:[%s6311_s29 + $0xd0] sm:$0xff]   ;;  %v4728_v28 = vld [vmem:[%s6311_s29 + $0xe0] sm:$0xff]  }
  0x48   : > { %v6343_v36 = vpack.i.bf16 %v4472_v30, %v4471_v29  ;;  %v6347_v41 = vpack.i.bf16 %v4484_v34, %v4483_v33  ;;  %v4492_v44 = vunpack.c.h.bf16 %v4711_v39  ;;  %v4487_v45 = vunpack.c.l.bf16 %v4710_v40  ;;  %v4730_v32 = vld [vmem:[%s6311_s29 + $0xf0] sm:$0xff]  }
  0x49   : > { %4810 = vperm.xlu1 %4803, %v6325_v19   ;;  %4799 = vperm.xlu0 %4792, %v6327_v20   ;;  %9964 = vst [vmem:[#allocation6_spill] sm:$0xff] %v6341_v35  ;;  %v6351_v43 = vpack.i.bf16 %v4480_v38, %v4479_v37  ;;  %v4488_v46 = vunpack.c.h.bf16 %v4710_v40  ;;  %v4499_v49 = vunpack.c.l.bf16 %v4713_v47  ;;  %v4500_v50 = vunpack.c.h.bf16 %v4713_v47  ;;  %v4733_v38 = vld [vmem:[%s6311_s29 + $0x108] sm:$0xff]  }
  0x4a   : > { %9965 = vst [vmem:[#allocation7_spill] sm:$0xff] %v6347_v41  ;;  %v6357_v51 = vpack.i.bf16 %v4492_v44, %v4491_v42  ;;  %v4495_v53 = vunpack.c.l.bf16 %v4712_v48  ;;  %v4496_v54 = vunpack.c.h.bf16 %v4712_v48  ;;  %v4507_v58 = vunpack.c.l.bf16 %v4715_v55  ;;  %v4736_v44 = vld [vmem:[%s6311_s29 + $0x120] sm:$0xff]   ;;  %v4738_v48 = vld [vmem:[%s6311_s29 + $0x130] sm:$0xff]  }
  0x4b   : > { %v6359_v52 = vpack.i.bf16 %v4488_v46, %v4487_v45  ;;  %v6363_v57 = vpack.i.bf16 %v4500_v50, %v4499_v49  ;;  %v4508_v60 = vunpack.c.h.bf16 %v4715_v55  ;;  %v4503_v61 = vunpack.c.l.bf16 %v4714_v56 }
  0x4c   : > { %9966 = vst [vmem:[#allocation8_spill] sm:$0xff] %v6357_v51  ;;  %v6367_v59 = vpack.i.bf16 %v4496_v54, %v4495_v53  ;;  %v4504_v62 = vunpack.c.h.bf16 %v4714_v56  ;;  %v4515_v3 = vunpack.c.l.bf16 %v4717_v63  ;;  %v4516_v4 = vunpack.c.h.bf16 %v4717_v63  ;;  %v4740_v54 = vld [vmem:[%s6311_s29 + $0x140] sm:$0xff]  }
  0x4d   : > { %4820 = vperm.xlu1 %4803, %v6331_v25   ;;  %4815 = vperm.xlu0 %4792, %v6335_v27   ;;  %9967 = vst [vmem:[#allocation9_spill] sm:$0xff] %v6363_v57  ;;  %v6372_v1 = vpack.i.bf16 %v4508_v60, %v4507_v58  ;;  %v4527_v7 = vunpack.c.l.bf16 %v4720_v5  ;;  %v4528_v8 = vunpack.c.h.bf16 %v4720_v5  ;;  %v9697_v10 = vmov 1  }
  0x4e   : > { %v6374_v2 = vpack.i.bf16 %v4504_v62, %v4503_v61  ;;  %v6379_v6 = vpack.i.bf16 %v4516_v4, %v4515_v3  ;;  %v4535_v12 = vunpack.c.l.bf16 %v4722_v9  ;;  %v4536_v13 = vunpack.c.h.bf16 %v4722_v9  ;;  %v4742_v61 = vld [vmem:[%s6311_s29 + $0x150] sm:$0xff]   ;;  %v4744_v4 = vld [vmem:[%s6311_s29 + $0x160] sm:$0xff]  }
  0x4f   : > { %9968 = vst [vmem:[#allocation10_spill] sm:$0xff] %v6372_v1  ;;  %v6384_v11 = vpack.i.bf16 %v4528_v8, %v4527_v7  ;;  %v4543_v18 = vunpack.c.l.bf16 %v4724_v14  ;;  %v4544_v21 = vunpack.c.h.bf16 %v4724_v14  ;;  %v4551_v24 = vunpack.c.l.bf16 %v4726_v22  ;;  %v4746_v9 = vld [vmem:[%s6311_s29 + $0x170] sm:$0xff]  }
  0x50   : > { %v6389_v17 = vpack.i.bf16 %v4536_v13, %v4535_v12  ;;  %v4552_v26 = vunpack.c.h.bf16 %v4726_v22  ;;  %v4559_v30 = vunpack.c.l.bf16 %v4728_v28  ;;  %v4560_v31 = vunpack.c.h.bf16 %v4728_v28 }
  0x51   : > { %4830 = vperm.xlu1 %4803, %v6341_v35   ;;  %4825 = vperm.xlu0 %4792, %v6343_v36   ;;  %v6394_v23 = vpack.i.bf16 %v4544_v21, %v4543_v18  ;;  %v4567_v34 = vunpack.c.l.bf16 %v4730_v32  ;;  %v4568_v37 = vunpack.c.h.bf16 %v4730_v32  ;;  %v4579_v40 = vunpack.c.l.bf16 %v4733_v38  ;;  %v4749_v18 = vld [vmem:[%s6311_s29 + $0x188] sm:$0xff]   ;;  %v4754_v32 = vld [vmem:[%s6311_s29 + $0x1b0] sm:$0xff]  }
  0x52   : > { %v6399_v29 = vpack.i.bf16 %v4552_v26, %v4551_v24  ;;  %v6404_v33 = vpack.i.bf16 %v4560_v31, %v4559_v30  ;;  %v4580_v42 = vunpack.c.h.bf16 %v4733_v38  ;;  %v4591_v46 = vunpack.c.l.bf16 %v4736_v44  ;;  %v4752_v26 = vld [vmem:[%s6311_s29 + $0x1a0] sm:$0xff]  }
  0x53   : > { %v6409_v39 = vpack.i.bf16 %v4568_v37, %v4567_v34  ;;  %v4592_v47 = vunpack.c.h.bf16 %v4736_v44  ;;  %v4599_v50 = vunpack.c.l.bf16 %v4738_v48  ;;  %v4600_v53 = vunpack.c.h.bf16 %v4738_v48 }
  0x54   : > { %v6414_v45 = vpack.i.bf16 %v4580_v42, %v4579_v40  ;;  %v4607_v56 = vunpack.c.l.bf16 %v4740_v54  ;;  %v4608_v58 = vunpack.c.h.bf16 %v4740_v54  ;;  %v9695_v60 = vmov 2   ;;  %v4756_v40 = vld [vmem:[%s6311_s29 + $0x1c0] sm:$0xff]  }
  0x55   : > { %4840 = vperm.xlu1 %4803, %v6347_v41   ;;  %4835 = vperm.xlu0 %4792, %v6351_v43   ;;  %v6419_v49 = vpack.i.bf16 %v4592_v47, %v4591_v46  ;;  %v6424_v55 = vpack.i.bf16 %v4600_v53, %v4599_v50  ;;  %v4615_v63 = vunpack.c.l.bf16 %v4742_v61  ;;  %v4616_v3 = vunpack.c.h.bf16 %v4742_v61  ;;  %v4758_v47 = vld [vmem:[%s6311_s29 + $0x1d0] sm:$0xff]   ;;  %v4760_v54 = vld [vmem:[%s6311_s29 + $0x1e0] sm:$0xff]  }
  0x56   : > { %9969 = vst [vmem:[#allocation11_spill] sm:$0xff] %v6414_v45  ;;  %v6430_v62 = vpack.i.bf16 %v4608_v58, %v4607_v56  ;;  %v4623_v7 = vunpack.c.l.bf16 %v4744_v4  ;;  %v4624_v8 = vunpack.c.h.bf16 %v4744_v4  ;;  %v4631_v13 = vunpack.c.l.bf16 %v4746_v9 }
  0x57   : > { %9970 = vst [vmem:[#allocation12_spill] sm:$0xff] %v6419_v49  ;;  %9971 = vst [vmem:[#allocation13_spill] sm:$0xff] %v6424_v55  ;;  %v6435_v5 = vpack.i.bf16 %v4616_v3, %v4615_v63  ;;  %v4632_v14 = vunpack.c.h.bf16 %v4746_v9  ;;  %v4643_v22 = vunpack.c.l.bf16 %v4749_v18  ;;  %v4644_v24 = vunpack.c.h.bf16 %v4749_v18  ;;  %v4762_v63 = vld [vmem:[%s6311_s29 + $0x1f0] sm:$0xff]  }
  0x58   : > { %9972 = vst [vmem:[#allocation14_spill] sm:$0xff] %v6430_v62  ;;  %v6440_v12 = vpack.i.bf16 %v4624_v8, %v4623_v7  ;;  %v4655_v30 = vunpack.c.l.bf16 %v4752_v26  ;;  %v4656_v31 = vunpack.c.h.bf16 %v4752_v26  ;;  %v4663_v37 = vunpack.c.l.bf16 %v4754_v32 }
  0x59   : > { %4850 = vperm.xlu1 %4803, %v6357_v51   ;;  %4845 = vperm.xlu0 %4792, %v6359_v52   ;;  %9973 = vst [vmem:[#allocation15_spill] sm:$0xff] %v6435_v5  ;;  %v6445_v21 = vpack.i.bf16 %v4632_v14, %v4631_v13  ;;  %v6450_v28 = vpack.i.bf16 %v4644_v24, %v4643_v22  ;;  %v4664_v38 = vunpack.c.h.bf16 %v4754_v32  ;;  %v4671_v44 = vunpack.c.l.bf16 %v4756_v40  ;;  %v4718_v24 = vld [vmem:[%s6311_s29 + $0x90] sm:$0xff]  }
  0x5a   : > { %9974 = vst [vmem:[#allocation16_spill] sm:$0xff] %v6440_v12  ;;  %v6455_v34 = vpack.i.bf16 %v4656_v31, %v4655_v30  ;;  %v4672_v46 = vunpack.c.h.bf16 %v4756_v40  ;;  %v4679_v50 = vunpack.c.l.bf16 %v4758_v47  ;;  %v4680_v53 = vunpack.c.h.bf16 %v4758_v47 }
  0x5b   : > { %9975 = vst [vmem:[#allocation17_spill] sm:$0xff] %v6445_v21  ;;  %9976 = vst [vmem:[#allocation18_spill] sm:$0xff] %v6450_v28  ;;  %v6460_v42 = vpack.i.bf16 %v4664_v38, %v4663_v37  ;;  %v4687_v58 = vunpack.c.l.bf16 %v4760_v54  ;;  %v4688_v61 = vunpack.c.h.bf16 %v4760_v54  ;;  %v9693_v3 = vmov 3   ;;  %v4719_v38 = vld [vmem:[%s6311_s29 + $0x98] sm:$0xff]  }
  0x5c   : > { %9977 = vst [vmem:[#allocation19_spill] sm:$0xff] %v6455_v34  ;;  %v6465_v48 = vpack.i.bf16 %v4672_v46, %v4671_v44  ;;  %v6470_v56 = vpack.i.bf16 %v4680_v53, %v4679_v50  ;;  %v4695_v7 = vunpack.c.l.bf16 %v4762_v63  ;;  %v4696_v8 = vunpack.c.h.bf16 %v4762_v63  ;;  %v4721_v53 = vld [vmem:[%s6311_s29 + $0xa8] sm:$0xff]  }
  0x5d   : > { %4860 = vperm.xlu1 %4803, %v6363_v57   ;;  %4855 = vperm.xlu0 %4792, %v6367_v59   ;;  %9978 = vst [vmem:[#allocation20_spill] sm:$0xff] %v6460_v42  ;;  %v6476_v4 = vpack.i.bf16 %v4688_v61, %v4687_v58  ;;  %v4519_v32 = vunpack.c.l.bf16 %v4718_v24  ;;  %v4520_v37 = vunpack.c.h.bf16 %v4718_v24  ;;  %v4523_v47 = vunpack.c.l.bf16 %v4719_v38 }
  0x5e   : > { %9979 = vst [vmem:[#allocation21_spill] sm:$0xff] %v6465_v48  ;;  %9980 = vst [vmem:[#allocation22_spill] sm:$0xff] %v6470_v56  ;;  %v6480_v9 = vpack.i.bf16 %v4696_v8, %v4695_v7  ;;  %v4524_v50 = vunpack.c.h.bf16 %v4719_v38  ;;  %v4531_v63 = vunpack.c.l.bf16 %v4721_v53  ;;  %v4532_v7 = vunpack.c.h.bf16 %v4721_v53  ;;  %v4723_v8 = vld [vmem:[%s6311_s29 + $0xb8] sm:$0xff]  }
  0x5f   : > { %9981 = vst [vmem:[#allocation23_spill] sm:$0xff] %v6476_v4  ;;  %v6514_v46 = vpack.i.bf16 %v4520_v37, %v4519_v32  ;;  %v4539_v24 = vunpack.c.l.bf16 %v4723_v8  ;;  %v4540_v32 = vunpack.c.h.bf16 %v4723_v8  ;;  %v4725_v37 = vld [vmem:[%s6311_s29 + $0xc8] sm:$0xff]  }
  0x60   : > { %9982 = vst [vmem:[#allocation24_spill] sm:$0xff] %v6480_v9  ;;  %v6523_v61 = vpack.i.bf16 %v4524_v50, %v4523_v47  ;;  %v4547_v53 = vunpack.c.l.bf16 %v4725_v37 }
  0x61   : > { %4870 = vperm.xlu1 %4803, %v6372_v1   ;;  %4865 = vperm.xlu0 %4792, %v6374_v2   ;;  %v6541_v50 = vpack.i.bf16 %v4540_v32, %v4539_v24  ;;  %v4729_v24 = vld [vmem:[%s6311_s29 + $0xe8] sm:$0xff]  }
  0x62   : > { %9984 = vst [vmem:[#allocation26_spill] sm:$0xff] %v6523_v61 }
  0x63   : > { %9986 = vst [vmem:[#allocation28_spill] sm:$0xff] %v6541_v50 }
  0x65   : > { %4874 = vset.pattern.permute.xlu1 %v9697_v10  ;;  %5009 = vperm.xlu0 %4792, %v6379_v6  }
  0x66   : > { %4876 = vperm.xlu1 %4874, %v6327_v20  }
  0x69   : > { %5024 = vperm.xlu0 %4792, %v6384_v11  }
  0x6a   : > { %4881 = vperm.xlu1 %4874, %v6319_v15  }
  0x6d   : > { %5034 = vperm.xlu0 %4792, %v6389_v17  }
  0x6e   : > { %4886 = vperm.xlu1 %4874, %v6335_v27  }
  0x71   : > { %5044 = vperm.xlu0 %4792, %v6394_v23  }
  0x72   : > { %4891 = vperm.xlu1 %4874, %v6343_v36  }
  0x75   : > { %5054 = vperm.xlu0 %4792, %v6399_v29  }
  0x76   : > { %4896 = vperm.xlu1 %4874, %v6351_v43  }
  0x79   : > { %5064 = vperm.xlu0 %4792, %v6404_v33  }
  0x7a   : > { %4901 = vperm.xlu1 %4874, %v6359_v52  }
  0x7d   : > { %5074 = vperm.xlu0 %4792, %v6409_v39  }
  0x7e   : > { %4906 = vperm.xlu1 %4874, %v6367_v59  }
  0x81   : > { %5218 = vperm.xlu0 %4792, %v6414_v45  }
  0x82   : > { %4911 = vperm.xlu1 %4874, %v6374_v2  }
  0x85   : > { %5233 = vperm.xlu0 %4792, %v6419_v49  }
  0x86   : > { %4915 = vset.pattern.permute.xlu1 %v9695_v60 }
  0x87   : > { %4917 = vperm.xlu1 %4915, %v6321_v16  }
  0x89   : > { %5243 = vperm.xlu0 %4792, %v6424_v55  }
  0x8b   : > { %4922 = vperm.xlu1 %4915, %v6319_v15  }
  0x8d   : > { %5253 = vperm.xlu0 %4792, %v6430_v62  }
  0x8f   : > { %4927 = vperm.xlu1 %4915, %v6325_v19  }
  0x91   : > { %5263 = vperm.xlu0 %4792, %v6435_v5  }
  0x93   : > { %4932 = vperm.xlu1 %4915, %v6331_v25  }
  0x95   : > { %5273 = vperm.xlu0 %4792, %v6440_v12   ;;  %v4737_v12 = vld [vmem:[%s6311_s29 + $0x128] sm:$0xff]  }
  0x97   : > { %4937 = vperm.xlu1 %4915, %v6341_v35  }
  0x99   : > { %5283 = vperm.xlu0 %4792, %v6445_v21  }
  0x9b   : > { %4942 = vperm.xlu1 %4915, %v6347_v41  }
  0x9d   : > { %5427 = vperm.xlu0 %4792, %v6450_v28  }
  0x9f   : > { %4947 = vperm.xlu1 %4915, %v6357_v51  }
  0xa1   : > { %5442 = vperm.xlu0 %4792, %v6455_v34  }
  0xa3   : > { %4952 = vperm.xlu1 %4915, %v6363_v57  }
  0xa5   : > { %5452 = vperm.xlu0 %4792, %v6460_v42  }
  0xa7   : > { %4957 = vperm.xlu1 %4915, %v6372_v1  }
  0xa9   : > { %5462 = vperm.xlu0 %4792, %v6465_v48  }
  0xab   : > { %4961 = vset.pattern.permute.xlu1 %v9693_v3 }
  0xac   : > { %4963 = vperm.xlu1 %4961, %v6327_v20  }
  0xad   : > { %5472 = vperm.xlu0 %4792, %v6470_v56   ;;  %v949_v56 = vlaneseq }
  0xaf   : > { %v6603_v5 = vshrl.u32 %v949_v56, 7 }
  0xb0   : > { %4968 = vperm.xlu1 %4961, %v6319_v15   ;;  %v4716_v15 = vld [vmem:[%s6311_s29 + $0x80] sm:$0xff]  }
  0xb1   : > { %5482 = vperm.xlu0 %4792, %v6476_v4   ;;  %v4511_v18 = vunpack.c.l.bf16 %v4716_v15  ;;  %v4512_v22 = vunpack.c.h.bf16 %v4716_v15  ;;  %v4735_v4 = vld [vmem:[%s6311_s29 + $0x118] sm:$0xff]   ;;  %v951_v49 = vsub.s32 0, %v6603_v5  ;;  %v1115_v45 = vsub.s32 1, %v6603_v5 }
  0xb2   : > { %v4587_v28 = vunpack.c.l.bf16 %v4735_v4  ;;  %v4588_v21 = vunpack.c.h.bf16 %v4735_v4  ;;  %v4596_v4 = vunpack.c.h.bf16 %v4737_v12 }
  0xb3   : > { %v6504_v31 = vpack.i.bf16 %v4512_v22, %v4511_v18  ;;  %v6532_v22 = vpack.i.bf16 %v4532_v7, %v4531_v63  ;;  %v4727_v63 = vld [vmem:[%s6311_s29 + $0xd8] sm:$0xff]  }
  0xb4   : > { %4973 = vperm.xlu1 %4961, %v6335_v27   ;;  %v4555_v60 = vunpack.c.l.bf16 %v4727_v63  ;;  %v6614_v55 = vpack.i.bf16 %v4588_v21, %v4587_v28  ;;  %v4741_v28 = vld [vmem:[%s6311_s29 + $0x148] sm:$0xff]  }
  0xb5   : > { %5492 = vperm.xlu0 %4792, %v6480_v9   ;;  %9983 = vst [vmem:[#allocation25_spill] sm:$0xff] %v6504_v31  ;;  %9985 = vst [vmem:[#allocation27_spill] sm:$0xff] %v6532_v22  ;;  %v9995_v9 = vmov 1  }
  0xb6   : > { %10000 = vst [vmem:[#allocation41_spill] sm:$0xff] %v6614_v55 }
  0xb8   : > { %4978 = vperm.xlu1 %4961, %v6343_v36  }
  0xb9   : > { %5496 = vset.pattern.permute.xlu0 %v9697_v10  ;;  %v4556_v10 = vunpack.c.h.bf16 %v4727_v63 }
  0xba   : > { %5498 = vperm.xlu0 %5496, %v6321_v16  }
  0xbc   : > { %4983 = vperm.xlu1 %4961, %v6351_v43  }
  0xbe   : > { %5503 = vperm.xlu0 %5496, %v6325_v19  }
  0xc0   : > { %4988 = vperm.xlu1 %4961, %v6359_v52  }
  0xc2   : > { %5508 = vperm.xlu0 %5496, %v6331_v25  }
  0xc4   : > { %v6492_v13 = vpop.permute.xlu1 %4805  ;;  %4993 = vperm.xlu1 %4961, %v6367_v59   ;;  %v6495_v14 = vpop.permute.xlu0 %4794 }
  0xc6   : > { %5513 = vperm.xlu0 %5496, %v6341_v35  }
  0xc8   : > { %v6499_v26 = vpop.permute.xlu1 %4810  ;;  %4998 = vperm.xlu1 %4961, %v6374_v2   ;;  %v6502_v30 = vpop.permute.xlu0 %4799 }
  0xca   : > { %5518 = vperm.xlu0 %5496, %v6347_v41   ;;  %v4731_v41 = vld [vmem:[%s6311_s29 + $0xf8] sm:$0xff]  }
  0xcb   : > { %v4571_v35 = vunpack.c.l.bf16 %v4731_v41  ;;  %v4572_v25 = vunpack.c.h.bf16 %v4731_v41  ;;  %v4732_v41 = vld [vmem:[%s6311_s29 + $0x100] sm:$0xff]  }
  0xcc   : > { %v6508_v40 = vpop.permute.xlu1 %4820  ;;  %5002 = vset.pattern.permute.xlu1 %v9691_v0  ;;  %v6511_v44 = vpop.permute.xlu0 %4815  ;;  %v4548_v0 = vunpack.c.h.bf16 %v4725_v37 }
  0xcd   : > { %5004 = vperm.xlu1 %5002, %v6504_v31  }
  0xce   : > { %5523 = vperm.xlu0 %5496, %v6357_v51   ;;  %v6550_v3 = vpack.i.bf16 %v4548_v0, %v4547_v53  ;;  %v4564_v51 = vunpack.c.h.bf16 %v4729_v24 }
  0xd0   : > { %v6518_v54 = vpop.permute.xlu1 %4830  ;;  %v6520_v58 = vpop.permute.xlu0 %4825  ;;  %9987 = vst [vmem:[#allocation29_spill] sm:$0xff] %v6550_v3 }
  0xd1   : > { %5014 = vperm.xlu1 %5002, %v6514_v46  }
  0xd2   : > { %5528 = vperm.xlu0 %5496, %v6363_v57   ;;  %v4563_v57 = vunpack.c.l.bf16 %v4729_v24  ;;  %v6576_v24 = vpack.i.bf16 %v4572_v25, %v4571_v35  ;;  %v4575_v25 = vunpack.c.l.bf16 %v4732_v41  ;;  %v4576_v35 = vunpack.c.h.bf16 %v4732_v41  ;;  %v723_v41 = vld [vmem:[%s9688_s1] sm:$0x3] }
  0xd3   : > { %v6617_v56 = vunpack.c.l.bf16 %v723_v41 }
  0xd4   : > { %v6527_v15 = vpop.permute.xlu1 %4840  ;;  %v6529_v18 = vpop.permute.xlu0 %4835  ;;  %v6568_v63 = vpack.i.bf16 %v4564_v51, %v4563_v57  ;;  %9990 = vst [vmem:[#allocation32_spill] sm:$0xff] %v6576_v24  ;;  %v6600_v34 = vpack.i.bf16 %v4576_v35, %v4575_v25  ;;  %v4595_v25 = vunpack.c.l.bf16 %v4737_v12  ;;  %v4739_v35 = vld [vmem:[%s6311_s29 + $0x138] sm:$0xff]  }
  0xd5   : > { %5019 = vperm.xlu1 %5002, %v6523_v61   ;;  %v6633_v41 = vrot.slane %v6617_v56, %v951_v49 }
  0xd6   : > { %5533 = vperm.xlu0 %5496, %v6372_v1   ;;  %v6559_v1 = vpack.i.bf16 %v4556_v10, %v4555_v60  ;;  %9989 = vst [vmem:[#allocation31_spill] sm:$0xff] %v6568_v63  ;;  %v6629_v12 = vpack.i.bf16 %v4596_v4, %v4595_v25 }
  0xd7   : > { %10004 = vst [vmem:[#allocation45_spill] sm:$0xff] %v6633_v41 }
  0xd8   : > { %v6536_v38 = vpop.permute.xlu1 %4850  ;;  %v6538_v47 = vpop.permute.xlu0 %4845  ;;  %9988 = vst [vmem:[#allocation30_spill] sm:$0xff] %v6559_v1  ;;  %10003 = vst [vmem:[#allocation44_spill] sm:$0xff] %v6629_v12 }
  0xd9   : > { %5029 = vperm.xlu1 %5002, %v6532_v22  }
  0xda   : > { %5538 = vperm.xlu0 %5496, %v6504_v31  }
  0xdc   : > { %v6545_v7 = vpop.permute.xlu1 %4860  ;;  %v6547_v8 = vpop.permute.xlu0 %4855 }
  0xdd   : > { %5039 = vperm.xlu1 %5002, %v6541_v50  }
  0xde   : > { %5543 = vperm.xlu0 %5496, %v6523_v61  }
  0xe0   : > { %v6554_v32 = vpop.permute.xlu1 %4870  ;;  %v6556_v37 = vpop.permute.xlu0 %4865 }
  0xe1   : > { %5049 = vperm.xlu1 %5002, %v6550_v3   ;;  %v4867_v21 = vunpack.i.l.bf16 %v6556_v37 }
  0xe2   : > { %5548 = vperm.xlu0 %5496, %v6532_v22  }
  0xe4   : > { %v6563_v0 = vpop.permute.xlu0 %5009 }
  0xe5   : > { %v6565_v53 = vpop.permute.xlu1 %4876  ;;  %5059 = vperm.xlu1 %5002, %v6559_v1  }
  0xe6   : > { %5553 = vperm.xlu0 %5496, %v6541_v50  }
  0xe8   : > { %v6571_v10 = vpop.permute.xlu0 %5024 }
  0xe9   : > { %v6573_v60 = vpop.permute.xlu1 %4881  ;;  %5069 = vperm.xlu1 %5002, %v6568_v63  }
  0xea   : > { %5558 = vperm.xlu0 %5496, %v6550_v3  }
  0xec   : > { %v6579_v19 = vpop.permute.xlu0 %5034 }
  0xed   : > { %9991 = vst [vmem:[#allocation33_spill] sm:$0xff] %v6579_v19  ;;  %v6581_v16 = vpop.permute.xlu1 %4886  ;;  %5079 = vperm.xlu1 %5002, %v6576_v24   ;;  %v4612_v19 = vunpack.c.h.bf16 %v4741_v28 }
  0xee   : > { %9992 = vst [vmem:[#allocation34_spill] sm:$0xff] %v6581_v16  ;;  %5563 = vperm.xlu0 %5496, %v6559_v1  }
  0xf0   : > { %v6586_v51 = vpop.permute.xlu0 %5044 }
  0xf1   : > { %9993 = vst [vmem:[#allocation35_spill] sm:$0xff] %v6586_v51  ;;  %v6588_v57 = vpop.permute.xlu1 %4891  ;;  %5083 = vset.pattern.permute.xlu1 %v9995_v9  ;;  %v4868_v51 = vunpack.i.h.bf16 %v6556_v37  ;;  %v4611_v37 = vunpack.c.l.bf16 %v4741_v28 }
  0xf2   : > { %9994 = vst [vmem:[#allocation36_spill] sm:$0xff] %v6588_v57  ;;  %5085 = vperm.xlu1 %5083, %v6379_v6   ;;  %5568 = vperm.xlu0 %5496, %v6568_v63  }
  0xf3   : > { %v982_v16 = vmul.f32 %v4868_v51, %v6633_v41 }
  0xf4   : > { %v6594_v48 = vpop.permute.xlu0 %5054 }
  0xf5   : > { %9996 = vst [vmem:[#allocation37_spill] sm:$0xff] %v6594_v48  ;;  %v6596_v42 = vpop.permute.xlu1 %4896 }
  0xf6   : > { %9997 = vst [vmem:[#allocation38_spill] sm:$0xff] %v6596_v42  ;;  %5090 = vperm.xlu1 %5083, %v6514_v46   ;;  %5573 = vperm.xlu0 %5496, %v6576_v24   ;;  %v4604_v42 = vunpack.c.h.bf16 %v4739_v35 }
  0xf8   : > { %v6605_v62 = vpop.permute.xlu0 %5064 }
  0xf9   : > { %9998 = vst [vmem:[#allocation39_spill] sm:$0xff] %v6605_v62  ;;  %v6610_v9 = vpop.permute.xlu1 %4901 }
  0xfa   : > { %9999 = vst [vmem:[#allocation40_spill] sm:$0xff] %v6610_v9  ;;  %5095 = vperm.xlu1 %5083, %v6384_v11   ;;  %5578 = vperm.xlu0 %5496, %v6600_v34   ;;  %v4603_v9 = vunpack.c.l.bf16 %v4739_v35 }
  0xfc   : > { %v6621_v62 = vpop.permute.xlu0 %5074  ;;  %v6640_v57 = vpack.i.bf16 %v4604_v42, %v4603_v9  ;;  %v6651_v9 = vpack.i.bf16 %v4612_v19, %v4611_v37  ;;  %v4747_v37 = vld [vmem:[%s6311_s29 + $0x178] sm:$0xff]  }
  0xfd   : > { %10001 = vst [vmem:[#allocation42_spill] sm:$0xff] %v6621_v62  ;;  %v6623_v48 = vpop.permute.xlu1 %4906  ;;  %v6636_v62 = vrot.slane %v6617_v56, %v1115_v45  ;;  %v4743_v45 = vld [vmem:[%s6311_s29 + $0x158] sm:$0xff]  }
  0xfe   : > { %10002 = vst [vmem:[#allocation43_spill] sm:$0xff] %v6623_v48  ;;  %5100 = vperm.xlu1 %5083, %v6389_v17   ;;  %5583 = vperm.xlu0 %5496, %v6614_v55   ;;  %10006 = vst [vmem:[#allocation47_spill] sm:$0xff] %v6640_v57  ;;  %v981_v55 = vmul.f32 %v4867_v21, %v6633_v41 }
  0xff   : > { %10008 = vst [vmem:[#allocation49_spill] sm:$0xff] %v6651_v9 }
 0x100   : > { %v6638_v48 = vpop.permute.xlu0 %5218 }
 0x101   : > { %10005 = vst [vmem:[#allocation46_spill] sm:$0xff] %v6638_v48  ;;  %v4912_v35 = vpop.permute.xlu1 %4911 }
 0x102   : > { %v4914_v25 = vunpack.i.h.bf16 %v4912_v35  ;;  %v4913_v4 = vunpack.i.l.bf16 %v4912_v35  ;;  %5105 = vperm.xlu1 %5083, %v6394_v23   ;;  %5588 = vperm.xlu0 %5496, %v6629_v12   ;;  %v4619_v35 = vunpack.c.l.bf16 %v4743_v45  ;;  %v4620_v12 = vunpack.c.h.bf16 %v4743_v45 }
 0x104   : > { %v1146_v49 = vmul.f32 %v4914_v25, %v6636_v62  ;;  %v1145_v48 = vmul.f32 %v4913_v4, %v6636_v62  ;;  %v6649_v42 = vpop.permute.xlu0 %5233  ;;  %v4745_v25 = vld [vmem:[%s6311_s29 + $0x168] sm:$0xff]  }
 0x105   : > { %10007 = vst [vmem:[#allocation48_spill] sm:$0xff] %v6649_v42 }
 0x106   : > { %v6653_v51 = vadd.f32 %v1145_v48, %v981_v55  ;;  %v6655_v21 = vadd.f32 %v1146_v49, %v982_v16  ;;  %5110 = vperm.xlu1 %5083, %v6399_v29   ;;  %v6658_v28 = vpop.permute.xlu1 %4917  ;;  %5593 = vperm.xlu0 %5496, %v6640_v57   ;;  %v6668_v16 = vpack.i.bf16 %v4620_v12, %v4619_v35  ;;  %v4627_v55 = vunpack.c.l.bf16 %v4745_v25 }
 0x107   : > { %10011 = vst [vmem:[#allocation52_spill] sm:$0xff] %v6658_v28  ;;  %v4628_v48 = vunpack.c.h.bf16 %v4745_v25  ;;  %v10019_v12 = vmov 2  }
 0x108   : > { %10009 = vst [vmem:[#allocation50_spill] sm:$0xff] %v6653_v51  ;;  %10010 = vst [vmem:[#allocation51_spill] sm:$0xff] %v6655_v21  ;;  %v6662_v4 = vpop.permute.xlu0 %5243  ;;  %v4635_v51 = vunpack.c.l.bf16 %v4747_v37 }
 0x109   : > { %10012 = vst [vmem:[#allocation53_spill] sm:$0xff] %v6662_v4  ;;  %10014 = vst [vmem:[#allocation55_spill] sm:$0xff] %v6668_v16  ;;  %v6677_v21 = vpack.i.bf16 %v4628_v48, %v4627_v55  ;;  %v4636_v4 = vunpack.c.h.bf16 %v4747_v37  ;;  %v4751_v55 = vld [vmem:[%s6311_s29 + $0x198] sm:$0xff]  }
 0x10a   : > { %5115 = vperm.xlu1 %5083, %v6404_v33   ;;  %v6665_v19 = vpop.permute.xlu1 %4922  ;;  %5598 = vperm.xlu0 %5496, %v6651_v9   ;;  %v4651_v42 = vunpack.c.l.bf16 %v4751_v55 }
 0x10b   : > { %10013 = vst [vmem:[#allocation54_spill] sm:$0xff] %v6665_v19  ;;  %10017 = vst [vmem:[#allocation58_spill] sm:$0xff] %v6677_v21  ;;  %v4748_v19 = vld [vmem:[%s6311_s29 + $0x180] sm:$0xff]   ;;  %v6686_v25 = vpack.i.bf16 %v4636_v4, %v4635_v51  ;;  %v4753_v51 = vld [vmem:[%s6311_s29 + $0x1a8] sm:$0xff]  }
 0x10c   : > { %v6671_v49 = vpop.permute.xlu0 %5253 }
 0x10d   : > { %10015 = vst [vmem:[#allocation56_spill] sm:$0xff] %v6671_v49  ;;  %10021 = vst [vmem:[#allocation61_spill] sm:$0xff] %v6686_v25  ;;  %v4639_v49 = vunpack.c.l.bf16 %v4748_v19 }
 0x10e   : > { %5120 = vperm.xlu1 %5083, %v6409_v39   ;;  %v6674_v45 = vpop.permute.xlu1 %4927  ;;  %5603 = vperm.xlu0 %5496, %v6668_v16  }
 0x10f   : > { %10016 = vst [vmem:[#allocation57_spill] sm:$0xff] %v6674_v45  ;;  %v4640_v45 = vunpack.c.h.bf16 %v4748_v19 }
 0x110   : > { %v6680_v28 = vpop.permute.xlu0 %5263 }
 0x111   : > { %10018 = vst [vmem:[#allocation59_spill] sm:$0xff] %v6680_v28  ;;  %v6695_v28 = vpack.i.bf16 %v4640_v45, %v4639_v49  ;;  %v4755_v49 = vld [vmem:[%s6311_s29 + $0x1b8] sm:$0xff]  }
 0x112   : > { %5124 = vset.pattern.permute.xlu1 %v10019_v12  ;;  %v6683_v35 = vpop.permute.xlu1 %4932  ;;  %5608 = vperm.xlu0 %5496, %v6677_v21  }
 0x113   : > { %10020 = vst [vmem:[#allocation60_spill] sm:$0xff] %v6683_v35  ;;  %5126 = vperm.xlu1 %5124, %v6504_v31   ;;  %10024 = vst [vmem:[#allocation64_spill] sm:$0xff] %v6695_v28  ;;  %v4652_v35 = vunpack.c.h.bf16 %v4751_v55 }
 0x114   : > { %v6690_v48 = vpop.permute.xlu0 %5273 }
 0x115   : > { %10022 = vst [vmem:[#allocation62_spill] sm:$0xff] %v6690_v48  ;;  %v6704_v31 = vpack.i.bf16 %v4652_v35, %v4651_v42  ;;  %v4659_v48 = vunpack.c.l.bf16 %v4753_v51  ;;  %v4757_v42 = vld [vmem:[%s6311_s29 + $0x1c8] sm:$0xff]  }
 0x116   : > { %v6692_v37 = vpop.permute.xlu1 %4937  ;;  %5613 = vperm.xlu0 %5496, %v6686_v25  }
 0x117   : > { %10023 = vst [vmem:[#allocation63_spill] sm:$0xff] %v6692_v37  ;;  %5131 = vperm.xlu1 %5124, %v6514_v46   ;;  %10027 = vst [vmem:[#allocation67_spill] sm:$0xff] %v6704_v31  ;;  %v4660_v37 = vunpack.c.h.bf16 %v4753_v51 }
 0x118   : > { %v6699_v4 = vpop.permute.xlu0 %5283 }
 0x119   : > { %10025 = vst [vmem:[#allocation65_spill] sm:$0xff] %v6699_v4  ;;  %v6713_v25 = vpack.i.bf16 %v4660_v37, %v4659_v48  ;;  %v4667_v4 = vunpack.c.l.bf16 %v4755_v49  ;;  %v4759_v48 = vld [vmem:[%s6311_s29 + $0x1d8] sm:$0xff]  }
 0x11a   : > { %v6701_v19 = vpop.permute.xlu1 %4942  ;;  %5623 = vperm.xlu0 %5496, %v6695_v28  }
 0x11b   : > { %10026 = vst [vmem:[#allocation66_spill] sm:$0xff] %v6701_v19  ;;  %5136 = vperm.xlu1 %5124, %v6523_v61   ;;  %10029 = vst [vmem:[#allocation69_spill] sm:$0xff] %v6713_v25  ;;  %v4668_v19 = vunpack.c.h.bf16 %v4755_v49  ;;  %v4675_v61 = vunpack.c.l.bf16 %v4757_v42 }
 0x11c   : > { %v6708_v45 = vpop.permute.xlu0 %5427 }
 0x11d   : > { %v6722_v28 = vpack.i.bf16 %v4668_v19, %v4667_v4  ;;  %v4761_v4 = vld [vmem:[%s6311_s29 + $0x1e8] sm:$0xff]  }
 0x11e   : > { %v6710_v55 = vpop.permute.xlu1 %4947  ;;  %5639 = vperm.xlu0 %5496, %v6704_v31  }
 0x11f   : > { %10028 = vst [vmem:[#allocation68_spill] sm:$0xff] %v6710_v55  ;;  %5141 = vperm.xlu1 %5124, %v6532_v22   ;;  %10031 = vst [vmem:[#allocation71_spill] sm:$0xff] %v6722_v28  ;;  %v4676_v55 = vunpack.c.h.bf16 %v4757_v42  ;;  %v4683_v22 = vunpack.c.l.bf16 %v4759_v48 }
 0x120   : > { %v6717_v35 = vpop.permute.xlu0 %5442 }
 0x121   : > { %v6731_v31 = vpack.i.bf16 %v4676_v55, %v4675_v61 }
 0x122   : > { %v6719_v51 = vpop.permute.xlu1 %4952  ;;  %5649 = vperm.xlu0 %5496, %v6713_v25   ;;  %v4691_v25 = vunpack.c.l.bf16 %v4761_v4 }
 0x123   : > { %10030 = vst [vmem:[#allocation70_spill] sm:$0xff] %v6719_v51  ;;  %5146 = vperm.xlu1 %5124, %v6541_v50   ;;  %10033 = vst [vmem:[#allocation73_spill] sm:$0xff] %v6731_v31  ;;  %v4684_v51 = vunpack.c.h.bf16 %v4759_v48  ;;  %v4692_v50 = vunpack.c.h.bf16 %v4761_v4 }
 0x124   : > { %v6726_v37 = vpop.permute.xlu0 %5452 }
 0x125   : > { %v6738_v42 = vpack.i.bf16 %v4684_v51, %v4683_v22  ;;  %v6747_v55 = vpack.i.bf16 %v4692_v50, %v4691_v25  ;;  %v10037_v50 = vmov 3  }
 0x126   : > { %v6728_v49 = vpop.permute.xlu1 %4957  ;;  %5659 = vperm.xlu0 %5496, %v6722_v28   ;;  %v4763_v28 = vld [vmem:[%s6311_s29 + $0x1f8] sm:$0xff]  }
 0x127   : > { %10032 = vst [vmem:[#allocation72_spill] sm:$0xff] %v6728_v49  ;;  %5151 = vperm.xlu1 %5124, %v6550_v3   ;;  %10034 = vst [vmem:[#allocation74_spill] sm:$0xff] %v6738_v42  ;;  %v4699_v48 = vunpack.c.l.bf16 %v4763_v28  ;;  %v4700_v3 = vunpack.c.h.bf16 %v4763_v28 }
 0x128   : > { %v6735_v19 = vpop.permute.xlu0 %5462  ;;  %10035 = vst [vmem:[#allocation75_spill] sm:$0xff] %v6747_v55 }
 0x129   : > { %v6755_v51 = vpack.i.bf16 %v4700_v3, %v4699_v48 }
 0x12a   : > { %5669 = vperm.xlu0 %5496, %v6731_v31  }
 0x12b   : > { %5156 = vperm.xlu1 %5124, %v6559_v1   ;;  %v6741_v49 = vpop.permute.xlu1 %4963  ;;  %10036 = vst [vmem:[#allocation76_spill] sm:$0xff] %v6755_v51 }
 0x12c   : > { %v6744_v61 = vpop.permute.xlu0 %5472 }
 0x12e   : > { %5679 = vperm.xlu0 %5496, %v6738_v42  }
 0x12f   : > { %5161 = vperm.xlu1 %5124, %v6568_v63   ;;  %v6750_v31 = vpop.permute.xlu1 %4968  ;;  %v1507_v63 = vsub.s32 3, %v6603_v5 }
 0x130   : > { %v6752_v22 = vpop.permute.xlu0 %5482 }
 0x132   : > { %5689 = vperm.xlu0 %5496, %v6747_v55  }
 0x133   : > { %5166 = vperm.xlu1 %5124, %v6576_v24   ;;  %v6758_v4 = vpop.permute.xlu1 %4973 }
 0x134   : > { %v6760_v1 = vpop.permute.xlu0 %5492 }
 0x136   : > { %5699 = vperm.xlu0 %5496, %v6755_v51  }
 0x137   : > { %5170 = vset.pattern.permute.xlu1 %v10037_v50  ;;  %v6764_v28 = vpop.permute.xlu1 %4978  ;;  %v4808_v50 = vunpack.i.h.bf16 %v6492_v13 }
 0x138   : > { %5172 = vperm.xlu1 %5170, %v6379_v6  }
 0x139   : > { %v6767_v25 = vpop.permute.xlu0 %5498 }
 0x13a   : > { %5703 = vset.pattern.permute.xlu0 %v10019_v12 }
 0x13b   : > { %v6770_v3 = vpop.permute.xlu1 %4983  ;;  %5705 = vperm.xlu0 %5703, %v6327_v20  }
 0x13c   : > { %5177 = vperm.xlu1 %5170, %v6514_v46  }
 0x13d   : > { %v6774_v48 = vpop.permute.xlu0 %5503 }
 0x13f   : > { %v6776_v55 = vpop.permute.xlu1 %4988  ;;  %5710 = vperm.xlu0 %5703, %v6335_v27   ;;  %v1311_v27 = vsub.s32 2, %v6603_v5  ;;  %v4802_v5 = vunpack.i.h.bf16 %v6502_v30 }
 0x140   : > { %10038 = vst [vmem:[#allocation77_spill] sm:$0xff] %v6776_v55  ;;  %5182 = vperm.xlu1 %5170, %v6384_v11  }
 0x141   : > { %v6780_v51 = vpop.permute.xlu0 %5508 }
 0x142   : > { %10039 = vst [vmem:[#allocation78_spill] sm:$0xff] %v6780_v51  ;;  %v6845_v51 = vmul.f32 %v4802_v5, %v6633_v41 }
 0x143   : > { %v6782_v42 = vpop.permute.xlu1 %4993  ;;  %5715 = vperm.xlu0 %5703, %v6343_v36  }
 0x144   : > { %10040 = vst [vmem:[#allocation79_spill] sm:$0xff] %v6782_v42  ;;  %5187 = vperm.xlu1 %5170, %v6389_v17   ;;  %v4796_v42 = vunpack.i.l.bf16 %v6495_v14 }
 0x145   : > { %v6786_v24 = vpop.permute.xlu0 %5513 }
 0x146   : > { %10041 = vst [vmem:[#allocation80_spill] sm:$0xff] %v6786_v24  ;;  %v4801_v24 = vunpack.i.l.bf16 %v6502_v30  ;;  %v6831_v55 = vmul.f32 %v4796_v42, %v6633_v41  ;;  %v4817_v42 = vunpack.i.l.bf16 %v6511_v44 }
 0x147   : > { %v6788_v20 = vpop.permute.xlu1 %4998  ;;  %5720 = vperm.xlu0 %5703, %v6351_v43   ;;  %v4797_v43 = vunpack.i.h.bf16 %v6495_v14  ;;  %v6816_v14 = vrot.slane %v6617_v56, %v1507_v63 }
 0x148   : > { %10042 = vst [vmem:[#allocation81_spill] sm:$0xff] %v6788_v20  ;;  %5192 = vperm.xlu1 %5170, %v6394_v23   ;;  %v4807_v20 = vunpack.i.l.bf16 %v6492_v13  ;;  %v6813_v13 = vrot.slane %v6617_v56, %v1311_v27 }
 0x149   : > { %v6792_v46 = vpop.permute.xlu0 %5518  ;;  %10047 = vst [vmem:[#allocation86_spill] sm:$0xff] %v6816_v14 }
 0x14a   : > { %10043 = vst [vmem:[#allocation82_spill] sm:$0xff] %v6792_v46  ;;  %v4812_v46 = vunpack.i.l.bf16 %v6499_v26  ;;  %10046 = vst [vmem:[#allocation85_spill] sm:$0xff] %v6813_v13  ;;  %v6825_v30 = vmul.f32 %v4807_v20, %v6633_v41  ;;  %v4734_v20 = vld [vmem:[%s6311_s29 + $0x110] sm:$0xff]  }
 0x14b   : > { %5725 = vperm.xlu0 %5703, %v6359_v52   ;;  %v4813_v52 = vunpack.i.h.bf16 %v6499_v26  ;;  %v6822_v26 = vmul.f32 %v4808_v50, %v6633_v41  ;;  %v4822_v50 = vunpack.i.l.bf16 %v6508_v40 }
 0x14c   : > { %5197 = vperm.xlu1 %5170, %v6399_v29   ;;  %v6798_v36 = vpop.permute.xlu1 %5004  ;;  %v6839_v56 = vmul.f32 %v4812_v46, %v6633_v41  ;;  %v4833_v46 = vunpack.i.h.bf16 %v6518_v54 }
 0x14d   : > { %10044 = vst [vmem:[#allocation83_spill] sm:$0xff] %v6798_v36  ;;  %v6804_v12 = vpop.permute.xlu0 %5523  ;;  %v4823_v36 = vunpack.i.h.bf16 %v6508_v40  ;;  %v6836_v63 = vmul.f32 %v4813_v52, %v6633_v41  ;;  %v4832_v40 = vunpack.i.l.bf16 %v6518_v54  ;;  %v4843_v54 = vunpack.i.h.bf16 %v6527_v15 }
 0x14e   : > { %10045 = vst [vmem:[#allocation84_spill] sm:$0xff] %v6804_v12  ;;  %10052 = vst [vmem:[#allocation91_spill] sm:$0xff] %v6839_v56 }
 0x14f   : > { %5730 = vperm.xlu0 %5703, %v6367_v59   ;;  %v6828_v59 = vmul.f32 %v4797_v43, %v6633_v41  ;;  %10051 = vst [vmem:[#allocation90_spill] sm:$0xff] %v6836_v63  ;;  %v6848_v43 = vmul.f32 %v4801_v24, %v6633_v41  ;;  %v6853_v52 = vmul.f32 %v4823_v36, %v6633_v41  ;;  %v4827_v24 = vunpack.i.l.bf16 %v6520_v58 }
 0x150   : > { %5202 = vperm.xlu1 %5170, %v6404_v33   ;;  %v6819_v12 = vpop.permute.xlu1 %5014  ;;  %v4584_v63 = vunpack.c.h.bf16 %v4734_v20 }
 0x151   : > { %10048 = vst [vmem:[#allocation87_spill] sm:$0xff] %v6819_v12  ;;  %10049 = vst [vmem:[#allocation88_spill] sm:$0xff] %v6828_v59  ;;  %v6833_v27 = vpop.permute.xlu0 %5528  ;;  %v4818_v12 = vunpack.i.h.bf16 %v6511_v44  ;;  %v4583_v44 = vunpack.c.l.bf16 %v4734_v20  ;;  %v6873_v59 = vmul.f32 %v4817_v42, %v6633_v41  ;;  %v6879_v20 = vmul.f32 %v4833_v46, %v6633_v41 }
 0x152   : > { %10050 = vst [vmem:[#allocation89_spill] sm:$0xff] %v6833_v27  ;;  %10053 = vst [vmem:[#allocation92_spill] sm:$0xff] %v6853_v52  ;;  %v4828_v27 = vunpack.i.h.bf16 %v6520_v58  ;;  %v4842_v52 = vunpack.i.l.bf16 %v6527_v15  ;;  %v4837_v58 = vunpack.i.l.bf16 %v6529_v18  ;;  %v10058_v15 = vmov 0  }
 0x153   : > { %5735 = vperm.xlu0 %5703, %v6374_v2   ;;  %v6865_v2 = vmul.f32 %v4822_v50, %v6633_v41  ;;  %v6868_v36 = vmul.f32 %v4818_v12, %v6633_v41  ;;  %10057 = vst [vmem:[#allocation96_spill] sm:$0xff] %v6879_v20  ;;  %v6882_v50 = vmul.f32 %v4832_v40, %v6633_v41  ;;  %v4853_v12 = vunpack.i.h.bf16 %v6536_v38 }
 0x154   : > { %5207 = vperm.xlu1 %5170, %v6409_v39   ;;  %v6859_v5 = vpop.permute.xlu1 %5019  ;;  %v6899_v40 = vpack.i.bf16 %v4584_v63, %v4583_v44  ;;  %v6913_v20 = vmul.f32 %v4837_v58, %v6633_v41  ;;  %v4857_v44 = vunpack.i.l.bf16 %v6547_v8  ;;  %v4879_v58 = vunpack.i.h.bf16 %v6565_v53 }
 0x155   : > { %10054 = vst [vmem:[#allocation93_spill] sm:$0xff] %v6859_v5  ;;  %v6862_v56 = vpop.permute.xlu0 %5533  ;;  %10056 = vst [vmem:[#allocation95_spill] sm:$0xff] %v6865_v2  ;;  %v4838_v5 = vunpack.i.h.bf16 %v6529_v18  ;;  %v6890_v2 = vmul.f32 %v4828_v27, %v6633_v41  ;;  %v6893_v18 = vmul.f32 %v4827_v24, %v6633_v41  ;;  %v4847_v27 = vunpack.i.l.bf16 %v6538_v47 }
 0x156   : > { %10055 = vst [vmem:[#allocation94_spill] sm:$0xff] %v6862_v56  ;;  %v4852_v56 = vunpack.i.l.bf16 %v6536_v38  ;;  %v6902_v38 = vmul.f32 %v4843_v54, %v6633_v41  ;;  %v6918_v63 = vmul.f32 %v4853_v12, %v6633_v41 }
 0x157   : > { %5740 = vperm.xlu0 %5703, %v6379_v6   ;;  %v4848_v6 = vunpack.i.h.bf16 %v6538_v47  ;;  %v6910_v24 = vmul.f32 %v4838_v5, %v6633_v41  ;;  %v4858_v47 = vunpack.i.h.bf16 %v6547_v8  ;;  %v4873_v8 = vunpack.i.h.bf16 %v6554_v32 }
 0x158   : > { %5211 = vset.pattern.permute.xlu1 %v10058_v15  ;;  %v6887_v42 = vpop.permute.xlu1 %5029  ;;  %10061 = vst [vmem:[#allocation99_spill] sm:$0xff] %v6902_v38  ;;  %v6905_v15 = vmul.f32 %v4842_v52, %v6633_v41  ;;  %10063 = vst [vmem:[#allocation101_spill] sm:$0xff] %v6918_v63  ;;  %v6921_v52 = vmul.f32 %v4852_v56, %v6633_v41  ;;  %v6936_v56 = vmul.f32 %v4847_v27, %v6633_v41 }
 0x159   : > { %10059 = vst [vmem:[#allocation97_spill] sm:$0xff] %v6887_v42  ;;  %5213 = vperm.xlu1 %5211, %v6600_v34   ;;  %v6897_v46 = vpop.permute.xlu0 %5538  ;;  %v4863_v42 = vunpack.i.h.bf16 %v6545_v7  ;;  %v6928_v5 = vmul.f32 %v4848_v6, %v6633_v41  ;;  %v6953_v27 = vmul.f32 %v4857_v44, %v6633_v41  ;;  %v5027_v63 = vunpack.i.h.bf16 %v6571_v10 }
 0x15a   : > { %10060 = vst [vmem:[#allocation98_spill] sm:$0xff] %v6897_v46  ;;  %10062 = vst [vmem:[#allocation100_spill] sm:$0xff] %v6905_v15  ;;  %v4862_v46 = vunpack.i.l.bf16 %v6545_v7  ;;  %v4878_v7 = vunpack.i.l.bf16 %v6565_v53  ;;  %v4884_v53 = vunpack.i.h.bf16 %v6573_v60  ;;  %v10070_v15 = vld [vmem:[#allocation41_spill] sm:$0xff] }
 0x15b   : > { %5745 = vperm.xlu0 %5703, %v6384_v11   ;;  %10064 = vst [vmem:[#allocation102_spill] sm:$0xff] %v6921_v52  ;;  %v6939_v12 = vmul.f32 %v4863_v42, %v6633_v41  ;;  %v5012_v52 = vunpack.i.h.bf16 %v6563_v0  ;;  %v5011_v42 = vunpack.i.l.bf16 %v6563_v0  ;;  %v5026_v0 = vunpack.i.l.bf16 %v6571_v10 }
 0x15c   : > { %v6925_v54 = vpop.permute.xlu1 %5039  ;;  %v6944_v6 = vmul.f32 %v4862_v46, %v6633_v41  ;;  %v1120_v46 = vmul.f32 %v4879_v58, %v6636_v62 }
 0x15d   : > { %10065 = vst [vmem:[#allocation103_spill] sm:$0xff] %v6925_v54  ;;  %5223 = vperm.xlu1 %5211, %v6899_v40   ;;  %v6933_v11 = vpop.permute.xlu0 %5543  ;;  %10067 = vst [vmem:[#allocation105_spill] sm:$0xff] %v6939_v12  ;;  %v4872_v54 = vunpack.i.l.bf16 %v6554_v32  ;;  %v4883_v12 = vunpack.i.l.bf16 %v6573_v60  ;;  %v10074_v60 = vld [vmem:[#allocation34_spill] sm:$0xff]  ;;  %v6974_v58 = vmul.f32 %v5012_v52, %v6633_v41 }
 0x15e   : > { %10066 = vst [vmem:[#allocation104_spill] sm:$0xff] %v6933_v11  ;;  %10068 = vst [vmem:[#allocation106_spill] sm:$0xff] %v6944_v6  ;;  %v6950_v11 = vmul.f32 %v4858_v47, %v6633_v41  ;;  %v1119_v6 = vmul.f32 %v4878_v7, %v6636_v62  ;;  %v6966_v47 = vmul.f32 %v4873_v8, %v6633_v41  ;;  %v4889_v38 = vunpack.i.h.bf16 %v10074_v60 }
 0x15f   : > { %5750 = vperm.xlu0 %5703, %v6389_v17   ;;  %v6969_v44 = vmul.f32 %v4872_v54, %v6633_v41  ;;  %10075 = vst [vmem:[#allocation34_spill] sm:$0xff] %v6974_v58  ;;  %v1122_v7 = vmul.f32 %v4884_v53, %v6636_v62  ;;  %v1121_v8 = vmul.f32 %v4883_v12, %v6636_v62  ;;  %v10077_v54 = vld [vmem:[#allocation33_spill] sm:$0xff] }
 0x160   : > { %v6957_v32 = vpop.permute.xlu1 %5049  ;;  %10072 = vst [vmem:[#allocation108_spill] sm:$0xff] %v6966_v47  ;;  %v6987_v10 = vadd.f32 %v1119_v6, %v6848_v43  ;;  %v6990_v52 = vadd.f32 %v1120_v46, %v6845_v51  ;;  %v6993_v53 = vmul.f32 %v5027_v63, %v6633_v41  ;;  %v7000_v12 = vmul.f32 %v5026_v0, %v6633_v41  ;;  %v10085_v0 = vld [vmem:[#allocation35_spill] sm:$0xff] }
 0x161   : > { %10069 = vst [vmem:[#allocation107_spill] sm:$0xff] %v6957_v32  ;;  %5228 = vperm.xlu1 %5211, %v10070_v15   ;;  %v6963_v17 = vpop.permute.xlu0 %5548  ;;  %10073 = vst [vmem:[#allocation109_spill] sm:$0xff] %v6969_v44  ;;  %v4888_v32 = vunpack.i.l.bf16 %v10074_v60  ;;  %v5037_v44 = vunpack.i.h.bf16 %v10077_v54  ;;  %v10081_v60 = vld [vmem:[#allocation44_spill] sm:$0xff]  ;;  %v7006_v51 = vadd.f32 %v1122_v7, %v6822_v26  ;;  %v1126_v63 = vmul.f32 %v4889_v38, %v6636_v62  ;;  %v10088_v26 = vld [vmem:[#allocation38_spill] sm:$0xff] }
 0x162   : > { %10071 = vst [vmem:[#allocation41_spill] sm:$0xff] %v6963_v17  ;;  %v6980_v17 = vmul.f32 %v5011_v42, %v6633_v41  ;;  %10078 = vst [vmem:[#allocation33_spill] sm:$0xff] %v6987_v10  ;;  %v7011_v46 = vadd.f32 %v1121_v8, %v6825_v30  ;;  %v4899_v7 = vunpack.i.h.bf16 %v10088_v26  ;;  %v4898_v38 = vunpack.i.l.bf16 %v10088_v26 }
 0x163   : > { %5755 = vperm.xlu0 %5703, %v6394_v23   ;;  %10079 = vst [vmem:[#allocation111_spill] sm:$0xff] %v6990_v52  ;;  %10080 = vst [vmem:[#allocation112_spill] sm:$0xff] %v6993_v53  ;;  %v5036_v23 = vunpack.i.l.bf16 %v10077_v54  ;;  %v1125_v58 = vmul.f32 %v4888_v32, %v6636_v62  ;;  %v7014_v54 = vmul.f32 %v5037_v44, %v6633_v41  ;;  %v5047_v52 = vunpack.i.h.bf16 %v10085_v0  ;;  %v10092_v53 = vld [vmem:[#allocation40_spill] sm:$0xff] }
 0x164   : > { %10076 = vst [vmem:[#allocation110_spill] sm:$0xff] %v6980_v17  ;;  %v6984_v47 = vpop.permute.xlu1 %5059  ;;  %10082 = vst [vmem:[#allocation113_spill] sm:$0xff] %v7000_v12  ;;  %v10083_v17 = vld [vmem:[#allocation36_spill] sm:$0xff]  ;;  %v5046_v32 = vunpack.i.l.bf16 %v10085_v0  ;;  %v7034_v0 = vadd.f32 %v1126_v63, %v6868_v36  ;;  %v4903_v26 = vunpack.i.l.bf16 %v10092_v53  ;;  %v1134_v36 = vmul.f32 %v4899_v7, %v6636_v62  ;;  %v10096_v63 = vld [vmem:[#allocation39_spill] sm:$0xff] }
 0x165   : > { %5238 = vperm.xlu1 %5211, %v10081_v60   ;;  %v6997_v42 = vpop.permute.xlu0 %5553  ;;  %v4894_v43 = vunpack.i.h.bf16 %v10083_v17  ;;  %v4893_v6 = vunpack.i.l.bf16 %v10083_v17  ;;  %10084 = vst [vmem:[#allocation36_spill] sm:$0xff] %v7014_v54  ;;  %v7021_v17 = vmul.f32 %v5036_v23, %v6633_v41  ;;  %v7029_v30 = vadd.f32 %v1125_v58, %v6873_v59  ;;  %v10091_v23 = vld [vmem:[#allocation37_spill] sm:$0xff] }
 0x166   : > { %10090 = vst [vmem:[#allocation115_spill] sm:$0xff] %v7034_v0  ;;  %v5057_v54 = vunpack.i.h.bf16 %v10091_v23  ;;  %v7041_v12 = vmul.f32 %v5047_v52, %v6633_v41  ;;  %v7044_v59 = vmul.f32 %v5046_v32, %v6633_v41  ;;  %v4904_v58 = vunpack.i.h.bf16 %v10092_v53  ;;  %v10100_v32 = vld [vmem:[#allocation43_spill] sm:$0xff] }
 0x167   : > { %5760 = vperm.xlu0 %5703, %v6399_v29   ;;  %10087 = vst [vmem:[#allocation114_spill] sm:$0xff] %v7021_v17  ;;  %10089 = vst [vmem:[#allocation38_spill] sm:$0xff] %v7029_v30  ;;  %v1130_v44 = vmul.f32 %v4894_v43, %v6636_v62  ;;  %v1129_v8 = vmul.f32 %v4893_v6, %v6636_v62  ;;  %v5056_v17 = vunpack.i.l.bf16 %v10091_v23  ;;  %v5067_v23 = vunpack.i.h.bf16 %v10096_v63 }
 0x168   : > { %v7018_v10 = vpop.permute.xlu1 %5069  ;;  %10093 = vst [vmem:[#allocation37_spill] sm:$0xff] %v7041_v12  ;;  %10094 = vst [vmem:[#allocation40_spill] sm:$0xff] %v7044_v59  ;;  %v1133_v6 = vmul.f32 %v4898_v38, %v6636_v62  ;;  %v5066_v53 = vunpack.i.l.bf16 %v10096_v63  ;;  %v4908_v30 = vunpack.i.l.bf16 %v10100_v32  ;;  %v7064_v7 = vmul.f32 %v5057_v54, %v6633_v41 }
 0x169   : > { %10086 = vst [vmem:[#allocation35_spill] sm:$0xff] %v7018_v10  ;;  %5248 = vperm.xlu1 %5211, %v6640_v57   ;;  %v7026_v29 = vpop.permute.xlu0 %5558  ;;  %v7059_v52 = vadd.f32 %v1130_v44, %v6890_v2  ;;  %v7067_v38 = vmul.f32 %v5056_v17, %v6633_v41  ;;  %v1137_v12 = vmul.f32 %v4903_v26, %v6636_v62  ;;  %v4909_v59 = vunpack.i.h.bf16 %v10100_v32  ;;  %v10103_v2 = vld [vmem:[#allocation42_spill] sm:$0xff] }
 0x16a   : > { %10101 = vst [vmem:[#allocation43_spill] sm:$0xff] %v7064_v7  ;;  %v5077_v44 = vunpack.i.h.bf16 %v10103_v2  ;;  %v7076_v63 = vadd.f32 %v1133_v6, %v6913_v20  ;;  %v7079_v54 = vadd.f32 %v1134_v36, %v6910_v24  ;;  %v7082_v17 = vmul.f32 %v5067_v23, %v6633_v41  ;;  %v10111_v36 = vld [vmem:[#allocation46_spill] sm:$0xff]  ;;  %v10124_v7 = vld [vmem:[#allocation12_spill] sm:$0xff] }
 0x16b   : > { %5765 = vperm.xlu0 %5703, %v6404_v33   ;;  %v7056_v33 = vadd.f32 %v1129_v8, %v6893_v18  ;;  %10099 = vst [vmem:[#allocation118_spill] sm:$0xff] %v7059_v52  ;;  %10102 = vst [vmem:[#allocation119_spill] sm:$0xff] %v7067_v38  ;;  %v1138_v18 = vmul.f32 %v4904_v58, %v6636_v62  ;;  %v5076_v8 = vunpack.i.l.bf16 %v10103_v2  ;;  %v5221_v6 = vunpack.i.h.bf16 %v10111_v36  ;;  %v10112_v2 = vld [vmem:[#allocation11_spill] sm:$0xff] }
 0x16c   : > { %v7047_v43 = vpop.permute.xlu1 %5079  ;;  %10104 = vst [vmem:[#allocation42_spill] sm:$0xff] %v7076_v63  ;;  %10105 = vst [vmem:[#allocation120_spill] sm:$0xff] %v7079_v54  ;;  %v7090_v58 = vmul.f32 %v5066_v53, %v6633_v41  ;;  %v1141_v32 = vmul.f32 %v4908_v30, %v6636_v62  ;;  %v7094_v20 = vadd.f32 %v1137_v12, %v6936_v56  ;;  %v5220_v23 = vunpack.i.l.bf16 %v10111_v36  ;;  %v10114_v30 = vld [vmem:[#allocation48_spill] sm:$0xff] }
 0x16d   : > { %10095 = vst [vmem:[#allocation116_spill] sm:$0xff] %v7047_v43  ;;  %5258 = vperm.xlu1 %5211, %v6651_v9   ;;  %v7053_v0 = vpop.permute.xlu0 %5563  ;;  %10098 = vst [vmem:[#allocation117_spill] sm:$0xff] %v7056_v33  ;;  %v1142_v24 = vmul.f32 %v4909_v59, %v6636_v62  ;;  %v7101_v54 = vadd.f32 %v1138_v18, %v6928_v5  ;;  %v7104_v63 = vmul.f32 %v5077_v44, %v6633_v41  ;;  %v10115_v59 = vld [vmem:[#allocation52_spill] sm:$0xff]  ;;  %v10119_v44 = vld [vmem:[#allocation54_spill] sm:$0xff] }
 0x16e   : > { %10097 = vst [vmem:[#allocation39_spill] sm:$0xff] %v7053_v0  ;;  %10106 = vst [vmem:[#allocation121_spill] sm:$0xff] %v7082_v17  ;;  %v7107_v53 = vmul.f32 %v5076_v8, %v6633_v41  ;;  %v5236_v56 = vunpack.i.h.bf16 %v10114_v30  ;;  %v5235_v12 = vunpack.i.l.bf16 %v10114_v30  ;;  %v4919_v52 = vunpack.i.l.bf16 %v10115_v59  ;;  %v10123_v17 = vld [vmem:[#allocation53_spill] sm:$0xff] }
 0x16f   : > { %5770 = vperm.xlu0 %5703, %v6409_v39   ;;  %10109 = vst [vmem:[#allocation124_spill] sm:$0xff] %v7090_v58  ;;  %10110 = vst [vmem:[#allocation125_spill] sm:$0xff] %v7094_v20  ;;  %v4920_v20 = vunpack.i.h.bf16 %v10115_v59  ;;  %v7119_v18 = vadd.f32 %v1141_v32, %v6953_v27  ;;  %v4925_v8 = vunpack.i.h.bf16 %v10119_v44  ;;  %v7124_v33 = vadd.f32 %v1142_v24, %v6950_v11 }
 0x170   : > { %10113 = vst [vmem:[#allocation46_spill] sm:$0xff] %v7101_v54  ;;  %v4924_v54 = vunpack.i.l.bf16 %v10119_v44  ;;  %v7127_v30 = vmul.f32 %v5221_v6, %v6633_v41  ;;  %v7130_v59 = vmul.f32 %v5220_v23, %v6633_v41  ;;  %v5246_v58 = vunpack.i.h.bf16 %v10123_v17  ;;  %v10127_v6 = vld [vmem:[#allocation61_spill] sm:$0xff] }
 0x171   : > { %5268 = vperm.xlu1 %5211, %v6668_v16   ;;  %v7085_v26 = vpop.permute.xlu1 %5085  ;;  %v7087_v39 = vpop.permute.xlu0 %5568  ;;  %10118 = vst [vmem:[#allocation126_spill] sm:$0xff] %v7119_v18  ;;  %10120 = vst [vmem:[#allocation54_spill] sm:$0xff] %v7124_v33  ;;  %v5245_v27 = vunpack.i.l.bf16 %v10123_v17  ;;  %v7136_v32 = vmul.f32 %v5236_v56, %v6633_v41  ;;  %v7139_v44 = vmul.f32 %v5235_v12, %v6633_v41  ;;  %v10133_v33 = vld [vmem:[#allocation13_spill] sm:$0xff] }
 0x172   : > { %10107 = vst [vmem:[#allocation122_spill] sm:$0xff] %v7085_v26  ;;  %10108 = vst [vmem:[#allocation123_spill] sm:$0xff] %v7087_v39  ;;  %v7142_v11 = vmul.f32 %v4920_v20, %v6813_v13  ;;  %v7145_v24 = vmul.f32 %v4919_v52, %v6813_v13  ;;  %v1318_v17 = vmul.f32 %v4925_v8, %v6813_v13 }
 0x173   : > { %5775 = vperm.xlu0 %5703, %v10112_v2   ;;  %10121 = vst [vmem:[#allocation127_spill] sm:$0xff] %v7127_v30  ;;  %10122 = vst [vmem:[#allocation128_spill] sm:$0xff] %v7130_v59  ;;  %v1317_v56 = vmul.f32 %v4924_v54, %v6813_v13  ;;  %v7157_v20 = vmul.f32 %v5246_v58, %v6633_v41  ;;  %v7162_v18 = vmul.f32 %v5245_v27, %v6633_v41 }
 0x174   : > { %10125 = vst [vmem:[#allocation53_spill] sm:$0xff] %v7136_v32  ;;  %10126 = vst [vmem:[#allocation129_spill] sm:$0xff] %v7139_v44  ;;  %v10130_v32 = vld [vmem:[#allocation56_spill] sm:$0xff]  ;;  %v10132_v44 = vld [vmem:[#allocation57_spill] sm:$0xff]  ;;  %v7175_v39 = vadd.f32 %v1318_v17, %v7006_v51 }
 0x175   : > { %5278 = vperm.xlu1 %5211, %v6677_v21   ;;  %v7114_v36 = vpop.permute.xlu1 %5090  ;;  %v7116_v5 = vpop.permute.xlu0 %5573  ;;  %v5256_v59 = vunpack.i.h.bf16 %v10130_v32  ;;  %v5255_v12 = vunpack.i.l.bf16 %v10130_v32  ;;  %10131 = vst [vmem:[#allocation56_spill] sm:$0xff] %v7157_v20  ;;  %v4930_v52 = vunpack.i.h.bf16 %v10132_v44  ;;  %10134 = vst [vmem:[#allocation57_spill] sm:$0xff] %v7162_v18  ;;  %v4929_v38 = vunpack.i.l.bf16 %v10132_v44  ;;  %v10142_v18 = vld [vmem:[#allocation62_spill] sm:$0xff]  ;;  %v10144_v17 = vld [vmem:[#allocation63_spill] sm:$0xff] }
 0x176   : > { %10116 = vst [vmem:[#allocation48_spill] sm:$0xff] %v7114_v36  ;;  %10117 = vst [vmem:[#allocation52_spill] sm:$0xff] %v7116_v5  ;;  %v10137_v36 = vmov 1   ;;  %v7178_v27 = vadd.f32 %v1317_v56, %v7011_v46  ;;  %v10143_v51 = vld [vmem:[#allocation14_spill] sm:$0xff]  ;;  %v4939_v56 = vunpack.i.l.bf16 %v10144_v17 }
 0x177   : > { %5780 = vperm.xlu0 %5703, %v10124_v7   ;;  %v7181_v44 = vmul.f32 %v5256_v59, %v6633_v41  ;;  %v7194_v46 = vmul.f32 %v4929_v38, %v6813_v13  ;;  %v4940_v59 = vunpack.i.h.bf16 %v10144_v17 }
 0x179   : > { %5288 = vperm.xlu1 %5211, %v10127_v6   ;;  %v7148_v23 = vpop.permute.xlu1 %5095  ;;  %v7150_v30 = vpop.permute.xlu0 %5578  ;;  %10140 = vst [vmem:[#allocation132_spill] sm:$0xff] %v7181_v44  ;;  %v10160_v6 = vld [vmem:[#allocation16_spill] sm:$0xff] }
 0x17a   : > { %10128 = vst [vmem:[#allocation130_spill] sm:$0xff] %v7148_v23  ;;  %10129 = vst [vmem:[#allocation131_spill] sm:$0xff] %v7150_v30  ;;  %v10135_v30 = vld [vmem:[#allocation59_spill] sm:$0xff]  ;;  %v10136_v23 = vld [vmem:[#allocation60_spill] sm:$0xff] }
 0x17b   : > { %5785 = vperm.xlu0 %5703, %v10133_v33   ;;  %v5266_v8 = vunpack.i.h.bf16 %v10135_v30  ;;  %v5265_v54 = vunpack.i.l.bf16 %v10135_v30  ;;  %v4935_v5 = vunpack.i.h.bf16 %v10136_v23  ;;  %v4934_v32 = vunpack.i.l.bf16 %v10136_v23 }
 0x17c   : > { %v7184_v30 = vmul.f32 %v5255_v12, %v6633_v41  ;;  %v7188_v23 = vmul.f32 %v4930_v52, %v6813_v13 }
 0x17d   : > { %5292 = vset.pattern.permute.xlu1 %v10137_v36  ;;  %v7170_v58 = vpop.permute.xlu1 %5100  ;;  %v7172_v20 = vpop.permute.xlu0 %5583  ;;  %v5276_v36 = vunpack.i.h.bf16 %v10142_v18  ;;  %v7199_v12 = vmul.f32 %v5266_v8, %v6633_v41  ;;  %v7202_v44 = vmul.f32 %v5265_v54, %v6633_v41  ;;  %v7205_v52 = vmul.f32 %v4935_v5, %v6813_v13 }
 0x17e   : > { %10138 = vst [vmem:[#allocation59_spill] sm:$0xff] %v7170_v58  ;;  %10139 = vst [vmem:[#allocation60_spill] sm:$0xff] %v7172_v20  ;;  %5294 = vperm.xlu1 %5292, %v10112_v2   ;;  %v5275_v20 = vunpack.i.l.bf16 %v10142_v18  ;;  %v7208_v18 = vmul.f32 %v4934_v32, %v6813_v13  ;;  %v10149_v58 = vld [vmem:[#allocation65_spill] sm:$0xff]  ;;  %v10150_v2 = vld [vmem:[#allocation66_spill] sm:$0xff] }
 0x17f   : > { %10141 = vst [vmem:[#allocation133_spill] sm:$0xff] %v7184_v30  ;;  %5790 = vperm.xlu0 %5703, %v10143_v51   ;;  %10145 = vst [vmem:[#allocation62_spill] sm:$0xff] %v7199_v12  ;;  %v5286_v26 = vunpack.i.h.bf16 %v10149_v58  ;;  %v5285_v17 = vunpack.i.l.bf16 %v10149_v58  ;;  %v4945_v8 = vunpack.i.h.bf16 %v10150_v2  ;;  %v4944_v12 = vunpack.i.l.bf16 %v10150_v2  ;;  %v10153_v32 = vld [vmem:[#allocation15_spill] sm:$0xff] }
 0x180   : > { %10146 = vst [vmem:[#allocation63_spill] sm:$0xff] %v7202_v44  ;;  %v7220_v5 = vmul.f32 %v5276_v36, %v6633_v41  ;;  %v7223_v54 = vmul.f32 %v5275_v20, %v6633_v41  ;;  %v7227_v44 = vmul.f32 %v4940_v59, %v6813_v13  ;;  %v5430_v58 = vunpack.i.h.bf16 %v6708_v45 }
 0x181   : > { %v7210_v30 = vpop.permute.xlu1 %5105  ;;  %v7212_v38 = vpop.permute.xlu0 %5588  ;;  %v5429_v2 = vunpack.i.l.bf16 %v6708_v45  ;;  %v7244_v59 = vmul.f32 %v5285_v17, %v6633_v41  ;;  %v7250_v0 = vmul.f32 %v4944_v12, %v6813_v13  ;;  %v5445_v45 = vunpack.i.h.bf16 %v6717_v35 }
 0x182   : > { %10147 = vst [vmem:[#allocation134_spill] sm:$0xff] %v7210_v30  ;;  %10148 = vst [vmem:[#allocation135_spill] sm:$0xff] %v7212_v38  ;;  %5299 = vperm.xlu1 %5292, %v6899_v40   ;;  %v7230_v38 = vmul.f32 %v4939_v56, %v6813_v13  ;;  %v10154_v30 = vld [vmem:[#allocation68_spill] sm:$0xff]  ;;  %v7247_v56 = vmul.f32 %v4945_v8, %v6813_v13  ;;  %v5455_v8 = vunpack.i.h.bf16 %v6726_v37 }
 0x183   : > { %10151 = vst [vmem:[#allocation65_spill] sm:$0xff] %v7220_v5  ;;  %10152 = vst [vmem:[#allocation66_spill] sm:$0xff] %v7223_v54  ;;  %5795 = vperm.xlu0 %5703, %v10153_v32   ;;  %v4950_v43 = vunpack.i.h.bf16 %v10154_v30  ;;  %v4949_v36 = vunpack.i.l.bf16 %v10154_v30  ;;  %v7241_v54 = vmul.f32 %v5286_v26, %v6633_v41  ;;  %v5444_v30 = vunpack.i.l.bf16 %v6717_v35 }
 0x184   : > { %10158 = vst [vmem:[#allocation137_spill] sm:$0xff] %v7244_v59  ;;  %v7258_v26 = vmul.f32 %v5430_v58, %v6633_v41  ;;  %v7263_v12 = vmul.f32 %v5429_v2, %v6633_v41  ;;  %v5454_v35 = vunpack.i.l.bf16 %v6726_v37  ;;  %v10165_v58 = vld [vmem:[#allocation72_spill] sm:$0xff]  ;;  %v7280_v2 = vmul.f32 %v5445_v45, %v6633_v41 }
 0x185   : > { %v7236_v5 = vpop.permute.xlu1 %5110  ;;  %v7238_v20 = vpop.permute.xlu0 %5593  ;;  %10157 = vst [vmem:[#allocation136_spill] sm:$0xff] %v7241_v54  ;;  %v7266_v54 = vmul.f32 %v4950_v43, %v6813_v13  ;;  %v7269_v59 = vmul.f32 %v4949_v36, %v6813_v13  ;;  %v7283_v43 = vmul.f32 %v5444_v30, %v6633_v41  ;;  %v5465_v37 = vunpack.i.h.bf16 %v6735_v19 }
 0x186   : > { %10155 = vst [vmem:[#allocation15_spill] sm:$0xff] %v7236_v5  ;;  %10156 = vst [vmem:[#allocation68_spill] sm:$0xff] %v7238_v20  ;;  %5304 = vperm.xlu1 %5292, %v10124_v7   ;;  %v10159_v5 = vld [vmem:[#allocation70_spill] sm:$0xff]  ;;  %v5464_v45 = vunpack.i.l.bf16 %v6735_v19  ;;  %v4966_v30 = vunpack.i.h.bf16 %v6741_v49  ;;  %v5475_v19 = vunpack.i.h.bf16 %v6744_v61 }
 0x187   : > { %v4955_v20 = vunpack.i.h.bf16 %v10159_v5  ;;  %5800 = vperm.xlu0 %5703, %v10160_v6   ;;  %10161 = vst [vmem:[#allocation70_spill] sm:$0xff] %v7258_v26  ;;  %v4954_v17 = vunpack.i.l.bf16 %v10159_v5  ;;  %10162 = vst [vmem:[#allocation16_spill] sm:$0xff] %v7263_v12  ;;  %v4960_v26 = vunpack.i.h.bf16 %v10165_v58  ;;  %v4959_v5 = vunpack.i.l.bf16 %v10165_v58  ;;  %v10168_v12 = vld [vmem:[#allocation17_spill] sm:$0xff] }
 0x188   : > { %10166 = vst [vmem:[#allocation72_spill] sm:$0xff] %v7280_v2  ;;  %10167 = vst [vmem:[#allocation140_spill] sm:$0xff] %v7283_v43  ;;  %v7294_v58 = vmul.f32 %v5455_v8, %v6633_v41 }
 0x189   : > { %v7272_v7 = vpop.permute.xlu1 %5115  ;;  %v7274_v10 = vpop.permute.xlu0 %5598  ;;  %v7286_v36 = vmul.f32 %v4955_v20, %v6813_v13  ;;  %v4965_v20 = vunpack.i.l.bf16 %v6741_v49  ;;  %v4970_v49 = vunpack.i.l.bf16 %v6750_v31 }
 0x18a   : > { %10163 = vst [vmem:[#allocation138_spill] sm:$0xff] %v7272_v7  ;;  %10164 = vst [vmem:[#allocation139_spill] sm:$0xff] %v7274_v10  ;;  %5309 = vperm.xlu1 %5292, %v10133_v33   ;;  %v7291_v10 = vmul.f32 %v4954_v17, %v6813_v13  ;;  %v7297_v7 = vmul.f32 %v5454_v35, %v6633_v41  ;;  %v7305_v33 = vmul.f32 %v4960_v26, %v6813_v13 }
 0x18b   : > { %5805 = vperm.xlu0 %5703, %v10168_v12   ;;  %10169 = vst [vmem:[#allocation17_spill] sm:$0xff] %v7294_v58  ;;  %v7308_v17 = vmul.f32 %v4959_v5, %v6813_v13  ;;  %v7312_v35 = vmul.f32 %v5465_v37, %v6633_v41  ;;  %v4971_v26 = vunpack.i.h.bf16 %v6750_v31  ;;  %v7325_v37 = vmul.f32 %v4966_v30, %v6816_v14 }
 0x18c   : > { %10170 = vst [vmem:[#allocation141_spill] sm:$0xff] %v7297_v7  ;;  %v10173_v7 = vld [vmem:[#allocation18_spill] sm:$0xff]  ;;  %v7344_v30 = vmul.f32 %v5475_v19, %v6633_v41  ;;  %v5495_v19 = vunpack.i.h.bf16 %v6760_v1 }
 0x18d   : > { %v5121_v2 = vpop.permute.xlu1 %5120  ;;  %v7302_v43 = vpop.permute.xlu0 %5603  ;;  %10172 = vst [vmem:[#allocation143_spill] sm:$0xff] %v7312_v35  ;;  %10175 = vst [vmem:[#allocation145_spill] sm:$0xff] %v7325_v37  ;;  %v7328_v35 = vmul.f32 %v4965_v20, %v6816_v14  ;;  %v1513_v20 = vmul.f32 %v4970_v49, %v6816_v14 }
 0x18e   : > { %10171 = vst [vmem:[#allocation142_spill] sm:$0xff] %v7302_v43  ;;  %v5123_v8 = vunpack.i.h.bf16 %v5121_v2  ;;  %v5122_v58 = vunpack.i.l.bf16 %v5121_v2  ;;  %5314 = vperm.xlu1 %5292, %v10143_v51   ;;  %v5474_v43 = vunpack.i.l.bf16 %v6744_v61  ;;  %v7322_v2 = vmul.f32 %v5464_v45, %v6633_v41  ;;  %10179 = vst [vmem:[#allocation149_spill] sm:$0xff] %v7344_v30 }
 0x18f   : > { %5816 = vperm.xlu0 %5703, %v10173_v7   ;;  %10176 = vst [vmem:[#allocation146_spill] sm:$0xff] %v7328_v35  ;;  %v5485_v7 = vunpack.i.h.bf16 %v6752_v22  ;;  %v5484_v61 = vunpack.i.l.bf16 %v6752_v22 }
 0x190   : > { %v1987_v5 = vmul.f32 %v5123_v8, %v6636_v62  ;;  %v1986_v13 = vmul.f32 %v5122_v58, %v6636_v62  ;;  %10174 = vst [vmem:[#allocation144_spill] sm:$0xff] %v7322_v2  ;;  %v5500_v8 = vunpack.i.l.bf16 %v6767_v25  ;;  %v10180_v2 = vld [vmem:[#allocation19_spill] sm:$0xff]  ;;  %v7350_v22 = vmul.f32 %v5474_v43, %v6633_v41 }
 0x191   : > { %v7330_v51 = vpop.permute.xlu0 %5608  ;;  %v7360_v49 = vmul.f32 %v5485_v7, %v6633_v41  ;;  %v5494_v43 = vunpack.i.l.bf16 %v6760_v1  ;;  %v10185_v7 = vld [vmem:[#allocation20_spill] sm:$0xff] }
 0x192   : > { %v7335_v31 = vadd.f32 %v1986_v13, %v7107_v53  ;;  %v7338_v58 = vadd.f32 %v1987_v5, %v7104_v63  ;;  %5319 = vperm.xlu1 %5292, %v10153_v32   ;;  %v7341_v45 = vpop.permute.xlu1 %5126  ;;  %10181 = vst [vmem:[#allocation150_spill] sm:$0xff] %v7350_v22  ;;  %v1514_v13 = vmul.f32 %v4971_v26, %v6816_v14  ;;  %v5501_v63 = vunpack.i.h.bf16 %v6767_v25 }
 0x193   : > { %5831 = vperm.xlu0 %5703, %v10180_v2   ;;  %v4976_v53 = vunpack.i.h.bf16 %v6758_v4  ;;  %v4975_v5 = vunpack.i.l.bf16 %v6758_v4  ;;  %10182 = vst [vmem:[#allocation151_spill] sm:$0xff] %v7360_v49  ;;  %v7363_v2 = vmul.f32 %v5484_v61, %v6633_v41  ;;  %v7370_v25 = vadd.f32 %v1513_v20, %v7178_v27 }
 0x194   : > { %10177 = vst [vmem:[#allocation147_spill] sm:$0xff] %v7335_v31  ;;  %10178 = vst [vmem:[#allocation148_spill] sm:$0xff] %v7338_v58  ;;  %v4981_v4 = vunpack.i.h.bf16 %v6764_v28  ;;  %v4980_v22 = vunpack.i.l.bf16 %v6764_v28  ;;  %v1117_v37 = vmul.f32 %v5500_v8, %v6636_v62  ;;  %v7377_v61 = vadd.f32 %v1514_v13, %v7175_v39  ;;  %v10208_v58 = vld [vmem:[#allocation79_spill] sm:$0xff] }
 0x195   : > { %v7357_v30 = vpop.permute.xlu0 %5613  ;;  %10183 = vst [vmem:[#allocation152_spill] sm:$0xff] %v7363_v2  ;;  %10184 = vst [vmem:[#allocation153_spill] sm:$0xff] %v7370_v25  ;;  %v1118_v1 = vmul.f32 %v5501_v63, %v6636_v62  ;;  %v5506_v49 = vunpack.i.h.bf16 %v6774_v48  ;;  %v5505_v2 = vunpack.i.l.bf16 %v6774_v48  ;;  %v7383_v27 = vmul.f32 %v4976_v53, %v6816_v14  ;;  %v10196_v25 = vld [vmem:[#allocation77_spill] sm:$0xff] }
 0x196   : > { %5324 = vperm.xlu1 %5292, %v10160_v6   ;;  %v7367_v26 = vpop.permute.xlu1 %5131  ;;  %10186 = vst [vmem:[#allocation154_spill] sm:$0xff] %v7377_v61  ;;  %v7386_v20 = vmul.f32 %v4975_v5, %v6816_v14  ;;  %v7389_v28 = vmul.f32 %v5495_v19, %v6633_v41  ;;  %v7394_v39 = vmul.f32 %v5494_v43, %v6633_v41  ;;  %v4986_v13 = vunpack.i.h.bf16 %v6770_v3  ;;  %v10194_v43 = vld [vmem:[#allocation21_spill] sm:$0xff] }
 0x197   : > { %5841 = vperm.xlu0 %5703, %v10185_v7   ;;  %10187 = vst [vmem:[#allocation155_spill] sm:$0xff] %v7383_v27  ;;  %v4985_v63 = vunpack.i.l.bf16 %v6770_v3  ;;  %v7402_v53 = vmul.f32 %v4981_v4, %v6816_v14  ;;  %v7405_v5 = vmul.f32 %v4980_v22, %v6816_v14  ;;  %v1149_v19 = vadd.f32 %v1117_v37, %v6831_v55 }
 0x198   : > { %10188 = vst [vmem:[#allocation156_spill] sm:$0xff] %v7386_v20  ;;  %10189 = vst [vmem:[#allocation157_spill] sm:$0xff] %v7389_v28  ;;  %v10193_v28 = vld [vmem:[#allocation78_spill] sm:$0xff]  ;;  %v1124_v3 = vmul.f32 %v5506_v49, %v6636_v62  ;;  %v1123_v20 = vmul.f32 %v5505_v2, %v6636_v62  ;;  %v4991_v4 = vunpack.i.h.bf16 %v10196_v25  ;;  %v7419_v55 = vmul.f32 %v4986_v13, %v6816_v14 }
 0x199   : > { %v7391_v8 = vpop.permute.xlu0 %5623  ;;  %10190 = vst [vmem:[#allocation158_spill] sm:$0xff] %v7394_v39  ;;  %10191 = vst [vmem:[#allocation159_spill] sm:$0xff] %v7402_v53  ;;  %v5510_v7 = vunpack.i.l.bf16 %v10193_v28  ;;  %v10195_v39 = vld [vmem:[#allocation88_spill] sm:$0xff]  ;;  %v5511_v61 = vunpack.i.h.bf16 %v10193_v28  ;;  %v4990_v53 = vunpack.i.l.bf16 %v10196_v25  ;;  %v7422_v37 = vmul.f32 %v4985_v63, %v6816_v14  ;;  %v10201_v25 = vld [vmem:[#allocation22_spill] sm:$0xff] }
 0x19a   : > { %5329 = vperm.xlu1 %5292, %v10168_v12   ;;  %v7399_v48 = vpop.permute.xlu1 %5136  ;;  %10192 = vst [vmem:[#allocation160_spill] sm:$0xff] %v7405_v5  ;;  %v1150_v27 = vadd.f32 %v1118_v1, %v10195_v39  ;;  %10197 = vst [vmem:[#allocation78_spill] sm:$0xff] %v7419_v55  ;;  %v10200_v39 = vmov 2   ;;  %v7433_v13 = vadd.f32 %v7145_v24, %v1149_v19  ;;  %v10203_v55 = vld [vmem:[#allocation90_spill] sm:$0xff]  ;;  %v4995_v24 = vunpack.i.l.bf16 %v10208_v58 }
 0x19b   : > { %5851 = vperm.xlu0 %5703, %v10194_v43   ;;  %10198 = vst [vmem:[#allocation88_spill] sm:$0xff] %v7422_v37  ;;  %v10199_v43 = vld [vmem:[#allocation80_spill] sm:$0xff]  ;;  %v1127_v2 = vmul.f32 %v5510_v7, %v6636_v62  ;;  %v1156_v63 = vadd.f32 %v1124_v3, %v10203_v55  ;;  %v10204_v37 = vld [vmem:[#allocation91_spill] sm:$0xff]  ;;  %v1128_v35 = vmul.f32 %v5511_v61, %v6636_v62 }
 0x19c   : > { %v5515_v1 = vunpack.i.l.bf16 %v10199_v43  ;;  %v5516_v28 = vunpack.i.h.bf16 %v10199_v43  ;;  %10202 = vst [vmem:[#allocation77_spill] sm:$0xff] %v7433_v13  ;;  %v1155_v5 = vadd.f32 %v1123_v20, %v10204_v37  ;;  %v7442_v7 = vmul.f32 %v4991_v4, %v6816_v14  ;;  %v10209_v20 = vld [vmem:[#allocation82_spill] sm:$0xff]  ;;  %v10213_v13 = vld [vmem:[#allocation81_spill] sm:$0xff] }
 0x19d   : > { %v7416_v22 = vpop.permute.xlu0 %5639  ;;  %v7445_v43 = vmul.f32 %v4990_v53, %v6816_v14  ;;  %v5521_v55 = vunpack.i.h.bf16 %v10209_v20  ;;  %v5520_v61 = vunpack.i.l.bf16 %v10209_v20  ;;  %v10211_v53 = vld [vmem:[#allocation23_spill] sm:$0xff] }
 0x19e   : > { %5333 = vset.pattern.permute.xlu1 %v10200_v39  ;;  %v7426_v49 = vpop.permute.xlu1 %5141  ;;  %v7439_v39 = vadd.f32 %v7142_v11, %v1150_v27  ;;  %10206 = vst [vmem:[#allocation90_spill] sm:$0xff] %v7442_v7  ;;  %v1131_v3 = vmul.f32 %v5515_v1, %v6636_v62  ;;  %v10210_v27 = vld [vmem:[#allocation95_spill] sm:$0xff]  ;;  %v1132_v37 = vmul.f32 %v5516_v28, %v6636_v62  ;;  %v5001_v7 = vunpack.i.h.bf16 %v10213_v13 }
 0x19f   : > { %5335 = vperm.xlu1 %5333, %v6600_v34   ;;  %5861 = vperm.xlu0 %5703, %v10201_v25   ;;  %10207 = vst [vmem:[#allocation91_spill] sm:$0xff] %v7445_v43  ;;  %v4996_v25 = vunpack.i.h.bf16 %v10208_v58  ;;  %v1159_v4 = vadd.f32 %v1127_v2, %v10210_v27  ;;  %v7463_v1 = vadd.f32 %v7194_v46, %v1155_v5  ;;  %v5000_v28 = vunpack.i.l.bf16 %v10213_v13 }
 0x1a0   : > { %10205 = vst [vmem:[#allocation80_spill] sm:$0xff] %v7439_v39  ;;  %v10212_v39 = vld [vmem:[#allocation92_spill] sm:$0xff]  ;;  %v7466_v43 = vadd.f32 %v7188_v23, %v1156_v63  ;;  %v7472_v2 = vmul.f32 %v4995_v24, %v6816_v14  ;;  %v1135_v46 = vmul.f32 %v5520_v61, %v6636_v62 }
 0x1a1   : > { %v7449_v19 = vpop.permute.xlu0 %5649  ;;  %v1160_v58 = vadd.f32 %v1128_v35, %v10212_v39  ;;  %10214 = vst [vmem:[#allocation79_spill] sm:$0xff] %v7463_v1  ;;  %v7469_v20 = vmul.f32 %v4996_v25, %v6816_v14  ;;  %v1163_v35 = vadd.f32 %v1131_v3, %v6882_v50  ;;  %v1136_v39 = vmul.f32 %v5521_v55, %v6636_v62  ;;  %v10218_v23 = vld [vmem:[#allocation96_spill] sm:$0xff]  ;;  %v10222_v3 = vld [vmem:[#allocation83_spill] sm:$0xff] }
 0x1a2   : > { %v7454_v11 = vpop.permute.xlu1 %5146  ;;  %10215 = vst [vmem:[#allocation82_spill] sm:$0xff] %v7466_v43  ;;  %10217 = vst [vmem:[#allocation92_spill] sm:$0xff] %v7472_v2  ;;  %v1164_v63 = vadd.f32 %v1132_v37, %v10218_v23  ;;  %v10219_v43 = vld [vmem:[#allocation84_spill] sm:$0xff]  ;;  %v7488_v13 = vadd.f32 %v7208_v18, %v1159_v4  ;;  %v7491_v50 = vmul.f32 %v5001_v7, %v6816_v14  ;;  %v5007_v55 = vunpack.i.h.bf16 %v10222_v3  ;;  %v10226_v18 = vld [vmem:[#allocation99_spill] sm:$0xff] }
 0x1a3   : > { %5340 = vperm.xlu1 %5333, %v6899_v40   ;;  %5871 = vperm.xlu0 %5703, %v10211_v53   ;;  %10216 = vst [vmem:[#allocation95_spill] sm:$0xff] %v7469_v20  ;;  %v5526_v25 = vunpack.i.h.bf16 %v10219_v43  ;;  %v5525_v20 = vunpack.i.l.bf16 %v10219_v43  ;;  %v10220_v24 = vld [vmem:[#allocation24_spill] sm:$0xff]  ;;  %v5006_v61 = vunpack.i.l.bf16 %v10222_v3  ;;  %v7496_v37 = vadd.f32 %v7205_v52, %v1160_v58  ;;  %v10224_v43 = vld [vmem:[#allocation89_spill] sm:$0xff] }
 0x1a4   : > { %10221 = vst [vmem:[#allocation81_spill] sm:$0xff] %v7488_v13  ;;  %v7499_v23 = vmul.f32 %v5000_v28, %v6816_v14  ;;  %v5531_v2 = vunpack.i.h.bf16 %v10224_v43  ;;  %v5530_v1 = vunpack.i.l.bf16 %v10224_v43  ;;  %v1168_v4 = vadd.f32 %v1136_v39, %v10226_v18  ;;  %v10227_v7 = vld [vmem:[#allocation100_spill] sm:$0xff]  ;;  %v10231_v18 = vld [vmem:[#allocation87_spill] sm:$0xff] }
 0x1a5   : > { %v7475_v27 = vpop.permute.xlu0 %5659  ;;  %10223 = vst [vmem:[#allocation96_spill] sm:$0xff] %v7496_v37  ;;  %v1167_v13 = vadd.f32 %v1135_v46, %v10227_v7  ;;  %v7510_v3 = vadd.f32 %v7230_v38, %v1163_v35  ;;  %v1140_v52 = vmul.f32 %v5526_v25, %v6636_v62  ;;  %v1139_v58 = vmul.f32 %v5525_v20, %v6636_v62  ;;  %v10232_v35 = vld [vmem:[#allocation3_spill] sm:$0xff] }
 0x1a6   : > { %v7480_v5 = vpop.permute.xlu1 %5151  ;;  %v10229_v28 = vmov 3   ;;  %v7517_v43 = vadd.f32 %v7227_v44, %v1164_v63  ;;  %v1799_v39 = vmul.f32 %v5007_v55, %v6633_v41  ;;  %v1798_v46 = vmul.f32 %v5006_v61, %v6633_v41 }
 0x1a7   : > { %5345 = vperm.xlu1 %5333, %v10070_v15   ;;  %5881 = vperm.xlu0 %5703, %v10220_v24   ;;  %10228 = vst [vmem:[#allocation83_spill] sm:$0xff] %v7510_v3  ;;  %v5017_v7 = vunpack.i.h.bf16 %v10231_v18  ;;  %v5016_v38 = vunpack.i.l.bf16 %v10231_v18  ;;  %v1144_v25 = vmul.f32 %v5531_v2, %v6636_v62  ;;  %v1143_v20 = vmul.f32 %v5530_v1, %v6636_v62  ;;  %v10233_v3 = vld [vmem:[#allocation94_spill] sm:$0xff]  ;;  %v10238_v18 = vld [vmem:[#allocation101_spill] sm:$0xff] }
 0x1a8   : > { %10230 = vst [vmem:[#allocation89_spill] sm:$0xff] %v7517_v43  ;;  %v5536_v37 = vunpack.i.h.bf16 %v10233_v3  ;;  %v7533_v55 = vadd.f32 %v7250_v0, %v1167_v13  ;;  %v7536_v61 = vadd.f32 %v7247_v56, %v1168_v4  ;;  %v10239_v43 = vld [vmem:[#allocation102_spill] sm:$0xff]  ;;  %v10241_v0 = vld [vmem:[#allocation4_spill] sm:$0xff]  ;;  %v10242_v56 = vld [vmem:[#allocation105_spill] sm:$0xff] }
 0x1a9   : > { %v7503_v24 = vpop.permute.xlu0 %5669  ;;  %v1171_v2 = vadd.f32 %v1139_v58, %v10239_v43  ;;  %v1176_v13 = vadd.f32 %v1144_v25, %v10242_v56  ;;  %v10243_v4 = vld [vmem:[#allocation106_spill] sm:$0xff] }
 0x1aa   : > { %10225 = vst [vmem:[#allocation84_spill] sm:$0xff] %v7503_v24  ;;  %v7507_v53 = vpop.permute.xlu1 %5156  ;;  %v5535_v24 = vunpack.i.l.bf16 %v10233_v3  ;;  %10236 = vst [vmem:[#allocation87_spill] sm:$0xff] %v7533_v55  ;;  %v7544_v3 = vmul.f32 %v5017_v7, %v6633_v41  ;;  %v1148_v58 = vmul.f32 %v5536_v37, %v6636_v62  ;;  %v10246_v55 = vld [vmem:[#allocation98_spill] sm:$0xff] }
 0x1ab   : > { %5350 = vperm.xlu1 %5333, %v10081_v60   ;;  %5885 = vset.pattern.permute.xlu0 %v10229_v28  ;;  %10237 = vst [vmem:[#allocation3_spill] sm:$0xff] %v7536_v61  ;;  %v10240_v60 = vld [vmem:[#allocation93_spill] sm:$0xff] }
 0x1ac   : > { %5887 = vperm.xlu0 %5885, %v10232_v35   ;;  %v1172_v35 = vadd.f32 %v1140_v52, %v10238_v18  ;;  %v5022_v1 = vunpack.i.h.bf16 %v10240_v60  ;;  %v5021_v31 = vunpack.i.l.bf16 %v10240_v60  ;;  %v1175_v52 = vadd.f32 %v1143_v20, %v10243_v4  ;;  %v10245_v60 = vld [vmem:[#allocation97_spill] sm:$0xff] }
 0x1ad   : > { %v7528_v44 = vpop.permute.xlu0 %5679  ;;  %v1147_v43 = vmul.f32 %v5535_v24, %v6636_v62  ;;  %v5032_v61 = vunpack.i.h.bf16 %v10245_v60  ;;  %v5031_v7 = vunpack.i.l.bf16 %v10245_v60  ;;  %v7566_v24 = vadd.f32 %v7269_v59, %v1171_v2  ;;  %v10251_v60 = vld [vmem:[#allocation5_spill] sm:$0xff] }
 0x1ae   : > { %10234 = vst [vmem:[#allocation99_spill] sm:$0xff] %v7528_v44  ;;  %v7530_v63 = vpop.permute.xlu1 %5161  ;;  %v7547_v44 = vmul.f32 %v5016_v38, %v6633_v41  ;;  %v5540_v38 = vunpack.i.l.bf16 %v10246_v55  ;;  %v1805_v25 = vmul.f32 %v5022_v1, %v6633_v41  ;;  %v1804_v20 = vmul.f32 %v5021_v31, %v6633_v41 }
 0x1af   : > { %10235 = vst [vmem:[#allocation100_spill] sm:$0xff] %v7530_v63  ;;  %5355 = vperm.xlu1 %5333, %v6640_v57   ;;  %v5541_v57 = vunpack.i.h.bf16 %v10246_v55  ;;  %10248 = vst [vmem:[#allocation102_spill] sm:$0xff] %v7566_v24  ;;  %v7569_v37 = vadd.f32 %v7266_v54, %v1172_v35  ;;  %v10252_v55 = vld [vmem:[#allocation108_spill] sm:$0xff]  ;;  %v7579_v31 = vadd.f32 %v7291_v10, %v1175_v52  ;;  %v10260_v52 = vld [vmem:[#allocation6_spill] sm:$0xff] }
 0x1b0   : > { %5892 = vperm.xlu0 %5885, %v10241_v0   ;;  %v10250_v0 = vld [vmem:[#allocation104_spill] sm:$0xff]  ;;  %v7582_v59 = vadd.f32 %v7286_v36, %v1176_v13  ;;  %v1809_v54 = vmul.f32 %v5032_v61, %v6633_v41  ;;  %v1808_v35 = vmul.f32 %v5031_v7, %v6633_v41 }
 0x1b1   : > { %v7554_v18 = vpop.permute.xlu0 %5689  ;;  %10249 = vst [vmem:[#allocation93_spill] sm:$0xff] %v7569_v37  ;;  %v5546_v56 = vunpack.i.h.bf16 %v10250_v0  ;;  %v5545_v4 = vunpack.i.l.bf16 %v10250_v0  ;;  %10255 = vst [vmem:[#allocation105_spill] sm:$0xff] %v7579_v31  ;;  %v1959_v2 = vmul.f32 %v5541_v57, %v6636_v62  ;;  %v1958_v0 = vmul.f32 %v5540_v38, %v6636_v62  ;;  %v10261_v57 = vld [vmem:[#allocation107_spill] sm:$0xff] }
 0x1b2   : > { %10244 = vst [vmem:[#allocation94_spill] sm:$0xff] %v7554_v18  ;;  %v7560_v63 = vpop.permute.xlu1 %5166  ;;  %v1180_v18 = vadd.f32 %v1148_v58, %v10252_v55  ;;  %10256 = vst [vmem:[#allocation106_spill] sm:$0xff] %v7582_v59  ;;  %v5052_v7 = vunpack.i.h.bf16 %v10261_v57  ;;  %v5556_v38 = vunpack.i.h.bf16 %v6997_v42 }
 0x1b3   : > { %10247 = vst [vmem:[#allocation101_spill] sm:$0xff] %v7560_v63  ;;  %5360 = vperm.xlu1 %5333, %v6651_v9   ;;  %v10253_v63 = vld [vmem:[#allocation109_spill] sm:$0xff]  ;;  %v1965_v36 = vmul.f32 %v5546_v56, %v6636_v62  ;;  %v1964_v61 = vmul.f32 %v5545_v4, %v6636_v62  ;;  %v7606_v31 = vadd.f32 %v1959_v2, %v1799_v39  ;;  %v5051_v56 = vunpack.i.l.bf16 %v10261_v57 }
 0x1b4   : > { %5897 = vperm.xlu0 %5885, %v10251_v60   ;;  %v1179_v1 = vadd.f32 %v1147_v43, %v10253_v63  ;;  %v10257_v60 = vld [vmem:[#allocation103_spill] sm:$0xff]  ;;  %v10258_v43 = vld [vmem:[#allocation41_spill] sm:$0xff]  ;;  %v7604_v59 = vadd.f32 %v7305_v33, %v1180_v18  ;;  %v7608_v37 = vadd.f32 %v1958_v0, %v1798_v46  ;;  %v5555_v4 = vunpack.i.l.bf16 %v6997_v42 }
 0x1b5   : > { %v7576_v14 = vpop.permute.xlu0 %5699  ;;  %v5042_v58 = vunpack.i.h.bf16 %v10257_v60  ;;  %v5041_v63 = vunpack.i.l.bf16 %v10257_v60  ;;  %v5551_v55 = vunpack.i.h.bf16 %v10258_v43  ;;  %v5550_v13 = vunpack.i.l.bf16 %v10258_v43 }
 0x1b6   : > { %10254 = vst [vmem:[#allocation4_spill] sm:$0xff] %v7576_v14  ;;  %v7601_v60 = vadd.f32 %v7308_v17, %v1179_v1  ;;  %10263 = vst [vmem:[#allocation104_spill] sm:$0xff] %v7604_v59  ;;  %v7620_v39 = vadd.f32 %v1965_v36, %v1805_v25  ;;  %v7622_v46 = vadd.f32 %v1964_v61, %v1804_v20  ;;  %v10265_v1 = vld [vmem:[#allocation7_spill] sm:$0xff]  ;;  %v5062_v2 = vunpack.i.h.bf16 %v6984_v47  ;;  %v10270_v59 = vld [vmem:[#allocation8_spill] sm:$0xff] }
 0x1b7   : > { %5365 = vperm.xlu1 %5333, %v6668_v16   ;;  %v7592_v10 = vpop.permute.xlu1 %5172  ;;  %v1812_v24 = vmul.f32 %v5041_v63, %v6633_v41  ;;  %v1969_v17 = vmul.f32 %v5551_v55, %v6636_v62  ;;  %v1968_v18 = vmul.f32 %v5550_v13, %v6636_v62  ;;  %v1817_v42 = vmul.f32 %v5052_v7, %v6633_v41  ;;  %v4750_v63 = vld [vmem:[%s6311_s29 + $0x190] sm:$0xff]   ;;  %v10267_v13 = vld [vmem:[#allocation35_spill] sm:$0xff] }
 0x1b8   : > { %10259 = vst [vmem:[#allocation97_spill] sm:$0xff] %v7592_v10  ;;  %5902 = vperm.xlu0 %5885, %v10260_v52   ;;  %10262 = vst [vmem:[#allocation98_spill] sm:$0xff] %v7601_v60  ;;  %v1813_v52 = vmul.f32 %v5042_v58, %v6633_v41  ;;  %v5061_v0 = vunpack.i.l.bf16 %v6984_v47  ;;  %v1973_v58 = vmul.f32 %v5556_v38, %v6636_v62  ;;  %v5561_v20 = vunpack.i.h.bf16 %v7026_v29 }
 0x1b9   : > { %v1816_v55 = vmul.f32 %v5051_v56, %v6633_v41  ;;  %v1972_v25 = vmul.f32 %v5555_v4, %v6636_v62  ;;  %v7636_v61 = vadd.f32 %v1969_v17, %v1809_v54  ;;  %v5072_v57 = vunpack.i.h.bf16 %v10267_v13 }
 0x1ba   : > { %v7612_v43 = vpop.permute.xlu0 %5705  ;;  %v5560_v7 = vunpack.i.l.bf16 %v7026_v29  ;;  %v7643_v38 = vadd.f32 %v1968_v18, %v1808_v35  ;;  %v5071_v56 = vunpack.i.l.bf16 %v10267_v13  ;;  %v4647_v4 = vunpack.c.l.bf16 %v4750_v63  ;;  %v10273_v13 = vld [vmem:[#allocation116_spill] sm:$0xff] }
 0x1bb   : > { %5370 = vperm.xlu1 %5333, %v6677_v21   ;;  %v7618_v33 = vpop.permute.xlu1 %5177  ;;  %v4648_v60 = vunpack.c.h.bf16 %v4750_v63  ;;  %v1821_v21 = vmul.f32 %v5062_v2, %v6633_v41  ;;  %v1820_v54 = vmul.f32 %v5061_v0, %v6633_v41  ;;  %v7649_v17 = vadd.f32 %v1973_v58, %v1813_v52  ;;  %v10275_v58 = vld [vmem:[#allocation11_spill] sm:$0xff] }
 0x1bc   : > { %10264 = vst [vmem:[#allocation5_spill] sm:$0xff] %v7618_v33  ;;  %5907 = vperm.xlu0 %5885, %v10265_v1   ;;  %v10268_v1 = vld [vmem:[#allocation61_spill] sm:$0xff]  ;;  %v7651_v10 = vadd.f32 %v1972_v25, %v1812_v24  ;;  %v1977_v29 = vmul.f32 %v5561_v20, %v6636_v62  ;;  %v1976_v63 = vmul.f32 %v5560_v7, %v6636_v62  ;;  %v5082_v2 = vunpack.i.h.bf16 %v10273_v13 }
 0x1bd   : > { %v5081_v0 = vunpack.i.l.bf16 %v10273_v13  ;;  %v1824_v52 = vmul.f32 %v5071_v56, %v6633_v41  ;;  %v10276_v25 = vld [vmem:[#allocation9_spill] sm:$0xff]  ;;  %v7668_v20 = vpack.i.bf16 %v4648_v60, %v4647_v4 }
 0x1be   : > { %v7634_v36 = vpop.permute.xlu0 %5710  ;;  %v1829_v60 = vmul.f32 %v5082_v2, %v6633_v41 }
 0x1bf   : > { %10266 = vst [vmem:[#allocation108_spill] sm:$0xff] %v7634_v36  ;;  %5375 = vperm.xlu1 %5333, %v10268_v1   ;;  %v7641_v47 = vpop.permute.xlu1 %5182  ;;  %v10271_v1 = vld [vmem:[#allocation39_spill] sm:$0xff]  ;;  %10277 = vst [vmem:[#allocation6_spill] sm:$0xff] %v7668_v20  ;;  %v7674_v36 = vadd.f32 %v1977_v29, %v1817_v42  ;;  %v1828_v4 = vmul.f32 %v5081_v0, %v6633_v41  ;;  %v10283_v42 = vld [vmem:[#allocation52_spill] sm:$0xff] }
 0x1c0   : > { %10269 = vst [vmem:[#allocation109_spill] sm:$0xff] %v7641_v47  ;;  %5912 = vperm.xlu0 %5885, %v10270_v59   ;;  %v5566_v47 = vunpack.i.h.bf16 %v10271_v1  ;;  %v5565_v35 = vunpack.i.l.bf16 %v10271_v1  ;;  %v1825_v59 = vmul.f32 %v5072_v57, %v6633_v41  ;;  %v10278_v1 = vld [vmem:[#allocation122_spill] sm:$0xff]  ;;  %v5576_v29 = vunpack.i.h.bf16 %v10283_v42 }
 0x1c1   : > { %v5088_v57 = vunpack.i.h.bf16 %v10278_v1  ;;  %v5087_v7 = vunpack.i.l.bf16 %v10278_v1 }
 0x1c2   : > { %v7656_v18 = vpop.permute.xlu0 %5715  ;;  %v1980_v56 = vmul.f32 %v5565_v35, %v6636_v62  ;;  %v10284_v35 = vld [vmem:[#allocation10_spill] sm:$0xff] }
 0x1c3   : > { %10272 = vst [vmem:[#allocation103_spill] sm:$0xff] %v7656_v18  ;;  %5379 = vset.pattern.permute.xlu1 %v10229_v28  ;;  %v7663_v24 = vpop.permute.xlu1 %5187  ;;  %v10279_v18 = vld [vmem:[#allocation123_spill] sm:$0xff]  ;;  %v1981_v28 = vmul.f32 %v5566_v47, %v6636_v62  ;;  %v5575_v47 = vunpack.i.l.bf16 %v10283_v42 }
 0x1c4   : > { %10274 = vst [vmem:[#allocation41_spill] sm:$0xff] %v7663_v24  ;;  %5381 = vperm.xlu1 %5379, %v10275_v58   ;;  %5917 = vperm.xlu0 %5885, %v10276_v25   ;;  %v5571_v16 = vunpack.i.h.bf16 %v10279_v18  ;;  %v5570_v13 = vunpack.i.l.bf16 %v10279_v18  ;;  %v7680_v58 = vadd.f32 %v1976_v63, %v1816_v55  ;;  %v10281_v25 = vld [vmem:[#allocation48_spill] sm:$0xff]  ;;  %v1961_v55 = vmul.f32 %v5088_v57, %v6636_v62 }
 0x1c5   : > { %v5092_v1 = vunpack.i.l.bf16 %v10281_v25  ;;  %v5093_v18 = vunpack.i.h.bf16 %v10281_v25  ;;  %v1960_v63 = vmul.f32 %v5087_v7, %v6636_v62  ;;  %v7696_v41 = vadd.f32 %v1981_v28, %v1821_v21  ;;  %v10286_v25 = vld [vmem:[#allocation130_spill] sm:$0xff]  ;;  %v10289_v21 = vld [vmem:[#allocation12_spill] sm:$0xff]  ;;  %v10290_v28 = vld [vmem:[#allocation25_spill] sm:$0xff] }
 0x1c6   : > { %v7678_v24 = vpop.permute.xlu0 %5720  ;;  %v1985_v2 = vmul.f32 %v5571_v16, %v6636_v62  ;;  %v1984_v0 = vmul.f32 %v5570_v13, %v6636_v62  ;;  %v5098_v42 = vunpack.i.h.bf16 %v10286_v25  ;;  %v1989_v16 = vmul.f32 %v5576_v29, %v6636_v62 }
 0x1c7   : > { %10280 = vst [vmem:[#allocation107_spill] sm:$0xff] %v7678_v24  ;;  %v7685_v14 = vpop.permute.xlu1 %5192  ;;  %10285 = vst [vmem:[#allocation35_spill] sm:$0xff] %v7696_v41  ;;  %v5097_v24 = vunpack.i.l.bf16 %v10286_v25  ;;  %v1963_v57 = vmul.f32 %v5093_v18, %v6636_v62  ;;  %v1988_v7 = vmul.f32 %v5575_v47, %v6636_v62  ;;  %v10296_v41 = vld [vmem:[#allocation59_spill] sm:$0xff] }
 0x1c8   : > { %10282 = vst [vmem:[#allocation7_spill] sm:$0xff] %v7685_v14  ;;  %5386 = vperm.xlu1 %5379, %v6899_v40   ;;  %5922 = vperm.xlu0 %5885, %v10284_v35   ;;  %v7698_v14 = vadd.f32 %v1980_v56, %v1820_v54  ;;  %v1962_v40 = vmul.f32 %v5092_v1, %v6636_v62  ;;  %v10291_v54 = vld [vmem:[#allocation110_spill] sm:$0xff] }
 0x1c9   : > { %v7713_v13 = vadd.f32 %v1960_v63, %v10291_v54  ;;  %v10293_v56 = vld [vmem:[#allocation34_spill] sm:$0xff]  ;;  %v7718_v1 = vadd.f32 %v1985_v2, %v1825_v59  ;;  %v7720_v25 = vadd.f32 %v1984_v0, %v1824_v52  ;;  %v1966_v18 = vmul.f32 %v5097_v24, %v6636_v62  ;;  %v10300_v0 = vld [vmem:[#allocation13_spill] sm:$0xff]  ;;  %v10302_v54 = vld [vmem:[#allocation60_spill] sm:$0xff] }
 0x1ca   : > { %v7701_v9 = vpop.permute.xlu0 %5725  ;;  %v7729_v63 = vadd.f32 %v1962_v40, %v7547_v44  ;;  %v7735_v59 = vadd.f32 %v1963_v57, %v7544_v3  ;;  %v7737_v52 = vadd.f32 %v1989_v16, %v1829_v60  ;;  %v7739_v24 = vadd.f32 %v1988_v7, %v1828_v4  ;;  %v10307_v57 = vld [vmem:[#allocation112_spill] sm:$0xff]  ;;  %v10309_v7 = vld [vmem:[#allocation134_spill] sm:$0xff] }
 0x1cb   : > { %10287 = vst [vmem:[#allocation8_spill] sm:$0xff] %v7701_v9  ;;  %v7705_v35 = vpop.permute.xlu1 %5197  ;;  %10292 = vst [vmem:[#allocation116_spill] sm:$0xff] %v7713_v13  ;;  %v7716_v9 = vadd.f32 %v1961_v55, %v10293_v56  ;;  %v1967_v55 = vmul.f32 %v5098_v42, %v6636_v62  ;;  %v5103_v2 = vunpack.i.h.bf16 %v10296_v41  ;;  %v5586_v44 = vunpack.i.h.bf16 %v10302_v54  ;;  %v10303_v42 = vld [vmem:[#allocation113_spill] sm:$0xff] }
 0x1cc   : > { %10288 = vst [vmem:[#allocation39_spill] sm:$0xff] %v7705_v35  ;;  %5391 = vperm.xlu1 %5379, %v10289_v21   ;;  %5927 = vperm.xlu0 %5885, %v10290_v28   ;;  %v10295_v35 = vld [vmem:[#allocation131_spill] sm:$0xff]  ;;  %v5102_v21 = vunpack.i.l.bf16 %v10296_v41  ;;  %10299 = vst [vmem:[#allocation123_spill] sm:$0xff] %v7737_v52  ;;  %v5585_v40 = vunpack.i.l.bf16 %v10302_v54  ;;  %v7747_v56 = vadd.f32 %v1966_v18, %v10303_v42  ;;  %v10310_v42 = vld [vmem:[#allocation14_spill] sm:$0xff] }
 0x1cd   : > { %10294 = vst [vmem:[#allocation11_spill] sm:$0xff] %v7716_v9  ;;  %v5581_v29 = vunpack.i.h.bf16 %v10295_v35  ;;  %v5580_v47 = vunpack.i.l.bf16 %v10295_v35  ;;  %v10301_v35 = vld [vmem:[#allocation26_spill] sm:$0xff]  ;;  %v7757_v16 = vadd.f32 %v1967_v55, %v10307_v57  ;;  %v1971_v18 = vmul.f32 %v5103_v2, %v6636_v62  ;;  %v10314_v57 = vld [vmem:[#allocation85_spill] sm:$0xff]  ;;  %v10317_v2 = vld [vmem:[#allocation135_spill] sm:$0xff] }
 0x1ce   : > { %v7726_v33 = vpop.permute.xlu0 %5730  ;;  %10304 = vst [vmem:[#allocation48_spill] sm:$0xff] %v7747_v56  ;;  %v1970_v4 = vmul.f32 %v5102_v21, %v6636_v62  ;;  %v7767_v21 = vmul.f32 %v5586_v44, %v6636_v62  ;;  %v7770_v55 = vmul.f32 %v5585_v40, %v6636_v62  ;;  %v5591_v56 = vunpack.i.h.bf16 %v10317_v2 }
 0x1cf   : > { %10297 = vst [vmem:[#allocation9_spill] sm:$0xff] %v7726_v33  ;;  %v7732_v28 = vpop.permute.xlu1 %5202  ;;  %v7750_v3 = vmul.f32 %v5581_v29, %v6636_v62  ;;  %v7753_v60 = vmul.f32 %v5580_v47, %v6636_v62  ;;  %10308 = vst [vmem:[#allocation130_spill] sm:$0xff] %v7757_v16  ;;  %v5108_v29 = vunpack.i.h.bf16 %v10309_v7  ;;  %v10311_v47 = vld [vmem:[#allocation27_spill] sm:$0xff] }
 0x1d0   : > { %10298 = vst [vmem:[#allocation122_spill] sm:$0xff] %v7732_v28  ;;  %5396 = vperm.xlu1 %5379, %v10300_v0   ;;  %5932 = vperm.xlu0 %5885, %v10301_v35   ;;  %v5107_v0 = vunpack.i.l.bf16 %v10309_v7  ;;  %10312 = vst [vmem:[#allocation12_spill] sm:$0xff] %v7767_v21  ;;  %v5590_v7 = vunpack.i.l.bf16 %v10317_v2  ;;  %v10320_v21 = vld [vmem:[#allocation50_spill] sm:$0xff] }
 0x1d1   : > { %10305 = vst [vmem:[#allocation52_spill] sm:$0xff] %v7750_v3  ;;  %10306 = vst [vmem:[#allocation10_spill] sm:$0xff] %v7753_v60  ;;  %v10315_v60 = vld [vmem:[#allocation114_spill] sm:$0xff] }
 0x1d2   : > { %v5736_v41 = vpop.permute.xlu0 %5735  ;;  %10313 = vst [vmem:[#allocation25_spill] sm:$0xff] %v7770_v55  ;;  %v7775_v16 = vadd.f32 %v1970_v4, %v10315_v60  ;;  %v1974_v44 = vmul.f32 %v5107_v0, %v6636_v62  ;;  %v1975_v60 = vmul.f32 %v5108_v29, %v6636_v62  ;;  %v10323_v4 = vld [vmem:[#allocation68_spill] sm:$0xff]  ;;  %v10324_v2 = vld [vmem:[#allocation138_spill] sm:$0xff]  ;;  %v7805_v29 = vmul.f32 %v5591_v56, %v6636_v62 }
 0x1d3   : > { %v5738_v35 = vunpack.i.h.bf16 %v5736_v41  ;;  %v5737_v9 = vunpack.i.l.bf16 %v5736_v41  ;;  %v7760_v54 = vpop.permute.xlu1 %5207  ;;  %v5117_v52 = vunpack.i.l.bf16 %v10324_v2  ;;  %v10325_v0 = vld [vmem:[#allocation28_spill] sm:$0xff] }
 0x1d4   : > { %5401 = vperm.xlu1 %5379, %v10310_v42   ;;  %5937 = vperm.xlu0 %5885, %v10311_v47   ;;  %10316 = vst [vmem:[#allocation110_spill] sm:$0xff] %v7775_v16  ;;  %v10318_v42 = vld [vmem:[#allocation15_spill] sm:$0xff]  ;;  %v5596_v16 = vunpack.i.h.bf16 %v10323_v4  ;;  %10328 = vst [vmem:[#allocation13_spill] sm:$0xff] %v7805_v29 }
 0x1d5   : > { %v1342_v3 = vmul.f32 %v5738_v35, %v10314_v57  ;;  %v1341_v41 = vmul.f32 %v5737_v9, %v10314_v57  ;;  %v5112_v13 = vunpack.i.l.bf16 %v10318_v42  ;;  %v5113_v40 = vunpack.i.h.bf16 %v10318_v42  ;;  %v10321_v35 = vld [vmem:[#allocation51_spill] sm:$0xff]  ;;  %v10322_v9 = vld [vmem:[#allocation36_spill] sm:$0xff] }
 0x1d6   : > { %v7780_v47 = vpop.permute.xlu0 %5740  ;;  %v7787_v33 = vadd.f32 %v1971_v18, %v10322_v9  ;;  %v5595_v42 = vunpack.i.l.bf16 %v10323_v4  ;;  %v7814_v4 = vmul.f32 %v5590_v7, %v6636_v62  ;;  %v7828_v7 = vmul.f32 %v5596_v16, %v6636_v62 }
 0x1d7   : > { %10319 = vst [vmem:[#allocation34_spill] sm:$0xff] %v7780_v47  ;;  %v1373_v55 = vadd.f32 %v1341_v41, %v10320_v21  ;;  %v1374_v28 = vadd.f32 %v1342_v3, %v10321_v35  ;;  %v5118_v21 = vunpack.i.h.bf16 %v10324_v2  ;;  %v1978_v41 = vmul.f32 %v5112_v13, %v6636_v62  ;;  %v10329_v35 = vld [vmem:[#allocation40_spill] sm:$0xff] }
 0x1d8   : > { %5406 = vperm.xlu1 %5379, %v10153_v32   ;;  %v7793_v47 = vpop.permute.xlu1 %5213  ;;  %5942 = vperm.xlu0 %5885, %v10325_v0   ;;  %v7811_v9 = vadd.f32 %v1974_v44, %v10329_v35  ;;  %10330 = vst [vmem:[#allocation26_spill] sm:$0xff] %v7814_v4  ;;  %v1979_v2 = vmul.f32 %v5113_v40, %v6636_v62  ;;  %v10332_v0 = vld [vmem:[#allocation37_spill] sm:$0xff]  ;;  %10335 = vst [vmem:[#allocation113_spill] sm:$0xff] %v7828_v7 }
 0x1d9   : > { %v7799_v3 = vadd.f32 %v7499_v23, %v1373_v55  ;;  %v7802_v18 = vadd.f32 %v7491_v50, %v1374_v28  ;;  %v10331_v23 = vld [vmem:[#allocation139_spill] sm:$0xff]  ;;  %v7819_v50 = vadd.f32 %v1975_v60, %v10332_v0  ;;  %v1982_v28 = vmul.f32 %v5117_v52, %v6636_v62  ;;  %v10334_v44 = vld [vmem:[#allocation29_spill] sm:$0xff]  ;;  %v10338_v52 = vld [vmem:[#allocation142_spill] sm:$0xff] }
 0x1da   : > { %v7808_v32 = vpop.permute.xlu0 %5745  ;;  %v5601_v55 = vunpack.i.h.bf16 %v10331_v23  ;;  %v5600_v56 = vunpack.i.l.bf16 %v10331_v23  ;;  %v7831_v40 = vmul.f32 %v5595_v42, %v6636_v62  ;;  %v1983_v35 = vmul.f32 %v5118_v21, %v6636_v62  ;;  %v10337_v60 = vld [vmem:[#allocation119_spill] sm:$0xff]  ;;  %v10341_v21 = vld [vmem:[#allocation124_spill] sm:$0xff] }
 0x1db   : > { %10326 = vst [vmem:[#allocation131_spill] sm:$0xff] %v7799_v3  ;;  %10327 = vst [vmem:[#allocation59_spill] sm:$0xff] %v7802_v18  ;;  %v7835_v0 = vadd.f32 %v1978_v41, %v10337_v60  ;;  %v5606_v29 = vunpack.i.h.bf16 %v10338_v52  ;;  %v5129_v23 = vunpack.i.h.bf16 %v7341_v45  ;;  %v5605_v42 = vunpack.i.l.bf16 %v10338_v52 }
 0x1dc   : > { %10333 = vst [vmem:[#allocation60_spill] sm:$0xff] %v7819_v50  ;;  %5411 = vperm.xlu1 %5379, %v10160_v6   ;;  %v7824_v13 = vpop.permute.xlu1 %5223  ;;  %5947 = vperm.xlu0 %5885, %v10334_v44   ;;  %10336 = vst [vmem:[#allocation112_spill] sm:$0xff] %v7831_v40  ;;  %v5128_v6 = vunpack.i.l.bf16 %v7341_v45  ;;  %v10339_v44 = vld [vmem:[#allocation43_spill] sm:$0xff]  ;;  %v7846_v16 = vmul.f32 %v5601_v55, %v6636_v62  ;;  %v7850_v7 = vadd.f32 %v1982_v28, %v10341_v21  ;;  %v10344_v40 = vld [vmem:[#allocation30_spill] sm:$0xff] }
 0x1dd   : > { %v7843_v50 = vadd.f32 %v1979_v2, %v10339_v44  ;;  %v7853_v41 = vmul.f32 %v5600_v56, %v6636_v62  ;;  %v5611_v60 = vunpack.i.h.bf16 %v7330_v51  ;;  %v10345_v2 = vld [vmem:[#allocation121_spill] sm:$0xff]  ;;  %v5610_v55 = vunpack.i.l.bf16 %v7330_v51 }
 0x1de   : > { %v7840_v4 = vpop.permute.xlu0 %5750  ;;  %10340 = vst [vmem:[#allocation134_spill] sm:$0xff] %v7846_v16  ;;  %10342 = vst [vmem:[#allocation14_spill] sm:$0xff] %v7850_v7  ;;  %v7861_v44 = vadd.f32 %v1983_v35, %v10345_v2  ;;  %v5134_v52 = vunpack.i.h.bf16 %v7367_v26  ;;  %v5133_v28 = vunpack.i.l.bf16 %v7367_v26  ;;  %v7867_v56 = vmul.f32 %v5606_v29, %v6636_v62 }
 0x1df   : > { %10343 = vst [vmem:[#allocation27_spill] sm:$0xff] %v7853_v41  ;;  %v2151_v21 = vmul.f32 %v5129_v23, %v10314_v57  ;;  %v5616_v35 = vunpack.i.h.bf16 %v7357_v30  ;;  %v5615_v51 = vunpack.i.l.bf16 %v7357_v30  ;;  %v7879_v2 = vmul.f32 %v5611_v60, %v6636_v62 }
 0x1e0   : > { %5416 = vperm.xlu1 %5379, %v10168_v12   ;;  %v7857_v45 = vpop.permute.xlu1 %5228  ;;  %5952 = vperm.xlu0 %5885, %v10344_v40   ;;  %10346 = vst [vmem:[#allocation85_spill] sm:$0xff] %v7861_v44  ;;  %10347 = vst [vmem:[#allocation114_spill] sm:$0xff] %v7867_v56  ;;  %v2150_v12 = vmul.f32 %v5128_v6, %v10314_v57  ;;  %v7874_v40 = vmul.f32 %v5605_v42, %v6636_v62  ;;  %v5139_v26 = vunpack.i.h.bf16 %v7399_v48  ;;  %v10350_v44 = vmov 0   ;;  %v10351_v6 = vld [vmem:[#allocation31_spill] sm:$0xff] }
 0x1e1   : > { %10349 = vst [vmem:[#allocation15_spill] sm:$0xff] %v7879_v2  ;;  %v5138_v29 = vunpack.i.l.bf16 %v7399_v48  ;;  %v7888_v42 = vmul.f32 %v5610_v55, %v6636_v62  ;;  %v2155_v56 = vmul.f32 %v5134_v52, %v10314_v57  ;;  %v2154_v30 = vmul.f32 %v5133_v28, %v10314_v57 }
 0x1e2   : > { %v7871_v7 = vpop.permute.xlu0 %5755  ;;  %10348 = vst [vmem:[#allocation135_spill] sm:$0xff] %v7874_v40  ;;  %v10353_v40 = vld [vmem:[#allocation64_spill] sm:$0xff]  ;;  %v7894_v60 = vadd.f32 %v2150_v12, %v7608_v37  ;;  %v7897_v48 = vadd.f32 %v2151_v21, %v7606_v31  ;;  %v5143_v2 = vunpack.i.l.bf16 %v7426_v49  ;;  %v7904_v55 = vmul.f32 %v5616_v35, %v6636_v62 }
 0x1e3   : > { %10352 = vst [vmem:[#allocation50_spill] sm:$0xff] %v7888_v42  ;;  %v7907_v52 = vmul.f32 %v5615_v51, %v6636_v62  ;;  %v5626_v28 = vunpack.i.h.bf16 %v7391_v8  ;;  %v5625_v37 = vunpack.i.l.bf16 %v7391_v8  ;;  %v2157_v12 = vmul.f32 %v5139_v26, %v10314_v57  ;;  %v10358_v42 = vld [vmem:[#allocation32_spill] sm:$0xff] }
 0x1e4   : > { %5420 = vset.pattern.permute.xlu1 %v10350_v44  ;;  %v7884_v23 = vpop.permute.xlu1 %5238  ;;  %5957 = vperm.xlu0 %5885, %v10351_v6   ;;  %10354 = vst [vmem:[#allocation51_spill] sm:$0xff] %v7894_v60  ;;  %10355 = vst [vmem:[#allocation36_spill] sm:$0xff] %v7897_v48  ;;  %v5144_v44 = vunpack.i.h.bf16 %v7426_v49  ;;  %v2156_v31 = vmul.f32 %v5138_v29, %v10314_v57  ;;  %v7917_v49 = vadd.f32 %v2154_v30, %v7729_v63 }
 0x1e5   : > { %5422 = vperm.xlu1 %5420, %v10353_v40   ;;  %10356 = vst [vmem:[#allocation68_spill] sm:$0xff] %v7904_v55  ;;  %10357 = vst [vmem:[#allocation138_spill] sm:$0xff] %v7907_v52  ;;  %v7920_v35 = vadd.f32 %v2155_v56, %v7735_v59  ;;  %v5642_v51 = vunpack.i.h.bf16 %v7416_v22  ;;  %v5641_v55 = vunpack.i.l.bf16 %v7416_v22  ;;  %v2160_v26 = vmul.f32 %v5143_v2, %v10314_v57 }
 0x1e6   : > { %v7901_v6 = vpop.permute.xlu0 %5760  ;;  %v2161_v8 = vmul.f32 %v5144_v44, %v10314_v57  ;;  %v5149_v29 = vunpack.i.h.bf16 %v7454_v11  ;;  %v7932_v63 = vmul.f32 %v5626_v28, %v6636_v62  ;;  %v7935_v59 = vmul.f32 %v5625_v37, %v6636_v62  ;;  %v10366_v37 = vld [vmem:[#allocation67_spill] sm:$0xff] }
 0x1e7   : > { %v5652_v22 = vunpack.i.h.bf16 %v7449_v19  ;;  %v5651_v56 = vunpack.i.l.bf16 %v7449_v19  ;;  %v7940_v30 = vadd.f32 %v2156_v31, %v7622_v46  ;;  %v7943_v2 = vadd.f32 %v2157_v12, %v7620_v39 }
 0x1e8   : > { %v7913_v21 = vpop.permute.xlu1 %5248  ;;  %5962 = vperm.xlu0 %5885, %v10358_v42   ;;  %v5148_v42 = vunpack.i.l.bf16 %v7454_v11  ;;  %10360 = vst [vmem:[#allocation40_spill] sm:$0xff] %v7932_v63  ;;  %10361 = vst [vmem:[#allocation139_spill] sm:$0xff] %v7935_v59  ;;  %v7949_v11 = vmul.f32 %v5642_v51, %v6636_v62  ;;  %v7952_v28 = vmul.f32 %v5641_v55, %v6636_v62  ;;  %v5154_v55 = vunpack.i.h.bf16 %v7480_v5  ;;  %v10376_v59 = vld [vmem:[#allocation86_spill] sm:$0xff] }
 0x1e9   : > { %5432 = vperm.xlu1 %5420, %v7668_v20   ;;  %10362 = vst [vmem:[#allocation37_spill] sm:$0xff] %v7940_v30  ;;  %10363 = vst [vmem:[#allocation29_spill] sm:$0xff] %v7943_v2  ;;  %v7956_v19 = vadd.f32 %v2160_v26, %v7643_v38  ;;  %v7959_v46 = vadd.f32 %v2161_v8, %v7636_v61  ;;  %v2165_v39 = vmul.f32 %v5149_v29, %v10314_v57  ;;  %v10418_v30 = vld [vmem:[#allocation75_spill] sm:$0xff] }
 0x1ea   : > { %v7929_v52 = vpop.permute.xlu0 %5765  ;;  %10364 = vst [vmem:[#allocation119_spill] sm:$0xff] %v7949_v11  ;;  %10365 = vst [vmem:[#allocation142_spill] sm:$0xff] %v7952_v28  ;;  %v2164_v12 = vmul.f32 %v5148_v42, %v10314_v57  ;;  %v7967_v51 = vmul.f32 %v5651_v56, %v6636_v62  ;;  %v5153_v11 = vunpack.i.l.bf16 %v7480_v5  ;;  %v5210_v38 = vunpack.i.h.bf16 %v7760_v54  ;;  %v10372_v56 = vld [vmem:[#allocation69_spill] sm:$0xff] }
 0x1eb   : > { %10359 = vst [vmem:[#allocation28_spill] sm:$0xff] %v7929_v52  ;;  %10367 = vst [vmem:[#allocation43_spill] sm:$0xff] %v7956_v19  ;;  %v5209_v61 = vunpack.i.l.bf16 %v7760_v54  ;;  %v5662_v42 = vunpack.i.h.bf16 %v7475_v27  ;;  %v7983_v5 = vadd.f32 %v2165_v39, %v7649_v17  ;;  %v5158_v63 = vunpack.i.l.bf16 %v7507_v53  ;;  %v10377_v17 = vld [vmem:[#allocation147_spill] sm:$0xff] }
 0x1ec   : > { %v7945_v44 = vpop.permute.xlu1 %5258  ;;  %5967 = vperm.xlu0 %5885, %v6600_v34   ;;  %10368 = vst [vmem:[#allocation124_spill] sm:$0xff] %v7959_v46  ;;  %v7964_v34 = vmul.f32 %v5652_v22, %v6636_v62  ;;  %10370 = vst [vmem:[#allocation121_spill] sm:$0xff] %v7967_v51  ;;  %v5661_v22 = vunpack.i.l.bf16 %v7475_v27  ;;  %v2168_v28 = vmul.f32 %v5153_v11, %v10314_v57  ;;  %v5159_v27 = vunpack.i.h.bf16 %v7507_v53  ;;  %v10383_v46 = vld [vmem:[#allocation84_spill] sm:$0xff]  ;;  %v10384_v19 = vld [vmem:[#allocation71_spill] sm:$0xff] }
 0x1ed   : > { %5437 = vperm.xlu1 %5420, %v10366_v37   ;;  %10374 = vst [vmem:[#allocation161_spill] sm:$0xff] %v7983_v5  ;;  %v10378_v5 = vld [vmem:[#allocation148_spill] sm:$0xff]  ;;  %v5672_v53 = vunpack.i.h.bf16 %v10383_v46 }
 0x1ee   : > { %v5771_v31 = vpop.permute.xlu0 %5770  ;;  %10369 = vst [vmem:[#allocation30_spill] sm:$0xff] %v7964_v34  ;;  %v7980_v34 = vadd.f32 %v2164_v12, %v7651_v10  ;;  %v2371_v10 = vmul.f32 %v5210_v38, %v10376_v59  ;;  %v2370_v12 = vmul.f32 %v5209_v61, %v10376_v59  ;;  %v8004_v11 = vmul.f32 %v5661_v22, %v6636_v62  ;;  %v10385_v61 = vld [vmem:[#allocation100_spill] sm:$0xff] }
 0x1ef   : > { %v5773_v8 = vunpack.i.h.bf16 %v5771_v31  ;;  %v5772_v26 = vunpack.i.l.bf16 %v5771_v31  ;;  %v5671_v38 = vunpack.i.l.bf16 %v10383_v46  ;;  %v2173_v46 = vmul.f32 %v5159_v27, %v10314_v57  ;;  %v10396_v27 = vld [vmem:[#allocation73_spill] sm:$0xff] }
 0x1f0   : > { %v7973_v29 = vpop.permute.xlu1 %5268  ;;  %5972 = vperm.xlu0 %5885, %v10070_v15   ;;  %10373 = vst [vmem:[#allocation32_spill] sm:$0xff] %v7980_v34  ;;  %v2169_v15 = vmul.f32 %v5154_v55, %v10314_v57  ;;  %v8001_v55 = vmul.f32 %v5662_v42, %v6636_v62  ;;  %10382 = vst [vmem:[#allocation148_spill] sm:$0xff] %v8004_v11  ;;  %v8017_v42 = vadd.f32 %v2168_v28, %v7680_v58 }
 0x1f1   : > { %10371 = vst [vmem:[#allocation31_spill] sm:$0xff] %v7973_v29  ;;  %5447 = vperm.xlu1 %5420, %v10372_v56   ;;  %v2179_v54 = vmul.f32 %v5773_v8, %v10314_v57  ;;  %v2178_v31 = vmul.f32 %v5772_v26, %v10314_v57  ;;  %v10380_v26 = vld [vmem:[#allocation44_spill] sm:$0xff]  ;;  %v8033_v58 = vmul.f32 %v5672_v53, %v6636_v62 }
 0x1f2   : > { %v7987_v51 = vpop.permute.xlu0 %5775  ;;  %10381 = vst [vmem:[#allocation147_spill] sm:$0xff] %v8001_v55  ;;  %10389 = vst [vmem:[#allocation100_spill] sm:$0xff] %v8017_v42  ;;  %v8020_v22 = vadd.f32 %v2169_v15, %v7674_v36  ;;  %v5164_v55 = vunpack.i.h.bf16 %v10385_v61  ;;  %v8036_v36 = vmul.f32 %v5671_v38, %v6636_v62  ;;  %v5708_v38 = vunpack.i.h.bf16 %v7612_v43 }
 0x1f3   : > { %10375 = vst [vmem:[#allocation162_spill] sm:$0xff] %v7987_v51  ;;  %v2210_v39 = vadd.f32 %v2178_v31, %v10377_v17  ;;  %v2211_v8 = vadd.f32 %v2179_v54, %v10378_v5  ;;  %v5163_v31 = vunpack.i.l.bf16 %v10385_v61  ;;  %v10472_v51 = vld [vmem:[#allocation19_spill] sm:$0xff] }
 0x1f4   : > { %v7997_v34 = vpop.permute.xlu1 %5278  ;;  %5977 = vperm.xlu0 %5885, %v10380_v26   ;;  %10390 = vst [vmem:[#allocation163_spill] sm:$0xff] %v8020_v22  ;;  %v2172_v26 = vmul.f32 %v5158_v63, %v10314_v57  ;;  %10394 = vst [vmem:[#allocation165_spill] sm:$0xff] %v8036_v36  ;;  %v10395_v63 = vld [vmem:[#allocation99_spill] sm:$0xff]  ;;  %v10403_v36 = vld [vmem:[#allocation94_spill] sm:$0xff] }
 0x1f5   : > { %10379 = vst [vmem:[#allocation86_spill] sm:$0xff] %v7997_v34  ;;  %5457 = vperm.xlu1 %5420, %v10384_v19   ;;  %v8010_v17 = vadd.f32 %v2370_v12, %v2210_v39  ;;  %v8012_v5 = vadd.f32 %v2371_v10, %v2211_v8  ;;  %v10392_v8 = vld [vmem:[#allocation47_spill] sm:$0xff]  ;;  %v5682_v28 = vunpack.i.h.bf16 %v10395_v63  ;;  %v5681_v15 = vunpack.i.l.bf16 %v10395_v63  ;;  %v10397_v12 = vld [vmem:[#allocation101_spill] sm:$0xff] }
 0x1f6   : > { %v8014_v54 = vpop.permute.xlu0 %5780  ;;  %10393 = vst [vmem:[#allocation47_spill] sm:$0xff] %v8033_v58  ;;  %v2176_v61 = vmul.f32 %v5163_v31, %v10314_v57  ;;  %v5169_v10 = vunpack.i.h.bf16 %v10397_v12  ;;  %v8048_v53 = vadd.f32 %v2172_v26, %v7698_v14  ;;  %v10401_v63 = vld [vmem:[#allocation35_spill] sm:$0xff]  ;;  %v2177_v31 = vmul.f32 %v5164_v55, %v10314_v57  ;;  %v10404_v22 = vld [vmem:[#allocation49_spill] sm:$0xff]  ;;  %v10407_v26 = vld [vmem:[#allocation74_spill] sm:$0xff] }
 0x1f7   : > { %10386 = vst [vmem:[#allocation44_spill] sm:$0xff] %v8010_v17  ;;  %10387 = vst [vmem:[#allocation84_spill] sm:$0xff] %v8012_v5  ;;  %v5168_v5 = vunpack.i.l.bf16 %v10397_v12  ;;  %v10400_v17 = vld [vmem:[#allocation5_spill] sm:$0xff]  ;;  %v8053_v58 = vadd.f32 %v2173_v46, %v10401_v63  ;;  %v5692_v11 = vunpack.i.h.bf16 %v10403_v36  ;;  %v8060_v42 = vmul.f32 %v5682_v28, %v6636_v62 }
 0x1f8   : > { %10388 = vst [vmem:[#allocation71_spill] sm:$0xff] %v8014_v54  ;;  %v8029_v39 = vpop.permute.xlu1 %5288  ;;  %5982 = vperm.xlu0 %5885, %v10392_v8   ;;  %v5707_v8 = vunpack.i.l.bf16 %v7612_v43  ;;  %10399 = vst [vmem:[#allocation73_spill] sm:$0xff] %v8048_v53  ;;  %v5179_v3 = vunpack.i.l.bf16 %v10400_v17  ;;  %v5180_v12 = vunpack.i.h.bf16 %v10400_v17  ;;  %v8063_v14 = vmul.f32 %v5681_v15, %v6636_v62  ;;  %v10471_v54 = vld [vmem:[#allocation46_spill] sm:$0xff] }
 0x1f9   : > { %10391 = vst [vmem:[#allocation164_spill] sm:$0xff] %v8029_v39  ;;  %5467 = vperm.xlu1 %5420, %v10396_v27   ;;  %10402 = vst [vmem:[#allocation101_spill] sm:$0xff] %v8053_v58  ;;  %v5691_v43 = vunpack.i.l.bf16 %v10403_v36  ;;  %v8070_v55 = vadd.f32 %v2176_v61, %v7720_v25  ;;  %v2181_v63 = vmul.f32 %v5169_v10, %v10314_v57  ;;  %v10412_v58 = vld [vmem:[#allocation108_spill] sm:$0xff]  ;;  %v10415_v61 = vld [vmem:[#allocation55_spill] sm:$0xff] }
 0x1fa   : > { %v8045_v18 = vpop.permute.xlu0 %5785  ;;  %10405 = vst [vmem:[#allocation5_spill] sm:$0xff] %v8060_v42  ;;  %10406 = vst [vmem:[#allocation35_spill] sm:$0xff] %v8063_v14  ;;  %v2180_v17 = vmul.f32 %v5168_v5, %v10314_v57  ;;  %v10411_v42 = vld [vmem:[#allocation4_spill] sm:$0xff]  ;;  %v1316_v14 = vmul.f32 %v5708_v38, %v10314_v57  ;;  %v2346_v36 = vmul.f32 %v5179_v3, %v10376_v59  ;;  %v5712_v53 = vunpack.i.l.bf16 %v10412_v58  ;;  %v10417_v3 = vld [vmem:[#allocation97_spill] sm:$0xff] }
 0x1fb   : > { %10398 = vst [vmem:[#allocation99_spill] sm:$0xff] %v8045_v18  ;;  %10409 = vst [vmem:[#allocation49_spill] sm:$0xff] %v8070_v55  ;;  %v5702_v15 = vunpack.i.h.bf16 %v10411_v42  ;;  %v8082_v2 = vadd.f32 %v2177_v31, %v7718_v1  ;;  %v8085_v25 = vmul.f32 %v5692_v11, %v6636_v62  ;;  %v2347_v5 = vmul.f32 %v5180_v12, %v10376_v59  ;;  %v10421_v31 = vld [vmem:[#allocation123_spill] sm:$0xff] }
 0x1fc   : > { %5987 = vperm.xlu0 %5885, %v10404_v22   ;;  %v1315_v22 = vmul.f32 %v5707_v8, %v10314_v57  ;;  %v5713_v10 = vunpack.i.h.bf16 %v10412_v58  ;;  %v8091_v8 = vmul.f32 %v5691_v43, %v6636_v62  ;;  %v5701_v38 = vunpack.i.l.bf16 %v10411_v42 }
 0x1fd   : > { %5477 = vperm.xlu1 %5420, %v10407_v26   ;;  %v8067_v46 = vpop.permute.xlu1 %5294  ;;  %10413 = vst [vmem:[#allocation4_spill] sm:$0xff] %v8082_v2  ;;  %10414 = vst [vmem:[#allocation108_spill] sm:$0xff] %v8085_v25  ;;  %v5175_v55 = vunpack.i.h.bf16 %v10417_v3  ;;  %v8099_v11 = vadd.f32 %v2180_v17, %v7739_v24  ;;  %v8102_v12 = vadd.f32 %v2181_v63, %v10421_v31  ;;  %v5174_v58 = vunpack.i.l.bf16 %v10417_v3  ;;  %v10429_v3 = vld [vmem:[#allocation103_spill] sm:$0xff] }
 0x1fe   : > { %10408 = vst [vmem:[#allocation94_spill] sm:$0xff] %v8067_v46  ;;  %v8075_v28 = vpop.permute.xlu0 %5790  ;;  %10416 = vst [vmem:[#allocation55_spill] sm:$0xff] %v8091_v8  ;;  %v8109_v42 = vmul.f32 %v5702_v15, %v6636_v62  ;;  %v10426_v8 = vld [vmem:[#allocation111_spill] sm:$0xff]  ;;  %v8113_v48 = vadd.f32 %v2346_v36, %v7917_v49  ;;  %v1321_v24 = vmul.f32 %v5712_v53, %v10314_v57  ;;  %v5718_v31 = vunpack.i.h.bf16 %v10429_v3  ;;  %v10432_v49 = vld [vmem:[#allocation109_spill] sm:$0xff] }
 0x1ff   : > { %10410 = vst [vmem:[#allocation74_spill] sm:$0xff] %v8075_v28  ;;  %10420 = vst [vmem:[#allocation75_spill] sm:$0xff] %v8099_v11  ;;  %v1348_v2 = vadd.f32 %v1316_v14, %v10426_v8  ;;  %v8117_v17 = vadd.f32 %v2347_v5, %v7920_v35  ;;  %v1322_v63 = vmul.f32 %v5713_v10, %v10314_v57  ;;  %v5185_v36 = vunpack.i.h.bf16 %v10432_v49  ;;  %v10433_v35 = vld [vmem:[#allocation76_spill] sm:$0xff]  ;;  %v10435_v8 = vld [vmem:[#allocation146_spill] sm:$0xff] }
 0x200   : > { %5992 = vperm.xlu0 %5885, %v10415_v61   ;;  %10422 = vst [vmem:[#allocation123_spill] sm:$0xff] %v8102_v12  ;;  %v10423_v61 = vld [vmem:[#allocation33_spill] sm:$0xff]  ;;  %10425 = vst [vmem:[#allocation166_spill] sm:$0xff] %v8109_v42  ;;  %v8124_v15 = vmul.f32 %v5701_v38, %v6636_v62  ;;  %v8127_v14 = vmul.f32 %v5175_v55, %v10376_v59  ;;  %v5184_v53 = vunpack.i.l.bf16 %v10432_v49  ;;  %v10441_v12 = vld [vmem:[#allocation38_spill] sm:$0xff] }
 0x201   : > { %5487 = vperm.xlu1 %5420, %v10418_v30   ;;  %v8096_v1 = vpop.permute.xlu1 %5299  ;;  %v1347_v25 = vadd.f32 %v1315_v22, %v10423_v61  ;;  %10427 = vst [vmem:[#allocation111_spill] sm:$0xff] %v8113_v48  ;;  %10428 = vst [vmem:[#allocation167_spill] sm:$0xff] %v8117_v17  ;;  %v5717_v22 = vunpack.i.l.bf16 %v10429_v3  ;;  %v10430_v61 = vld [vmem:[#allocation58_spill] sm:$0xff]  ;;  %v8135_v10 = vmul.f32 %v5174_v58, %v10376_v59  ;;  %v10438_v38 = vld [vmem:[#allocation145_spill] sm:$0xff]  ;;  %v10447_v48 = vmov 1  }
 0x202   : > { %10419 = vst [vmem:[#allocation97_spill] sm:$0xff] %v8096_v1  ;;  %v8106_v43 = vpop.permute.xlu0 %5795  ;;  %10431 = vst [vmem:[#allocation103_spill] sm:$0xff] %v8124_v15  ;;  %v8143_v42 = vadd.f32 %v10438_v38, %v1348_v2  ;;  %v1353_v49 = vadd.f32 %v1321_v24, %v10441_v12  ;;  %v10442_v11 = vld [vmem:[#allocation107_spill] sm:$0xff]  ;;  %v8156_v2 = vmul.f32 %v5185_v36, %v10376_v59  ;;  %v10446_v12 = vld [vmem:[#allocation41_spill] sm:$0xff] }
 0x203   : > { %10424 = vst [vmem:[#allocation33_spill] sm:$0xff] %v8106_v43  ;;  %v8138_v3 = vadd.f32 %v10435_v8, %v1347_v25  ;;  %v5722_v60 = vunpack.i.l.bf16 %v10442_v11  ;;  %v10444_v58 = vld [vmem:[#allocation115_spill] sm:$0xff]  ;;  %v1326_v25 = vmul.f32 %v5718_v31, %v10314_v57  ;;  %v1325_v8 = vmul.f32 %v5717_v22, %v10314_v57  ;;  %v10449_v31 = vld [vmem:[#allocation8_spill] sm:$0xff] }
 0x204   : > { %5997 = vperm.xlu0 %5885, %v10430_v61   ;;  %10439 = vst [vmem:[#allocation146_spill] sm:$0xff] %v8143_v42  ;;  %v1354_v39 = vadd.f32 %v1322_v63, %v10444_v58  ;;  %v8159_v38 = vmul.f32 %v5184_v53, %v10376_v59  ;;  %v5190_v24 = vunpack.i.h.bf16 %v10446_v12  ;;  %v5723_v15 = vunpack.i.h.bf16 %v10442_v11  ;;  %v10450_v58 = vld [vmem:[#allocation18_spill] sm:$0xff]  ;;  %v10451_v17 = vld [vmem:[#allocation156_spill] sm:$0xff]  ;;  %v10457_v46 = vld [vmem:[#allocation7_spill] sm:$0xff] }
 0x205   : > { %5618 = vperm.xlu1 %5420, %v10433_v35   ;;  %v8132_v5 = vpop.permute.xlu1 %5304  ;;  %10436 = vst [vmem:[#allocation109_spill] sm:$0xff] %v8138_v3  ;;  %v5189_v63 = vunpack.i.l.bf16 %v10446_v12  ;;  %v5728_v22 = vunpack.i.h.bf16 %v10449_v31  ;;  %v8171_v53 = vadd.f32 %v10451_v17, %v1353_v49  ;;  %v1329_v43 = vmul.f32 %v5722_v60, %v10314_v57  ;;  %v10456_v12 = vld [vmem:[#allocation118_spill] sm:$0xff]  ;;  %v10552_v42 = vld [vmem:[#allocation27_spill] sm:$0xff] }
 0x206   : > { %10434 = vst [vmem:[#allocation58_spill] sm:$0xff] %v8132_v5  ;;  %v8140_v61 = vpop.permute.xlu0 %5800  ;;  %v10453_v5 = vld [vmem:[#allocation155_spill] sm:$0xff]  ;;  %v1358_v18 = vadd.f32 %v1326_v25, %v10456_v12  ;;  %v5195_v16 = vunpack.i.h.bf16 %v10457_v46  ;;  %v5194_v17 = vunpack.i.l.bf16 %v10457_v46 }
 0x207   : > { %10437 = vst [vmem:[#allocation76_spill] sm:$0xff] %v8140_v61  ;;  %v10445_v61 = vld [vmem:[#allocation61_spill] sm:$0xff]  ;;  %10452 = vst [vmem:[#allocation38_spill] sm:$0xff] %v8171_v53  ;;  %v1334_v25 = vmul.f32 %v5728_v22, %v10314_v57 }
 0x208   : > { %6002 = vperm.xlu0 %5885, %v10445_v61   ;;  %v5727_v61 = vunpack.i.l.bf16 %v10449_v31  ;;  %v1330_v31 = vmul.f32 %v5723_v15, %v10314_v57  ;;  %v8212_v22 = vmul.f32 %v5195_v16, %v10376_v59 }
 0x209   : > { %5627 = vset.pattern.permute.xlu1 %v10447_v48  ;;  %v8164_v1 = vpop.permute.xlu1 %5309  ;;  %v8175_v48 = vadd.f32 %v10453_v5, %v1354_v39  ;;  %v8195_v5 = vmul.f32 %v5189_v63, %v10376_v59  ;;  %v1366_v16 = vadd.f32 %v1334_v25, %v10471_v54  ;;  %v5748_v54 = vunpack.i.h.bf16 %v7808_v32 }
 0x20a   : > { %10448 = vst [vmem:[#allocation145_spill] sm:$0xff] %v8164_v1  ;;  %5629 = vperm.xlu1 %5627, %v10450_v58   ;;  %v5806_v36 = vpop.permute.xlu0 %5805  ;;  %v10455_v1 = vld [vmem:[#allocation117_spill] sm:$0xff]  ;;  %v1333_v15 = vmul.f32 %v5727_v61, %v10314_v57  ;;  %v10462_v58 = vld [vmem:[#allocation160_spill] sm:$0xff]  ;;  %v5747_v25 = vunpack.i.l.bf16 %v7808_v32 }
 0x20b   : > { %v5808_v55 = vunpack.i.h.bf16 %v5806_v36  ;;  %v5807_v11 = vunpack.i.l.bf16 %v5806_v36  ;;  %10454 = vst [vmem:[#allocation107_spill] sm:$0xff] %v8175_v48  ;;  %v1357_v28 = vadd.f32 %v1325_v8, %v10455_v1  ;;  %v8192_v1 = vmul.f32 %v5190_v24, %v10376_v59  ;;  %v10461_v36 = vld [vmem:[#allocation34_spill] sm:$0xff]  ;;  %v10466_v61 = vld [vmem:[#allocation9_spill] sm:$0xff]  ;;  %v10524_v48 = vld [vmem:[#allocation24_spill] sm:$0xff] }
 0x20c   : > { %6012 = vperm.xlu0 %5885, %v10353_v40   ;;  %v5742_v12 = vunpack.i.l.bf16 %v10461_v36  ;;  %v5732_v41 = vunpack.i.l.bf16 %v10466_v61 }
 0x20d   : > { %v8184_v49 = vmul.f32 %v5808_v55, %v10314_v57  ;;  %v8187_v60 = vmul.f32 %v5807_v11, %v10314_v57  ;;  %v8189_v39 = vpop.permute.xlu1 %5314  ;;  %v10460_v55 = vld [vmem:[#allocation42_spill] sm:$0xff]  ;;  %v5743_v11 = vunpack.i.h.bf16 %v10461_v36  ;;  %v8206_v24 = vadd.f32 %v10462_v58, %v1357_v28 }
 0x20e   : > { %10458 = vst [vmem:[#allocation115_spill] sm:$0xff] %v8189_v39  ;;  %5634 = vperm.xlu1 %5627, %v7668_v20   ;;  %v8200_v46 = vpop.permute.xlu0 %5816  ;;  %v1361_v8 = vadd.f32 %v1329_v43, %v10460_v55  ;;  %v10464_v39 = vld [vmem:[#allocation159_spill] sm:$0xff]  ;;  %v8218_v43 = vmul.f32 %v5194_v17, %v10376_v59  ;;  %v5733_v28 = vunpack.i.h.bf16 %v10466_v61  ;;  %v10476_v17 = vld [vmem:[#allocation122_spill] sm:$0xff]  ;;  %v2152_v61 = vmul.f32 %v5742_v12, %v10314_v57 }
 0x20f   : > { %10459 = vst [vmem:[#allocation61_spill] sm:$0xff] %v8200_v46  ;;  %10463 = vst [vmem:[#allocation41_spill] sm:$0xff] %v8206_v24  ;;  %v8209_v63 = vadd.f32 %v10464_v39, %v1358_v18  ;;  %v10467_v46 = vld [vmem:[#allocation120_spill] sm:$0xff]  ;;  %v10468_v55 = vld [vmem:[#allocation39_spill] sm:$0xff]  ;;  %v5205_v29 = vunpack.i.h.bf16 %v10476_v17  ;;  %v2153_v40 = vmul.f32 %v5743_v11, %v10314_v57  ;;  %v5215_v12 = vunpack.i.l.bf16 %v7793_v47 }
 0x210   : > { %6028 = vperm.xlu0 %5885, %v10366_v37   ;;  %v1362_v20 = vadd.f32 %v1330_v31, %v10467_v46  ;;  %v5200_v36 = vunpack.i.h.bf16 %v10468_v55  ;;  %v10470_v18 = vld [vmem:[#allocation125_spill] sm:$0xff]  ;;  %v5199_v34 = vunpack.i.l.bf16 %v10468_v55  ;;  %v10474_v31 = vld [vmem:[#allocation88_spill] sm:$0xff]  ;;  %v10477_v55 = vld [vmem:[#allocation78_spill] sm:$0xff]  ;;  %v1338_v11 = vmul.f32 %v5733_v28, %v10314_v57 }
 0x211   : > { %10465 = vst [vmem:[#allocation8_spill] sm:$0xff] %v8209_v63  ;;  %v8222_v58 = vpop.permute.xlu1 %5319  ;;  %v1365_v39 = vadd.f32 %v1333_v15, %v10470_v18  ;;  %v8231_v46 = vadd.f32 %v10474_v31, %v1361_v8  ;;  %v5204_v15 = vunpack.i.l.bf16 %v10476_v17  ;;  %v10488_v28 = vld [vmem:[#allocation116_spill] sm:$0xff] }
 0x212   : > { %10469 = vst [vmem:[#allocation156_spill] sm:$0xff] %v8222_v58  ;;  %5644 = vperm.xlu1 %5627, %v10472_v51   ;;  %v8228_v37 = vpop.permute.xlu0 %5831  ;;  %v1337_v58 = vmul.f32 %v5732_v41, %v10314_v57  ;;  %v8242_v18 = vadd.f32 %v10477_v55, %v1362_v20  ;;  %v8245_v8 = vmul.f32 %v5200_v36, %v10376_v59  ;;  %v10481_v41 = vld [vmem:[#allocation91_spill] sm:$0xff]  ;;  %v10485_v20 = vld [vmem:[#allocation20_spill] sm:$0xff] }
 0x213   : > { %10473 = vst [vmem:[#allocation155_spill] sm:$0xff] %v8228_v37  ;;  %10475 = vst [vmem:[#allocation117_spill] sm:$0xff] %v8231_v46  ;;  %v8252_v17 = vadd.f32 %v10481_v41, %v1365_v39  ;;  %v10483_v37 = vld [vmem:[#allocation90_spill] sm:$0xff]  ;;  %v8258_v32 = vmul.f32 %v5199_v34, %v10376_v59  ;;  %v8264_v36 = vmul.f32 %v5205_v29, %v10376_v59  ;;  %v5216_v39 = vunpack.i.h.bf16 %v7793_v47  ;;  %v10548_v63 = vld [vmem:[#allocation112_spill] sm:$0xff] }
 0x214   : > { %6038 = vperm.xlu0 %5885, %v10372_v56   ;;  %10478 = vst [vmem:[#allocation118_spill] sm:$0xff] %v8242_v18  ;;  %10479 = vst [vmem:[#allocation7_spill] sm:$0xff] %v8245_v8  ;;  %v8255_v51 = vadd.f32 %v10483_v37, %v1366_v16  ;;  %v2184_v56 = vadd.f32 %v2152_v61, %v10488_v28  ;;  %v10489_v8 = vld [vmem:[#allocation11_spill] sm:$0xff]  ;;  %v10490_v41 = vld [vmem:[#allocation126_spill] sm:$0xff]  ;;  %v8273_v37 = vmul.f32 %v5204_v15, %v10376_v59 }
 0x215   : > { %v8249_v31 = vpop.permute.xlu1 %5324  ;;  %10482 = vst [vmem:[#allocation34_spill] sm:$0xff] %v8252_v17  ;;  %10487 = vst [vmem:[#allocation9_spill] sm:$0xff] %v8264_v36  ;;  %v8270_v17 = vadd.f32 %v1337_v58, %v10490_v41  ;;  %v2159_v34 = vmul.f32 %v5748_v54, %v10314_v57  ;;  %v2158_v16 = vmul.f32 %v5747_v25, %v10314_v57  ;;  %v10493_v29 = vld [vmem:[#allocation54_spill] sm:$0xff]  ;;  %v10495_v61 = vld [vmem:[#allocation45_spill] sm:$0xff]  ;;  %v5752_v47 = vunpack.i.l.bf16 %v7840_v4 }
 0x216   : > { %10480 = vst [vmem:[#allocation42_spill] sm:$0xff] %v8249_v31  ;;  %10484 = vst [vmem:[#allocation160_spill] sm:$0xff] %v8255_v51  ;;  %5654 = vperm.xlu1 %5627, %v10485_v20   ;;  %v8261_v55 = vpop.permute.xlu0 %5841  ;;  %v2185_v31 = vadd.f32 %v2153_v40, %v10489_v8  ;;  %v8279_v36 = vadd.f32 %v1338_v11, %v10493_v29  ;;  %v2631_v28 = vmul.f32 %v5215_v12, %v10495_v61  ;;  %v10496_v15 = vld [vmem:[#allocation21_spill] sm:$0xff]  ;;  %v10500_v12 = vld [vmem:[#allocation48_spill] sm:$0xff] }
 0x217   : > { %10486 = vst [vmem:[#allocation159_spill] sm:$0xff] %v8261_v55  ;;  %10491 = vst [vmem:[#allocation120_spill] sm:$0xff] %v8270_v17  ;;  %v5753_v40 = vunpack.i.h.bf16 %v7840_v4  ;;  %v8288_v54 = vadd.f32 %v8135_v10, %v2184_v56  ;;  %v2632_v11 = vmul.f32 %v5216_v39, %v10495_v61  ;;  %v2190_v29 = vadd.f32 %v2158_v16, %v10500_v12  ;;  %v10502_v51 = vld [vmem:[#allocation10_spill] sm:$0xff]  ;;  %v10505_v16 = vld [vmem:[#allocation136_spill] sm:$0xff] }
 0x218   : > { %10492 = vst [vmem:[#allocation39_spill] sm:$0xff] %v8273_v37  ;;  %6048 = vperm.xlu0 %5885, %v10384_v19   ;;  %10494 = vst [vmem:[#allocation125_spill] sm:$0xff] %v8279_v36  ;;  %v8291_v25 = vadd.f32 %v8127_v14, %v2185_v31  ;;  %v10501_v36 = vld [vmem:[#allocation130_spill] sm:$0xff]  ;;  %v2162_v14 = vmul.f32 %v5752_v47, %v10314_v57  ;;  %v5757_v10 = vunpack.i.l.bf16 %v7871_v7  ;;  %v5230_v31 = vunpack.i.l.bf16 %v7857_v45 }
 0x219   : > { %v5330_v58 = vpop.permute.xlu1 %5329  ;;  %10498 = vst [vmem:[#allocation88_spill] sm:$0xff] %v8288_v54  ;;  %v2191_v37 = vadd.f32 %v2159_v34, %v10501_v36  ;;  %v2163_v56 = vmul.f32 %v5753_v40, %v10314_v57  ;;  %v5758_v39 = vunpack.i.h.bf16 %v7871_v7  ;;  %v10504_v36 = vld [vmem:[#allocation137_spill] sm:$0xff]  ;;  %v10509_v40 = vld [vmem:[#allocation52_spill] sm:$0xff]  ;;  %v5225_v7 = vunpack.i.l.bf16 %v7824_v13 }
 0x21a   : > { %v5332_v8 = vunpack.i.h.bf16 %v5330_v58  ;;  %v5331_v41 = vunpack.i.l.bf16 %v5330_v58  ;;  %5664 = vperm.xlu1 %5627, %v10496_v15   ;;  %v8285_v17 = vpop.permute.xlu0 %5851  ;;  %10499 = vst [vmem:[#allocation122_spill] sm:$0xff] %v8291_v25  ;;  %v8317_v47 = vadd.f32 %v10509_v40, %v2632_v11  ;;  %v10513_v11 = vld [vmem:[#allocation110_spill] sm:$0xff] }
 0x21b   : > { %10497 = vst [vmem:[#allocation46_spill] sm:$0xff] %v8285_v17  ;;  %v8300_v17 = vadd.f32 %v10502_v51, %v2631_v28  ;;  %v2194_v40 = vadd.f32 %v2162_v14, %v10513_v11  ;;  %v2195_v28 = vadd.f32 %v2163_v56, %v7787_v33  ;;  %v5763_v56 = vunpack.i.h.bf16 %v7901_v6  ;;  %v10521_v33 = vld [vmem:[#allocation25_spill] sm:$0xff] }
 0x21c   : > { %v2820_v4 = vmul.f32 %v5332_v8, %v6636_v62  ;;  %v2819_v58 = vmul.f32 %v5331_v41, %v6636_v62  ;;  %6058 = vperm.xlu0 %5885, %v10396_v27   ;;  %v10506_v41 = vld [vmem:[#allocation22_spill] sm:$0xff]  ;;  %10510 = vst [vmem:[#allocation20_spill] sm:$0xff] %v8317_v47  ;;  %v5762_v14 = vunpack.i.l.bf16 %v7901_v6 }
 0x21d   : > { %10503 = vst [vmem:[#allocation78_spill] sm:$0xff] %v8300_v17  ;;  %v5226_v17 = vunpack.i.h.bf16 %v7824_v13  ;;  %v5231_v13 = vunpack.i.h.bf16 %v7857_v45 }
 0x21e   : > { %v2851_v34 = vadd.f32 %v2819_v58, %v10504_v36  ;;  %v2852_v8 = vadd.f32 %v2820_v4, %v10505_v16  ;;  %5674 = vperm.xlu1 %5627, %v10506_v41   ;;  %v8310_v12 = vpop.permute.xlu1 %5335  ;;  %v8312_v51 = vpop.permute.xlu0 %5861  ;;  %v8322_v58 = vadd.f32 %v8159_v38, %v2190_v29  ;;  %v8325_v4 = vadd.f32 %v8156_v2, %v2191_v37 }
 0x21f   : > { %10507 = vst [vmem:[#allocation91_spill] sm:$0xff] %v8310_v12  ;;  %10508 = vst [vmem:[#allocation90_spill] sm:$0xff] %v8312_v51  ;;  %v2166_v38 = vmul.f32 %v5757_v10, %v10314_v57  ;;  %v2637_v29 = vmul.f32 %v5230_v31, %v10495_v61  ;;  %v2167_v2 = vmul.f32 %v5758_v39, %v10314_v57  ;;  %v5241_v37 = vunpack.i.h.bf16 %v7884_v23  ;;  %v10579_v12 = vld [vmem:[#allocation133_spill] sm:$0xff] }
 0x220   : > { %10511 = vst [vmem:[#allocation116_spill] sm:$0xff] %v8322_v58  ;;  %10512 = vst [vmem:[#allocation11_spill] sm:$0xff] %v8325_v4  ;;  %6068 = vperm.xlu0 %5885, %v10407_v26   ;;  %v8329_v36 = vadd.f32 %v8187_v60, %v2851_v34  ;;  %v8332_v16 = vadd.f32 %v8184_v49, %v2852_v8  ;;  %v5240_v60 = vunpack.i.l.bf16 %v7884_v23  ;;  %v10514_v34 = vld [vmem:[#allocation23_spill] sm:$0xff]  ;;  %v10523_v58 = vld [vmem:[#allocation60_spill] sm:$0xff] }
 0x221   : > { %v8350_v45 = vmul.f32 %v5226_v17, %v10495_v61  ;;  %v8359_v31 = vmul.f32 %v5225_v7, %v10495_v61  ;;  %v8363_v39 = vadd.f32 %v8195_v5, %v2194_v40  ;;  %v8366_v17 = vadd.f32 %v8192_v1, %v2195_v28 }
 0x222   : > { %5684 = vperm.xlu1 %5627, %v10514_v34   ;;  %v8343_v49 = vpop.permute.xlu1 %5340  ;;  %v8345_v8 = vpop.permute.xlu0 %5871  ;;  %v2638_v11 = vmul.f32 %v5231_v13, %v10495_v61  ;;  %v2198_v6 = vadd.f32 %v2166_v38, %v7811_v9  ;;  %v8371_v10 = vadd.f32 %v10521_v33, %v2637_v29  ;;  %v2199_v23 = vadd.f32 %v2167_v2, %v10523_v58  ;;  %v10526_v33 = vld [vmem:[#allocation12_spill] sm:$0xff] }
 0x223   : > { %10515 = vst [vmem:[#allocation126_spill] sm:$0xff] %v8343_v49  ;;  %10516 = vst [vmem:[#allocation54_spill] sm:$0xff] %v8345_v8  ;;  %v2642_v7 = vmul.f32 %v5241_v37, %v10495_v61  ;;  %v2641_v4 = vmul.f32 %v5240_v60, %v10495_v61  ;;  %v2171_v1 = vmul.f32 %v5763_v56, %v10314_v57  ;;  %v5251_v9 = vunpack.i.h.bf16 %v7913_v21  ;;  %v10576_v8 = vld [vmem:[#allocation42_spill] sm:$0xff] }
 0x224   : > { %10517 = vst [vmem:[#allocation45_spill] sm:$0xff] %v8350_v45  ;;  %10518 = vst [vmem:[#allocation21_spill] sm:$0xff] %v8359_v31  ;;  %6078 = vperm.xlu0 %5885, %v10418_v30   ;;  %v2170_v28 = vmul.f32 %v5762_v14, %v10314_v57  ;;  %v5250_v13 = vunpack.i.l.bf16 %v7913_v21  ;;  %v5261_v38 = vunpack.i.h.bf16 %v7945_v44  ;;  %v5260_v58 = vunpack.i.l.bf16 %v7945_v44  ;;  %v10529_v21 = vld [vmem:[#allocation26_spill] sm:$0xff]  ;;  %v10531_v44 = vld [vmem:[#allocation13_spill] sm:$0xff] }
 0x225   : > { %10519 = vst [vmem:[#allocation48_spill] sm:$0xff] %v8363_v39  ;;  %10520 = vst [vmem:[#allocation130_spill] sm:$0xff] %v8366_v17  ;;  %v8391_v56 = vadd.f32 %v10526_v33, %v2638_v11  ;;  %v8394_v14 = vadd.f32 %v8218_v43, %v2198_v6  ;;  %v8397_v53 = vadd.f32 %v10529_v21, %v2641_v4  ;;  %v10535_v39 = vmov 2   ;;  %v10547_v17 = vld [vmem:[#allocation6_spill] sm:$0xff]  ;;  %v10577_v45 = vld [vmem:[#allocation57_spill] sm:$0xff] }
 0x226   : > { %10522 = vst [vmem:[#allocation10_spill] sm:$0xff] %v8371_v10  ;;  %5694 = vperm.xlu1 %5627, %v10524_v48   ;;  %v8377_v5 = vpop.permute.xlu1 %5345  ;;  %v5882_v40 = vpop.permute.xlu0 %5881  ;;  %v8400_v25 = vadd.f32 %v10531_v44, %v2642_v7  ;;  %v8412_v11 = vadd.f32 %v8212_v22, %v2199_v23  ;;  %v2202_v43 = vadd.f32 %v2170_v28, %v7835_v0  ;;  %v10538_v7 = vld [vmem:[#allocation64_spill] sm:$0xff]  ;;  %v10540_v28 = vld [vmem:[#allocation162_spill] sm:$0xff]  ;;  %v10544_v0 = vld [vmem:[#allocation7_spill] sm:$0xff]  ;;  %v5327_v49 = vunpack.i.h.bf16 %v10576_v8 }
 0x227   : > { %10525 = vst [vmem:[#allocation137_spill] sm:$0xff] %v8377_v5  ;;  %v5884_v29 = vunpack.i.h.bf16 %v5882_v40  ;;  %v5883_v2 = vunpack.i.l.bf16 %v5882_v40  ;;  %10527 = vst [vmem:[#allocation136_spill] sm:$0xff] %v8391_v56  ;;  %v2203_v4 = vadd.f32 %v2171_v1, %v7843_v50  ;;  %v2645_v33 = vmul.f32 %v5250_v13, %v10495_v61  ;;  %v10539_v50 = vld [vmem:[#allocation31_spill] sm:$0xff]  ;;  %v10567_v10 = vld [vmem:[#allocation128_spill] sm:$0xff] }
 0x228   : > { %6088 = vperm.xlu0 %5885, %v10433_v35   ;;  %10528 = vst [vmem:[#allocation22_spill] sm:$0xff] %v8394_v14  ;;  %10530 = vst [vmem:[#allocation52_spill] sm:$0xff] %v8397_v53  ;;  %v2649_v21 = vmul.f32 %v5260_v58, %v10495_v61  ;;  %v5271_v23 = vunpack.i.h.bf16 %v10539_v50  ;;  %v5270_v1 = vunpack.i.l.bf16 %v10539_v50  ;;  %v5778_v44 = vunpack.i.h.bf16 %v10540_v28  ;;  %v10546_v50 = vld [vmem:[#allocation71_spill] sm:$0xff]  ;;  %v10575_v5 = vld [vmem:[#allocation53_spill] sm:$0xff] }
 0x229   : > { %10532 = vst [vmem:[#allocation110_spill] sm:$0xff] %v8400_v25  ;;  %v8403_v40 = vmul.f32 %v5884_v29, %v10314_v57  ;;  %v8406_v37 = vmul.f32 %v5883_v2, %v10314_v57  ;;  %10537 = vst [vmem:[#allocation12_spill] sm:$0xff] %v8412_v11  ;;  %v2646_v2 = vmul.f32 %v5251_v9, %v10495_v61  ;;  %v10541_v9 = vld [vmem:[#allocation86_spill] sm:$0xff]  ;;  %v5783_v46 = vunpack.i.h.bf16 %v10546_v50  ;;  %v10566_v25 = vld [vmem:[#allocation69_spill] sm:$0xff] }
 0x22a   : > { %5809 = vset.pattern.permute.xlu1 %v10535_v39  ;;  %v8409_v60 = vpop.permute.xlu1 %5350  ;;  %v2650_v39 = vmul.f32 %v5261_v38, %v10495_v61  ;;  %v5281_v6 = vunpack.i.h.bf16 %v10541_v9  ;;  %v5280_v13 = vunpack.i.l.bf16 %v10541_v9  ;;  %v8438_v22 = vadd.f32 %v8258_v32, %v2202_v43  ;;  %v10550_v9 = vld [vmem:[#allocation113_spill] sm:$0xff]  ;;  %v10554_v32 = vld [vmem:[#allocation134_spill] sm:$0xff]  ;;  %v10578_v31 = vld [vmem:[#allocation56_spill] sm:$0xff] }
 0x22b   : > { %10533 = vst [vmem:[#allocation23_spill] sm:$0xff] %v8403_v40  ;;  %10534 = vst [vmem:[#allocation25_spill] sm:$0xff] %v8406_v37  ;;  %5811 = vperm.xlu1 %5809, %v10538_v7   ;;  %v8418_v29 = vpop.permute.xlu0 %5887  ;;  %v5777_v7 = vunpack.i.l.bf16 %v10540_v28  ;;  %v8441_v14 = vadd.f32 %v10544_v0, %v2203_v4  ;;  %v8448_v24 = vadd.f32 %v10548_v63, %v2645_v33  ;;  %v10556_v11 = vld [vmem:[#allocation94_spill] sm:$0xff]  ;;  %v10562_v40 = vld [vmem:[#allocation145_spill] sm:$0xff] }
 0x22c   : > { %10536 = vst [vmem:[#allocation60_spill] sm:$0xff] %v8409_v60  ;;  %10543 = vst [vmem:[#allocation13_spill] sm:$0xff] %v8438_v22  ;;  %v8451_v52 = vadd.f32 %v10550_v9, %v2646_v2  ;;  %v8454_v58 = vadd.f32 %v10552_v42, %v2649_v21  ;;  %v8457_v43 = vadd.f32 %v10554_v32, %v2650_v39  ;;  %v5297_v18 = vunpack.i.h.bf16 %v10556_v11  ;;  %v10558_v9 = vld [vmem:[#allocation67_spill] sm:$0xff]  ;;  %v10574_v60 = vld [vmem:[#allocation129_spill] sm:$0xff] }
 0x22d   : > { %10545 = vst [vmem:[#allocation64_spill] sm:$0xff] %v8441_v14  ;;  %10549 = vst [vmem:[#allocation31_spill] sm:$0xff] %v8448_v24  ;;  %v8460_v4 = vmul.f32 %v5271_v23, %v10495_v61  ;;  %v8463_v0 = vmul.f32 %v5270_v1, %v10495_v61  ;;  %v5296_v63 = vunpack.i.l.bf16 %v10556_v11  ;;  %v8468_v33 = vmul.f32 %v5778_v44, %v10314_v57  ;;  %v10559_v44 = vld [vmem:[#allocation99_spill] sm:$0xff]  ;;  %v10565_v24 = vld [vmem:[#allocation164_spill] sm:$0xff] }
 0x22e   : > { %v8433_v38 = vpop.permute.xlu1 %5355  ;;  %10551 = vst [vmem:[#allocation162_spill] sm:$0xff] %v8451_v52  ;;  %10553 = vst [vmem:[#allocation86_spill] sm:$0xff] %v8454_v58  ;;  %v2985_v2 = vmul.f32 %v5777_v7, %v10314_v57  ;;  %v8472_v42 = vmul.f32 %v5281_v6, %v10495_v61  ;;  %v8475_v39 = vmul.f32 %v5280_v13, %v10495_v61  ;;  %v5782_v1 = vunpack.i.l.bf16 %v10546_v50  ;;  %v10560_v6 = vld [vmem:[#allocation74_spill] sm:$0xff]  ;;  %v10580_v48 = vld [vmem:[#allocation132_spill] sm:$0xff] }
 0x22f   : > { %10542 = vst [vmem:[#allocation26_spill] sm:$0xff] %v8433_v38  ;;  %5821 = vperm.xlu1 %5809, %v10547_v17   ;;  %v8445_v28 = vpop.permute.xlu0 %5892  ;;  %10555 = vst [vmem:[#allocation7_spill] sm:$0xff] %v8457_v43  ;;  %v8480_v23 = vmul.f32 %v5783_v46, %v10314_v57  ;;  %v5788_v32 = vunpack.i.h.bf16 %v10559_v44  ;;  %v5787_v7 = vunpack.i.l.bf16 %v10559_v44  ;;  %v5793_v14 = vunpack.i.h.bf16 %v10560_v6  ;;  %v10561_v46 = vld [vmem:[#allocation58_spill] sm:$0xff]  ;;  %v10563_v43 = vld [vmem:[#allocation115_spill] sm:$0xff] }
 0x230   : > { %v5792_v13 = vunpack.i.l.bf16 %v10560_v6  ;;  %v2794_v22 = vmul.f32 %v5297_v18, %v6636_v62  ;;  %v2793_v54 = vmul.f32 %v5296_v63, %v6636_v62  ;;  %v5307_v3 = vunpack.i.h.bf16 %v10561_v46 }
 0x231   : > { %v5306_v50 = vunpack.i.l.bf16 %v10561_v46  ;;  %v5311_v37 = vunpack.i.l.bf16 %v10562_v40  ;;  %v5317_v58 = vunpack.i.h.bf16 %v10563_v43  ;;  %v5316_v44 = vunpack.i.l.bf16 %v10563_v43 }
 0x232   : > { %v8477_v21 = vpop.permute.xlu1 %5360  ;;  %v2991_v6 = vmul.f32 %v5782_v1, %v10314_v57  ;;  %v2996_v46 = vmul.f32 %v5788_v32, %v10314_v57  ;;  %v3000_v56 = vmul.f32 %v5793_v14, %v10314_v57  ;;  %v2999_v43 = vmul.f32 %v5792_v13, %v10314_v57 }
 0x233   : > { %10557 = vst [vmem:[#allocation71_spill] sm:$0xff] %v8477_v21  ;;  %5826 = vperm.xlu1 %5809, %v10558_v9   ;;  %v8484_v11 = vpop.permute.xlu0 %5897  ;;  %v5312_v9 = vunpack.i.h.bf16 %v10562_v40  ;;  %v2995_v40 = vmul.f32 %v5787_v7, %v10314_v57  ;;  %v10568_v21 = vld [vmem:[#allocation127_spill] sm:$0xff]  ;;  %v2800_v18 = vmul.f32 %v5307_v3, %v6636_v62  ;;  %v2799_v63 = vmul.f32 %v5306_v50, %v6636_v62  ;;  %v10572_v50 = vld [vmem:[#allocation33_spill] sm:$0xff] }
 0x234   : > { %v2826_v1 = vadd.f32 %v2794_v22, %v10568_v21  ;;  %v2803_v47 = vmul.f32 %v5311_v37, %v6636_v62  ;;  %v2808_v32 = vmul.f32 %v5317_v58, %v6636_v62  ;;  %v2807_v7 = vmul.f32 %v5316_v44, %v6636_v62 }
 0x235   : > { %v5798_v37 = vunpack.i.h.bf16 %v10572_v50  ;;  %v5797_v58 = vunpack.i.l.bf16 %v10572_v50  ;;  %v2831_v13 = vadd.f32 %v2799_v63, %v10574_v60 }
 0x236   : > { %v8498_v52 = vpop.permute.xlu1 %5365  ;;  %v2839_v55 = vadd.f32 %v2807_v7, %v10579_v12  ;;  %v2840_v50 = vadd.f32 %v2808_v32, %v10580_v48  ;;  %v10581_v32 = vld [vmem:[#allocation63_spill] sm:$0xff] }
 0x237   : > { %10564 = vst [vmem:[#allocation6_spill] sm:$0xff] %v8498_v52  ;;  %5836 = vperm.xlu1 %5809, %v10566_v25   ;;  %v8504_v53 = vpop.permute.xlu0 %5902  ;;  %v2825_v52 = vadd.f32 %v2793_v54, %v10567_v10  ;;  %v2804_v25 = vmul.f32 %v5312_v9, %v6636_v62  ;;  %v10571_v10 = vld [vmem:[#allocation156_spill] sm:$0xff]  ;;  %v2832_v54 = vadd.f32 %v2800_v18, %v10575_v5 }
 0x238   : > { %v5322_v22 = vunpack.i.h.bf16 %v10571_v10  ;;  %v5321_v3 = vunpack.i.l.bf16 %v10571_v10  ;;  %v10573_v9 = vld [vmem:[#allocation76_spill] sm:$0xff]  ;;  %v5326_v10 = vunpack.i.l.bf16 %v10576_v8  ;;  %v3018_v8 = vadd.f32 %v8468_v33, %v2826_v1 }
 0x239   : > { %v5803_v44 = vunpack.i.h.bf16 %v10573_v9  ;;  %v2836_v51 = vadd.f32 %v2804_v25, %v10578_v31  ;;  %v3017_v18 = vadd.f32 %v2985_v2, %v2825_v52  ;;  %v2816_v31 = vmul.f32 %v5327_v49, %v6636_v62 }
 0x23a   : > { %v8518_v38 = vpop.permute.xlu1 %5370  ;;  %v2811_v60 = vmul.f32 %v5321_v3, %v6636_v62  ;;  %v2815_v63 = vmul.f32 %v5326_v10, %v6636_v62  ;;  %v8553_v25 = vadd.f32 %v2991_v6, %v2831_v13  ;;  %v8562_v2 = vadd.f32 %v2999_v43, %v2839_v55 }
 0x23b   : > { %10569 = vst [vmem:[#allocation112_spill] sm:$0xff] %v8518_v38  ;;  %5846 = vperm.xlu1 %5809, %v10384_v19   ;;  %v8525_v21 = vpop.permute.xlu0 %5907  ;;  %v5802_v38 = vunpack.i.l.bf16 %v10573_v9  ;;  %v2835_v19 = vadd.f32 %v2803_v47, %v10577_v45  ;;  %v2812_v9 = vmul.f32 %v5322_v22, %v6636_v62  ;;  %v3004_v47 = vmul.f32 %v5798_v37, %v10314_v57 }
 0x23c   : > { %v3003_v45 = vmul.f32 %v5797_v58, %v10314_v57  ;;  %v3008_v12 = vmul.f32 %v5803_v44, %v10314_v57  ;;  %v8560_v33 = vadd.f32 %v2996_v46, %v2836_v51  ;;  %v8564_v1 = vadd.f32 %v3000_v56, %v2840_v50 }
 0x23d   : > { %v3007_v48 = vmul.f32 %v5802_v38, %v10314_v57  ;;  %v8558_v52 = vadd.f32 %v2995_v40, %v2835_v19  ;;  %v2843_v7 = vadd.f32 %v2811_v60, %v10581_v32  ;;  %v10582_v38 = vld [vmem:[#allocation62_spill] sm:$0xff]  ;;  %v5890_v49 = vunpack.i.h.bf16 %v8418_v29 }
 0x23e   : > { %v8539_v14 = vpop.permute.xlu1 %5375  ;;  %v2844_v22 = vadd.f32 %v2812_v9, %v10582_v38  ;;  %v5889_v6 = vunpack.i.l.bf16 %v8418_v29  ;;  %v5895_v51 = vunpack.i.h.bf16 %v8445_v28  ;;  %v5894_v55 = vunpack.i.l.bf16 %v8445_v28  ;;  %v10583_v40 = vld [vmem:[#allocation66_spill] sm:$0xff] }
 0x23f   : > { %5856 = vperm.xlu1 %5809, %v10396_v27   ;;  %v8544_v5 = vpop.permute.xlu0 %5912  ;;  %v8556_v27 = vadd.f32 %v8480_v23, %v2832_v54  ;;  %v2847_v43 = vadd.f32 %v2815_v63, %v10583_v40  ;;  %v10584_v54 = vld [vmem:[#allocation65_spill] sm:$0xff]  ;;  %v5900_v37 = vunpack.i.h.bf16 %v8484_v11  ;;  %v5899_v58 = vunpack.i.l.bf16 %v8484_v11 }
 0x240   : > { %v2848_v3 = vadd.f32 %v2816_v31, %v10584_v54  ;;  %v5905_v29 = vunpack.i.h.bf16 %v8504_v53  ;;  %v1510_v28 = vmul.f32 %v5890_v49, %v10376_v59  ;;  %v1509_v19 = vmul.f32 %v5889_v6, %v10376_v59 }
 0x241   : > { %v5910_v50 = vunpack.i.h.bf16 %v8525_v21  ;;  %v5909_v9 = vunpack.i.l.bf16 %v8525_v21  ;;  %v1515_v31 = vmul.f32 %v5894_v55, %v10376_v59  ;;  %v1520_v38 = vmul.f32 %v5900_v37, %v10376_v59  ;;  %v10595_v37 = vld [vmem:[#allocation81_spill] sm:$0xff] }
 0x242   : > { %v1519_v49 = vmul.f32 %v5899_v58, %v10376_v59  ;;  %v8600_v6 = vadd.f32 %v3003_v45, %v2843_v7  ;;  %v8602_v21 = vadd.f32 %v3004_v47, %v2844_v22  ;;  %v10591_v22 = vld [vmem:[#allocation79_spill] sm:$0xff] }
 0x243   : > { %5866 = vperm.xlu1 %5809, %v10407_v26   ;;  %v5382_v23 = vpop.permute.xlu1 %5381  ;;  %v8571_v13 = vpop.permute.xlu0 %5917  ;;  %v5904_v26 = vunpack.i.l.bf16 %v8504_v53  ;;  %v1516_v53 = vmul.f32 %v5895_v51, %v10376_v59  ;;  %v8608_v51 = vadd.f32 %v3008_v12, %v2848_v3  ;;  %v1528_v40 = vmul.f32 %v5910_v50, %v10376_v59 }
 0x244   : > { %v5384_v46 = vunpack.i.h.bf16 %v5382_v23  ;;  %v5383_v56 = vunpack.i.l.bf16 %v5382_v23  ;;  %v1527_v45 = vmul.f32 %v5909_v9, %v10376_v59  ;;  %v8620_v54 = vadd.f32 %v1515_v31, %v10591_v22  ;;  %v10603_v31 = vld [vmem:[#allocation87_spill] sm:$0xff] }
 0x245   : > { %v1523_v23 = vmul.f32 %v5904_v26, %v10376_v59  ;;  %v8626_v58 = vadd.f32 %v1519_v49, %v10595_v37  ;;  %v10605_v49 = vld [vmem:[#allocation3_spill] sm:$0xff] }
 0x246   : > { %v3178_v44 = vmul.f32 %v5384_v46, %v10376_v59  ;;  %v3177_v10 = vmul.f32 %v5383_v56, %v10376_v59  ;;  %v8606_v46 = vadd.f32 %v3007_v48, %v2847_v43  ;;  %10592 = vst [vmem:[#allocation67_spill] sm:$0xff] %v8620_v54  ;;  %v10593_v48 = vld [vmem:[#allocation82_spill] sm:$0xff]  ;;  %v10697_v54 = vld [vmem:[#allocation112_spill] sm:$0xff] }
 0x247   : > { %5876 = vperm.xlu1 %5809, %v10418_v30   ;;  %v8588_v60 = vpop.permute.xlu1 %5386  ;;  %v8590_v11 = vpop.permute.xlu0 %5922  ;;  %v1524_v30 = vmul.f32 %v5905_v29, %v10376_v59  ;;  %v8623_v12 = vadd.f32 %v1516_v53, %v10593_v48  ;;  %10596 = vst [vmem:[#allocation74_spill] sm:$0xff] %v8626_v58  ;;  %v10597_v29 = vld [vmem:[#allocation96_spill] sm:$0xff]  ;;  %v10694_v58 = vld [vmem:[#allocation6_spill] sm:$0xff] }
 0x248   : > { %v8594_v63 = vadd.f32 %v3177_v10, %v3017_v18  ;;  %v8596_v32 = vadd.f32 %v3178_v44, %v3018_v8  ;;  %v10587_v18 = vld [vmem:[#allocation77_spill] sm:$0xff]  ;;  %v10589_v8 = vld [vmem:[#allocation80_spill] sm:$0xff]  ;;  %v8629_v26 = vadd.f32 %v1520_v38, %v10597_v29 }
 0x249   : > { %v8611_v55 = vadd.f32 %v1509_v19, %v10587_v18  ;;  %v8614_v56 = vadd.f32 %v1510_v28, %v10589_v8  ;;  %10594 = vst [vmem:[#allocation99_spill] sm:$0xff] %v8623_v12  ;;  %v10599_v28 = vld [vmem:[#allocation83_spill] sm:$0xff]  ;;  %v10601_v19 = vld [vmem:[#allocation89_spill] sm:$0xff]  ;;  %v8640_v18 = vadd.f32 %v1527_v45, %v10603_v31  ;;  %v8643_v8 = vadd.f32 %v1528_v40, %v10605_v49  ;;  %v10613_v29 = vld [vmem:[#allocation36_spill] sm:$0xff] }
 0x24a   : > { %10585 = vst [vmem:[#allocation113_spill] sm:$0xff] %v8594_v63  ;;  %10586 = vst [vmem:[#allocation27_spill] sm:$0xff] %v8596_v32  ;;  %v8635_v50 = vadd.f32 %v1524_v30, %v10601_v19  ;;  %v10611_v40 = vld [vmem:[#allocation51_spill] sm:$0xff]  ;;  %v5915_v19 = vunpack.i.h.bf16 %v8544_v5 }
 0x24b   : > { %10588 = vst [vmem:[#allocation134_spill] sm:$0xff] %v8611_v55  ;;  %10590 = vst [vmem:[#allocation94_spill] sm:$0xff] %v8614_v56  ;;  %6007 = vperm.xlu1 %5809, %v10433_v35   ;;  %v5392_v47 = vpop.permute.xlu1 %5391  ;;  %v5928_v7 = vpop.permute.xlu0 %5927  ;;  %v8632_v35 = vadd.f32 %v1523_v23, %v10599_v28  ;;  %v10677_v32 = vld [vmem:[#allocation155_spill] sm:$0xff]  ;;  %v5378_v55 = vunpack.i.h.bf16 %v8539_v14 }
 0x24c   : > { %v5394_v43 = vunpack.i.h.bf16 %v5392_v47  ;;  %v5393_v3 = vunpack.i.l.bf16 %v5392_v47  ;;  %10598 = vst [vmem:[#allocation58_spill] sm:$0xff] %v8629_v26  ;;  %v5930_v44 = vunpack.i.h.bf16 %v5928_v7  ;;  %v5929_v10 = vunpack.i.l.bf16 %v5928_v7  ;;  %10602 = vst [vmem:[#allocation115_spill] sm:$0xff] %v8635_v50  ;;  %v10691_v50 = vld [vmem:[#allocation78_spill] sm:$0xff] }
 0x24d   : > { %10600 = vst [vmem:[#allocation145_spill] sm:$0xff] %v8632_v35  ;;  %10604 = vst [vmem:[#allocation164_spill] sm:$0xff] %v8640_v18  ;;  %v10607_v7 = vmov 3   ;;  %v8685_v31 = vmul.f32 %v5915_v19, %v10376_v59 }
 0x24e   : > { %v3184_v9 = vmul.f32 %v5394_v43, %v10376_v59  ;;  %v3183_v53 = vmul.f32 %v5393_v3, %v10376_v59  ;;  %10606 = vst [vmem:[#allocation69_spill] sm:$0xff] %v8643_v8  ;;  %v2343_v38 = vmul.f32 %v5930_v44, %v10376_v59  ;;  %v2342_v47 = vmul.f32 %v5929_v10, %v10376_v59  ;;  %v10610_v3 = vld [vmem:[#allocation18_spill] sm:$0xff]  ;;  %v10689_v8 = vld [vmem:[#allocation60_spill] sm:$0xff] }
 0x24f   : > { %6016 = vset.pattern.permute.xlu1 %v10607_v7  ;;  %v5397_v23 = vpop.permute.xlu1 %5396  ;;  %v5933_v22 = vpop.permute.xlu0 %5932 }
 0x250   : > { %v8649_v30 = vadd.f32 %v3183_v53, %v8553_v25  ;;  %v8652_v48 = vadd.f32 %v3184_v9, %v8556_v27  ;;  %v5399_v43 = vunpack.i.h.bf16 %v5397_v23  ;;  %v5398_v45 = vunpack.i.l.bf16 %v5397_v23  ;;  %6018 = vperm.xlu1 %6016, %v10610_v3  }
 0x251   : > { %v8656_v37 = vadd.f32 %v2342_v47, %v10611_v40  ;;  %v8659_v44 = vadd.f32 %v2343_v38, %v10613_v29  ;;  %v5935_v10 = vunpack.i.h.bf16 %v5933_v22  ;;  %v5934_v28 = vunpack.i.l.bf16 %v5933_v22  ;;  %v10619_v40 = vld [vmem:[#allocation29_spill] sm:$0xff] }
 0x252   : > { %10608 = vst [vmem:[#allocation128_spill] sm:$0xff] %v8649_v30  ;;  %10609 = vst [vmem:[#allocation127_spill] sm:$0xff] %v8652_v48  ;;  %v5914_v25 = vunpack.i.l.bf16 %v8544_v5  ;;  %v3188_v53 = vmul.f32 %v5399_v43, %v10376_v59  ;;  %v3187_v27 = vmul.f32 %v5398_v45, %v10376_v59  ;;  %v10617_v45 = vld [vmem:[#allocation37_spill] sm:$0xff]  ;;  %v10675_v48 = vld [vmem:[#allocation24_spill] sm:$0xff] }
 0x253   : > { %10612 = vst [vmem:[#allocation156_spill] sm:$0xff] %v8656_v37  ;;  %10614 = vst [vmem:[#allocation33_spill] sm:$0xff] %v8659_v44  ;;  %v2349_v49 = vmul.f32 %v5935_v10, %v10376_v59  ;;  %v2348_v38 = vmul.f32 %v5934_v28, %v10376_v59  ;;  %v5402_v47 = vpop.permute.xlu1 %5401  ;;  %v5938_v7 = vpop.permute.xlu0 %5937  ;;  %v5373_v44 = vunpack.i.h.bf16 %v10697_v54  ;;  %v10701_v37 = vld [vmem:[#allocation136_spill] sm:$0xff] }
 0x254   : > { %v8672_v23 = vadd.f32 %v3187_v27, %v8558_v52  ;;  %v8675_v5 = vadd.f32 %v3188_v53, %v8560_v33  ;;  %v5404_v22 = vunpack.i.h.bf16 %v5402_v47  ;;  %v5403_v43 = vunpack.i.l.bf16 %v5402_v47  ;;  %6023 = vperm.xlu1 %6016, %v10547_v17   ;;  %v10626_v27 = vld [vmem:[#allocation124_spill] sm:$0xff] }
 0x255   : > { %v8679_v3 = vadd.f32 %v2348_v38, %v10617_v45  ;;  %v8682_v29 = vadd.f32 %v2349_v49, %v10619_v40  ;;  %v5940_v10 = vunpack.i.h.bf16 %v5938_v7  ;;  %v5939_v28 = vunpack.i.l.bf16 %v5938_v7  ;;  %v10623_v45 = vld [vmem:[#allocation19_spill] sm:$0xff] }
 0x256   : > { %10615 = vst [vmem:[#allocation76_spill] sm:$0xff] %v8672_v23  ;;  %10616 = vst [vmem:[#allocation129_spill] sm:$0xff] %v8675_v5  ;;  %v8688_v52 = vmul.f32 %v5914_v25, %v10376_v59  ;;  %v3192_v33 = vmul.f32 %v5404_v22, %v10376_v59  ;;  %v3191_v53 = vmul.f32 %v5403_v43, %v10376_v59  ;;  %v10624_v40 = vld [vmem:[#allocation43_spill] sm:$0xff]  ;;  %v5920_v5 = vunpack.i.h.bf16 %v8571_v13 }
 0x257   : > { %10618 = vst [vmem:[#allocation53_spill] sm:$0xff] %v8679_v3  ;;  %10620 = vst [vmem:[#allocation42_spill] sm:$0xff] %v8682_v29  ;;  %v2353_v49 = vmul.f32 %v5940_v10, %v10376_v59  ;;  %v2352_v38 = vmul.f32 %v5939_v28, %v10376_v59  ;;  %v5407_v47 = vpop.permute.xlu1 %5406  ;;  %v5943_v19 = vpop.permute.xlu0 %5942  ;;  %v5368_v29 = vunpack.i.h.bf16 %v10694_v58 }
 0x258   : > { %v8699_v7 = vadd.f32 %v3191_v53, %v8562_v2  ;;  %v8702_v25 = vadd.f32 %v3192_v33, %v8564_v1  ;;  %v5409_v22 = vunpack.i.h.bf16 %v5407_v47  ;;  %v5408_v43 = vunpack.i.l.bf16 %v5407_v47  ;;  %6033 = vperm.xlu1 %6016, %v10623_v45  }
 0x259   : > { %v8706_v17 = vadd.f32 %v2352_v38, %v10624_v40  ;;  %v8709_v9 = vadd.f32 %v2353_v49, %v10626_v27  ;;  %v5945_v10 = vunpack.i.h.bf16 %v5943_v19  ;;  %v5944_v28 = vunpack.i.l.bf16 %v5943_v19  ;;  %v10630_v40 = vld [vmem:[#allocation32_spill] sm:$0xff]  ;;  %v10632_v38 = vld [vmem:[#allocation161_spill] sm:$0xff] }
 0x25a   : > { %10621 = vst [vmem:[#allocation57_spill] sm:$0xff] %v8699_v7  ;;  %10622 = vst [vmem:[#allocation56_spill] sm:$0xff] %v8702_v25  ;;  %v5919_v2 = vunpack.i.l.bf16 %v8571_v13  ;;  %v3196_v53 = vmul.f32 %v5409_v22, %v10376_v59  ;;  %v3195_v1 = vmul.f32 %v5408_v43, %v10376_v59  ;;  %v1536_v7 = vmul.f32 %v5920_v5, %v10376_v59 }
 0x25b   : > { %10625 = vst [vmem:[#allocation133_spill] sm:$0xff] %v8706_v17  ;;  %10627 = vst [vmem:[#allocation132_spill] sm:$0xff] %v8709_v9  ;;  %v2357_v47 = vmul.f32 %v5945_v10, %v10376_v59  ;;  %v2356_v27 = vmul.f32 %v5944_v28, %v10376_v59  ;;  %v5412_v49 = vpop.permute.xlu1 %5411  ;;  %v5948_v19 = vpop.permute.xlu0 %5947  ;;  %v10693_v9 = vld [vmem:[#allocation71_spill] sm:$0xff] }
 0x25c   : > { %v8722_v45 = vadd.f32 %v3195_v1, %v8600_v6  ;;  %v8725_v13 = vadd.f32 %v3196_v53, %v8602_v21  ;;  %v5414_v22 = vunpack.i.h.bf16 %v5412_v49  ;;  %v5413_v43 = vunpack.i.l.bf16 %v5412_v49  ;;  %6043 = vperm.xlu1 %6016, %v10485_v20   ;;  %v10638_v20 = vld [vmem:[#allocation163_spill] sm:$0xff] }
 0x25d   : > { %v8729_v33 = vadd.f32 %v2356_v27, %v10630_v40  ;;  %v8732_v25 = vadd.f32 %v2357_v47, %v10632_v38  ;;  %v5950_v10 = vunpack.i.h.bf16 %v5948_v19  ;;  %v5949_v28 = vunpack.i.l.bf16 %v5948_v19 }
 0x25e   : > { %10628 = vst [vmem:[#allocation63_spill] sm:$0xff] %v8722_v45  ;;  %10629 = vst [vmem:[#allocation62_spill] sm:$0xff] %v8725_v13  ;;  %v1535_v6 = vmul.f32 %v5919_v2, %v10376_v59  ;;  %v3200_v1 = vmul.f32 %v5414_v22, %v10376_v59  ;;  %v3199_v21 = vmul.f32 %v5413_v43, %v10376_v59  ;;  %v10636_v43 = vld [vmem:[#allocation100_spill] sm:$0xff]  ;;  %v5925_v13 = vunpack.i.h.bf16 %v8590_v11 }
 0x25f   : > { %10631 = vst [vmem:[#allocation66_spill] sm:$0xff] %v8729_v33  ;;  %10633 = vst [vmem:[#allocation65_spill] sm:$0xff] %v8732_v25  ;;  %v2361_v27 = vmul.f32 %v5950_v10, %v10376_v59  ;;  %v2360_v38 = vmul.f32 %v5949_v28, %v10376_v59  ;;  %v5417_v47 = vpop.permute.xlu1 %5416  ;;  %v5953_v49 = vpop.permute.xlu0 %5952  ;;  %v10692_v33 = vld [vmem:[#allocation20_spill] sm:$0xff]  ;;  %v5362_v26 = vunpack.i.l.bf16 %v10693_v9 }
 0x260   : > { %v8745_v5 = vadd.f32 %v3199_v21, %v8606_v46  ;;  %v8748_v2 = vadd.f32 %v3200_v1, %v8608_v51  ;;  %v5419_v19 = vunpack.i.h.bf16 %v5417_v47  ;;  %v5418_v22 = vunpack.i.l.bf16 %v5417_v47  ;;  %6053 = vperm.xlu1 %6016, %v10496_v15   ;;  %v10646_v1 = vld [vmem:[#allocation73_spill] sm:$0xff] }
 0x261   : > { %v8752_v40 = vadd.f32 %v2360_v38, %v10636_v43  ;;  %v8755_v53 = vadd.f32 %v2361_v27, %v10638_v20  ;;  %v5955_v10 = vunpack.i.h.bf16 %v5953_v49  ;;  %v5954_v28 = vunpack.i.l.bf16 %v5953_v49  ;;  %v10642_v43 = vld [vmem:[#allocation102_spill] sm:$0xff] }
 0x262   : > { %10634 = vst [vmem:[#allocation77_spill] sm:$0xff] %v8745_v5  ;;  %10635 = vst [vmem:[#allocation80_spill] sm:$0xff] %v8748_v2  ;;  %v5924_v46 = vunpack.i.l.bf16 %v8590_v11  ;;  %v3204_v21 = vmul.f32 %v5419_v19, %v10376_v59  ;;  %v3203_v51 = vmul.f32 %v5418_v22, %v10376_v59  ;;  %v8778_v15 = vadd.f32 %v8688_v52, %v10642_v43  ;;  %v10669_v5 = vld [vmem:[#allocation104_spill] sm:$0xff] }
 0x263   : > { %10637 = vst [vmem:[#allocation79_spill] sm:$0xff] %v8752_v40  ;;  %10639 = vst [vmem:[#allocation82_spill] sm:$0xff] %v8755_v53  ;;  %v2365_v38 = vmul.f32 %v5955_v10, %v10376_v59  ;;  %v2364_v20 = vmul.f32 %v5954_v28, %v10376_v59  ;;  %v5958_v27 = vpop.permute.xlu0 %5957  ;;  %v10644_v10 = vld [vmem:[#allocation93_spill] sm:$0xff]  ;;  %v1540_v43 = vmul.f32 %v5925_v13, %v10376_v59  ;;  %v5352_v40 = vunpack.i.l.bf16 %v10689_v8 }
 0x264   : > { %v8768_v47 = vadd.f32 %v3203_v51, %v8329_v36  ;;  %v8771_v11 = vadd.f32 %v3204_v21, %v8332_v16  ;;  %v5960_v49 = vunpack.i.h.bf16 %v5958_v27  ;;  %v5959_v19 = vunpack.i.l.bf16 %v5958_v27  ;;  %6063 = vperm.xlu1 %6016, %v10506_v41   ;;  %v8774_v22 = vpop.permute.xlu1 %5422  ;;  %10643 = vst [vmem:[#allocation83_spill] sm:$0xff] %v8778_v15  ;;  %v10648_v51 = vld [vmem:[#allocation101_spill] sm:$0xff]  ;;  %v10652_v41 = vld [vmem:[#allocation106_spill] sm:$0xff] }
 0x265   : > { %v8782_v28 = vadd.f32 %v8685_v31, %v10644_v10  ;;  %v8785_v36 = vadd.f32 %v2364_v20, %v10646_v1  ;;  %v8788_v16 = vadd.f32 %v2365_v38, %v10648_v51  ;;  %v10650_v21 = vld [vmem:[#allocation105_spill] sm:$0xff]  ;;  %v1539_v31 = vmul.f32 %v5924_v46, %v10376_v59  ;;  %v10658_v46 = vld [vmem:[#allocation135_spill] sm:$0xff] }
 0x266   : > { %10640 = vst [vmem:[#allocation81_spill] sm:$0xff] %v8768_v47  ;;  %10641 = vst [vmem:[#allocation96_spill] sm:$0xff] %v8771_v11  ;;  %v8791_v27 = vadd.f32 %v1535_v6, %v10650_v21  ;;  %v8794_v11 = vadd.f32 %v1536_v7, %v10652_v41  ;;  %v2369_v47 = vmul.f32 %v5960_v49, %v10376_v59  ;;  %v10654_v6 = vld [vmem:[#allocation49_spill] sm:$0xff]  ;;  %v10656_v7 = vld [vmem:[#allocation4_spill] sm:$0xff] }
 0x267   : > { %10645 = vst [vmem:[#allocation89_spill] sm:$0xff] %v8782_v28  ;;  %10647 = vst [vmem:[#allocation87_spill] sm:$0xff] %v8785_v36  ;;  %v2368_v52 = vmul.f32 %v5959_v19, %v10376_v59  ;;  %v5963_v20 = vpop.permute.xlu0 %5962  ;;  %v8815_v19 = vadd.f32 %v10658_v46, %v8463_v0  ;;  %v10659_v41 = vld [vmem:[#allocation114_spill] sm:$0xff]  ;;  %v8853_v45 = vadd.f32 %v1540_v43, %v10669_v5  ;;  %v10678_v5 = vld [vmem:[#allocation159_spill] sm:$0xff] }
 0x268   : > { %10649 = vst [vmem:[#allocation3_spill] sm:$0xff] %v8788_v16  ;;  %10651 = vst [vmem:[#allocation18_spill] sm:$0xff] %v8791_v27  ;;  %v8808_v51 = vadd.f32 %v2369_v47, %v10656_v7  ;;  %v5965_v49 = vunpack.i.h.bf16 %v5963_v20  ;;  %v5964_v21 = vunpack.i.l.bf16 %v5963_v20  ;;  %6073 = vperm.xlu1 %6016, %v10514_v34   ;;  %v8811_v13 = vpop.permute.xlu1 %5432  ;;  %v8819_v38 = vadd.f32 %v10659_v41, %v8460_v4  ;;  %v10661_v47 = vld [vmem:[#allocation15_spill] sm:$0xff]  ;;  %v10688_v15 = vld [vmem:[#allocation137_spill] sm:$0xff] }
 0x269   : > { %10653 = vst [vmem:[#allocation51_spill] sm:$0xff] %v8794_v11  ;;  %v8805_v10 = vadd.f32 %v2368_v52, %v10654_v6  ;;  %v10660_v52 = vld [vmem:[#allocation50_spill] sm:$0xff]  ;;  %v8827_v7 = vadd.f32 %v10661_v47, %v8472_v42  ;;  %v10662_v4 = vunpack.i.h.bf16 %v10565_v24  ;;  %v10664_v42 = vld [vmem:[#allocation97_spill] sm:$0xff]  ;;  %10670 = vst [vmem:[#allocation19_spill] sm:$0xff] %v8853_v45  ;;  %v5844_v43 = vunpack.i.h.bf16 %v10678_v5 }
 0x26a   : > { %10657 = vst [vmem:[#allocation37_spill] sm:$0xff] %v8808_v51  ;;  %v8823_v6 = vadd.f32 %v10660_v52, %v8475_v39  ;;  %v2373_v0 = vmul.f32 %v5965_v49, %v10376_v59  ;;  %v2372_v46 = vmul.f32 %v5964_v21, %v10376_v59  ;;  %v10663_v39 = vunpack.i.l.bf16 %v10565_v24  ;;  %v10667_v49 = vld [vmem:[#allocation98_spill] sm:$0xff]  ;;  %v10673_v24 = vld [vmem:[#allocation123_spill] sm:$0xff]  ;;  %v10684_v45 = vld [vmem:[#allocation21_spill] sm:$0xff] }
 0x26b   : > { %10655 = vst [vmem:[#allocation36_spill] sm:$0xff] %v8805_v10  ;;  %v2662_v41 = vmul.f32 %v10662_v4, %v10495_v61  ;;  %v10665_v47 = vunpack.i.h.bf16 %v10664_v42  ;;  %v10666_v34 = vunpack.i.l.bf16 %v10664_v42  ;;  %v8847_v2 = vpop.permute.xlu0 %5967  ;;  %v8850_v21 = vadd.f32 %v1539_v31, %v10667_v49  ;;  %v10671_v4 = vld [vmem:[#allocation75_spill] sm:$0xff]  ;;  %v10676_v42 = vld [vmem:[#allocation61_spill] sm:$0xff] }
 0x26c   : > { %v2661_v52 = vmul.f32 %v10663_v39, %v10495_v61  ;;  %v8856_v23 = vadd.f32 %v2372_v46, %v10671_v4  ;;  %v8859_v39 = vadd.f32 %v2373_v0, %v10673_v24  ;;  %6083 = vperm.xlu1 %6016, %v10675_v48   ;;  %v5818_v30 = vunpack.i.l.bf16 %v10676_v42  ;;  %v10679_v4 = vld [vmem:[#allocation46_spill] sm:$0xff]  ;;  %v10680_v51 = vld [vmem:[#allocation91_spill] sm:$0xff] }
 0x26d   : > { %v2796_v1 = vmul.f32 %v10665_v47, %v6636_v62  ;;  %v2795_v20 = vmul.f32 %v10666_v34, %v6636_v62  ;;  %10668 = vst [vmem:[#allocation29_spill] sm:$0xff] %v8850_v21  ;;  %v8862_v47 = vpop.permute.xlu1 %5437  ;;  %v5819_v34 = vunpack.i.h.bf16 %v10676_v42  ;;  %v5834_v31 = vunpack.i.h.bf16 %v10677_v32  ;;  %v10683_v0 = vld [vmem:[#allocation90_spill] sm:$0xff]  ;;  %v10685_v21 = vld [vmem:[#allocation45_spill] sm:$0xff] }
 0x26e   : > { %10672 = vst [vmem:[#allocation43_spill] sm:$0xff] %v8856_v23  ;;  %10674 = vst [vmem:[#allocation124_spill] sm:$0xff] %v8859_v39  ;;  %v5833_v49 = vunpack.i.l.bf16 %v10677_v32  ;;  %v5843_v46 = vunpack.i.l.bf16 %v10678_v5  ;;  %v5854_v24 = vunpack.i.h.bf16 %v10679_v4  ;;  %v5853_v63 = vunpack.i.l.bf16 %v10679_v4  ;;  %v10681_v32 = vld [vmem:[#allocation138_spill] sm:$0xff]  ;;  %v10682_v5 = vld [vmem:[#allocation68_spill] sm:$0xff] }
 0x26f   : > { %v5338_v42 = vunpack.i.h.bf16 %v10680_v51  ;;  %v5337_v11 = vunpack.i.l.bf16 %v10680_v51  ;;  %v8878_v10 = vpop.permute.xlu0 %5972  ;;  %v8881_v27 = vadd.f32 %v10681_v32, %v2661_v52  ;;  %v8884_v16 = vadd.f32 %v10682_v5, %v2662_v41 }
 0x270   : > { %v5864_v23 = vunpack.i.h.bf16 %v10683_v0  ;;  %v5863_v48 = vunpack.i.l.bf16 %v10683_v0  ;;  %v2827_v4 = vadd.f32 %v2795_v20, %v10684_v45  ;;  %v2828_v28 = vadd.f32 %v2796_v1, %v10685_v21 }
 0x271   : > { %v8888_v39 = vpop.permute.xlu1 %5447  ;;  %v8893_v51 = vmul.f32 %v5819_v34, %v10314_v57  ;;  %v8896_v36 = vmul.f32 %v5818_v30, %v10314_v57  ;;  %v8899_v52 = vmul.f32 %v5834_v31, %v10314_v57  ;;  %v8902_v41 = vmul.f32 %v5833_v49, %v10314_v57  ;;  %v10686_v49 = vld [vmem:[#allocation126_spill] sm:$0xff] }
 0x272   : > { %v8905_v0 = vmul.f32 %v5844_v43, %v10314_v57  ;;  %v8908_v32 = vmul.f32 %v5843_v46, %v10314_v57  ;;  %v8911_v45 = vmul.f32 %v5854_v24, %v10314_v57  ;;  %v8914_v1 = vmul.f32 %v5853_v63, %v10314_v57  ;;  %v10687_v63 = vld [vmem:[#allocation54_spill] sm:$0xff] }
 0x273   : > { %v2984_v30 = vmul.f32 %v5338_v42, %v10314_v57  ;;  %v2983_v20 = vmul.f32 %v5337_v11, %v10314_v57  ;;  %v8918_v21 = vpop.permute.xlu0 %5977  ;;  %v8921_v34 = vmul.f32 %v5864_v23, %v10314_v57  ;;  %v8924_v31 = vmul.f32 %v5863_v48, %v10314_v57  ;;  %v10690_v48 = vld [vmem:[#allocation26_spill] sm:$0xff] }
 0x274   : > { %v5343_v43 = vunpack.i.h.bf16 %v10686_v49  ;;  %v5342_v46 = vunpack.i.l.bf16 %v10686_v49  ;;  %v5874_v5 = vunpack.i.h.bf16 %v10687_v63  ;;  %v5873_v42 = vunpack.i.l.bf16 %v10687_v63 }
 0x275   : > { %v8928_v24 = vpop.permute.xlu1 %5457  ;;  %v5348_v11 = vunpack.i.h.bf16 %v10688_v15  ;;  %v5347_v53 = vunpack.i.l.bf16 %v10688_v15  ;;  %v5353_v23 = vunpack.i.h.bf16 %v10689_v8  ;;  %v5358_v18 = vunpack.i.h.bf16 %v10690_v48 }
 0x276   : > { %v5357_v25 = vunpack.i.l.bf16 %v10690_v48  ;;  %v8939_v49 = vadd.f32 %v2983_v20, %v10691_v50  ;;  %v8942_v35 = vadd.f32 %v2984_v30, %v10692_v33  ;;  %v5363_v63 = vunpack.i.h.bf16 %v10693_v9 }
 0x277   : > { %v8946_v17 = vpop.permute.xlu0 %5982  ;;  %v2988_v15 = vmul.f32 %v5343_v43, %v10314_v57  ;;  %v2987_v8 = vmul.f32 %v5342_v46, %v10314_v57  ;;  %v5367_v48 = vunpack.i.l.bf16 %v10694_v58  ;;  %v8955_v50 = vmul.f32 %v5874_v5, %v10314_v57 }
 0x278   : > { %v8958_v33 = vmul.f32 %v5873_v42, %v10314_v57  ;;  %v2990_v9 = vmul.f32 %v5348_v11, %v10314_v57  ;;  %v2989_v30 = vmul.f32 %v5347_v53, %v10314_v57  ;;  %v2994_v20 = vmul.f32 %v5353_v23, %v10314_v57 }
 0x279   : > { %v8952_v12 = vpop.permute.xlu1 %5467  ;;  %10695 = vst [vmem:[#allocation32_spill] sm:$0xff] %v8955_v50  ;;  %v2993_v43 = vmul.f32 %v5352_v40, %v10314_v57  ;;  %v2998_v46 = vmul.f32 %v5358_v18, %v10314_v57  ;;  %v2997_v58 = vmul.f32 %v5357_v25, %v10314_v57  ;;  %v3002_v3 = vmul.f32 %v5363_v63, %v10314_v57  ;;  %v10700_v25 = vld [vmem:[#allocation10_spill] sm:$0xff]  ;;  %v10702_v50 = vld [vmem:[#allocation52_spill] sm:$0xff] }
 0x27a   : > { %10696 = vst [vmem:[#allocation161_spill] sm:$0xff] %v8958_v33  ;;  %v3001_v5 = vmul.f32 %v5362_v26, %v10314_v57  ;;  %v5372_v42 = vunpack.i.l.bf16 %v10697_v54  ;;  %v8972_v11 = vadd.f32 %v2987_v8, %v2827_v4  ;;  %v8974_v53 = vadd.f32 %v2988_v15, %v2828_v28  ;;  %v10703_v4 = vld [vmem:[#allocation110_spill] sm:$0xff]  ;;  %v10704_v15 = vld [vmem:[#allocation31_spill] sm:$0xff] }
 0x27b   : > { %v8970_v56 = vpop.permute.xlu0 %5987  ;;  %v3006_v40 = vmul.f32 %v5368_v29, %v10314_v57  ;;  %v3005_v18 = vmul.f32 %v5367_v48, %v10314_v57  ;;  %v3021_v63 = vadd.f32 %v2989_v30, %v10700_v25  ;;  %v3022_v26 = vadd.f32 %v2990_v9, %v10701_v37  ;;  %v10705_v8 = vld [vmem:[#allocation162_spill] sm:$0xff]  ;;  %v10707_v37 = vld [vmem:[#allocation7_spill] sm:$0xff] }
 0x27c   : > { %10698 = vst [vmem:[#allocation100_spill] sm:$0xff] %v8972_v11  ;;  %10699 = vst [vmem:[#allocation163_spill] sm:$0xff] %v8974_v53  ;;  %v5377_v54 = vunpack.i.l.bf16 %v8539_v14  ;;  %v8985_v33 = vadd.f32 %v2993_v43, %v10702_v50  ;;  %v8988_v28 = vadd.f32 %v2994_v20, %v10703_v4  ;;  %v8991_v29 = vadd.f32 %v2997_v58, %v10704_v15  ;;  %v10706_v53 = vld [vmem:[#allocation86_spill] sm:$0xff] }
 0x27d   : > { %v8978_v23 = vpop.permute.xlu1 %5477  ;;  %v8994_v48 = vadd.f32 %v2998_v46, %v10705_v8  ;;  %v8997_v30 = vadd.f32 %v3001_v5, %v10706_v53  ;;  %v9000_v9 = vadd.f32 %v3002_v3, %v10707_v37  ;;  %v3010_v14 = vmul.f32 %v5373_v44, %v10314_v57 }
 0x27e   : > { %v3009_v50 = vmul.f32 %v5372_v42, %v10314_v57  ;;  %v9007_v20 = vadd.f32 %v3005_v18, %v8815_v19  ;;  %v9010_v58 = vadd.f32 %v3006_v40, %v8819_v38  ;;  %v5425_v46 = vunpack.i.h.bf16 %v8774_v22 }
 0x27f   : > { %v9004_v43 = vpop.permute.xlu0 %5992  ;;  %v5424_v5 = vunpack.i.l.bf16 %v8774_v22  ;;  %v3014_v3 = vmul.f32 %v5378_v55, %v10314_v57  ;;  %v3013_v44 = vmul.f32 %v5377_v54, %v10314_v57  ;;  %v5970_v42 = vunpack.i.h.bf16 %v8847_v2 }
 0x280   : > { %v5969_v25 = vunpack.i.l.bf16 %v8847_v2  ;;  %v5389_v19 = vunpack.i.h.bf16 %v8588_v60  ;;  %v5388_v18 = vunpack.i.l.bf16 %v8588_v60  ;;  %v5440_v38 = vunpack.i.h.bf16 %v8862_v47 }
 0x281   : > { %v9014_v53 = vpop.permute.xlu1 %5487  ;;  %v5439_v40 = vunpack.i.l.bf16 %v8862_v47  ;;  %v9025_v22 = vadd.f32 %v3009_v50, %v8823_v6  ;;  %v9028_v4 = vadd.f32 %v3010_v14, %v8827_v7  ;;  %v5975_v55 = vunpack.i.h.bf16 %v8878_v10 }
 0x282   : > { %v5974_v54 = vunpack.i.l.bf16 %v8878_v10  ;;  %v3465_v2 = vmul.f32 %v5425_v46, %v10495_v61  ;;  %v3464_v60 = vmul.f32 %v5424_v5, %v10495_v61  ;;  %v5435_v8 = vunpack.i.h.bf16 %v8811_v13 }
 0x283   : > { %v9032_v15 = vpop.permute.xlu0 %5997  ;;  %v5434_v47 = vunpack.i.l.bf16 %v8811_v13  ;;  %v9041_v6 = vadd.f32 %v3013_v44, %v8881_v27  ;;  %v9044_v7 = vadd.f32 %v3014_v3, %v8884_v16  ;;  %v3176_v10 = vmul.f32 %v5970_v42, %v10376_v59 }
 0x284   : > { %v3175_v14 = vmul.f32 %v5969_v25, %v10376_v59  ;;  %v9049_v50 = vmul.f32 %v5389_v19, %v10376_v59  ;;  %v9052_v46 = vmul.f32 %v5388_v18, %v10376_v59  ;;  %v3471_v13 = vmul.f32 %v5440_v38, %v10495_v61  ;;  %v10710_v25 = vld [vmem:[#allocation139_spill] sm:$0xff] }
 0x285   : > { %v9038_v37 = vpop.permute.xlu1 %5618  ;;  %v3470_v5 = vmul.f32 %v5439_v40, %v10495_v61  ;;  %v3182_v27 = vmul.f32 %v5975_v55, %v10376_v59  ;;  %v3181_v44 = vmul.f32 %v5974_v54, %v10376_v59  ;;  %v5450_v16 = vunpack.i.h.bf16 %v8888_v39 }
 0x286   : > { %10708 = vst [vmem:[#allocation102_spill] sm:$0xff] %v9049_v50  ;;  %10709 = vst [vmem:[#allocation93_spill] sm:$0xff] %v9052_v46  ;;  %v5449_v3 = vunpack.i.l.bf16 %v8888_v39  ;;  %v9063_v19 = vadd.f32 %v10710_v25, %v3464_v60  ;;  %v10711_v50 = vld [vmem:[#allocation40_spill] sm:$0xff]  ;;  %v3469_v38 = vmul.f32 %v5435_v8, %v10495_v61  ;;  %v3468_v40 = vmul.f32 %v5434_v47, %v10495_v61  ;;  %v10714_v60 = vld [vmem:[#allocation142_spill] sm:$0xff] }
 0x287   : > { %v9060_v42 = vpop.permute.xlu0 %6002  ;;  %v9066_v18 = vadd.f32 %v10711_v50, %v3465_v2  ;;  %v9071_v55 = vadd.f32 %v3175_v14, %v8939_v49  ;;  %v9074_v54 = vadd.f32 %v3176_v10, %v8942_v35  ;;  %v5980_v39 = vunpack.i.h.bf16 %v8918_v21  ;;  %v10716_v2 = vld [vmem:[#allocation119_spill] sm:$0xff] }
 0x288   : > { %v5979_v46 = vunpack.i.l.bf16 %v8918_v21  ;;  %v9079_v25 = vadd.f32 %v10714_v60, %v3470_v5  ;;  %v9082_v50 = vadd.f32 %v10716_v2, %v3471_v13  ;;  %v9084_v47 = vadd.f32 %v3181_v44, %v3021_v63  ;;  %v10721_v2 = vld [vmem:[#allocation70_spill] sm:$0xff] }
 0x289   : > { %10712 = vst [vmem:[#allocation73_spill] sm:$0xff] %v9066_v18  ;;  %10713 = vst [vmem:[#allocation101_spill] sm:$0xff] %v9074_v54  ;;  %v5630_v11 = vpop.permute.xlu1 %5629  ;;  %v9086_v49 = vadd.f32 %v3182_v27, %v3022_v26  ;;  %v3475_v35 = vmul.f32 %v5450_v16, %v10495_v61  ;;  %v3474_v10 = vmul.f32 %v5449_v3, %v10495_v61  ;;  %v5460_v21 = vunpack.i.h.bf16 %v8928_v24  ;;  %v10720_v16 = vld [vmem:[#allocation16_spill] sm:$0xff] }
 0x28a   : > { %10715 = vst [vmem:[#allocation105_spill] sm:$0xff] %v9079_v25  ;;  %10717 = vst [vmem:[#allocation106_spill] sm:$0xff] %v9082_v50  ;;  %v5632_v8 = vunpack.i.h.bf16 %v5630_v11  ;;  %v5631_v18 = vunpack.i.l.bf16 %v5630_v11  ;;  %v5459_v5 = vunpack.i.l.bf16 %v8928_v24  ;;  %v3186_v11 = vmul.f32 %v5980_v39, %v10376_v59  ;;  %v10722_v24 = vld [vmem:[#allocation121_spill] sm:$0xff] }
 0x28b   : > { %10718 = vst [vmem:[#allocation49_spill] sm:$0xff] %v9084_v47  ;;  %10719 = vst [vmem:[#allocation4_spill] sm:$0xff] %v9086_v49  ;;  %v9090_v14 = vpop.permute.xlu0 %6012  ;;  %v3185_v63 = vmul.f32 %v5979_v46, %v10376_v59  ;;  %v5985_v26 = vunpack.i.h.bf16 %v8946_v17  ;;  %v5984_v27 = vunpack.i.l.bf16 %v8946_v17  ;;  %v9103_v25 = vadd.f32 %v10722_v24, %v3474_v10 }
 0x28c   : > { %v3627_v60 = vmul.f32 %v5632_v8, %v6636_v62  ;;  %v3626_v13 = vmul.f32 %v5631_v18, %v6636_v62  ;;  %v10723_v8 = vld [vmem:[#allocation30_spill] sm:$0xff]  ;;  %v5470_v39 = vunpack.i.h.bf16 %v8952_v12  ;;  %v5469_v46 = vunpack.i.l.bf16 %v8952_v12 }
 0x28d   : > { %v5635_v44 = vpop.permute.xlu1 %5634  ;;  %v9106_v18 = vadd.f32 %v10723_v8, %v3475_v35  ;;  %v3479_v54 = vmul.f32 %v5460_v21, %v10495_v61  ;;  %v3478_v17 = vmul.f32 %v5459_v5, %v10495_v61  ;;  %v3190_v10 = vmul.f32 %v5985_v26, %v10376_v59 }
 0x28e   : > { %v3658_v3 = vadd.f32 %v3626_v13, %v10720_v16  ;;  %v3659_v49 = vadd.f32 %v3627_v60, %v10721_v2  ;;  %v5637_v47 = vunpack.i.h.bf16 %v5635_v44  ;;  %v5636_v50 = vunpack.i.l.bf16 %v5635_v44 }
 0x28f   : > { %v9114_v16 = vpop.permute.xlu0 %6028  ;;  %v3189_v44 = vmul.f32 %v5984_v27, %v10376_v59  ;;  %v9125_v21 = vadd.f32 %v3185_v63, %v8985_v33  ;;  %v3483_v26 = vmul.f32 %v5470_v39, %v10495_v61  ;;  %v3482_v27 = vmul.f32 %v5469_v46, %v10495_v61 }
 0x290   : > { %v3629_v13 = vmul.f32 %v5637_v47, %v6636_v62  ;;  %v3628_v60 = vmul.f32 %v5636_v50, %v6636_v62  ;;  %v9119_v2 = vadd.f32 %v8896_v36, %v3658_v3  ;;  %v9122_v12 = vadd.f32 %v8893_v51, %v3659_v49  ;;  %v10726_v3 = vld [vmem:[#allocation148_spill] sm:$0xff]  ;;  %v10727_v51 = vld [vmem:[#allocation147_spill] sm:$0xff] }
 0x291   : > { %v5645_v35 = vpop.permute.xlu1 %5644  ;;  %v9128_v47 = vadd.f32 %v3186_v11, %v8988_v28  ;;  %v9137_v8 = vadd.f32 %v10726_v3, %v3478_v17  ;;  %v9140_v49 = vadd.f32 %v10727_v51, %v3479_v54  ;;  %v5990_v33 = vunpack.i.h.bf16 %v8970_v56 }
 0x292   : > { %10724 = vst [vmem:[#allocation135_spill] sm:$0xff] %v9119_v2  ;;  %10725 = vst [vmem:[#allocation114_spill] sm:$0xff] %v9122_v12  ;;  %v9130_v50 = vadd.f32 %v3628_v60, %v3468_v40  ;;  %v9132_v5 = vadd.f32 %v3629_v13, %v3469_v38  ;;  %v5647_v24 = vunpack.i.h.bf16 %v5645_v35  ;;  %v5646_v36 = vunpack.i.l.bf16 %v5645_v35 }
 0x293   : > { %v5989_v28 = vunpack.i.l.bf16 %v8970_v56  ;;  %v9145_v40 = vadd.f32 %v3189_v44, %v8991_v29  ;;  %v9148_v38 = vadd.f32 %v3190_v10, %v8994_v48  ;;  %v5480_v46 = vunpack.i.h.bf16 %v8978_v23  ;;  %v9154_v17 = vpop.permute.xlu0 %6038  ;;  %v10728_v56 = vld [vmem:[#allocation165_spill] sm:$0xff]  ;;  %v10729_v29 = vld [vmem:[#allocation47_spill] sm:$0xff]  ;;  %v10730_v48 = vld [vmem:[#allocation140_spill] sm:$0xff] }
 0x294   : > { %v3633_v11 = vmul.f32 %v5647_v24, %v6636_v62  ;;  %v3632_v63 = vmul.f32 %v5646_v36, %v6636_v62  ;;  %v5479_v54 = vunpack.i.l.bf16 %v8978_v23  ;;  %v9157_v35 = vadd.f32 %v10728_v56, %v3482_v27  ;;  %v10731_v24 = vld [vmem:[#allocation72_spill] sm:$0xff] }
 0x295   : > { %v5655_v39 = vpop.permute.xlu1 %5654  ;;  %v9160_v44 = vadd.f32 %v10729_v29, %v3483_v26  ;;  %v3194_v36 = vmul.f32 %v5990_v33, %v10376_v59  ;;  %v3193_v51 = vmul.f32 %v5989_v28, %v10376_v59  ;;  %v5994_v27 = vunpack.i.l.bf16 %v9004_v43  ;;  %v10734_v28 = vld [vmem:[#allocation141_spill] sm:$0xff] }
 0x296   : > { %v5657_v13 = vunpack.i.h.bf16 %v5655_v39  ;;  %v5656_v60 = vunpack.i.l.bf16 %v5655_v39  ;;  %v3664_v10 = vadd.f32 %v3632_v63, %v10730_v48  ;;  %v3665_v3 = vadd.f32 %v3633_v11, %v10731_v24 }
 0x297   : > { %v5995_v39 = vunpack.i.h.bf16 %v9004_v43  ;;  %v3487_v11 = vmul.f32 %v5480_v46, %v10495_v61  ;;  %v3486_v33 = vmul.f32 %v5479_v54, %v10495_v61  ;;  %v5489_v24 = vunpack.i.l.bf16 %v9014_v53 }
 0x298   : > { %v3637_v23 = vmul.f32 %v5657_v13, %v6636_v62  ;;  %v3636_v12 = vmul.f32 %v5656_v60, %v6636_v62  ;;  %v9171_v26 = vadd.f32 %v8902_v41, %v3664_v10  ;;  %v9174_v63 = vadd.f32 %v8899_v52, %v3665_v3  ;;  %v10735_v13 = vld [vmem:[#allocation17_spill] sm:$0xff]  ;;  %v9188_v10 = vpop.permute.xlu0 %6048 }
 0x299   : > { %v5665_v56 = vpop.permute.xlu1 %5664  ;;  %v5490_v60 = vunpack.i.h.bf16 %v9014_v53  ;;  %v9183_v41 = vadd.f32 %v3193_v51, %v8997_v30  ;;  %v9186_v52 = vadd.f32 %v3194_v36, %v9000_v9  ;;  %v3198_v54 = vmul.f32 %v5995_v39, %v10376_v59  ;;  %v10739_v36 = vld [vmem:[#allocation5_spill] sm:$0xff]  ;;  %v10740_v39 = vld [vmem:[#allocation144_spill] sm:$0xff] }
 0x29a   : > { %10732 = vst [vmem:[#allocation50_spill] sm:$0xff] %v9171_v26  ;;  %10733 = vst [vmem:[#allocation15_spill] sm:$0xff] %v9174_v63  ;;  %v3668_v29 = vadd.f32 %v3636_v12, %v10734_v28  ;;  %v3669_v48 = vadd.f32 %v3637_v23, %v10735_v13  ;;  %v5667_v43 = vunpack.i.h.bf16 %v5665_v56  ;;  %v5666_v2 = vunpack.i.l.bf16 %v5665_v56  ;;  %v10738_v23 = vld [vmem:[#allocation35_spill] sm:$0xff] }
 0x29b   : > { %v3197_v53 = vmul.f32 %v5994_v27, %v10376_v59  ;;  %v9201_v9 = vadd.f32 %v10738_v23, %v3486_v33  ;;  %v9204_v56 = vadd.f32 %v10739_v36, %v3487_v11  ;;  %v10741_v27 = vld [vmem:[#allocation143_spill] sm:$0xff] }
 0x29c   : > { %v9191_v46 = vadd.f32 %v8908_v32, %v3668_v29  ;;  %v9194_v12 = vadd.f32 %v8905_v0, %v3669_v48  ;;  %v3641_v3 = vmul.f32 %v5667_v43, %v6636_v62  ;;  %v3640_v30 = vmul.f32 %v5666_v2, %v6636_v62  ;;  %v9228_v36 = vpop.permute.xlu0 %6058 }
 0x29d   : > { %v5675_v51 = vpop.permute.xlu1 %5674  ;;  %v3491_v0 = vmul.f32 %v5490_v60, %v10495_v61  ;;  %v3490_v29 = vmul.f32 %v5489_v24, %v10495_v61  ;;  %v6000_v43 = vunpack.i.h.bf16 %v9032_v15  ;;  %v5999_v2 = vunpack.i.l.bf16 %v9032_v15 }
 0x29e   : > { %10736 = vst [vmem:[#allocation97_spill] sm:$0xff] %v9191_v46  ;;  %10737 = vst [vmem:[#allocation98_spill] sm:$0xff] %v9194_v12  ;;  %v5677_v32 = vunpack.i.h.bf16 %v5675_v51  ;;  %v5676_v28 = vunpack.i.l.bf16 %v5675_v51  ;;  %v3672_v13 = vadd.f32 %v3640_v30, %v10740_v39  ;;  %v3673_v48 = vadd.f32 %v3641_v3, %v10741_v27 }
 0x29f   : > { %v9215_v11 = vadd.f32 %v3197_v53, %v9007_v20  ;;  %v9218_v51 = vadd.f32 %v3198_v54, %v9010_v58  ;;  %v5621_v30 = vunpack.i.h.bf16 %v9038_v37  ;;  %v5620_v15 = vunpack.i.l.bf16 %v9038_v37  ;;  %v10745_v20 = vld [vmem:[#allocation149_spill] sm:$0xff] }
 0x2a0   : > { %v3645_v33 = vmul.f32 %v5677_v32, %v6636_v62  ;;  %v3644_v23 = vmul.f32 %v5676_v28, %v6636_v62  ;;  %v9221_v24 = vadd.f32 %v8914_v1, %v3672_v13  ;;  %v9224_v3 = vadd.f32 %v8911_v45, %v3673_v48  ;;  %v10744_v32 = vld [vmem:[#allocation150_spill] sm:$0xff]  ;;  %v10748_v48 = vld [vmem:[#allocation55_spill] sm:$0xff] }
 0x2a1   : > { %v5685_v60 = vpop.permute.xlu1 %5684  ;;  %v6005_v58 = vunpack.i.h.bf16 %v9060_v42  ;;  %v6004_v54 = vunpack.i.l.bf16 %v9060_v42  ;;  %v3202_v13 = vmul.f32 %v6000_v43, %v10376_v59  ;;  %v3201_v45 = vmul.f32 %v5999_v2, %v10376_v59 }
 0x2a2   : > { %10742 = vst [vmem:[#allocation104_spill] sm:$0xff] %v9221_v24  ;;  %10743 = vst [vmem:[#allocation75_spill] sm:$0xff] %v9224_v3  ;;  %v3676_v28 = vadd.f32 %v3644_v23, %v10744_v32  ;;  %v3677_v53 = vadd.f32 %v3645_v33, %v10745_v20  ;;  %v5687_v39 = vunpack.i.h.bf16 %v5685_v60  ;;  %v5686_v1 = vunpack.i.l.bf16 %v5685_v60  ;;  %v10749_v33 = vld [vmem:[#allocation108_spill] sm:$0xff] }
 0x2a3   : > { %v9243_v23 = vadd.f32 %v10748_v48, %v3490_v29  ;;  %v9246_v32 = vadd.f32 %v10749_v33, %v3491_v0  ;;  %v3495_v43 = vmul.f32 %v5621_v30, %v10495_v61  ;;  %v3494_v2 = vmul.f32 %v5620_v15, %v10495_v61  ;;  %v10750_v29 = vld [vmem:[#allocation152_spill] sm:$0xff]  ;;  %v10751_v0 = vld [vmem:[#allocation151_spill] sm:$0xff]  ;;  %v6069_v30 = vpop.permute.xlu0 %6068 }
 0x2a4   : > { %v9237_v27 = vadd.f32 %v8924_v31, %v3676_v28  ;;  %v9240_v37 = vadd.f32 %v8921_v34, %v3677_v53  ;;  %v3649_v42 = vmul.f32 %v5687_v39, %v6636_v62  ;;  %v3648_v60 = vmul.f32 %v5686_v1, %v6636_v62 }
 0x2a5   : > { %v5695_v20 = vpop.permute.xlu1 %5694  ;;  %v3206_v34 = vmul.f32 %v6005_v58, %v10376_v59  ;;  %v3205_v53 = vmul.f32 %v6004_v54, %v10376_v59  ;;  %v9257_v39 = vadd.f32 %v3201_v45, %v9025_v22  ;;  %v9260_v1 = vadd.f32 %v3202_v13, %v9028_v4  ;;  %v10756_v22 = vld [vmem:[#allocation103_spill] sm:$0xff]  ;;  %v10757_v4 = vld [vmem:[#allocation166_spill] sm:$0xff] }
 0x2a6   : > { %10746 = vst [vmem:[#allocation123_spill] sm:$0xff] %v9237_v27  ;;  %10747 = vst [vmem:[#allocation24_spill] sm:$0xff] %v9240_v37  ;;  %v5697_v31 = vunpack.i.h.bf16 %v5695_v20  ;;  %v5696_v28 = vunpack.i.l.bf16 %v5695_v20  ;;  %v3680_v48 = vadd.f32 %v3648_v60, %v10750_v29  ;;  %v3681_v33 = vadd.f32 %v3649_v42, %v10751_v0  ;;  %v10752_v20 = vld [vmem:[#allocation161_spill] sm:$0xff]  ;;  %v10754_v60 = vld [vmem:[#allocation32_spill] sm:$0xff] }
 0x2a7   : > { %v6015_v58 = vunpack.i.h.bf16 %v9090_v14  ;;  %v6014_v54 = vunpack.i.l.bf16 %v9090_v14  ;;  %v9273_v45 = vadd.f32 %v10756_v22, %v3494_v2  ;;  %v9276_v13 = vadd.f32 %v10757_v4, %v3495_v43  ;;  %v10758_v29 = vld [vmem:[#allocation158_spill] sm:$0xff]  ;;  %v10759_v0 = vld [vmem:[#allocation157_spill] sm:$0xff] }
 0x2a8   : > { %v3653_v61 = vmul.f32 %v5697_v31, %v6636_v62  ;;  %v3652_v15 = vmul.f32 %v5696_v28, %v6636_v62  ;;  %v9267_v37 = vadd.f32 %v10752_v20, %v3680_v48  ;;  %v9270_v42 = vadd.f32 %v10754_v60, %v3681_v33 }
 0x2a9   : > { %v9285_v28 = vadd.f32 %v3205_v53, %v9041_v6  ;;  %v9288_v48 = vadd.f32 %v3206_v34, %v9044_v7  ;;  %v6031_v43 = vunpack.i.h.bf16 %v9114_v16  ;;  %v6030_v20 = vunpack.i.l.bf16 %v9114_v16 }
 0x2aa   : > { %10753 = vst [vmem:[#allocation61_spill] sm:$0xff] %v9267_v37  ;;  %10755 = vst [vmem:[#allocation155_spill] sm:$0xff] %v9270_v42  ;;  %v3684_v31 = vadd.f32 %v3652_v15, %v10758_v29  ;;  %v3685_v62 = vadd.f32 %v3653_v61, %v10759_v0  ;;  %v5812_v14 = vpop.permute.xlu1 %5811  ;;  %v10761_v15 = vld [vmem:[#allocation25_spill] sm:$0xff]  ;;  %v10763_v61 = vld [vmem:[#allocation23_spill] sm:$0xff]  ;;  %v4009_v4 = vmul.f32 %v6015_v58, %v10376_v59  ;;  %v6041_v53 = vunpack.i.h.bf16 %v9154_v17  ;;  %v6079_v0 = vpop.permute.xlu0 %6078 }
 0x2ab   : > { %10760 = vst [vmem:[#allocation159_spill] sm:$0xff] %v9288_v48  ;;  %v5814_v2 = vunpack.i.h.bf16 %v5812_v14  ;;  %v5813_v33 = vunpack.i.l.bf16 %v5812_v14  ;;  %v4008_v6 = vmul.f32 %v6014_v54, %v10376_v59  ;;  %v6040_v29 = vunpack.i.l.bf16 %v9154_v17 }
 0x2ac   : > { %v9293_v60 = vadd.f32 %v10761_v15, %v3684_v31  ;;  %v9296_v22 = vadd.f32 %v10763_v61, %v3685_v62  ;;  %v6051_v16 = vunpack.i.h.bf16 %v9188_v10  ;;  %v6050_v31 = vunpack.i.l.bf16 %v9188_v10 }
 0x2ad   : > { %v3817_v7 = vmul.f32 %v5814_v2, %v10314_v57  ;;  %v3816_v34 = vmul.f32 %v5813_v33, %v10314_v57  ;;  %v6061_v58 = vunpack.i.h.bf16 %v9228_v36  ;;  %v6060_v54 = vunpack.i.l.bf16 %v9228_v36  ;;  %v10765_v2 = vld [vmem:[#allocation73_spill] sm:$0xff] }
 0x2ae   : > { %10762 = vst [vmem:[#allocation46_spill] sm:$0xff] %v9293_v60  ;;  %10764 = vst [vmem:[#allocation91_spill] sm:$0xff] %v9296_v22  ;;  %v5822_v62 = vpop.permute.xlu1 %5821  ;;  %v4015_v15 = vmul.f32 %v6031_v43, %v10376_v59  ;;  %v4014_v17 = vmul.f32 %v6030_v20, %v10376_v59  ;;  %v6071_v61 = vunpack.i.h.bf16 %v6069_v30  ;;  %v6070_v22 = vunpack.i.l.bf16 %v6069_v30 }
 0x2af   : > { %v3848_v14 = vadd.f32 %v3816_v34, %v9063_v19  ;;  %v3849_v33 = vadd.f32 %v3817_v7, %v10765_v2  ;;  %v6081_v60 = vunpack.i.h.bf16 %v6079_v0  ;;  %v6080_v42 = vunpack.i.l.bf16 %v6079_v0  ;;  %v10768_v2 = vld [vmem:[#allocation156_spill] sm:$0xff] }
 0x2b0   : > { %v4019_v36 = vmul.f32 %v6041_v53, %v10376_v59  ;;  %v4018_v19 = vmul.f32 %v6040_v29, %v10376_v59  ;;  %v9321_v7 = vmul.f32 %v6051_v16, %v10376_v59  ;;  %v9324_v43 = vmul.f32 %v6050_v31, %v10376_v59  ;;  %v9343_v31 = vld [vmem:[%s9689_s2] ss:$0 sm:$0xff] }
 0x2b1   : > { %v4040_v10 = vadd.f32 %v4008_v6, %v3848_v14  ;;  %v4041_v37 = vadd.f32 %v4009_v4, %v3849_v33  ;;  %v9327_v20 = vmul.f32 %v6061_v58, %v10376_v59  ;;  %v9330_v34 = vmul.f32 %v6060_v54, %v10376_v59  ;;  %v10766_v6 = vld [vmem:[#allocation101_spill] sm:$0xff]  ;;  %v10767_v14 = vld [vmem:[#allocation134_spill] sm:$0xff] }
 0x2b2   : > { %v5827_v30 = vpop.permute.xlu1 %5826  ;;  %v9335_v29 = vmul.f32 %v6071_v61, %v10376_v59  ;;  %v9338_v16 = vmul.f32 %v6070_v22, %v10376_v59  ;;  %v9346_v54 = vmul.f32 %v6081_v60, %v10376_v59  ;;  %v10769_v33 = vmax.f32 %v10767_v14, %v10768_v2  ;;  %v10770_v61 = vld [vmem:[#allocation94_spill] sm:$0xff] }
 0x2b3   : > { %v4104_v4 = vmax.f32 %v9071_v55, %v4040_v10  ;;  %v4105_v53 = vmax.f32 %v10766_v6, %v4041_v37  ;;  %v5829_v0 = vunpack.i.h.bf16 %v5827_v30  ;;  %v5828_v58 = vunpack.i.l.bf16 %v5827_v30  ;;  %v6089_v37 = vpop.permute.xlu0 %6088  ;;  %v10771_v10 = vld [vmem:[#allocation33_spill] sm:$0xff] }
 0x2b4   : > { %v9349_v55 = vmul.f32 %v6080_v42, %v10376_v59  ;;  %v10772_v6 = vmax.f32 %v10770_v61, %v10771_v10  ;;  %v5824_v3 = vunpack.i.h.bf16 %v5822_v62  ;;  %v5823_v24 = vunpack.i.l.bf16 %v5822_v62 }
 0x2b5   : > { %v4136_v22 = vmax.f32 %v10769_v33, %v4104_v4  ;;  %v3823_v30 = vmul.f32 %v5829_v0, %v10314_v57  ;;  %v3822_v60 = vmul.f32 %v5828_v58, %v10314_v57  ;;  %v6091_v48 = vunpack.i.h.bf16 %v6089_v37  ;;  %v10773_v4 = vld [vmem:[#allocation105_spill] sm:$0xff] }
 0x2b6   : > { %v4137_v27 = vmax.f32 %v10772_v6, %v4105_v53  ;;  %v5837_v12 = vpop.permute.xlu1 %5836  ;;  %v6090_v14 = vunpack.i.l.bf16 %v6089_v37  ;;  %v10774_v53 = vld [vmem:[#allocation106_spill] sm:$0xff]  ;;  %v3820_v37 = vmul.f32 %v5823_v24, %v10314_v57  ;;  %v10775_v24 = vld [vmem:[#allocation49_spill] sm:$0xff] }
 0x2b7   : > { %v4175_v42 = vadd.f32 %v9343_v31, %v4136_v22  ;;  %v5839_v63 = vunpack.i.h.bf16 %v5837_v12  ;;  %v5838_v26 = vunpack.i.l.bf16 %v5837_v12  ;;  %v3854_v62 = vadd.f32 %v3822_v60, %v10773_v4 }
 0x2b8   : > { %v4176_v46 = vadd.f32 %v9343_v31, %v4137_v27  ;;  %v3855_v0 = vadd.f32 %v3823_v30, %v10774_v53  ;;  %v3821_v12 = vmul.f32 %v5824_v3, %v10314_v57 }
 0x2b9   : > { %v4207_v58 = vmax.f32 %v4175_v42, 0.0  ;;  %v3827_v33 = vmul.f32 %v5839_v63, %v10314_v57  ;;  %v3826_v27 = vmul.f32 %v5838_v26, %v10314_v57  ;;  %v4046_v22 = vadd.f32 %v4014_v17, %v3854_v62 }
 0x2ba   : > { %v4208_v2 = vmax.f32 %v4176_v46, 0.0  ;;  %v4047_v61 = vadd.f32 %v4015_v15, %v3855_v0  ;;  %v5847_v10 = vpop.permute.xlu1 %5846  ;;  %v9380_v63 = vmul.f32 %v6091_v48, %v10376_v59  ;;  %v9383_v26 = vmul.f32 %v6090_v14, %v10376_v59  ;;  %v10776_v15 = vld [vmem:[#allocation4_spill] sm:$0xff]  ;;  %v10777_v48 = vld [vmem:[#allocation67_spill] sm:$0xff]  ;;  %v10778_v0 = vld [vmem:[#allocation53_spill] sm:$0xff] }
 0x2bb   : > { %4240 = vst.msk [vmem:[%s9365_s11] sm:$0xff] %vm4239_vm0, %v4207_v58  ;;  %v3858_v6 = vadd.f32 %v3826_v27, %v9103_v25  ;;  %v3859_v30 = vadd.f32 %v3827_v33, %v9106_v18  ;;  %v5849_v46 = vunpack.i.h.bf16 %v5847_v10  ;;  %v5848_v60 = vunpack.i.l.bf16 %v5847_v10  ;;  %v10781_v33 = vld [vmem:[#allocation42_spill] sm:$0xff] }
 0x2bc   : > { %4241 = vst.msk [vmem:[%s9365_s11 + $0x8] sm:$0xff] %vm4239_vm0, %v4208_v2  ;;  %v4110_v3 = vmax.f32 %v10775_v24, %v4046_v22  ;;  %v4111_v17 = vmax.f32 %v10776_v15, %v4047_v61  ;;  %v9390_v18 = vadd.f32 %v3820_v37, %v9130_v50  ;;  %v9393_v53 = vadd.f32 %v3821_v12, %v9132_v5  ;;  %v10780_v2 = vld [vmem:[#allocation99_spill] sm:$0xff] }
 0x2bd   : > { %v4050_v42 = vadd.f32 %v4018_v19, %v3858_v6  ;;  %v4051_v4 = vadd.f32 %v4019_v36, %v3859_v30  ;;  %v3831_v62 = vmul.f32 %v5849_v46, %v10314_v57  ;;  %v3830_v25 = vmul.f32 %v5848_v60, %v10314_v57  ;;  %v10783_v30 = vld [vmem:[#allocation74_spill] sm:$0xff]  ;;  %v10784_v46 = vld [vmem:[#allocation133_spill] sm:$0xff] }
 0x2be   : > { %v10779_v14 = vmax.f32 %v10777_v48, %v10778_v0  ;;  %v10782_v27 = vmax.f32 %v10780_v2, %v10781_v33  ;;  %v5857_v19 = vpop.permute.xlu1 %5856  ;;  %v10785_v60 = vmax.f32 %v10783_v30, %v10784_v46 }
 0x2bf   : > { %v4114_v36 = vmax.f32 %v9125_v21, %v4050_v42  ;;  %v4115_v61 = vmax.f32 %v9128_v47, %v4051_v4  ;;  %v3862_v10 = vadd.f32 %v3830_v25, %v9137_v8  ;;  %v3863_v50 = vadd.f32 %v3831_v62, %v9140_v49  ;;  %v10787_v21 = vld [vmem:[#allocation132_spill] sm:$0xff] }
 0x2c0   : > { %v4142_v58 = vmax.f32 %v10779_v14, %v4110_v3  ;;  %v4143_v22 = vmax.f32 %v10782_v27, %v4111_v17  ;;  %v5859_v37 = vunpack.i.h.bf16 %v5857_v19  ;;  %v5858_v6 = vunpack.i.l.bf16 %v5857_v19  ;;  %v10786_v3 = vld [vmem:[#allocation58_spill] sm:$0xff]  ;;  %v10789_v19 = vld [vmem:[#allocation145_spill] sm:$0xff] }
 0x2c1   : > { %v4146_v24 = vmax.f32 %v10785_v60, %v4114_v36  ;;  %v10788_v15 = vmax.f32 %v10786_v3, %v10787_v21  ;;  %v4054_v8 = vadd.f32 %v9324_v43, %v3862_v10  ;;  %v4055_v49 = vadd.f32 %v9321_v7, %v3863_v50  ;;  %v10790_v36 = vld [vmem:[#allocation66_spill] sm:$0xff]  ;;  %v10792_v10 = vld [vmem:[#allocation115_spill] sm:$0xff] }
 0x2c2   : > { %v4181_v5 = vadd.f32 %v9343_v31, %v4142_v58  ;;  %v4182_v12 = vadd.f32 %v9343_v31, %v4143_v22  ;;  %v3835_v4 = vmul.f32 %v5859_v37, %v10314_v57  ;;  %v3834_v62 = vmul.f32 %v5858_v6, %v10314_v57  ;;  %v5867_v25 = vpop.permute.xlu1 %5866 }
 0x2c3   : > { %v4147_v47 = vmax.f32 %v10788_v15, %v4115_v61  ;;  %v4185_v48 = vadd.f32 %v9343_v31, %v4146_v24  ;;  %v4118_v14 = vmax.f32 %v9145_v40, %v4054_v8  ;;  %v4119_v58 = vmax.f32 %v9148_v38, %v4055_v49  ;;  %v10793_v38 = vld [vmem:[#allocation65_spill] sm:$0xff] }
 0x2c4   : > { %v4213_v17 = vmax.f32 %v4181_v5, 0.0  ;;  %v4214_v42 = vmax.f32 %v4182_v12, 0.0  ;;  %v3866_v7 = vadd.f32 %v3834_v62, %v9157_v35  ;;  %v3867_v43 = vadd.f32 %v3835_v4, %v9160_v44 }
 0x2c5   : > { %v4186_v0 = vadd.f32 %v9343_v31, %v4147_v47  ;;  %v5869_v2 = vunpack.i.h.bf16 %v5867_v25  ;;  %v5868_v33 = vunpack.i.l.bf16 %v5867_v25  ;;  %v4217_v27 = vmax.f32 %v4185_v48, 0.0  ;;  %v10798_v25 = vld [vmem:[#allocation69_spill] sm:$0xff]  ;;  %v10799_v48 = vld [vmem:[#allocation82_spill] sm:$0xff] }
 0x2c6   : > { %4246 = vst.msk [vmem:[%s9365_s11 + $0x30] sm:$0xff] %vm4239_vm0, %v4213_v17  ;;  %4247 = vst.msk [vmem:[%s9365_s11 + $0x38] sm:$0xff] %vm4239_vm0, %v4214_v42  ;;  %v10791_v61 = vmax.f32 %v10789_v19, %v10790_v36  ;;  %v10794_v50 = vmax.f32 %v10792_v10, %v10793_v38  ;;  %v4058_v12 = vadd.f32 %v9330_v34, %v3866_v7  ;;  %v5877_v6 = vpop.permute.xlu1 %5876  ;;  %v10795_v17 = vld [vmem:[#allocation164_spill] sm:$0xff]  ;;  %v10796_v42 = vld [vmem:[#allocation79_spill] sm:$0xff] }
 0x2c7   : > { %v4218_v22 = vmax.f32 %v4186_v0, 0.0  ;;  %v4059_v37 = vadd.f32 %v9327_v20, %v3867_v43  ;;  %v3839_v35 = vmul.f32 %v5869_v2, %v10314_v57  ;;  %v3838_v44 = vmul.f32 %v5868_v33, %v10314_v57  ;;  %4250 = vst.msk [vmem:[%s9365_s11 + $0x50] sm:$0xff] %vm4239_vm0, %v4217_v27 }
 0x2c8   : > { %v4150_v40 = vmax.f32 %v10791_v61, %v4118_v14  ;;  %v4151_v5 = vmax.f32 %v10794_v50, %v4119_v58  ;;  %v5879_v60 = vunpack.i.h.bf16 %v5877_v6  ;;  %v5878_v24 = vunpack.i.l.bf16 %v5877_v6  ;;  %v10801_v61 = vld [vmem:[#allocation83_spill] sm:$0xff]  ;;  %v10804_v50 = vld [vmem:[#allocation89_spill] sm:$0xff] }
 0x2c9   : > { %4251 = vst.msk [vmem:[%s9365_s11 + $0x58] sm:$0xff] %vm4239_vm0, %v4218_v22  ;;  %v4122_v34 = vmax.f32 %v9183_v41, %v4058_v12  ;;  %v4123_v20 = vmax.f32 %v9186_v52, %v4059_v37  ;;  %v3870_v3 = vadd.f32 %v3838_v44, %v9201_v9  ;;  %v3871_v21 = vadd.f32 %v3839_v35, %v9204_v56 }
 0x2ca   : > { %v4189_v30 = vadd.f32 %v9343_v31, %v4150_v40  ;;  %v4190_v46 = vadd.f32 %v9343_v31, %v4151_v5  ;;  %v3843_v8 = vmul.f32 %v5879_v60, %v10314_v57  ;;  %v3842_v49 = vmul.f32 %v5878_v24, %v10314_v57  ;;  %v6008_v14 = vpop.permute.xlu1 %6007  ;;  %v10802_v40 = vld [vmem:[#allocation87_spill] sm:$0xff]  ;;  %v10808_v60 = vld [vmem:[#allocation36_spill] sm:$0xff] }
 0x2cb   : > { %v10797_v4 = vmax.f32 %v10795_v17, %v10796_v42  ;;  %v10800_v0 = vmax.f32 %v10798_v25, %v10799_v48  ;;  %v4062_v52 = vadd.f32 %v9338_v16, %v3870_v3  ;;  %v4063_v9 = vadd.f32 %v9335_v29, %v3871_v21  ;;  %v10805_v5 = vld [vmem:[#allocation3_spill] sm:$0xff] }
 0x2cc   : > { %v4221_v15 = vmax.f32 %v4189_v30, 0.0  ;;  %v4222_v47 = vmax.f32 %v4190_v46, 0.0  ;;  %v3874_v56 = vadd.f32 %v3842_v49, %v9243_v23  ;;  %v3875_v58 = vadd.f32 %v3843_v8, %v9246_v32 }
 0x2cd   : > { %v4154_v62 = vmax.f32 %v10797_v4, %v4122_v34  ;;  %v4155_v41 = vmax.f32 %v10800_v0, %v4123_v20  ;;  %v6010_v7 = vunpack.i.h.bf16 %v6008_v14  ;;  %v6009_v43 = vunpack.i.l.bf16 %v6008_v14  ;;  %v10811_v34 = vld [vmem:[#allocation37_spill] sm:$0xff]  ;;  %v10815_v0 = vld [vmem:[#allocation114_spill] sm:$0xff] }
 0x2ce   : > { %4254 = vst.msk [vmem:[%s9365_s11 + $0x70] sm:$0xff] %vm4239_vm0, %v4221_v15  ;;  %4255 = vst.msk [vmem:[%s9365_s11 + $0x78] sm:$0xff] %vm4239_vm0, %v4222_v47  ;;  %v4126_v16 = vmax.f32 %v9215_v11, %v4062_v52  ;;  %v4127_v29 = vmax.f32 %v9218_v51, %v4063_v9  ;;  %v4066_v27 = vadd.f32 %v9349_v55, %v3874_v56 }
 0x2cf   : > { %v4193_v2 = vadd.f32 %v9343_v31, %v4154_v62  ;;  %v4194_v33 = vadd.f32 %v9343_v31, %v4155_v41  ;;  %v4067_v22 = vadd.f32 %v9346_v54, %v3875_v58  ;;  %v3847_v23 = vmul.f32 %v6010_v7, %v10314_v57  ;;  %v6019_v35 = vpop.permute.xlu1 %6018  ;;  %v10813_v62 = vld [vmem:[#allocation159_spill] sm:$0xff]  ;;  %v10816_v58 = vld [vmem:[#allocation29_spill] sm:$0xff] }
 0x2d0   : > { %v3846_v32 = vmul.f32 %v6009_v43, %v10314_v57  ;;  %v10803_v10 = vmax.f32 %v10801_v61, %v10802_v40  ;;  %v10806_v11 = vmax.f32 %v10804_v50, %v10805_v5  ;;  %v4130_v51 = vmax.f32 %v9257_v39, %v4066_v27  ;;  %v10807_v39 = vld [vmem:[#allocation18_spill] sm:$0xff]  ;;  %v10817_v7 = vld [vmem:[#allocation43_spill] sm:$0xff]  ;;  %v10822_v27 = vld [vmem:[#allocation113_spill] sm:$0xff] }
 0x2d1   : > { %v4225_v19 = vmax.f32 %v4193_v2, 0.0  ;;  %v4226_v36 = vmax.f32 %v4194_v33, 0.0  ;;  %v4131_v55 = vmax.f32 %v9260_v1, %v4067_v22  ;;  %v3879_v37 = vadd.f32 %v3847_v23, %v9276_v13  ;;  %v10819_v2 = vld [vmem:[#allocation19_spill] sm:$0xff]  ;;  %v10820_v33 = vld [vmem:[#allocation124_spill] sm:$0xff]  ;;  %v10825_v40 = vld [vmem:[#allocation93_spill] sm:$0xff] }
 0x2d2   : > { %v4158_v38 = vmax.f32 %v10803_v10, %v4126_v16  ;;  %v4159_v12 = vmax.f32 %v10806_v11, %v4127_v29  ;;  %v3878_v54 = vadd.f32 %v3846_v32, %v9273_v45  ;;  %v6021_v30 = vunpack.i.h.bf16 %v6019_v35  ;;  %v10810_v45 = vld [vmem:[#allocation51_spill] sm:$0xff]  ;;  %v10824_v61 = vld [vmem:[#allocation100_spill] sm:$0xff]  ;;  %v10827_v50 = vld [vmem:[#allocation102_spill] sm:$0xff] }
 0x2d3   : > { %4258 = vst.msk [vmem:[%s9365_s11 + $0x90] sm:$0xff] %vm4239_vm0, %v4225_v19  ;;  %4259 = vst.msk [vmem:[%s9365_s11 + $0x98] sm:$0xff] %vm4239_vm0, %v4226_v36  ;;  %v6020_v46 = vunpack.i.l.bf16 %v6019_v35  ;;  %v10809_v1 = vmax.f32 %v10807_v39, %v10808_v60  ;;  %v10812_v13 = vmax.f32 %v10810_v45, %v10811_v34  ;;  %v4071_v21 = vadd.f32 %v9380_v63, %v3879_v37  ;;  %v6024_v48 = vpop.permute.xlu1 %6023  ;;  %v10814_v63 = vld [vmem:[#allocation135_spill] sm:$0xff] }
 0x2d4   : > { %v4197_v44 = vadd.f32 %v9343_v31, %v4158_v38  ;;  %v4198_v6 = vadd.f32 %v9343_v31, %v4159_v12  ;;  %v4070_v3 = vadd.f32 %v9383_v26, %v3878_v54  ;;  %v4011_v8 = vmul.f32 %v6021_v30, %v10376_v59  ;;  %v10823_v23 = vld [vmem:[#allocation27_spill] sm:$0xff]  ;;  %v10829_v54 = vld [vmem:[#allocation88_spill] sm:$0xff] }
 0x2d5   : > { %v4162_v24 = vmax.f32 %v10809_v1, %v4130_v51  ;;  %v4163_v20 = vmax.f32 %v10812_v13, %v4131_v55  ;;  %v4010_v49 = vmul.f32 %v6020_v46, %v10376_v59  ;;  %v4135_v25 = vmax.f32 %v10813_v62, %v4071_v21  ;;  %v10826_v38 = vld [vmem:[#allocation163_spill] sm:$0xff]  ;;  %v10828_v55 = vld [vmem:[#allocation109_spill] sm:$0xff] }
 0x2d6   : > { %v4229_v15 = vmax.f32 %v4197_v44, 0.0  ;;  %v4230_v47 = vmax.f32 %v4198_v6, 0.0  ;;  %v4134_v4 = vmax.f32 %v9285_v28, %v4070_v3  ;;  %v4043_v41 = vadd.f32 %v4011_v8, %v10815_v0  ;;  %v10831_v44 = vld [vmem:[#allocation146_spill] sm:$0xff] }
 0x2d7   : > { %v4201_v17 = vadd.f32 %v9343_v31, %v4162_v24  ;;  %v4202_v42 = vadd.f32 %v9343_v31, %v4163_v20  ;;  %v4042_v26 = vadd.f32 %v4010_v49, %v10814_v63  ;;  %v6026_v52 = vunpack.i.h.bf16 %v6024_v48  ;;  %v6034_v51 = vpop.permute.xlu1 %6033  ;;  %v10832_v6 = vld [vmem:[#allocation122_spill] sm:$0xff] }
 0x2d8   : > { %4262 = vst.msk [vmem:[%s9365_s11 + $0xb0] sm:$0xff] %vm4239_vm0, %v4229_v15  ;;  %4263 = vst.msk [vmem:[%s9365_s11 + $0xb8] sm:$0xff] %vm4239_vm0, %v4230_v47  ;;  %v6025_v9 = vunpack.i.l.bf16 %v6024_v48  ;;  %v10818_v28 = vmax.f32 %v10816_v58, %v10817_v7  ;;  %v10821_v16 = vmax.f32 %v10819_v2, %v10820_v33  ;;  %v4107_v32 = vmax.f32 %v10823_v23, %v4043_v41  ;;  %v10834_v15 = vld [vmem:[#allocation28_spill] sm:$0xff]  ;;  %v10838_v48 = vld [vmem:[#allocation111_spill] sm:$0xff] }
 0x2d9   : > { %v4233_v14 = vmax.f32 %v4201_v17, 0.0  ;;  %v4234_v56 = vmax.f32 %v4202_v42, 0.0  ;;  %v4106_v22 = vmax.f32 %v10822_v27, %v4042_v26  ;;  %v4013_v19 = vmul.f32 %v6026_v52, %v10376_v59  ;;  %v10840_v0 = vld [vmem:[#allocation154_spill] sm:$0xff]  ;;  %v10841_v41 = vld [vmem:[#allocation167_spill] sm:$0xff] }
 0x2da   : > { %v4166_v43 = vmax.f32 %v10818_v28, %v4134_v4  ;;  %v4167_v29 = vmax.f32 %v10821_v16, %v4135_v25  ;;  %v4012_v36 = vmul.f32 %v6025_v9, %v10376_v59  ;;  %v3211_v10 = vadd.f32 %v10825_v40, %v10824_v61  ;;  %v10837_v25 = vld [vmem:[#allocation153_spill] sm:$0xff]  ;;  %v10843_v9 = vld [vmem:[#allocation50_spill] sm:$0xff]  ;;  %v10847_v16 = vld [vmem:[#allocation64_spill] sm:$0xff] }
 0x2db   : > { %v3212_v5 = vadd.f32 %v10827_v50, %v10826_v38  ;;  %4266 = vst.msk [vmem:[%s9365_s11 + $0xd0] sm:$0xff] %vm4239_vm0, %v4233_v14  ;;  %4267 = vst.msk [vmem:[%s9365_s11 + $0xd8] sm:$0xff] %vm4239_vm0, %v4234_v56  ;;  %v10830_v37 = vmax.f32 %v10828_v55, %v10829_v54  ;;  %v10833_v30 = vmax.f32 %v10831_v44, %v10832_v6  ;;  %v6036_v45 = vunpack.i.h.bf16 %v6034_v51  ;;  %v6044_v42 = vpop.permute.xlu1 %6043  ;;  %v10844_v56 = vld [vmem:[#allocation15_spill] sm:$0xff]  ;;  %v10846_v2 = vld [vmem:[#allocation34_spill] sm:$0xff] }
 0x2dc   : > { %v4205_v11 = vadd.f32 %v9343_v31, %v4166_v43  ;;  %v4206_v12 = vadd.f32 %v9343_v31, %v4167_v29  ;;  %v4044_v39 = vadd.f32 %v4012_v36, %v9390_v18  ;;  %v4045_v60 = vadd.f32 %v4013_v19, %v9393_v53  ;;  %v10845_v43 = vld [vmem:[#allocation13_spill] sm:$0xff]  ;;  %v10848_v29 = vld [vmem:[#allocation160_spill] sm:$0xff]  ;;  %v10850_v36 = vld [vmem:[#allocation127_spill] sm:$0xff] }
 0x2dd   : > { %v4138_v35 = vmax.f32 %v10830_v37, %v4106_v22  ;;  %v4139_v46 = vmax.f32 %v10833_v30, %v4107_v32  ;;  %v6035_v34 = vunpack.i.l.bf16 %v6034_v51  ;;  %v10835_v47 = vunpack.i.h.bf16 %v10834_v15  ;;  %v10849_v32 = vld [vmem:[#allocation128_spill] sm:$0xff]  ;;  %v10851_v51 = vld [vmem:[#allocation38_spill] sm:$0xff]  ;;  %v10855_v44 = vld [vmem:[#allocation11_spill] sm:$0xff] }
 0x2de   : > { %v4237_v1 = vmax.f32 %v4205_v11, 0.0  ;;  %v4238_v24 = vmax.f32 %v4206_v12, 0.0  ;;  %v4108_v3 = vmax.f32 %v3211_v10, %v4044_v39  ;;  %v4109_v21 = vmax.f32 %v3212_v5, %v4045_v60  ;;  %v10852_v55 = vld [vmem:[#allocation116_spill] sm:$0xff]  ;;  %v10858_v60 = vld [vmem:[#allocation98_spill] sm:$0xff] }
 0x2df   : > { %v4177_v13 = vadd.f32 %v9343_v31, %v4138_v35  ;;  %v4178_v20 = vadd.f32 %v9343_v31, %v4139_v46  ;;  %v2175_v8 = vmul.f32 %v10835_v47, %v10314_v57  ;;  %v10836_v49 = vunpack.i.l.bf16 %v10834_v15  ;;  %v6054_v38 = vpop.permute.xlu1 %6053  ;;  %v10854_v35 = vld [vmem:[#allocation107_spill] sm:$0xff]  ;;  %v10857_v46 = vld [vmem:[#allocation97_spill] sm:$0xff]  ;;  %v10861_v47 = vld [vmem:[#allocation76_spill] sm:$0xff] }
 0x2e0   : > { %4270 = vst.msk [vmem:[%s9365_s11 + $0xf0] sm:$0xff] %vm4239_vm0, %v4237_v1  ;;  %4271 = vst.msk [vmem:[%s9365_s11 + $0xf8] sm:$0xff] %vm4239_vm0, %v4238_v24  ;;  %v4017_v53 = vmul.f32 %v6036_v45, %v10376_v59  ;;  %v4016_v17 = vmul.f32 %v6035_v34, %v10376_v59  ;;  %v10839_v63 = vmax.f32 %v10837_v25, %v10838_v48  ;;  %v6046_v7 = vunpack.i.h.bf16 %v6044_v42  ;;  %v10859_v24 = vld [vmem:[#allocation14_spill] sm:$0xff]  ;;  %v10860_v34 = vld [vmem:[#allocation85_spill] sm:$0xff] }
 0x2e1   : > { %v2174_v18 = vmul.f32 %v10836_v49, %v10314_v57  ;;  %v4209_v4 = vmax.f32 %v4177_v13, 0.0  ;;  %v4210_v62 = vmax.f32 %v4178_v20, 0.0  ;;  %v10842_v57 = vmax.f32 %v10840_v0, %v10841_v41  ;;  %v10865_v0 = vld [vmem:[#allocation41_spill] sm:$0xff]  ;;  %v10866_v41 = vld [vmem:[#allocation48_spill] sm:$0xff] }
 0x2e2   : > { %v4140_v26 = vmax.f32 %v10839_v63, %v4108_v3  ;;  %v4048_v14 = vadd.f32 %v4016_v17, %v10843_v9  ;;  %v4049_v58 = vadd.f32 %v4017_v53, %v10844_v56  ;;  %v6045_v28 = vunpack.i.l.bf16 %v6044_v42  ;;  %v10862_v53 = vld [vmem:[#allocation129_spill] sm:$0xff]  ;;  %v10863_v42 = vld [vmem:[#allocation104_spill] sm:$0xff] }
 0x2e3   : > { %v4141_v52 = vmax.f32 %v10842_v57, %v4109_v21  ;;  %v4092_v33 = vmax.f32 %v10846_v2, %v10845_v43  ;;  %v4093_v27 = vmax.f32 %v10848_v29, %v10847_v16  ;;  %4242 = vst.msk [vmem:[%s9365_s11 + $0x10] sm:$0xff] %vm4239_vm0, %v4209_v4  ;;  %4243 = vst.msk [vmem:[%s9365_s11 + $0x18] sm:$0xff] %vm4239_vm0, %v4210_v62  ;;  %v6056_v11 = vunpack.i.h.bf16 %v6054_v38  ;;  %v10864_v4 = vld [vmem:[#allocation75_spill] sm:$0xff]  ;;  %v10868_v9 = vld [vmem:[#allocation8_spill] sm:$0xff] }
 0x2e4   : > { %v4179_v22 = vadd.f32 %v9343_v31, %v4140_v26  ;;  %v4112_v19 = vmax.f32 %v10849_v32, %v4048_v14  ;;  %v4113_v61 = vmax.f32 %v10850_v36, %v4049_v58  ;;  %v4021_v40 = vmul.f32 %v6046_v7, %v10376_v59  ;;  %v10869_v14 = vld [vmem:[#allocation130_spill] sm:$0xff]  ;;  %v10871_v7 = vld [vmem:[#allocation57_spill] sm:$0xff]  ;;  %v10873_v36 = vld [vmem:[#allocation39_spill] sm:$0xff] }
 0x2e5   : > { %v4180_v23 = vadd.f32 %v9343_v31, %v4141_v52  ;;  %v4020_v10 = vmul.f32 %v6045_v28, %v10376_v59  ;;  %v6055_v12 = vunpack.i.l.bf16 %v6054_v38  ;;  %v10853_v54 = vmax.f32 %v10851_v51, %v10852_v55  ;;  %v10892_v29 = vld [vmem:[#allocation80_spill] sm:$0xff] }
 0x2e6   : > { %v4211_v50 = vmax.f32 %v4179_v22, 0.0  ;;  %v10856_v6 = vmax.f32 %v10854_v35, %v10855_v44  ;;  %v4053_v1 = vadd.f32 %v4021_v40, %v10858_v60  ;;  %v2206_v45 = vadd.f32 %v2174_v18, %v10859_v24  ;;  %v6064_v18 = vpop.permute.xlu1 %6063  ;;  %v10872_v22 = vld [vmem:[#allocation56_spill] sm:$0xff]  ;;  %v10874_v40 = vld [vmem:[#allocation9_spill] sm:$0xff] }
 0x2e7   : > { %v4212_v5 = vmax.f32 %v4180_v23, 0.0  ;;  %v4144_v37 = vmax.f32 %v10853_v54, %v4112_v19  ;;  %v4052_v39 = vadd.f32 %v4020_v10, %v10857_v46  ;;  %v2207_v13 = vadd.f32 %v2175_v8, %v10860_v34  ;;  %v10878_v54 = vld [vmem:[#allocation118_spill] sm:$0xff]  ;;  %v10882_v46 = vld [vmem:[#allocation24_spill] sm:$0xff] }
 0x2e8   : > { %v4145_v30 = vmax.f32 %v10856_v6, %v4113_v61  ;;  %4244 = vst.msk [vmem:[%s9365_s11 + $0x20] sm:$0xff] %vm4239_vm0, %v4211_v50  ;;  %v4025_v20 = vmul.f32 %v6056_v11, %v10376_v59  ;;  %v4024_v3 = vmul.f32 %v6055_v12, %v10376_v59  ;;  %v4117_v17 = vmax.f32 %v10862_v53, %v4053_v1  ;;  %v10875_v11 = vld [vmem:[#allocation117_spill] sm:$0xff]  ;;  %v10876_v12 = vld [vmem:[#allocation22_spill] sm:$0xff]  ;;  %v10881_v6 = vld [vmem:[#allocation123_spill] sm:$0xff] }
 0x2e9   : > { %4245 = vst.msk [vmem:[%s9365_s11 + $0x28] sm:$0xff] %vm4239_vm0, %v4212_v5  ;;  %v4183_v21 = vadd.f32 %v9343_v31, %v4144_v37  ;;  %v4116_v49 = vmax.f32 %v10861_v47, %v4052_v39  ;;  %v6066_v25 = vunpack.i.h.bf16 %v6064_v18  ;;  %v6065_v48 = vunpack.i.l.bf16 %v6064_v18  ;;  %v10879_v37 = vld [vmem:[#allocation12_spill] sm:$0xff]  ;;  %v10888_v18 = vld [vmem:[#allocation95_spill] sm:$0xff] }
 0x2ea   : > { %v4184_v15 = vadd.f32 %v9343_v31, %v4145_v30  ;;  %v4056_v8 = vadd.f32 %v4024_v3, %v10863_v42  ;;  %v4057_v62 = vadd.f32 %v4025_v20, %v10864_v4  ;;  %v10867_v57 = vmax.f32 %v10865_v0, %v10866_v41  ;;  %v6074_v5 = vpop.permute.xlu1 %6073  ;;  %v10883_v20 = vld [vmem:[#allocation63_spill] sm:$0xff]  ;;  %v10885_v47 = vld [vmem:[#allocation120_spill] sm:$0xff]  ;;  %v10889_v0 = vld [vmem:[#allocation61_spill] sm:$0xff] }
 0x2eb   : > { %v4215_v63 = vmax.f32 %v4183_v21, 0.0  ;;  %v10870_v56 = vmax.f32 %v10868_v9, %v10869_v14  ;;  %v4029_v32 = vmul.f32 %v6066_v25, %v10376_v59  ;;  %v4028_v19 = vmul.f32 %v6065_v48, %v10376_v59  ;;  %v10884_v21 = vld [vmem:[#allocation62_spill] sm:$0xff] }
 0x2ec   : > { %v4216_v26 = vmax.f32 %v4184_v15, 0.0  ;;  %v4148_v52 = vmax.f32 %v10867_v57, %v4116_v49  ;;  %v4120_v28 = vmax.f32 %v10871_v7, %v4056_v8  ;;  %v4121_v23 = vmax.f32 %v10872_v22, %v4057_v62  ;;  %v10886_v49 = vld [vmem:[#allocation92_spill] sm:$0xff]  ;;  %v10890_v57 = vld [vmem:[#allocation155_spill] sm:$0xff] }
 0x2ed   : > { %v4149_v58 = vmax.f32 %v10870_v56, %v4117_v17  ;;  %v2398_v61 = vadd.f32 %v10873_v36, %v2206_v45  ;;  %v2399_v10 = vadd.f32 %v10874_v40, %v2207_v13  ;;  %4248 = vst.msk [vmem:[%s9365_s11 + $0x40] sm:$0xff] %vm4239_vm0, %v4215_v63  ;;  %v10877_v51 = vmax.f32 %v10875_v11, %v10876_v12  ;;  %v10887_v17 = vld [vmem:[#allocation125_spill] sm:$0xff]  ;;  %v10893_v36 = vld [vmem:[#allocation46_spill] sm:$0xff]  ;;  %v10894_v40 = vld [vmem:[#allocation91_spill] sm:$0xff] }
 0x2ee   : > { %4249 = vst.msk [vmem:[%s9365_s11 + $0x48] sm:$0xff] %vm4239_vm0, %v4216_v26  ;;  %v4187_v38 = vadd.f32 %v9343_v31, %v4148_v52  ;;  %v10880_v35 = vmax.f32 %v10878_v54, %v10879_v37  ;;  %v4060_v30 = vadd.f32 %v4028_v19, %v10881_v6  ;;  %v4061_v39 = vadd.f32 %v4029_v32, %v10882_v46  ;;  %v6084_v62 = vpop.permute.xlu1 %6083  ;;  %v10896_v11 = vld [vmem:[#allocation96_spill] sm:$0xff]  ;;  %v10897_v54 = vld [vmem:[#allocation131_spill] sm:$0xff] }
 0x2ef   : > { %v4188_v50 = vadd.f32 %v9343_v31, %v4149_v58  ;;  %v4152_v55 = vmax.f32 %v10877_v51, %v4120_v28  ;;  %v6076_v24 = vunpack.i.h.bf16 %v6074_v5  ;;  %v6075_v45 = vunpack.i.l.bf16 %v6074_v5  ;;  %v10898_v37 = vld [vmem:[#allocation44_spill] sm:$0xff]  ;;  %v10900_v6 = vld [vmem:[#allocation59_spill] sm:$0xff] }
 0x2f0   : > { %v4153_v44 = vmax.f32 %v10880_v35, %v4121_v23  ;;  %v4219_v60 = vmax.f32 %v4187_v38, 0.0  ;;  %v4124_v3 = vmax.f32 %v10883_v20, %v4060_v30  ;;  %v4125_v15 = vmax.f32 %v10884_v21, %v4061_v39  ;;  %v10901_v30 = vld [vmem:[#allocation84_spill] sm:$0xff] }
 0x2f1   : > { %v4220_v1 = vmax.f32 %v4188_v50, 0.0  ;;  %v4191_v34 = vadd.f32 %v9343_v31, %v4152_v55  ;;  %v1565_v53 = vadd.f32 %v10886_v49, %v10885_v47  ;;  %v1566_v42 = vadd.f32 %v10888_v18, %v10887_v17  ;;  %v10895_v50 = vld [vmem:[#allocation81_spill] sm:$0xff] }
 0x2f2   : > { %v4192_v13 = vadd.f32 %v9343_v31, %v4153_v44  ;;  %4252 = vst.msk [vmem:[%s9365_s11 + $0x60] sm:$0xff] %vm4239_vm0, %v4219_v60  ;;  %v4033_v8 = vmul.f32 %v6076_v24, %v10376_v59  ;;  %v4032_v4 = vmul.f32 %v6075_v45, %v10376_v59  ;;  %v4156_v63 = vmax.f32 %v4092_v33, %v4124_v3  ;;  %v10891_v33 = vld [vmem:[#allocation77_spill] sm:$0xff] }
 0x2f3   : > { %4253 = vst.msk [vmem:[%s9365_s11 + $0x68] sm:$0xff] %vm4239_vm0, %v4220_v1  ;;  %v4223_v25 = vmax.f32 %v4191_v34, 0.0  ;;  %v4157_v26 = vmax.f32 %v4093_v27, %v4125_v15  ;;  %v6086_v9 = vunpack.i.h.bf16 %v6084_v62  ;;  %v6085_v14 = vunpack.i.l.bf16 %v6084_v62 }
 0x2f4   : > { %v4224_v48 = vmax.f32 %v4192_v13, 0.0  ;;  %v4064_v41 = vadd.f32 %v4032_v4, %v10889_v0  ;;  %v4065_v52 = vadd.f32 %v4033_v8, %v10890_v57  ;;  %v4096_v56 = vmax.f32 %v1565_v53, %v2398_v61 }
 0x2f5   : > { %v4097_v58 = vmax.f32 %v1566_v42, %v2399_v10  ;;  %4256 = vst.msk [vmem:[%s9365_s11 + $0x80] sm:$0xff] %vm4239_vm0, %v4223_v25  ;;  %v4195_v43 = vadd.f32 %v9343_v31, %v4156_v63  ;;  %v4196_v2 = vadd.f32 %v9343_v31, %v4157_v26  ;;  %v4037_v7 = vmul.f32 %v6086_v9, %v10376_v59 }
 0x2f6   : > { %4257 = vst.msk [vmem:[%s9365_s11 + $0x88] sm:$0xff] %vm4239_vm0, %v4224_v48  ;;  %v4128_v16 = vmax.f32 %v10891_v33, %v4064_v41  ;;  %v4129_v27 = vmax.f32 %v10892_v29, %v4065_v52  ;;  %v4036_v28 = vmul.f32 %v6085_v14, %v10376_v59  ;;  %v10899_v35 = vmax.f32 %v10897_v54, %v10898_v37 }
 0x2f7   : > { %v4227_v22 = vmax.f32 %v4195_v43, 0.0  ;;  %v4228_v23 = vmax.f32 %v4196_v2, 0.0  ;;  %v4069_v10 = vadd.f32 %v4037_v7, %v10894_v40  ;;  %v10902_v46 = vmax.f32 %v10900_v6, %v10901_v30 }
 0x2f8   : > { %v4160_v32 = vmax.f32 %v4096_v56, %v4128_v16  ;;  %v4161_v19 = vmax.f32 %v4097_v58, %v4129_v27  ;;  %v4068_v61 = vadd.f32 %v4036_v28, %v10893_v36 }
 0x2f9   : > { %4260 = vst.msk [vmem:[%s9365_s11 + $0xa0] sm:$0xff] %vm4239_vm0, %v4227_v22  ;;  %4261 = vst.msk [vmem:[%s9365_s11 + $0xa8] sm:$0xff] %vm4239_vm0, %v4228_v23  ;;  %v4133_v12 = vmax.f32 %v10896_v11, %v4069_v10 }
 0x2fa   : > { %v4199_v38 = vadd.f32 %v9343_v31, %v4160_v32  ;;  %v4200_v59 = vadd.f32 %v9343_v31, %v4161_v19  ;;  %v4132_v5 = vmax.f32 %v10895_v50, %v4068_v61 }
 0x2fb   : > { %v4165_v39 = vmax.f32 %v10902_v46, %v4133_v12 }
 0x2fc   : > { %v4231_v51 = vmax.f32 %v4199_v38, 0.0  ;;  %v4232_v55 = vmax.f32 %v4200_v59, 0.0  ;;  %v4164_v44 = vmax.f32 %v10899_v35, %v4132_v5 }
 0x2fd   : > { %v4204_v1 = vadd.f32 %v9343_v31, %v4165_v39 }
 0x2fe   : > { %4264 = vst.msk [vmem:[%s9365_s11 + $0xc0] sm:$0xff] %vm4239_vm0, %v4231_v51  ;;  %4265 = vst.msk [vmem:[%s9365_s11 + $0xc8] sm:$0xff] %vm4239_vm0, %v4232_v55  ;;  %v4203_v60 = vadd.f32 %v9343_v31, %v4164_v44 }
 0x2ff   : > { %v4236_v45 = vmax.f32 %v4204_v1, 0.0 }
 0x300   : > { %v4235_v24 = vmax.f32 %v4203_v60, 0.0 }
 0x301   : > { %4269 = vst.msk [vmem:[%s9365_s11 + $0xe8] sm:$0xff] %vm4239_vm0, %v4236_v45 }
 0x302   : > { %4268 = vst.msk [vmem:[%s9365_s11 + $0xe0] sm:$0xff] %vm4239_vm0, %v4235_v24 }
 0x303 PF: > { %p10_p9 = scmp.ge.s32.totalorder %s6157_s16, 4   ;;  %s10903_s12 = smov %s6110_s13 }
 0x304   : > { %s10904_s13 = smov %s6166_s19  ;;  %s10905_s14 = smov %s6157_s16 }
 0x305   :  { %12 = sbr.rel (!%p10_p9) target bundleno = 2 (0x2), region = 111 }

// kernel: cnn43_forward.3
= control target key start
LH: loop header
LB: loop body
LE: loop exit
PB: predicated region body
PF: predicated region fallthrough
CT: control target
= control target key end

     0   :  { %s7551_s0 = inlined_call_operand.vmem [shape: bf16[4,128,128], index: 0, kind: input, shape index: {}]   ;;  %s7552_s1 = inlined_call_operand.vmem [shape: bf16[128,32], index: 1, kind: input, shape index: {}]   ;;  %s7553_s2 = inlined_call_operand.vmem [shape: f32[1,32], index: 2, kind: input, shape index: {}]   ;;  %s7554_s3 = inlined_call_operand.vmem [shape: bf16[4,32,64], index: 3, kind: input, shape index: {}]   ;;  %s7555_s4 = inlined_call_operand.vmem [shape: f32[1,64], index: 4, kind: input, shape index: {}]   ;;  %s7556_s5 = inlined_call_operand.vmem [shape: f32[3,3,16,64], index: 5, kind: input, shape index: {}]   ;;  %s7557_s6 = inlined_call_operand.vmem [shape: bf16[4,64,64], index: 6, kind: input, shape index: {}]   ;;  %s7558_s7 = inlined_call_operand.vmem [shape: f32[1,64], index: 7, kind: input, shape index: {}]   ;;  %s7559_s8 = inlined_call_operand.vmem [shape: f32[3,3,4,16], index: 8, kind: input, shape index: {}]   ;;  %s7560_s9 = inlined_call_operand.vmem [shape: bf16[4,64,50], index: 9, kind: input, shape index: {}]   ;;  %s7561_s10 = inlined_call_operand.vmem [shape: f32[1,50], index: 10, kind: input, shape index: {}]   ;;  %s7562_s11 = inlined_call_operand.vmem [shape: bf16[50,50], index: 11, kind: input, shape index: {}]   ;;  %s7563_s12 = inlined_call_operand.vmem [shape: f32[1,50], index: 12, kind: input, shape index: {}]   ;;  %s7564_s13 = inlined_call_operand.vmem [shape: bf16[50,8], index: 13, kind: input, shape index: {}]   ;;  %s7565_s14 = inlined_call_operand.vmem [shape: f32[1,8], index: 14, kind: input, shape index: {}]   ;;  %s7566_s15 = inlined_call_operand.hbm [shape: f32[2,1,8], index: 15, kind: output, shape index: {}]  }
   0x1   :  { %7568 = sst [smem:[#allocation6_spill]] %s7551_s0 }
   0x2   :  { %7569 = sst [smem:[#allocation7_spill]] %s7552_s1 }
   0x3   :  { %7570 = sst [smem:[#allocation8_spill]] %s7553_s2 }
   0x4   :  { %7571 = sst [smem:[#allocation9_spill]] %s7554_s3 }
   0x5   :  { %20 = vsyncpa [#allocation4], 0 }
   0x6   :  { %22 = vsyncpa [#allocation4 + $0x1], 0  ;;  %s6756_s18 = smov 0   ;;  %s6758_s19 = smov 0  }
   0x7   :  { %s6760_s20 = smov 0   ;;  %s6762_s21 = smov 0  }
   0x8 LB: > { %s7567_s22 = sadd.s32 4294967295, %s6670_s21   ;;  %s4850_s23 = sadd.s32 4294967294, %s6670_s21   ;;  %s6670_s21 = sphi %s6762_s21, %s7582_s21   ;;  %s6666_s20 = sphi %s6760_s20, %s7581_s20   ;;  %s6662_s19 = sphi %s6758_s19, %s7580_s19   ;;  %s6658_s18 = sphi %s6756_s18, %s7579_s18  }
   0x9   : > { %s6779_s24 = sadd.s32 1, %s6670_s21   ;;  %s35_s25 = sadd.s32 1, %s6666_s20 }
   0xa   : > { %s32_s26 = ssub.s32 %s6670_s21, %s6779_s24  ;;  %p42_p0 = scmp.ne.s32.totalorder %s6666_s20, %s6662_s19 }
   0xb   : > { %p33_p1 = scmp.eq.s32.totalorder %s32_s26, 0  ;;  %p43_p2 = scmp.eq.s32.totalorder %s6670_s21, 0 }
   0xc   : > { %p366_p3 = scmp.eq.s32.totalorder %s7567_s22, 1  ;;  %p371_p4 = scmp.ne.s32.totalorder %s6662_s19, %s6658_s18 }
   0xd   : > { %s6792_s27 = scalar_select %p33_p1, %s6666_s20, %s35_s25  }
   0xe   : > { %p44_p5 = por %p43_p2, %p42_p0  ;;  %p6794_p6 = por %p366_p3, %p42_p0 }
   0xf   : > { %p372_p7 = scmp.eq.s32.totalorder %s4850_s23, 1  ;;  %p4852_p9 = scmp.ge.s32.totalorder %s6670_s21, 2 }
  0x11   : > { %p6798_p8 = por %p372_p7, %p371_p4  ;;  %430 = sbr.rel (%p4852_p9) target bundleno = 42 (0x2a), region = 72 }
  0x18   : > { %433 = sbr.rel (!%p44_p5) target bundleno = 42 (0x2a), region = 76  ;;  %s435_s30 = sand.u32 (%p44_p5), 1, %s6666_s20  }
  0x19   : > { %s5118_s16 = sshll.u32 (%p44_p5), %s6670_s21, 5  ;;  %s4853_s17 = sshll.u32 (%p44_p5), %s435_s30, 7 }
  0x1a   : > { %s7574_s0 = sld [smem:[#allocation6_spill]] (%p44_p5)  ;;  %s437_s23 = scalar_lea.vmem (%p44_p5), [#allocation2], %s4853_s17 }
  0x20   : > { %s6810_s22 = scalar_lea.vmem %s7574_s0, %s5118_s16 }
  0x21   : > { %v456_v0 = vld [vmem:[%s6810_s22] sm:$0xff]   ;;  %v460_v1 = vld [vmem:[%s6810_s22 + $0x8] sm:$0xff]   ;;  %v464_v2 = vld [vmem:[%s6810_s22 + $0x10] sm:$0xff]  }
  0x22   : > { %457 = vst [vmem:[%s437_s23] sm:$0xff] %v456_v0   ;;  %461 = vst [vmem:[%s437_s23 + $0x8] sm:$0xff] %v460_v1   ;;  %v468_v3 = vld [vmem:[%s6810_s22 + $0x18] sm:$0xff]   ;;  %v472_v4 = vld [vmem:[%s6810_s22 + $0x40] sm:$0xff]  }
  0x23   : > { %465 = vst [vmem:[%s437_s23 + $0x10] sm:$0xff] %v464_v2   ;;  %v476_v5 = vld [vmem:[%s6810_s22 + $0x48] sm:$0xff]   ;;  %469 = vst [vmem:[%s437_s23 + $0x18] sm:$0xff] %v468_v3   ;;  %v480_v6 = vld [vmem:[%s6810_s22 + $0x50] sm:$0xff]  }
  0x24   : > { %473 = vst [vmem:[%s437_s23 + $0x20] sm:$0xff] %v472_v4   ;;  %477 = vst [vmem:[%s437_s23 + $0x28] sm:$0xff] %v476_v5   ;;  %v484_v7 = vld [vmem:[%s6810_s22 + $0x58] sm:$0xff]   ;;  %v488_v8 = vld [vmem:[%s6810_s22 + $0x80] sm:$0xff]  }
  0x25   : > { %481 = vst [vmem:[%s437_s23 + $0x30] sm:$0xff] %v480_v6   ;;  %485 = vst [vmem:[%s437_s23 + $0x38] sm:$0xff] %v484_v7   ;;  %v492_v9 = vld [vmem:[%s6810_s22 + $0x88] sm:$0xff]   ;;  %v496_v10 = vld [vmem:[%s6810_s22 + $0x90] sm:$0xff]  }
  0x26   : > { %489 = vst [vmem:[%s437_s23 + $0x40] sm:$0xff] %v488_v8   ;;  %v500_v11 = vld [vmem:[%s6810_s22 + $0x98] sm:$0xff]   ;;  %493 = vst [vmem:[%s437_s23 + $0x48] sm:$0xff] %v492_v9   ;;  %v504_v12 = vld [vmem:[%s6810_s22 + $0xc0] sm:$0xff]  }
  0x27   : > { %497 = vst [vmem:[%s437_s23 + $0x50] sm:$0xff] %v496_v10   ;;  %501 = vst [vmem:[%s437_s23 + $0x58] sm:$0xff] %v500_v11   ;;  %v508_v13 = vld [vmem:[%s6810_s22 + $0xc8] sm:$0xff]   ;;  %v512_v14 = vld [vmem:[%s6810_s22 + $0xd0] sm:$0xff]  }
  0x28   : > { %505 = vst [vmem:[%s437_s23 + $0x60] sm:$0xff] %v504_v12   ;;  %509 = vst [vmem:[%s437_s23 + $0x68] sm:$0xff] %v508_v13   ;;  %v516_v15 = vld [vmem:[%s6810_s22 + $0xd8] sm:$0xff]  }
  0x29   : > { %513 = vst [vmem:[%s437_s23 + $0x70] sm:$0xff] %v512_v14   ;;  %517 = vst [vmem:[%s437_s23 + $0x78] sm:$0xff] %v516_v15  }
  0x2a PF: > { %p4856_p10 = scmp.ge.s32.totalorder %s6670_s21, 1  ;;  %p605_p11 = scmp.lt.s32.totalorder %s6670_s21, 3 }
  0x2c   : > { %p606_p12 = pnand %p4856_p10, %p605_p11 }
  0x2d   : > { %s7575_s1 = sld [smem:[#allocation7_spill]] (!%p606_p12)  ;;  %s6834_s17 = sand.u32 (!%p606_p12), 1, %s6662_s19   ;;  %vm1182_vm0 = vcmask (!%p606_p12), 261120   ;;  %vm1511_vm1 = vcmask (!%p606_p12), 523264   ;;  %vm6673_vm2 = vmmov (!%p606_p12), 0   ;;  %vm3122_vm3 = vcmask (!%p606_p12), 130048  }
  0x2e   : > { %609 = sbr.rel (%p606_p12) target bundleno = 2131 (0x853), region = 117  ;;  %s4857_s22 = sshll.u32 (!%p606_p12), %s6834_s17, 7  ;;  %vm4653_vm4 = vcmask (!%p606_p12), 1040384   ;;  %vm4649_vm5 = vcmask (!%p606_p12), 408576   ;;  %vm4774_vm6 = vcmask (!%p606_p12), 57344  }
  0x2f   : > { %s6848_s25 = scalar_lea.vmem (!%p606_p12), [#allocation2], %s4857_s22  ;;  %s7576_s3 = sld [smem:[#allocation9_spill]] (!%p606_p12) }
  0x30   : > { %v6544_v20 = vld [vmem:[%s6848_s25] sm:$0xff] (!%p606_p12)   ;;  %v6546_v26 = vld [vmem:[%s6848_s25 + $0x8] sm:$0xff] (!%p606_p12)   ;;  %v6548_v28 = vld [vmem:[%s6848_s25 + $0x10] sm:$0xff] (!%p606_p12)   ;;  %s7577_s2 = sld [smem:[#allocation8_spill]] (!%p606_p12)  ;;  %s657_s16 = scalar_lea.vmem (!%p606_p12), [#allocation3], %s6834_s17 }
  0x31   : > { %v6545_v21 = vld [vmem:[%s6848_s25 + $0x20] sm:$0xff] (!%p606_p12)   ;;  %5465 = vmatprep.mubr.bf16.mxu0 (!%p606_p12), %v6544_v20  ;;  %v6547_v27 = vld [vmem:[%s6848_s25 + $0x28] sm:$0xff] (!%p606_p12)   ;;  %v6549_v29 = vld [vmem:[%s6848_s25 + $0x30] sm:$0xff] (!%p606_p12)   ;;  %s4789_s0 = sshll.u32 (!%p606_p12), %s657_s16, 4  ;;  %s4777_s22 = scalar_lea.sflag (!%p606_p12), [#allocation4], %s6834_s17  ;;  %s7509_s0 = int_to_ptr.vmem [resolvable:$true] %s4789_s0 }
  0x32   : > { %5489 = vmatprep.mubr.bf16.mxu1 (!%p606_p12), %v6545_v21  ;;  %v6550_v30 = vld [vmem:[%s6848_s25 + $0x18] sm:$0xff] (!%p606_p12)   ;;  %v6552_v32 = vld [vmem:[%s6848_s25 + $0x40] sm:$0xff] (!%p606_p12)   ;;  %v6554_v34 = vld [vmem:[%s6848_s25 + $0x48] sm:$0xff] (!%p606_p12)   ;;  %s6608_s23 = scalar_lea.vmem (!%p606_p12), %s7509_s0, 16 }
  0x33   : > { %v6536_v16 = vld [vmem:[%s7575_s1] sm:$0xff] (!%p606_p12)   ;;  %v6537_v17 = vld [vmem:[%s7575_s1 + $0x8] sm:$0xff] (!%p606_p12)   ;;  %v6538_v18 = vld [vmem:[%s7575_s1 + $0x10] sm:$0xff] (!%p606_p12)   ;;  %p6609_p13 = scmp.ne.s32.totalorder (!%p606_p12), %s7509_s0, %s6608_s23 }
  0x34   : > { %5449 = vmatprep.subr.bf16.mxu0 (!%p606_p12), %v6536_v16  ;;  %5473 = vmatprep.subr.bf16.mxu1 (!%p606_p12), %v6536_v16  ;;  %v6846_v19 = vld [vmem:[%s7575_s1 + $0x18] sm:$0xff] (!%p606_p12)   ;;  %v6540_v22 = vld [vmem:[%s7575_s1 + $0x20] sm:$0xff] (!%p606_p12)   ;;  %v6541_v23 = vld [vmem:[%s7575_s1 + $0x28] sm:$0xff] (!%p606_p12)  }
  0x35   : > { %5450 = vmatpush3.bf16.msra.mxu0 %v6536_v16  ;;  %5474 = vmatpush3.bf16.msra.mxu1 %v6536_v16  ;;  %v6542_v24 = vld [vmem:[%s7575_s1 + $0x30] sm:$0xff]   ;;  %v6543_v25 = vld [vmem:[%s7575_s1 + $0x38] sm:$0xff]   ;;  %v6553_v33 = vld [vmem:[%s6848_s25 + $0x60] sm:$0xff]   ;;  %s7578_s1 = sadd.s32 4294967295, %s6670_s21   ;;  %p6610_p0 = pnand %p6609_p13, %p6794_p6 }
  0x36   : > { %5451 = vmatprep.subr.bf16.mxu0 %v6537_v17  ;;  %5475 = vmatprep.subr.bf16.mxu1 %v6537_v17  ;;  %v6551_v31 = vld [vmem:[%s6848_s25 + $0x38] sm:$0xff]   ;;  %v6555_v35 = vld [vmem:[%s6848_s25 + $0x68] sm:$0xff]   ;;  %v6556_v36 = vld [vmem:[%s6848_s25 + $0x50] sm:$0xff]   ;;  %s5115_s30 = sshll.u32 %s7578_s1, 4  ;;  %s6675_s1 = smov [#allocation3]  }
  0x37   : > { %v6557_v37 = vld [vmem:[%s6848_s25 + $0x70] sm:$0xff]   ;;  %v6558_v38 = vld [vmem:[%s6848_s25 + $0x58] sm:$0xff]   ;;  %v6560_v40 = vld [vmem:[%s7576_s3] sm:$0xff]   ;;  %p6611_p1 = pneg %p6610_p0 }
  0x38   : > { %v6559_v39 = vld [vmem:[%s6848_s25 + $0x78] sm:$0xff]   ;;  %v6561_v41 = vld [vmem:[%s7576_s3 + $0x20] sm:$0xff]   ;;  %v6562_v42 = vld [vmem:[%s7576_s3 + $0x8] sm:$0xff]  }
  0x39   : > { %5452 = vmatpush3.bf16.msra.mxu0 %v6537_v17  ;;  %5476 = vmatpush3.bf16.msra.mxu1 %v6537_v17  ;;  %v6563_v43 = vld [vmem:[%s7576_s3 + $0x28] sm:$0xff]   ;;  %v6901_v44 = vld [vmem:[%s7576_s3 + $0x10] sm:$0xff]   ;;  %v4906_v10 = vld [vmem:[%s7577_s2] ss:$0 sm:$0xff]  ;;  %s7507_s2 = scalar_lea.hbm %s7566_s15, %s5115_s30 }
  0x3a   : > { %5453 = vmatprep.subr.bf16.mxu0 %v6538_v18  ;;  %5477 = vmatprep.subr.bf16.mxu1 %v6538_v18 }
  0x3d   : > { %5454 = vmatpush3.bf16.msra.mxu0 %v6538_v18  ;;  %5478 = vmatpush3.bf16.msra.mxu1 %v6538_v18 }
  0x3e   : > { %5455 = vmatprep.subr.bf16.mxu0 %v6846_v19  ;;  %5479 = vmatprep.subr.bf16.mxu1 %v6846_v19 }
  0x41   : > { %5456 = vmatpush3.bf16.msra.mxu0 %v6846_v19  ;;  %5480 = vmatpush3.bf16.msra.mxu1 %v6846_v19 }
  0x42   : > { %5457 = vmatprep.subr.bf16.mxu0 %v6540_v22  ;;  %5481 = vmatprep.subr.bf16.mxu1 %v6540_v22 }
  0x45   : > { %5458 = vmatpush3.bf16.msra.mxu0 %v6540_v22  ;;  %5482 = vmatpush3.bf16.msra.mxu1 %v6540_v22 }
  0x46   : > { %5459 = vmatprep.subr.bf16.mxu0 %v6541_v23  ;;  %5483 = vmatprep.subr.bf16.mxu1 %v6541_v23 }
  0x49   : > { %5460 = vmatpush3.bf16.msra.mxu0 %v6541_v23  ;;  %5484 = vmatpush3.bf16.msra.mxu1 %v6541_v23 }
  0x4a   : > { %5461 = vmatprep.subr.bf16.mxu0 %v6542_v24  ;;  %5485 = vmatprep.subr.bf16.mxu1 %v6542_v24 }
  0x4d   : > { %5462 = vmatpush3.bf16.msra.mxu0 %v6542_v24  ;;  %5486 = vmatpush3.bf16.msra.mxu1 %v6542_v24 }
  0x4e   : > { %5463 = vmatprep.subr.bf16.mxu0 %v6543_v25  ;;  %5487 = vmatprep.subr.bf16.mxu1 %v6543_v25 }
  0x51   : > { %5464 = vmatpush3.bf16.msra.mxu0 %v6543_v25  ;;  %5488 = vmatpush3.bf16.msra.mxu1 %v6543_v25 }
  0x52   : > { %5497 = vmatprep.subr.bf16.mxu0 %v6536_v16  ;;  %5521 = vmatprep.subr.bf16.mxu1 %v6536_v16 }
  0x54   : > { %5466 = vmatmul.mubr.bf16.vlgmr.msra.gmra.mrb[0].mxu0 %v6546_v26  ;;  %5490 = vmatmul.mubr.bf16.vlgmr.msra.gmra.mrb[0].mxu1 %v6547_v27 }
  0x55   : > { %5498 = vmatpush3.bf16.msra.mxu0 %v6536_v16  ;;  %5522 = vmatpush3.bf16.msra.mxu1 %v6536_v16 }
  0x56   : > { %5499 = vmatprep.subr.bf16.mxu0 %v6537_v17  ;;  %5523 = vmatprep.subr.bf16.mxu1 %v6537_v17 }
  0x57   : > { %5469 = vmatprep.mubr.bf16.mxu0 %v6548_v28  ;;  %5493 = vmatprep.mubr.bf16.mxu1 %v6549_v29 }
  0x59   : > { %5500 = vmatpush3.bf16.msra.mxu0 %v6537_v17  ;;  %5524 = vmatpush3.bf16.msra.mxu1 %v6537_v17 }
  0x5a   : > { %5501 = vmatprep.subr.bf16.mxu0 %v6538_v18  ;;  %5525 = vmatprep.subr.bf16.mxu1 %v6538_v18 }
  0x5c   : > { %5470 = vmatmul.mubr.bf16.gmra.mrb[4].mxu0 %v6550_v30  ;;  %5494 = vmatmul.mubr.bf16.gmra.mrb[4].mxu1 %v6551_v31 }
  0x5d   : > { %5502 = vmatpush3.bf16.msra.mxu0 %v6538_v18  ;;  %5526 = vmatpush3.bf16.msra.mxu1 %v6538_v18 }
  0x5e   : > { %5503 = vmatprep.subr.bf16.mxu0 %v6846_v19  ;;  %5527 = vmatprep.subr.bf16.mxu1 %v6846_v19 }
  0x5f   : > { %5513 = vmatprep.mubr.bf16.mxu0 %v6552_v32  ;;  %5537 = vmatprep.mubr.bf16.mxu1 %v6553_v33 }
  0x61   : > { %5504 = vmatpush3.bf16.msra.mxu0 %v6846_v19  ;;  %5528 = vmatpush3.bf16.msra.mxu1 %v6846_v19 }
  0x62   : > { %5505 = vmatprep.subr.bf16.mxu0 %v6540_v22  ;;  %5529 = vmatprep.subr.bf16.mxu1 %v6540_v22 }
  0x65   : > { %5506 = vmatpush3.bf16.msra.mxu0 %v6540_v22  ;;  %5530 = vmatpush3.bf16.msra.mxu1 %v6540_v22 }
  0x66   : > { %5507 = vmatprep.subr.bf16.mxu0 %v6541_v23  ;;  %5531 = vmatprep.subr.bf16.mxu1 %v6541_v23 }
  0x69   : > { %5508 = vmatpush3.bf16.msra.mxu0 %v6541_v23  ;;  %5532 = vmatpush3.bf16.msra.mxu1 %v6541_v23 }
  0x6a   : > { %5509 = vmatprep.subr.bf16.mxu0 %v6542_v24  ;;  %5533 = vmatprep.subr.bf16.mxu1 %v6542_v24 }
  0x6d   : > { %5510 = vmatpush3.bf16.msra.mxu0 %v6542_v24  ;;  %5534 = vmatpush3.bf16.msra.mxu1 %v6542_v24 }
  0x6e   : > { %5511 = vmatprep.subr.bf16.mxu0 %v6543_v25  ;;  %5535 = vmatprep.subr.bf16.mxu1 %v6543_v25 }
  0x71   : > { %5512 = vmatpush3.bf16.msra.mxu0 %v6543_v25  ;;  %5536 = vmatpush3.bf16.msra.mxu1 %v6543_v25 }
  0x72   : > { %5545 = vmatprep.subr.bf16.mxu1 %v6560_v40  ;;  %5569 = vmatprep.subr.bf16.mxu0 %v6561_v41 }
  0x74   : > { %5514 = vmatmul.mubr.bf16.vlgmr.msra.gmra.mrb[8].mxu0 %v6554_v34  ;;  %5538 = vmatmul.mubr.bf16.vlgmr.msra.gmra.mrb[8].mxu1 %v6555_v35 }
  0x75   : > { %5517 = vmatprep.mubr.bf16.mxu0 %v6556_v36  ;;  %5541 = vmatprep.mubr.bf16.mxu1 %v6557_v37 }
  0x76   : > { %5546 = vmatpush3.bf16.msra.mxu1 %v6560_v40  ;;  %5570 = vmatpush3.bf16.msra.mxu0 %v6561_v41 }
  0x77   : > { %5547 = vmatprep.subr.bf16.mxu1 %v6562_v42  ;;  %5571 = vmatprep.subr.bf16.mxu0 %v6563_v43 }
  0x7a   : > { %5548 = vmatpush3.bf16.msra.mxu1 %v6562_v42  ;;  %5572 = vmatpush3.bf16.msra.mxu0 %v6563_v43 }
  0x7b   : > { %5557 = vmatprep.subr.bf16.mxu1 %v6901_v44 }
  0x7c   : > { %5518 = vmatmul.mubr.bf16.gmra.mrb[12].mxu0 %v6558_v38  ;;  %5542 = vmatmul.mubr.bf16.gmra.mrb[12].mxu1 %v6559_v39 }
 0x127   : > { %v5467_v45 = vpop.f32.mrb[0].mxu0  ;;  %v5491_v46 = vpop.f32.mrb[0].mxu1 }
 0x128   : > { %v1117_v47 = vmax.f32 %v5467_v45, %v5491_v46  ;;  %v790_v48 = vpop.f32.mrb[1].mxu0  ;;  %v888_v49 = vpop.f32.mrb[1].mxu1 }
 0x129   : > { %v1115_v50 = vmax.f32 %v790_v48, %v888_v49  ;;  %v5468_v51 = vpop.f32.mrb[2].mxu0  ;;  %v5492_v52 = vpop.f32.mrb[2].mxu1  ;;  %v6565_v49 = vld [vmem:[%s7576_s3 + $0x18] sm:$0xff]  }
 0x12a   : > { %v1118_v53 = vmax.f32 %v5468_v51, %v5492_v52  ;;  %v793_v54 = vpop.f32.mrb[3].mxu0  ;;  %v891_v55 = vpop.f32.mrb[3].mxu1 }
 0x12b   : > { %v1116_v56 = vmax.f32 %v793_v54, %v891_v55 }
 0x12f   : > { %v5471_v57 = vpop.f32.mrb[4].mxu0  ;;  %v5495_v58 = vpop.f32.mrb[4].mxu1 }
 0x130   : > { %v1121_v59 = vmax.f32 %v5471_v57, %v5495_v58  ;;  %v806_v60 = vpop.f32.mrb[5].mxu0  ;;  %v904_v61 = vpop.f32.mrb[5].mxu1 }
 0x131   : > { %v1119_v62 = vmax.f32 %v806_v60, %v904_v61  ;;  %v5472_v63 = vpop.f32.mrb[6].mxu0  ;;  %v5496_v0 = vpop.f32.mrb[6].mxu1  ;;  %v6936_v61 = vld [vmem:[%s7556_s5 + $0x10] sm:$0xff] }
 0x132   : > { %v1122_v1 = vmax.f32 %v5472_v63, %v5496_v0  ;;  %v809_v2 = vpop.f32.mrb[7].mxu0  ;;  %v907_v3 = vpop.f32.mrb[7].mxu1 }
 0x133   : > { %v1120_v4 = vmax.f32 %v809_v2, %v907_v3 }
 0x147   : > { %v5515_v5 = vpop.f32.mrb[8].mxu0  ;;  %v5539_v6 = vpop.f32.mrb[8].mxu1 }
 0x148   : > { %v1125_v7 = vmax.f32 %v5515_v5, %v5539_v6  ;;  %v986_v8 = vpop.f32.mrb[9].mxu0  ;;  %v1084_v9 = vpop.f32.mrb[9].mxu1 }
 0x149   : > { %v1123_v11 = vmax.f32 %v986_v8, %v1084_v9  ;;  %v5516_v12 = vpop.f32.mrb[10].mxu0  ;;  %v5540_v13 = vpop.f32.mrb[10].mxu1 }
 0x14a   : > { %v1133_v14 = vmax.f32 %v1117_v47, %v1125_v7  ;;  %v1126_v15 = vmax.f32 %v5516_v12, %v5540_v13  ;;  %v989_v16 = vpop.f32.mrb[11].mxu0  ;;  %v1087_v17 = vpop.f32.mrb[11].mxu1 }
 0x14b   : > { %v1131_v18 = vmax.f32 %v1115_v50, %v1123_v11  ;;  %v1124_v19 = vmax.f32 %v989_v16, %v1087_v17 }
 0x14c   : > { %v1148_v20 = vadd.f32 %v4906_v10, %v1133_v14  ;;  %v1134_v21 = vmax.f32 %v1118_v53, %v1126_v15 }
 0x14d   : > { %v1146_v22 = vadd.f32 %v4906_v10, %v1131_v18  ;;  %v1132_v23 = vmax.f32 %v1116_v56, %v1124_v19  ;;  %v6566_v56 = vld [vmem:[%s7576_s3 + $0x30] sm:$0xff]  }
 0x14e   : > { %v1149_v24 = vadd.f32 %v4906_v10, %v1134_v21  ;;  %v1156_v28 = vmax.f32 %v1148_v20, 0.0 }
 0x14f   : > { %v1147_v25 = vadd.f32 %v4906_v10, %v1132_v23  ;;  %v5519_v26 = vpop.f32.mrb[12].mxu0  ;;  %v5543_v27 = vpop.f32.mrb[12].mxu1  ;;  %v1154_v33 = vmax.f32 %v1146_v22, 0.0 }
 0x150   : > { %v1157_v29 = vmax.f32 %v1149_v24, 0.0  ;;  %v1129_v30 = vmax.f32 %v5519_v26, %v5543_v27  ;;  %v1002_v31 = vpop.f32.mrb[13].mxu0  ;;  %v1100_v32 = vpop.f32.mrb[13].mxu1 }
 0x151   : > { %v1155_v34 = vmax.f32 %v1147_v25, 0.0  ;;  %v1127_v35 = vmax.f32 %v1002_v31, %v1100_v32  ;;  %v5520_v36 = vpop.f32.mrb[14].mxu0  ;;  %v5544_v37 = vpop.f32.mrb[14].mxu1 }
 0x152   : > { %v1163_v38 = vpack.c.bf16 %v1157_v29, %v1156_v28  ;;  %v1137_v39 = vmax.f32 %v1121_v59, %v1129_v30  ;;  %v1130_v40 = vmax.f32 %v5520_v36, %v5544_v37  ;;  %v1005_v41 = vpop.f32.mrb[15].mxu0  ;;  %v1103_v42 = vpop.f32.mrb[15].mxu1 }
 0x153   : > { %v1162_v43 = vpack.c.bf16 %v1155_v34, %v1154_v33  ;;  %v1135_v45 = vmax.f32 %v1119_v62, %v1127_v35  ;;  %v1128_v46 = vmax.f32 %v1005_v41, %v1103_v42  ;;  %v4957_v62 = vld [vmem:[%s7556_s5 + $0x20] sm:$0xff]  ;;  %v4958_v41 = vld [vmem:[%s7556_s5 + $0x28] sm:$0xff] }
 0x154   : > { %v1152_v47 = vadd.f32 %v4906_v10, %v1137_v39  ;;  %v1138_v48 = vmax.f32 %v1122_v1, %v1130_v40  ;;  %v4944_v40 = vld [vmem:[%s7556_s5 + $0x18] sm:$0xff] }
 0x155   : > { %v1150_v50 = vadd.f32 %v4906_v10, %v1135_v45  ;;  %v1136_v51 = vmax.f32 %v1120_v4, %v1128_v46  ;;  %5549 = vmatprep.mubr.msk.bf16.mxu1 %vm1182_vm0, %v1162_v43  ;;  %5573 = vmatprep.mubr.msk.bf16.mxu0 %vm1182_vm0, %v1162_v43 }
 0x156   : > { %v1153_v52 = vadd.f32 %v4906_v10, %v1138_v48  ;;  %5550 = vmatmul.mubr.msk.bf16.vlgmr.msra.gmra.mrb[16].mxu1 %vm1182_vm0, %v1163_v38  ;;  %5574 = vmatmul.mubr.msk.bf16.vlgmr.msra.gmra.mrb[16].mxu0 %vm1182_vm0, %v1163_v38  ;;  %v1160_v54 = vmax.f32 %v1152_v47, 0.0 }
 0x157   : > { %v1151_v53 = vadd.f32 %v4906_v10, %v1136_v51  ;;  %5558 = vmatpush3.bf16.msra.mxu1 %v6901_v44  ;;  %v1158_v57 = vmax.f32 %v1150_v50, 0.0  ;;  %v6567_v44 = vld [vmem:[%s7576_s3 + $0x38] sm:$0xff]   ;;  %v1507_v51 = vld [vmem:[%s7556_s5 + $0x8] sm:$0xff]  ;;  %s6612_s3 = sshll.u32 %s6675_s1, 4  ;;  %s6613_s3 = int_to_ptr.vmem [resolvable:$false] %s6612_s3 }
 0x158   : > { %v1161_v55 = vmax.f32 %v1153_v52, 0.0  ;;  %5559 = vmatprep.subr.bf16.mxu1 %v6565_v49  ;;  %v7032_v52 = vld [vmem:[%s7556_s5 + $0x30] sm:$0xff]  ;;  %s6614_s26 = scalar_lea.vmem %s6613_s3, 32  ;;  %p6615_p2 = scmp.lt.s32.totalorder %s7509_s0, %s6613_s3 }
 0x159   : > { %v1159_v58 = vmax.f32 %v1151_v53, 0.0  ;;  %v7037_v53 = vld [vmem:[%s7556_s5 + $0x40] sm:$0xff]  ;;  %p6616_p3 = scmp.lt.s32.totalorder %s6614_s26, %s6608_s23 }
 0x15a   : > { %v1165_v59 = vpack.c.bf16 %v1161_v55, %v1160_v54  ;;  %v7060_v54 = vld [vmem:[%s7556_s5 + $0x38] sm:$0xff]  ;;  %v7065_v55 = vld [vmem:[%s7556_s5 + $0x48] sm:$0xff] }
 0x15b   : > { %v1164_v60 = vpack.c.bf16 %v1159_v58, %v1158_v57  ;;  %5560 = vmatpush3.bf16.msra.mxu1 %v6565_v49  ;;  %v4966_v57 = vld [vmem:[%s7556_s5 + $0x58] sm:$0xff]  ;;  %v4973_v58 = vld [vmem:[%s7556_s5 + $0x60] sm:$0xff]  ;;  %p6617_p4 = por %p6616_p3, %p6615_p2 }
 0x15c   : > { %5581 = vmatprep.subr.bf16.mxu1 %v6566_v56 }
 0x15d   : > { %5553 = vmatprep.mubr.msk.bf16.mxu1 %vm1182_vm0, %v1164_v60  ;;  %5577 = vmatprep.mubr.msk.bf16.mxu0 %vm1182_vm0, %v1164_v60  ;;  %p6618_p5 = pnand %p6617_p4, %p6611_p1 }
 0x15e   : > { %5554 = vmatmul.mubr.msk.bf16.gmra.mrb[20].mxu1 %vm1182_vm0, %v1165_v59  ;;  %5578 = vmatmul.mubr.msk.bf16.gmra.mrb[20].mxu0 %vm1182_vm0, %v1165_v59 }
 0x15f   : > { %5561 = vmatprep.mubr.msk.bf16.mxu1 %vm1182_vm0, %v1162_v43  ;;  %5609 = vmatprep.mubr.msk.f32.mxu0 %vm1511_vm1, %v6936_v61 }
 0x166   : > { %5562 = vmatmul.mubr.msk.bf16.vlgmr.msra.gmra.mrb[24].mxu1 %vm1182_vm0, %v1163_v38 }
 0x167   : > { %5565 = vmatprep.mubr.msk.bf16.mxu1 %vm1182_vm0, %v1164_v60  ;;  %5582 = vmatpush3.bf16.msra.mxu1 %v6566_v56  ;;  %v4965_v56 = vld [vmem:[%s7556_s5 + $0x50] sm:$0xff] }
 0x168   : > { %5583 = vmatprep.subr.bf16.mxu1 %v6567_v44 }
 0x16b   : > { %5584 = vmatpush3.bf16.msra.mxu1 %v6567_v44  ;;  %v4978_v44 = vld [vmem:[%s7556_s5 + $0x78] sm:$0xff] }
 0x16e   : > { %5566 = vmatmul.mubr.msk.bf16.gmra.mrb[28].mxu1 %vm1182_vm0, %v1165_v59 }
 0x16f   : > { %5585 = vmatprep.mubr.msk.bf16.mxu1 %vm1182_vm0, %v1162_v43  ;;  %v1506_v43 = vld [vmem:[%s7556_s5] sm:$0xff] }
 0x176   : > { %5586 = vmatmul.mubr.msk.bf16.vlgmr.msra.gmra.mrb[32].mxu1 %vm1182_vm0, %v1163_v38 }
 0x177   : > { %5589 = vmatprep.mubr.msk.bf16.mxu1 %vm1182_vm0, %v1164_v60  ;;  %v4974_v60 = vld [vmem:[%s7556_s5 + $0x68] sm:$0xff] }
 0x17e   : > { %5590 = vmatmul.mubr.msk.bf16.gmra.mrb[36].mxu1 %vm1182_vm0, %v1165_v59  ;;  %v4977_v59 = vld [vmem:[%s7556_s5 + $0x70] sm:$0xff] }
 0x17f   : > { %5685 = vmatprep.mubr.msk.f32.mxu1 %vm1511_vm1, %v4957_v62  ;;  %v4988_v62 = vld [vmem:[%s7556_s5 + $0x88] sm:$0xff] }
 0x229   : > { %v5551_v63 = vpop.f32.mrb[16].mxu1  ;;  %v5575_v0 = vpop.f32.mrb[16].mxu0 }
 0x22a   : > { %v1229_v1 = vpop.f32.mrb[17].mxu1  ;;  %v1393_v2 = vpop.f32.mrb[17].mxu0 }
 0x22b   : > { %v5552_v3 = vpop.f32.mrb[18].mxu1  ;;  %v5576_v4 = vpop.f32.mrb[18].mxu0 }
 0x22c   : > { %v6944_v5 = vpack.c.bf16 %v5552_v3, %v5551_v63  ;;  %v6946_v6 = vpack.c.bf16 %v5576_v4, %v5575_v0  ;;  %v1232_v7 = vpop.f32.mrb[19].mxu1  ;;  %v1396_v8 = vpop.f32.mrb[19].mxu0  ;;  %v6568_v63 = vld [vmem:[%s7557_s6] sm:$0xff]   ;;  %v6571_v3 = vld [vmem:[%s7557_s6 + $0x28] sm:$0xff]   ;;  %v6572_v4 = vld [vmem:[%s7557_s6 + $0x10] sm:$0xff]  }
 0x22d   : > { %v6948_v9 = vpack.c.bf16 %v1232_v7, %v1229_v1  ;;  %v6950_v10 = vpack.c.bf16 %v1396_v8, %v1393_v2  ;;  %v6569_v0 = vld [vmem:[%s7557_s6 + $0x20] sm:$0xff]   ;;  %v6672_v1 = vmov 0.0   ;;  %v6570_v2 = vld [vmem:[%s7557_s6 + $0x8] sm:$0xff]   ;;  %v6575_v7 = vld [vmem:[%s7557_s6 + $0x38] sm:$0xff]  }
 0x231   : > { %v5555_v11 = vpop.f32.mrb[20].mxu1  ;;  %v5579_v12 = vpop.f32.mrb[20].mxu0 }
 0x232   : > { %v1245_v13 = vpop.f32.mrb[21].mxu1  ;;  %v1409_v14 = vpop.f32.mrb[21].mxu0 }
 0x233   : > { %v5556_v15 = vpop.f32.mrb[22].mxu1  ;;  %v5580_v16 = vpop.f32.mrb[22].mxu0 }
 0x234   : > { %v6952_v17 = vpack.c.bf16 %v5556_v15, %v5555_v11  ;;  %v6954_v18 = vpack.c.bf16 %v5580_v16, %v5579_v12  ;;  %v1248_v19 = vpop.f32.mrb[23].mxu1  ;;  %v1412_v20 = vpop.f32.mrb[23].mxu0 }
 0x235   : > { %v6956_v21 = vpack.c.bf16 %v1248_v19, %v1245_v13  ;;  %v6958_v22 = vpack.c.bf16 %v1412_v20, %v1409_v14  ;;  %v4991_v19 = vld [vmem:[%s7555_s4] ss:$0 sm:$0xff] }
 0x239   : > { %v5563_v23 = vpop.f32.mrb[24].mxu1 }
 0x23a   : > { %v1311_v24 = vpop.f32.mrb[25].mxu1 }
 0x23b   : > { %v5564_v25 = vpop.f32.mrb[26].mxu1 }
 0x23c   : > { %v6960_v26 = vpack.c.bf16 %v5564_v25, %v5563_v23  ;;  %v1314_v27 = vpop.f32.mrb[27].mxu1 }
 0x23d   : > { %v6962_v28 = vpack.c.bf16 %v1314_v27, %v1311_v24  ;;  %v6576_v27 = vld [vmem:[%s7557_s6 + $0x40] sm:$0xff]  }
 0x23f   : > { %6130 = vmatprep.subr.bf16.mxu0 %v6962_v28  ;;  %6194 = vmatprep.subr.bf16.mxu1 %v6962_v28 }
 0x240   : > { %6132 = vmatpush3.bf16.msra.mxu0 %v6962_v28  ;;  %6196 = vmatpush3.bf16.msra.mxu1 %v6962_v28 }
 0x241   : > { %v5567_v29 = vpop.f32.mrb[28].mxu1  ;;  %6134 = vmatprep.subr.bf16.mxu0 %v6960_v26  ;;  %6198 = vmatprep.subr.bf16.mxu1 %v6960_v26 }
 0x242   : > { %v1327_v30 = vpop.f32.mrb[29].mxu1 }
 0x243   : > { %v5568_v31 = vpop.f32.mrb[30].mxu1 }
 0x244   : > { %v6970_v32 = vpack.c.bf16 %v5568_v31, %v5567_v29  ;;  %v1330_v33 = vpop.f32.mrb[31].mxu1  ;;  %6136 = vmatpush3.bf16.msra.mxu0 %v6960_v26  ;;  %6200 = vmatpush3.bf16.msra.mxu1 %v6960_v26  ;;  %v6579_v31 = vld [vmem:[%s7557_s6 + $0x68] sm:$0xff]  }
 0x245   : > { %v6974_v34 = vpack.c.bf16 %v1330_v33, %v1327_v30  ;;  %v6578_v30 = vld [vmem:[%s7557_s6 + $0x48] sm:$0xff]   ;;  %v6581_v33 = vld [vmem:[%s7557_s6 + $0x70] sm:$0xff]  }
 0x247   : > { %6138 = vmatprep.subr.bf16.mxu0 %v6974_v34  ;;  %6202 = vmatprep.subr.bf16.mxu1 %v6974_v34 }
 0x248   : > { %6140 = vmatpush3.bf16.msra.mxu0 %v6974_v34  ;;  %6204 = vmatpush3.bf16.msra.mxu1 %v6974_v34 }
 0x249   : > { %v5587_v35 = vpop.f32.mrb[32].mxu1  ;;  %6142 = vmatprep.subr.bf16.mxu0 %v6970_v32  ;;  %6206 = vmatprep.subr.bf16.mxu1 %v6970_v32 }
 0x24a   : > { %v1475_v36 = vpop.f32.mrb[33].mxu1 }
 0x24b   : > { %v5588_v37 = vpop.f32.mrb[34].mxu1 }
 0x24c   : > { %v6982_v38 = vpack.c.bf16 %v5588_v37, %v5587_v35  ;;  %v1478_v39 = vpop.f32.mrb[35].mxu1  ;;  %6144 = vmatpush3.bf16.msra.mxu0 %v6970_v32  ;;  %6208 = vmatpush3.bf16.msra.mxu1 %v6970_v32  ;;  %v6583_v35 = vld [vmem:[%s7557_s6 + $0x78] sm:$0xff]  }
 0x24d   : > { %v6992_v42 = vpack.c.bf16 %v1478_v39, %v1475_v36  ;;  %6146 = vmatprep.subr.bf16.mxu0 %v6948_v9  ;;  %6210 = vmatprep.subr.bf16.mxu1 %v6948_v9  ;;  %v6674_v36 = vmov 0.0|0.0  }
 0x24f   : > { %5610 = vmatmul.mubr.msk.f32.vlgmr.msra.gmra.mrb[24].mxu0 %vm1511_vm1, %v4944_v40  ;;  %5686 = vmatmul.mubr.msk.f32.vlgmr.msra.gmra.mrb[40].mxu1 %vm1511_vm1, %v4958_v41 }
 0x250   : > { %6148 = vmatpush3.bf16.msra.mxu0 %v6948_v9  ;;  %6212 = vmatpush3.bf16.msra.mxu1 %v6948_v9 }
 0x251   : > { %v5591_v45 = vpop.f32.mrb[36].mxu1  ;;  %6150 = vmatprep.subr.bf16.mxu0 %v6944_v5  ;;  %6214 = vmatprep.subr.bf16.mxu1 %v6944_v5 }
 0x252   : > { %v1491_v46 = vpop.f32.mrb[37].mxu1  ;;  %5628 = vmatprep.mubr.msk.f32.mxu0 %vm1511_vm1, %v1506_v43  ;;  %5704 = vmatprep.mubr.msk.f32.mxu1 %vm1511_vm1, %v6936_v61  ;;  %v4987_v61 = vld [vmem:[%s7556_s5 + $0x80] sm:$0xff] }
 0x253   : > { %v5592_v47 = vpop.f32.mrb[38].mxu1 }
 0x254   : > { %v7008_v48 = vpack.c.bf16 %v5592_v47, %v5591_v45  ;;  %v1494_v49 = vpop.f32.mrb[39].mxu1  ;;  %6152 = vmatpush3.bf16.msra.mxu0 %v6944_v5  ;;  %6216 = vmatpush3.bf16.msra.mxu1 %v6944_v5 }
 0x255   : > { %v7012_v50 = vpack.c.bf16 %v1494_v49, %v1491_v46  ;;  %6154 = vmatprep.subr.bf16.mxu0 %v6956_v21  ;;  %6218 = vmatprep.subr.bf16.mxu1 %v6956_v21  ;;  %v5043_v49 = vld [vmem:[%s7559_s8 + $0x8] sm:$0xf] }
 0x258   : > { %6156 = vmatpush3.bf16.msra.mxu0 %v6956_v21  ;;  %6220 = vmatpush3.bf16.msra.mxu1 %v6956_v21 }
 0x259   : > { %6158 = vmatprep.subr.bf16.mxu0 %v6952_v17  ;;  %6222 = vmatprep.subr.bf16.mxu1 %v6952_v17 }
 0x25c   : > { %6160 = vmatpush3.bf16.msra.mxu0 %v6952_v17  ;;  %6224 = vmatpush3.bf16.msra.mxu1 %v6952_v17 }
 0x25d   : > { %6162 = vmatprep.subr.bf16.mxu0 %v6950_v10  ;;  %6226 = vmatprep.subr.bf16.mxu1 %v6950_v10 }
 0x25f   : > { %5629 = vmatmul.mubr.msk.f32.vlgmr.msra.gmra.mrb[24].mxu0 %vm1511_vm1, %v1507_v51  ;;  %5705 = vmatmul.mubr.msk.f32.vlgmr.msra.gmra.mrb[40].mxu1 %vm1511_vm1, %v4944_v40 }
 0x260   : > { %6164 = vmatpush3.bf16.msra.mxu0 %v6950_v10  ;;  %6228 = vmatpush3.bf16.msra.mxu1 %v6950_v10 }
 0x261   : > { %6166 = vmatprep.subr.bf16.mxu0 %v6946_v6  ;;  %6230 = vmatprep.subr.bf16.mxu1 %v6946_v6 }
 0x262   : > { %5647 = vmatprep.mubr.msk.f32.mxu0 %vm1511_vm1, %v7032_v52  ;;  %5723 = vmatprep.mubr.msk.f32.mxu1 %vm1511_vm1, %v7037_v53 }
 0x264   : > { %6168 = vmatpush3.bf16.msra.mxu0 %v6946_v6  ;;  %6232 = vmatpush3.bf16.msra.mxu1 %v6946_v6 }
 0x265   : > { %6170 = vmatprep.subr.bf16.mxu0 %v6958_v22  ;;  %6234 = vmatprep.subr.bf16.mxu1 %v6958_v22 }
 0x268   : > { %6172 = vmatpush3.bf16.msra.mxu0 %v6958_v22  ;;  %6236 = vmatpush3.bf16.msra.mxu1 %v6958_v22 }
 0x269   : > { %6174 = vmatprep.subr.bf16.mxu0 %v6954_v18  ;;  %6238 = vmatprep.subr.bf16.mxu1 %v6954_v18 }
 0x26c   : > { %6176 = vmatpush3.bf16.msra.mxu0 %v6954_v18  ;;  %6240 = vmatpush3.bf16.msra.mxu1 %v6954_v18 }
 0x26d   : > { %6178 = vmatprep.subr.bf16.mxu0 %v6992_v42  ;;  %6242 = vmatprep.subr.bf16.mxu1 %v6992_v42 }
 0x26f   : > { %5648 = vmatmul.mubr.msk.f32.vlgmr.msra.gmra.mrb[24].mxu0 %vm1511_vm1, %v7060_v54  ;;  %5724 = vmatmul.mubr.msk.f32.vlgmr.msra.gmra.mrb[40].mxu1 %vm1511_vm1, %v7065_v55 }
 0x270   : > { %6180 = vmatpush3.bf16.msra.mxu0 %v6992_v42  ;;  %6244 = vmatpush3.bf16.msra.mxu1 %v6992_v42 }
 0x271   : > { %6182 = vmatprep.subr.bf16.mxu0 %v6982_v38  ;;  %6246 = vmatprep.subr.bf16.mxu1 %v6982_v38 }
 0x272   : > { %5666 = vmatprep.mubr.msk.f32.mxu0 %vm1511_vm1, %v7037_v53  ;;  %5742 = vmatprep.mubr.msk.f32.mxu1 %vm1511_vm1, %v4965_v56 }
 0x274   : > { %6184 = vmatpush3.bf16.msra.mxu0 %v6982_v38  ;;  %6248 = vmatpush3.bf16.msra.mxu1 %v6982_v38 }
 0x275   : > { %6186 = vmatprep.subr.bf16.mxu0 %v7012_v50  ;;  %6250 = vmatprep.subr.bf16.mxu1 %v7012_v50 }
 0x278   : > { %6188 = vmatpush3.bf16.msra.mxu0 %v7012_v50  ;;  %6252 = vmatpush3.bf16.msra.mxu1 %v7012_v50 }
 0x279   : > { %6190 = vmatprep.subr.bf16.mxu0 %v7008_v48  ;;  %6254 = vmatprep.subr.bf16.mxu1 %v7008_v48 }
 0x27c   : > { %6192 = vmatpush3.bf16.msra.mxu0 %v7008_v48  ;;  %6256 = vmatpush3.bf16.msra.mxu1 %v7008_v48 }
 0x27d   : > { %6258 = vmatprep.subr.bf16.mxu0 %v6962_v28  ;;  %6322 = vmatprep.subr.bf16.mxu1 %v6962_v28 }
 0x27f   : > { %5667 = vmatmul.mubr.msk.f32.vlgmr.msra.gmra.mrb[24].mxu0 %vm1511_vm1, %v7065_v55  ;;  %5743 = vmatmul.mubr.msk.f32.vlgmr.msra.gmra.mrb[40].mxu1 %vm1511_vm1, %v4966_v57 }
 0x280   : > { %6260 = vmatpush3.bf16.msra.mxu0 %v6962_v28  ;;  %6324 = vmatpush3.bf16.msra.mxu1 %v6962_v28  ;;  %v6577_v28 = vld [vmem:[%s7557_s6 + $0x60] sm:$0xff]  }
 0x281   : > { %6262 = vmatprep.subr.bf16.mxu0 %v6960_v26  ;;  %6326 = vmatprep.subr.bf16.mxu1 %v6960_v26 }
 0x282   : > { %5761 = vmatprep.mubr.msk.f32.mxu0 %vm1511_vm1, %v7037_v53  ;;  %5837 = vmatprep.mubr.msk.f32.mxu1 %vm1511_vm1, %v4965_v56 }
 0x284   : > { %6264 = vmatpush3.bf16.msra.mxu0 %v6960_v26  ;;  %6328 = vmatpush3.bf16.msra.mxu1 %v6960_v26 }
 0x285   : > { %6266 = vmatprep.subr.bf16.mxu0 %v6974_v34  ;;  %6330 = vmatprep.subr.bf16.mxu1 %v6974_v34 }
 0x288   : > { %6268 = vmatpush3.bf16.msra.mxu0 %v6974_v34  ;;  %6332 = vmatpush3.bf16.msra.mxu1 %v6974_v34  ;;  %v6582_v34 = vld [vmem:[%s7557_s6 + $0x58] sm:$0xff]  }
 0x289   : > { %6270 = vmatprep.subr.bf16.mxu0 %v6970_v32  ;;  %6334 = vmatprep.subr.bf16.mxu1 %v6970_v32 }
 0x28c   : > { %6272 = vmatpush3.bf16.msra.mxu0 %v6970_v32  ;;  %6336 = vmatpush3.bf16.msra.mxu1 %v6970_v32  ;;  %v6580_v32 = vld [vmem:[%s7557_s6 + $0x50] sm:$0xff]  }
 0x28d   : > { %6274 = vmatprep.subr.bf16.mxu0 %v6948_v9  ;;  %6338 = vmatprep.subr.bf16.mxu1 %v6948_v9 }
 0x28f   : > { %5762 = vmatmul.mubr.msk.f32.vlgmr.msra.gmra.mrb[26].mxu0 %vm1511_vm1, %v7065_v55  ;;  %5838 = vmatmul.mubr.msk.f32.vlgmr.msra.gmra.mrb[42].mxu1 %vm1511_vm1, %v4966_v57 }
 0x290   : > { %6276 = vmatpush3.bf16.msra.mxu0 %v6948_v9  ;;  %6340 = vmatpush3.bf16.msra.mxu1 %v6948_v9 }
 0x291   : > { %6278 = vmatprep.subr.bf16.mxu0 %v6944_v5  ;;  %6342 = vmatprep.subr.bf16.mxu1 %v6944_v5 }
 0x292   : > { %5780 = vmatprep.mubr.msk.f32.mxu0 %vm1511_vm1, %v7032_v52  ;;  %5856 = vmatprep.mubr.msk.f32.mxu1 %vm1511_vm1, %v7037_v53 }
 0x294   : > { %6280 = vmatpush3.bf16.msra.mxu0 %v6944_v5  ;;  %6344 = vmatpush3.bf16.msra.mxu1 %v6944_v5  ;;  %v6573_v5 = vld [vmem:[%s7557_s6 + $0x30] sm:$0xff]  }
 0x295   : > { %6282 = vmatprep.subr.bf16.mxu0 %v6956_v21  ;;  %6346 = vmatprep.subr.bf16.mxu1 %v6956_v21 }
 0x298   : > { %6284 = vmatpush3.bf16.msra.mxu0 %v6956_v21  ;;  %6348 = vmatpush3.bf16.msra.mxu1 %v6956_v21 }
 0x299   : > { %6286 = vmatprep.subr.bf16.mxu0 %v6952_v17  ;;  %6350 = vmatprep.subr.bf16.mxu1 %v6952_v17 }
 0x29c   : > { %6288 = vmatpush3.bf16.msra.mxu0 %v6952_v17  ;;  %6352 = vmatpush3.bf16.msra.mxu1 %v6952_v17 }
 0x29d   : > { %6290 = vmatprep.subr.bf16.mxu0 %v6950_v10  ;;  %6354 = vmatprep.subr.bf16.mxu1 %v6950_v10 }
 0x29f   : > { %5781 = vmatmul.mubr.msk.f32.vlgmr.msra.gmra.mrb[26].mxu0 %vm1511_vm1, %v7060_v54  ;;  %5857 = vmatmul.mubr.msk.f32.vlgmr.msra.gmra.mrb[42].mxu1 %vm1511_vm1, %v7065_v55 }
 0x2a0   : > { %6292 = vmatpush3.bf16.msra.mxu0 %v6950_v10  ;;  %6356 = vmatpush3.bf16.msra.mxu1 %v6950_v10 }
 0x2a1   : > { %6294 = vmatprep.subr.bf16.mxu0 %v6946_v6  ;;  %6358 = vmatprep.subr.bf16.mxu1 %v6946_v6 }
 0x2a2   : > { %5799 = vmatprep.mubr.msk.f32.mxu0 %vm1511_vm1, %v4973_v58  ;;  %5875 = vmatprep.mubr.msk.f32.mxu1 %vm1511_vm1, %v4977_v59 }
 0x2a4   : > { %6296 = vmatpush3.bf16.msra.mxu0 %v6946_v6  ;;  %6360 = vmatpush3.bf16.msra.mxu1 %v6946_v6  ;;  %v6574_v6 = vld [vmem:[%s7557_s6 + $0x18] sm:$0xff]  }
 0x2a5   : > { %6298 = vmatprep.subr.bf16.mxu0 %v6958_v22  ;;  %6362 = vmatprep.subr.bf16.mxu1 %v6958_v22 }
 0x2a8   : > { %6300 = vmatpush3.bf16.msra.mxu0 %v6958_v22  ;;  %6364 = vmatpush3.bf16.msra.mxu1 %v6958_v22 }
 0x2a9   : > { %6302 = vmatprep.subr.bf16.mxu0 %v6954_v18  ;;  %6366 = vmatprep.subr.bf16.mxu1 %v6954_v18 }
 0x2ac   : > { %6304 = vmatpush3.bf16.msra.mxu0 %v6954_v18  ;;  %6368 = vmatpush3.bf16.msra.mxu1 %v6954_v18 }
 0x2ad   : > { %6306 = vmatprep.subr.bf16.mxu0 %v6992_v42  ;;  %6370 = vmatprep.subr.bf16.mxu1 %v6992_v42 }
 0x2af   : > { %5800 = vmatmul.mubr.msk.f32.vlgmr.msra.gmra.mrb[26].mxu0 %vm1511_vm1, %v4974_v60  ;;  %5876 = vmatmul.mubr.msk.f32.vlgmr.msra.gmra.mrb[42].mxu1 %vm1511_vm1, %v4978_v44 }
 0x2b0   : > { %6308 = vmatpush3.bf16.msra.mxu0 %v6992_v42  ;;  %6372 = vmatpush3.bf16.msra.mxu1 %v6992_v42 }
 0x2b1   : > { %6310 = vmatprep.subr.bf16.mxu0 %v6982_v38  ;;  %6374 = vmatprep.subr.bf16.mxu1 %v6982_v38 }
 0x2b2   : > { %5818 = vmatprep.mubr.msk.f32.mxu0 %vm1511_vm1, %v4977_v59  ;;  %5894 = vmatprep.mubr.msk.f32.mxu1 %vm1511_vm1, %v4987_v61  ;;  %v5041_v61 = vld [vmem:[%s7559_s8 + $0x10] sm:$0xf] }
 0x2b4   : > { %6312 = vmatpush3.bf16.msra.mxu0 %v6982_v38  ;;  %6376 = vmatpush3.bf16.msra.mxu1 %v6982_v38 }
 0x2b5   : > { %6314 = vmatprep.subr.bf16.mxu0 %v7012_v50  ;;  %6378 = vmatprep.subr.bf16.mxu1 %v7012_v50 }
 0x2b8   : > { %6316 = vmatpush3.bf16.msra.mxu0 %v7012_v50  ;;  %6380 = vmatpush3.bf16.msra.mxu1 %v7012_v50  ;;  %v3119_v50 = vld [vmem:[%s7559_s8] sm:$0xf] }
 0x2b9   : > { %6318 = vmatprep.subr.bf16.mxu0 %v7008_v48  ;;  %6382 = vmatprep.subr.bf16.mxu1 %v7008_v48 }
 0x2bc   : > { %6320 = vmatpush3.bf16.msra.mxu0 %v7008_v48  ;;  %6384 = vmatpush3.bf16.msra.mxu1 %v7008_v48  ;;  %v5036_v48 = vld [vmem:[%s7559_s8 + $0x4] sm:$0xf] }
 0x2bd   : > { %5897 = vmatprep.subr.bf16.mxu0 %v6672_v1  ;;  %5909 = vmatprep.subr.bf16.mxu1 %v6672_v1 }
 0x2bf   : > { %5819 = vmatmul.mubr.msk.f32.vlgmr.msra.gmra.mrb[26].mxu0 %vm1511_vm1, %v4978_v44  ;;  %5895 = vmatmul.mubr.msk.f32.vlgmr.msra.gmra.mrb[42].mxu1 %vm1511_vm1, %v4988_v62  ;;  %v5039_v44 = vld [vmem:[%s7559_s8 + $0xc] sm:$0xf]  ;;  %v5047_v62 = vld [vmem:[%s7559_s8 + $0x14] sm:$0xf] }
 0x2c0   : > { %5898 = vmatpush3.bf16.msra.mxu0 %v6568_v63  ;;  %5910 = vmatpush3.bf16.msra.mxu1 %v6569_v0  ;;  %v5051_v63 = vld [vmem:[%s7559_s8 + $0x18] sm:$0xf]  ;;  %v5053_v0 = vld [vmem:[%s7559_s8 + $0x1c] sm:$0xf] }
 0x2c1   : > { %5899 = vmatprep.subr.bf16.mxu0 %v6672_v1  ;;  %5911 = vmatprep.subr.bf16.mxu1 %v6672_v1 }
 0x2c2   : > { %5905 = vmatprep.mubr.msk.bf16.mxu0 %vm6673_vm2, %v6672_v1  ;;  %5917 = vmatprep.mubr.msk.bf16.mxu1 %vm6673_vm2, %v6672_v1 }
 0x2c4   : > { %5900 = vmatpush3.bf16.msra.mxu0 %v6570_v2  ;;  %5912 = vmatpush3.bf16.msra.mxu1 %v6571_v3  ;;  %v5058_v2 = vld [vmem:[%s7559_s8 + $0x20] sm:$0xf] }
 0x2c5   : > { %5901 = vmatprep.subr.bf16.mxu0 %v6672_v1  ;;  %5913 = vmatprep.subr.bf16.mxu1 %v6672_v1  ;;  %v6584_v3 = vld [vmem:[%s7560_s9] sm:$0xff]  }
 0x2c8   : > { %5902 = vmatpush3.bf16.msra.mxu0 %v6572_v4  ;;  %5914 = vmatpush3.bf16.msra.mxu1 %v6573_v5  ;;  %v6585_v4 = vld [vmem:[%s7560_s9 + $0x8] sm:$0xff]   ;;  %v6586_v5 = vld [vmem:[%s7560_s9 + $0x10] sm:$0xff]  }
 0x2c9   : > { %5903 = vmatprep.subr.bf16.mxu0 %v6672_v1  ;;  %5915 = vmatprep.subr.bf16.mxu1 %v6672_v1 }
 0x2cc   : > { %5904 = vmatpush3.bf16.msra.mxu0 %v6574_v6  ;;  %5916 = vmatpush3.bf16.msra.mxu1 %v6575_v7  ;;  %v6587_v6 = vld [vmem:[%s7560_s9 + $0x18] sm:$0xff]   ;;  %v6600_v7 = vld [vmem:[%s7562_s11] sm:$0xff]  }
 0x2cd   : > { %5921 = vmatprep.subr.bf16.mxu0 %v6672_v1  ;;  %5933 = vmatprep.subr.bf16.mxu1 %v6672_v1 }
 0x352   : > { %v5668_v8 = vpop.f32.mrb[24].mxu0  ;;  %v5744_v9 = vpop.f32.mrb[40].mxu1 }
 0x353   : > { %v2804_v10 = vmax.f32 %v5668_v8, %v5744_v9  ;;  %v1835_v11 = vpop.f32.mrb[25].mxu0  ;;  %v2157_v12 = vpop.f32.mrb[41].mxu1  ;;  %v6601_v8 = vld [vmem:[%s7562_s11 + $0x8] sm:$0xff]  }
 0x354   : > { %v2803_v13 = vmax.f32 %v1835_v11, %v2157_v12 }
 0x392   : > { %v5820_v14 = vpop.f32.mrb[26].mxu0  ;;  %v5896_v15 = vpop.f32.mrb[42].mxu1 }
 0x393   : > { %v2806_v16 = vmax.f32 %v5820_v14, %v5896_v15  ;;  %v2479_v17 = vpop.f32.mrb[27].mxu0  ;;  %v2792_v18 = vpop.f32.mrb[43].mxu1 }
 0x394   : > { %v2805_v20 = vmax.f32 %v2479_v17, %v2792_v18 }
 0x395   : > { %v2808_v21 = vmax.f32 %v2804_v10, %v2806_v16 }
 0x396   : > { %v2807_v22 = vmax.f32 %v2803_v13, %v2805_v20 }
 0x397   : > { %v2817_v23 = vadd.f32 %v4991_v19, %v2808_v21 }
 0x398   : > { %v2816_v24 = vadd.f32 %v4991_v19, %v2807_v22  ;;  %v5060_v19 = vld [vmem:[%s7558_s7] ss:$0 sm:$0xff] }
 0x399   : > { %v2819_v25 = vmax.f32 %v2817_v23, 0.0  ;;  %v6588_v23 = vld [vmem:[%s7560_s9 + $0x20] sm:$0xff]  }
 0x39a   : > { %v2818_v26 = vmax.f32 %v2816_v24, 0.0 }
 0x39c   : > { %v2820_v29 = vpack.c.bf16 %v2819_v25, %v2818_v26  ;;  %v6589_v25 = vld [vmem:[%s7560_s9 + $0x28] sm:$0xff]   ;;  %v6590_v26 = vld [vmem:[%s7560_s9 + $0x30] sm:$0xff]  }
 0x39e   : > { %5906 = vmatmul.mubr.msk.bf16.vlgmr.msra.gmra.mrb[28].mxu0 %vm1511_vm1, %v2820_v29  ;;  %5918 = vmatmul.mubr.msk.bf16.vlgmr.msra.gmra.mrb[44].mxu1 %vm1511_vm1, %v2820_v29 }
 0x39f   : > { %5922 = vmatpush3.bf16.msra.mxu0 %v6576_v27  ;;  %5934 = vmatpush3.bf16.msra.mxu1 %v6577_v28  ;;  %v6591_v27 = vld [vmem:[%s7560_s9 + $0x38] sm:$0xff]   ;;  %v6592_v28 = vld [vmem:[%s7560_s9 + $0x40] sm:$0xff]  }
 0x3a0   : > { %5923 = vmatprep.subr.bf16.mxu0 %v6672_v1  ;;  %5935 = vmatprep.subr.bf16.mxu1 %v6672_v1 }
 0x3a1   : > { %5929 = vmatprep.mubr.msk.bf16.mxu0 %vm6673_vm2, %v6672_v1  ;;  %5941 = vmatprep.mubr.msk.bf16.mxu1 %vm6673_vm2, %v6672_v1 }
 0x3a3   : > { %5924 = vmatpush3.bf16.msra.mxu0 %v6578_v30  ;;  %5936 = vmatpush3.bf16.msra.mxu1 %v6579_v31  ;;  %v6593_v30 = vld [vmem:[%s7560_s9 + $0x48] sm:$0xff]   ;;  %v6594_v31 = vld [vmem:[%s7560_s9 + $0x50] sm:$0xff]  }
 0x3a4   : > { %5925 = vmatprep.subr.bf16.mxu0 %v6672_v1  ;;  %5937 = vmatprep.subr.bf16.mxu1 %v6672_v1 }
 0x3a7   : > { %5926 = vmatpush3.bf16.msra.mxu0 %v6580_v32  ;;  %5938 = vmatpush3.bf16.msra.mxu1 %v6581_v33  ;;  %v6595_v32 = vld [vmem:[%s7560_s9 + $0x58] sm:$0xff]   ;;  %v6596_v33 = vld [vmem:[%s7560_s9 + $0x60] sm:$0xff]  }
 0x3a8   : > { %5927 = vmatprep.subr.bf16.mxu0 %v6672_v1  ;;  %5939 = vmatprep.subr.bf16.mxu1 %v6672_v1 }
 0x3ab   : > { %5928 = vmatpush3.bf16.msra.mxu0 %v6582_v34  ;;  %5940 = vmatpush3.bf16.msra.mxu1 %v6583_v35  ;;  %v6597_v35 = vld [vmem:[%s7560_s9 + $0x68] sm:$0xff]  }
 0x3ac   : > { %6385 = vmatprep.subr.bf16.mxu0 %v6674_v36  ;;  %6397 = vmatprep.subr.bf16.mxu1 %v6674_v36 }
 0x3ae   : > { %5930 = vmatmul.mubr.msk.bf16.vlgmr.msra.gmra.mrb[32].mxu0 %vm1511_vm1, %v2820_v29  ;;  %5942 = vmatmul.mubr.msk.bf16.vlgmr.msra.gmra.mrb[48].mxu1 %vm1511_vm1, %v2820_v29 }
 0x3af   : > { %5949 = vmatprep.mubr.msk.f32.mxu0 %vm6673_vm2, %v6672_v1  ;;  %5977 = vmatprep.mubr.msk.f32.mxu1 %vm6673_vm2, %v6672_v1 }
 0x471   : > { %v2890_v37 = vpop.f32.mrb[28].mxu0  ;;  %v2964_v38 = vpop.f32.mrb[44].mxu1 }
 0x472   : > { %v5907_v39 = vpop.f32.mrb[29].mxu0  ;;  %v5919_v40 = vpop.f32.mrb[45].mxu1 }
 0x473   : > { %v2893_v41 = vpop.f32.mrb[30].mxu0  ;;  %v2967_v42 = vpop.f32.mrb[46].mxu1  ;;  %v6602_v39 = vld [vmem:[%s7562_s11 + $0x10] sm:$0xff]   ;;  %v6603_v40 = vld [vmem:[%s7562_s11 + $0x18] ss:$0 sps:$4 sm:$0x11]  }
 0x474   : > { %v6389_v43 = vpack.c.bf16 %v2893_v41, %v2890_v37  ;;  %v6386_v45 = vpack.c.bf16 %v2967_v42, %v2964_v38  ;;  %v5908_v46 = vpop.f32.mrb[31].mxu0  ;;  %v5920_v47 = vpop.f32.mrb[47].mxu1  ;;  %v6599_v37 = vld [vmem:[%s7560_s9 + $0x78] sm:$0xff]   ;;  %v4655_v41 = vsel %vm4653_vm4, %v6603_v40, 0  ;;  %v4304_v42 = vld [vmem:[%s7561_s10] sm:$0x1] }
 0x476   : > { %6387 = vmatpush3.bf16.msra.mxu0 %v6386_v45  ;;  %6399 = vmatpush3.bf16.msra.mxu1 %v6386_v45 }
 0x477   : > { %6388 = vmatprep.subr.bf16.mxu0 %v6674_v36  ;;  %6400 = vmatprep.subr.bf16.mxu1 %v6674_v36 }
 0x479   : > { %5950 = vmatmul.mubr.msk.f32.vlgmr.msra.gmra.mrb[36].mxu0 %vm3122_vm3, %v5036_v48  ;;  %5978 = vmatmul.mubr.msk.f32.vlgmr.msra.gmra.mrb[52].mxu1 %vm3122_vm3, %v5043_v49 }
 0x47a   : > { %6390 = vmatpush3.bf16.msra.mxu0 %v6389_v43  ;;  %6402 = vmatpush3.bf16.msra.mxu1 %v6389_v43 }
 0x47b   : > { %5956 = vmatprep.mubr.msk.f32.mxu0 %vm6673_vm2, %v6672_v1  ;;  %5984 = vmatprep.mubr.msk.f32.mxu1 %vm6673_vm2, %v6672_v1 }
 0x47c   : > { %6391 = vmatprep.subr.bf16.mxu0 %v6674_v36  ;;  %6403 = vmatprep.subr.bf16.mxu1 %v6674_v36 }
 0x481   : > { %v3038_v51 = vpop.f32.mrb[32].mxu0  ;;  %v3112_v52 = vpop.f32.mrb[48].mxu1  ;;  %5957 = vmatmul.mubr.msk.f32.vlgmr.msra.gmra.mrb[36].mxu0 %vm3122_vm3, %v3119_v50  ;;  %5985 = vmatmul.mubr.msk.f32.vlgmr.msra.gmra.mrb[52].mxu1 %vm3122_vm3, %v5036_v48  ;;  %v6604_v50 = vld [vmem:[%s7564_s13] sm:$0xff]  }
 0x482   : > { %v5931_v53 = vpop.f32.mrb[33].mxu0  ;;  %v5943_v54 = vpop.f32.mrb[49].mxu1  ;;  %5963 = vmatprep.mubr.msk.f32.mxu0 %vm6673_vm2, %v6672_v1  ;;  %5991 = vmatprep.mubr.msk.f32.mxu1 %vm6673_vm2, %v6672_v1 }
 0x483   : > { %v3041_v55 = vpop.f32.mrb[34].mxu0  ;;  %v3115_v56 = vpop.f32.mrb[50].mxu1  ;;  %v6606_v53 = vld [vmem:[%s7564_s13 + $0x10] sm:$0xff]   ;;  %v6607_v54 = vld [vmem:[%s7564_s13 + $0x18] ss:$0 sps:$4 sm:$0x11]  }
 0x484   : > { %v6392_v57 = vpack.c.bf16 %v3041_v55, %v3038_v51  ;;  %v6395_v58 = vpack.c.bf16 %v3115_v56, %v3112_v52  ;;  %v5932_v59 = vpop.f32.mrb[35].mxu0  ;;  %v5944_v60 = vpop.f32.mrb[51].mxu1  ;;  %v6605_v52 = vld [vmem:[%s7564_s13 + $0x8] sm:$0xff]   ;;  %v4732_v55 = vsel %vm4653_vm4, %v6607_v54, 0  ;;  %v4627_v56 = vld [vmem:[%s7563_s12] sm:$0x1] }
 0x486   : > { %6393 = vmatpush3.bf16.msra.mxu0 %v6392_v57  ;;  %6405 = vmatpush3.bf16.msra.mxu1 %v6392_v57 }
 0x487   : > { %6394 = vmatprep.subr.bf16.mxu0 %v6674_v36  ;;  %6406 = vmatprep.subr.bf16.mxu1 %v6674_v36 }
 0x489   : > { %5964 = vmatmul.mubr.msk.f32.vlgmr.msra.gmra.mrb[36].mxu0 %vm3122_vm3, %v5039_v44  ;;  %5992 = vmatmul.mubr.msk.f32.vlgmr.msra.gmra.mrb[52].mxu1 %vm3122_vm3, %v5041_v61 }
 0x48a   : > { %6396 = vmatpush3.bf16.msra.mxu0 %v6395_v58  ;;  %6408 = vmatpush3.bf16.msra.mxu1 %v6395_v58 }
 0x48b   : > { %5970 = vmatprep.mubr.msk.f32.mxu0 %vm6673_vm2, %v6672_v1  ;;  %5998 = vmatprep.mubr.msk.f32.mxu1 %vm6673_vm2, %v6672_v1 }
 0x48c   : > { %6409 = vmatprep.subr.bf16.mxu0 %v6674_v36  ;;  %6421 = vmatprep.subr.bf16.mxu1 %v6674_v36 }
 0x491   : > { %5971 = vmatmul.mubr.msk.f32.vlgmr.msra.gmra.mrb[36].mxu0 %vm3122_vm3, %v5041_v61  ;;  %5999 = vmatmul.mubr.msk.f32.vlgmr.msra.gmra.mrb[52].mxu1 %vm3122_vm3, %v5047_v62 }
 0x492   : > { %6411 = vmatpush3.bf16.msra.mxu0 %v6386_v45  ;;  %6423 = vmatpush3.bf16.msra.mxu1 %v6386_v45 }
 0x493   : > { %6005 = vmatprep.mubr.msk.f32.mxu0 %vm6673_vm2, %v6672_v1  ;;  %6412 = vmatprep.subr.bf16.mxu0 %v6674_v36 }
 0x494   : > { %6033 = vmatprep.mubr.msk.f32.mxu1 %vm6673_vm2, %v6672_v1  ;;  %6424 = vmatprep.subr.bf16.mxu1 %v6674_v36 }
 0x495   : > { %6006 = vmatmul.mubr.msk.f32.vlgmr.msra.gmra.mrb[38].mxu0 %vm3122_vm3, %v5041_v61  ;;  %6034 = vmatmul.mubr.msk.f32.vlgmr.msra.gmra.mrb[54].mxu1 %vm3122_vm3, %v5047_v62 }
 0x496   : > { %6414 = vmatpush3.bf16.msra.mxu0 %v6389_v43  ;;  %6426 = vmatpush3.bf16.msra.mxu1 %v6389_v43 }
 0x497   : > { %6012 = vmatprep.mubr.msk.f32.mxu0 %vm6673_vm2, %v6672_v1  ;;  %6415 = vmatprep.subr.bf16.mxu0 %v6674_v36 }
 0x498   : > { %6040 = vmatprep.mubr.msk.f32.mxu1 %vm6673_vm2, %v6672_v1  ;;  %6427 = vmatprep.subr.bf16.mxu1 %v6674_v36 }
 0x49d   : > { %6013 = vmatmul.mubr.msk.f32.vlgmr.msra.gmra.mrb[38].mxu0 %vm3122_vm3, %v5039_v44  ;;  %6041 = vmatmul.mubr.msk.f32.vlgmr.msra.gmra.mrb[54].mxu1 %vm3122_vm3, %v5041_v61 }
 0x49e   : > { %6417 = vmatpush3.bf16.msra.mxu0 %v6392_v57  ;;  %6429 = vmatpush3.bf16.msra.mxu1 %v6392_v57 }
 0x49f   : > { %6019 = vmatprep.mubr.msk.f32.mxu0 %vm6673_vm2, %v6672_v1  ;;  %6418 = vmatprep.subr.bf16.mxu0 %v6674_v36 }
 0x4a0   : > { %6047 = vmatprep.mubr.msk.f32.mxu1 %vm6673_vm2, %v6672_v1  ;;  %6430 = vmatprep.subr.bf16.mxu1 %v6674_v36  ;;  %v6598_v36 = vld [vmem:[%s7560_s9 + $0x70] sm:$0xff]  }
 0x4a5   : > { %6020 = vmatmul.mubr.msk.f32.vlgmr.msra.gmra.mrb[38].mxu0 %vm3122_vm3, %v5051_v63  ;;  %6048 = vmatmul.mubr.msk.f32.vlgmr.msra.gmra.mrb[54].mxu1 %vm3122_vm3, %v5053_v0 }
 0x4a6   : > { %6420 = vmatpush3.bf16.msra.mxu0 %v6395_v58  ;;  %6432 = vmatpush3.bf16.msra.mxu1 %v6395_v58 }
 0x4a7   : > { %6026 = vmatprep.mubr.msk.f32.mxu0 %vm6673_vm2, %v6672_v1  ;;  %6054 = vmatprep.mubr.msk.f32.mxu1 %vm6673_vm2, %v6672_v1 }
 0x4a8   : > { %6057 = vmatprep.subr.bf16.mxu0 %v6672_v1  ;;  %6105 = vmatprep.subr.bf16.mxu1 %v6672_v1 }
 0x4ad   : > { %6027 = vmatmul.mubr.msk.f32.vlgmr.msra.gmra.mrb[38].mxu0 %vm3122_vm3, %v5053_v0  ;;  %6055 = vmatmul.mubr.msk.f32.vlgmr.msra.gmra.mrb[54].mxu1 %vm3122_vm3, %v5058_v2 }
 0x4ae   : > { %6065 = vmatprep.mubr.msk.bf16.mxu0 %vm6673_vm2, %v6672_v1  ;;  %6113 = vmatprep.mubr.msk.bf16.mxu1 %vm6673_vm2, %v6672_v1 }
 0x4af   : > { %6058 = vmatpush3.bf16.msra.mxu0 %v6584_v3  ;;  %6106 = vmatpush3.bf16.msra.mxu1 %v6600_v7 }
 0x4b0   : > { %6059 = vmatprep.subr.bf16.mxu0 %v6672_v1  ;;  %6107 = vmatprep.subr.bf16.mxu1 %v6672_v1 }
 0x4b3   : > { %6060 = vmatpush3.bf16.msra.mxu0 %v6585_v4  ;;  %6108 = vmatpush3.bf16.msra.mxu1 %v6601_v8 }
 0x4b4   : > { %6061 = vmatprep.subr.bf16.mxu0 %v6672_v1  ;;  %6109 = vmatprep.subr.bf16.mxu1 %v6672_v1 }
 0x4b7   : > { %6062 = vmatpush3.bf16.msra.mxu0 %v6586_v5  ;;  %6110 = vmatpush3.bf16.msra.mxu1 %v6602_v39 }
 0x4b8   : > { %6063 = vmatprep.subr.bf16.mxu0 %v6672_v1  ;;  %6111 = vmatprep.subr.bf16.mxu1 %v6672_v1 }
 0x4bb   : > { %6064 = vmatpush3.bf16.msra.mxu0 %v6587_v6  ;;  %6112 = vmatpush3.bf16.msra.mxu1 %v4655_v41 }
 0x4bc   : > { %6069 = vmatprep.subr.bf16.mxu0 %v6672_v1  ;;  %6117 = vmatprep.subr.bf16.mxu1 %v6672_v1 }
 0x564   : > { %v3416_v9 = vpop.f32.mrb[36].mxu0  ;;  %v3708_v10 = vpop.f32.mrb[52].mxu1 }
 0x565   : > { %v4292_v11 = vmax.f32 %v3416_v9, %v3708_v10  ;;  %v5972_v12 = vpop.f32.mrb[37].mxu0  ;;  %v6000_v13 = vpop.f32.mrb[53].mxu1 }
 0x580   : > { %v4000_v14 = vpop.f32.mrb[38].mxu0  ;;  %v4287_v15 = vpop.f32.mrb[54].mxu1 }
 0x581   : > { %v4293_v16 = vmax.f32 %v4000_v14, %v4287_v15  ;;  %v6028_v17 = vpop.f32.mrb[39].mxu0  ;;  %v6056_v18 = vpop.f32.mrb[55].mxu1 }
 0x583   : > { %v4294_v20 = vmax.f32 %v4292_v11, %v4293_v16 }
 0x585   : > { %v4302_v21 = vadd.f32 %v5060_v19, %v4294_v20 }
 0x587   : > { %v4303_v22 = vmax.f32 %v4302_v21, 0.0 }
 0x589   : > { %v4305_v24 = vpack.c.bf16 %v4303_v22, %v4303_v22 }
 0x58b   : > { %6066 = vmatmul.mubr.msk.bf16.vlgmr.msra.gmra.mrb[40].mxu0 %vm1511_vm1, %v4305_v24  ;;  %v4391_v29 = vshrl.u32 %v4305_v24, 16  ;;  %v4471_v34 = vrot.slane %v4305_v24, 1 }
 0x58c   : > { %6070 = vmatpush3.bf16.msra.mxu0 %v6588_v23  ;;  %6077 = vmatprep.mubr.msk.bf16.mxu0 %vm6673_vm2, %v6672_v1 }
 0x58d   : > { %6071 = vmatprep.subr.bf16.mxu0 %v6672_v1  ;;  %v4549_v38 = vrot.slane %v4391_v29, 1 }
 0x590   : > { %6072 = vmatpush3.bf16.msra.mxu0 %v6589_v25 }
 0x591   : > { %6073 = vmatprep.subr.bf16.mxu0 %v6672_v1 }
 0x594   : > { %6074 = vmatpush3.bf16.msra.mxu0 %v6590_v26 }
 0x595   : > { %6075 = vmatprep.subr.bf16.mxu0 %v6672_v1 }
 0x598   : > { %6076 = vmatpush3.bf16.msra.mxu0 %v6591_v27 }
 0x599   : > { %6081 = vmatprep.subr.bf16.mxu0 %v6672_v1 }
 0x59b   : > { %6078 = vmatmul.mubr.msk.bf16.vlgmr.msra.gmra.mrb[40].mxu0 %vm1511_vm1, %v4391_v29 }
 0x59c   : > { %6082 = vmatpush3.bf16.msra.mxu0 %v6592_v28  ;;  %6089 = vmatprep.mubr.msk.bf16.mxu0 %vm6673_vm2, %v6672_v1 }
 0x59d   : > { %6083 = vmatprep.subr.bf16.mxu0 %v6672_v1 }
 0x5a0   : > { %6084 = vmatpush3.bf16.msra.mxu0 %v6593_v30 }
 0x5a1   : > { %6085 = vmatprep.subr.bf16.mxu0 %v6672_v1 }
 0x5a4   : > { %6086 = vmatpush3.bf16.msra.mxu0 %v6594_v31 }
 0x5a5   : > { %6087 = vmatprep.subr.bf16.mxu0 %v6672_v1 }
 0x5a8   : > { %6088 = vmatpush3.bf16.msra.mxu0 %v6595_v32 }
 0x5a9   : > { %6093 = vmatprep.subr.bf16.mxu0 %v6672_v1 }
 0x5ab   : > { %6090 = vmatmul.mubr.msk.bf16.vlgmr.msra.gmra.mrb[40].mxu0 %vm1511_vm1, %v4471_v34 }
 0x5ac   : > { %6094 = vmatpush3.bf16.msra.mxu0 %v6596_v33  ;;  %6101 = vmatprep.mubr.msk.bf16.mxu0 %vm6673_vm2, %v6672_v1 }
 0x5ad   : > { %6095 = vmatprep.subr.bf16.mxu0 %v6672_v1 }
 0x5b0   : > { %6096 = vmatpush3.bf16.msra.mxu0 %v6597_v35 }
 0x5b1   : > { %6097 = vmatprep.subr.bf16.mxu0 %v6672_v1 }
 0x5b4   : > { %6098 = vmatpush3.bf16.msra.mxu0 %v6598_v36 }
 0x5b5   : > { %6099 = vmatprep.subr.bf16.mxu0 %v6672_v1 }
 0x5b8   : > { %6100 = vmatpush3.bf16.msra.mxu0 %v6599_v37 }
 0x5bb   : > { %6102 = vmatmul.mubr.msk.bf16.vlgmr.msra.gmra.mrb[40].mxu0 %vm1511_vm1, %v4549_v38 }
 0x68e   : > { %v4611_v43 = vpop.f32.mrb[40].mxu0 }
 0x68f   : > { %v6433_v45 = vadd.f32 %v4611_v43, %v4304_v42  ;;  %v6103_v46 = vpop.f32.mrb[41].mxu0 }
 0x690   : > { %v4614_v47 = vpop.f32.mrb[42].mxu0 }
 0x691   : > { %v4618_v48 = vmax.f32 %v6433_v45, 0.0  ;;  %v6104_v49 = vpop.f32.mrb[43].mxu0 }
 0x693   : > { %v4619_v51 = vpack.c.bf16 %v4618_v48, %v4618_v48 }
 0x695   : > { %6114 = vmatmul.mubr.msk.bf16.vlgmr.msra.gmra.mrb[56].mxu1 %vm4649_vm5, %v4619_v51 }
 0x696   : > { %6118 = vmatpush3.bf16.msra.mxu1 %v6604_v50  ;;  %6125 = vmatprep.mubr.msk.bf16.mxu1 %vm6673_vm2, %v6672_v1 }
 0x697   : > { %6119 = vmatprep.subr.bf16.mxu1 %v6672_v1 }
 0x69a   : > { %6120 = vmatpush3.bf16.msra.mxu1 %v6605_v52 }
 0x69b   : > { %6121 = vmatprep.subr.bf16.mxu1 %v6672_v1 }
 0x69e   : > { %6122 = vmatpush3.bf16.msra.mxu1 %v6606_v53 }
 0x69f   : > { %6123 = vmatprep.subr.bf16.mxu1 %v6672_v1  ;;  %v4706_v1 = vld [vmem:[%s7565_s14] sm:$0x1] }
 0x6a2   : > { %6124 = vmatpush3.bf16.msra.mxu1 %v4732_v55 }
 0x768   : > { %v4691_v57 = vpop.f32.mrb[56].mxu1 }
 0x769   : > { %v4692_v58 = vadd.f32 %v4691_v57, %v4627_v56  ;;  %v6115_v59 = vpop.f32.mrb[57].mxu1 }
 0x76a   : > { %v4694_v60 = vpop.f32.mrb[58].mxu1 }
 0x76b   : > { %v4697_v44 = vmax.f32 %v4692_v58, 0.0  ;;  %v6116_v61 = vpop.f32.mrb[59].mxu1 }
 0x76d   : > { %v4698_v62 = vpack.c.bf16 %v4697_v44, %v4697_v44 }
 0x76f   : > { %6126 = vmatmul.mubr.msk.bf16.vlgmr.msra.gmra.mrb[60].mxu1 %vm4649_vm5, %v4698_v62 }
 0x842   : > { %v4768_v63 = vpop.f32.mrb[60].mxu1 }
 0x843   : > { %v4769_v0 = vadd.f32 %v4768_v63, %v4706_v1  ;;  %v6127_v2 = vpop.f32.mrb[61].mxu1 }
 0x844   : > { %v4771_v3 = vpop.f32.mrb[62].mxu1 }
 0x845   : > { %v6128_v4 = vpop.f32.mrb[63].mxu1  ;;  %4775 = vst.msk [vmem:[%s657_s16] sm:$0x1] %vm4774_vm6, %v4769_v0 }
 0x846   : > { %6621 = shalt.err (!%p6618_p5)
}
 0x847   : > { %s6622_s17 = scalar_lea.hbm %s7507_s2, 16  ;;  %s6626_s25 = scalar_lea.hbm %s7566_s15, 32 }
 0x848   : > { %p6623_p7 = scmp.ne.s32.totalorder %s7507_s2, %s6622_s17  ;;  %p6627_p12 = scmp.lt.u32.totalorder %s7507_s2, %s7566_s15 }
 0x849   : > { %p6628_p13 = scmp.lt.u32.totalorder %s6626_s25, %s6622_s17  ;;  %p6630_p1 = scmp.lt.u32.totalorder %s6622_s17, %s7507_s2 }
 0x84a   : > { %p6624_p10 = pnand %p6623_p7, %p6794_p6 }
 0x84b   : > { %p6629_p0 = por %p6628_p13, %p6627_p12 }
 0x84c   : > { %p6625_p11 = pneg %p6624_p10 }
 0x84d   : > { %p6631_p2 = por %p6630_p1, %p6629_p0 }
 0x84f   : > { %p6632_p3 = pnand %p6631_p2, %p6625_p11 }
 0x851   : > { %6635 = shalt.err (!%p6632_p3)
}
 0x852   : > { %6494 = dma.vmem_to_hbm [thread:$0]  (%p6794_p6), %s7509_s0, 16, %s7507_s2, %s4777_s22  }
 0x853 PF: > { %s4801_s23 = sand.u32 1, %s6658_s18   ;;  %p6497_p4 = pnand %p4852_p9, %p6798_p8 }
 0x854   : > { %s4802_s26 = scalar_lea.sflag [#allocation4], %s4801_s23 }
 0x855   : > { %6653 = dma.done.wait (!%p6497_p4), %s4802_s26, 16  }
 0x856   : > { %6655 = vsyncadd (!%p6497_p4), %s4802_s26, 4294967280  ;;  %p25_p5 = scmp.ge.s32.totalorder %s6779_s24, 4   ;;  %s7579_s18 = smov %s6662_s19 }
 0x857   : > { %s7580_s19 = smov %s6666_s20  ;;  %s7581_s20 = smov %s6792_s27 }
 0x858   : > { %s7582_s21 = smov %s6779_s24  ;;  %27 = sbr.rel (!%p25_p5) target bundleno = 8 (0x8), region = 189 }
 0x85f   :  { %4806 = vsyncpa [#allocation4], 1 }
 0x860   :  { %4808 = vsyncpa [#allocation4 + $0x1], 1 }

</bundles_post_ra>
